<compile_context>
chip_gen: v6e
topology: v6e:2x2x1
jax: 0.10.0
libtpu: 0.0.40
codegen_flags: <defaults>
</compile_context>

<pallas_src>
import functools

import jax
import jax.numpy as jnp
from jax.experimental import pallas as pl
from jax.experimental.pallas import tpu as pltpu

LEAKY_SLOPE = 0.2
EPS = 1e-5  # PyTorch InstanceNorm2d default eps


def _round_up(x, m):
    return ((x + m - 1) // m) * m


# ----------------------------------------------------------------------------
# Pallas kernels
# ----------------------------------------------------------------------------
def _conv_matmul_kernel(x_ref, w_ref, b_ref, o_ref, acc_ref, *, leaky):
    """im2col conv as tiled matmul: accumulate over K grid axis in f32 scratch."""
    k = pl.program_id(1)

    @pl.when(k == 0)
    def _():
        acc_ref[...] = jnp.zeros_like(acc_ref)

    acc_ref[...] += jnp.dot(
        x_ref[...], w_ref[...], preferred_element_type=jnp.float32
    )

    @pl.when(k == pl.num_programs(1) - 1)
    def _():
        y = acc_ref[...] + b_ref[...]          # bias (1, Cp) broadcast over rows, f32
        if leaky:
            y = jnp.where(y > 0, y, LEAKY_SLOPE * y)
        o_ref[...] = y


def _inorm_lrelu_kernel(x_ref, o_ref):
    """InstanceNorm2d (affine=False) + LeakyReLU(0.2) on a (1, HW, tc) tile.

    Single-pass statistics: var = E[x^2] - E[x]^2 (biased, like PyTorch).
    """
    x = x_ref[...]
    mean = jnp.mean(x, axis=1, keepdims=True)
    mean_sq = jnp.mean(x * x, axis=1, keepdims=True)
    var = jnp.maximum(mean_sq - mean * mean, 0.0)
    y = (x - mean) * jax.lax.rsqrt(var + EPS)
    o_ref[...] = jnp.where(y > 0, y, LEAKY_SLOPE * y)


# ----------------------------------------------------------------------------
# pallas_call wrappers
# ----------------------------------------------------------------------------
def _matmul_pallas(x2d, w2d, b2d, leaky, *, tm, tk):
    M, K = x2d.shape
    _, Cp = w2d.shape
    assert K % tk == 0
    grid = (pl.cdiv(M, tm), K // tk)
    kern = functools.partial(_conv_matmul_kernel, leaky=leaky)
    return pl.pallas_call(
        kern,
        out_shape=jax.ShapeDtypeStruct((M, Cp), jnp.float32),
        grid_spec=pltpu.PrefetchScalarGridSpec(
            num_scalar_prefetch=0,
            grid=grid,
            in_specs=[
                pl.BlockSpec((tm, tk), lambda i, k: (i, k)),   # activations (bf16)
                pl.BlockSpec((tk, Cp), lambda i, k: (k, 0)),   # weights (bf16)
                pl.BlockSpec((1, Cp), lambda i, k: (0, 0)),    # bias (f32)
            ],
            out_specs=pl.BlockSpec((tm, Cp), lambda i, k: (i, 0)),
            scratch_shapes=[pltpu.VMEM((tm, Cp), jnp.float32)],
        ),
        compiler_params=pltpu.CompilerParams(
            dimension_semantics=("parallel", "arbitrary"),
            vmem_limit_bytes=32 * 1024 * 1024,
        ),
    )(x2d, w2d, b2d)


def _inorm_lrelu_pallas(x3d):
    N, HW, C = x3d.shape
    tc = 128 if C % 128 == 0 else C
    grid = (N, C // tc)
    return pl.pallas_call(
        _inorm_lrelu_kernel,
        out_shape=jax.ShapeDtypeStruct((N, HW, C), jnp.float32),
        grid_spec=pltpu.PrefetchScalarGridSpec(
            num_scalar_prefetch=0,
            grid=grid,
            in_specs=[pl.BlockSpec((1, HW, tc), lambda n, c: (n, 0, c))],
            out_specs=pl.BlockSpec((1, HW, tc), lambda n, c: (n, 0, c)),
        ),
        compiler_params=pltpu.CompilerParams(
            dimension_semantics=("parallel", "parallel"),
            vmem_limit_bytes=32 * 1024 * 1024,
        ),
    )(x3d)


# ----------------------------------------------------------------------------
# Glue: im2col patch extraction, padding, parameter shaping (plain JAX)
# ----------------------------------------------------------------------------
def _im2col(x_nhwc, k, stride, pad):
    x = jnp.pad(x_nhwc, ((0, 0), (pad, pad), (pad, pad), (0, 0)))
    N, H, W, C = x.shape
    OH = (H - k) // stride + 1
    OW = (W - k) // stride + 1
    cols = []
    for i in range(k):
        for j in range(k):
            cols.append(x[:, i:i + stride * OH:stride, j:j + stride * OW:stride, :])
    cols = jnp.concatenate(cols, axis=-1)                 # (N, OH, OW, k*k*C)
    return cols.reshape(N * OH * OW, k * k * C), (N, OH, OW)


def conv2d_pallas(x_nhwc, w_oihw, b, stride, pad, leaky):
    Cout, Cin, kH, kW = w_oihw.shape
    # bf16 activations for the MXU + halved HBM traffic of the im2col matrix.
    cols, (N, OH, OW) = _im2col(x_nhwc.astype(jnp.bfloat16), kH, stride, pad)
    M, K = cols.shape

    # (Cout, Cin, kH, kW) -> (kH, kW, Cin, Cout) -> (kH*kW*Cin, Cout); matches im2col order.
    w2d = jnp.transpose(w_oihw, (2, 3, 1, 0)).reshape(kH * kW * Cin, Cout)

    # Pad K up to a multiple of the K tile and Cout up to a multiple of 128
    # (lane-dense stores, full MXU passes).  Zero padding does not change the dot.
    Kp128 = _round_up(K, 128)
    tk = min(2048, Kp128)
    Kp = _round_up(Kp128, tk)
    Cp = _round_up(Cout, 128)

    cols_p = jnp.pad(cols, ((0, 0), (0, Kp - K)))
    w2d_p = jnp.pad(w2d, ((0, Kp - K), (0, Cp - Cout))).astype(jnp.bfloat16)
    b2d_p = jnp.pad(b.astype(jnp.float32), (0, Cp - Cout)).reshape(1, Cp)

    tm = min(512, M)

    y = _matmul_pallas(cols_p, w2d_p, b2d_p, leaky, tm=tm, tk=tk)
    y = y[:, :Cout]                                       # drop padded output channels
    return y.reshape(N, OH, OW, Cout)


# ----------------------------------------------------------------------------
# Discriminator (in_channels=3): C6->64 (no norm) ->128->256->512 -> ZeroPad -> conv to 1
# ----------------------------------------------------------------------------
def init_params(in_channels=3, seed=42):
    key = jax.random.PRNGKey(seed)
    shapes = {
        "w1": (64, in_channels * 2, 4, 4),
        "w2": (128, 64, 4, 4),
        "w3": (256, 128, 4, 4),
        "w4": (512, 256, 4, 4),
        "w5": (1, 512, 4, 4),                 # final conv: bias=False
    }
    params = {}
    for name, shp in shapes.items():
        key, sub = jax.random.split(key)
        params[name] = (0.05 * jax.random.normal(sub, shp)).astype(jnp.float32)
    for name, cout in (("b1", 64), ("b2", 128), ("b3", 256), ("b4", 512)):
        key, sub = jax.random.split(key)
        params[name] = (0.01 * jax.random.normal(sub, (cout,))).astype(jnp.float32)
    return params


def discriminator_forward(params, img_A, img_B):
    # img_A, img_B: (N, C, H, W) float32 (NCHW, like the PyTorch module)
    x = jnp.concatenate([img_A, img_B], axis=1)           # cat along channels
    x = jnp.transpose(x, (0, 2, 3, 1))                    # NCHW -> NHWC

    # block 1: conv(s=2, p=1) + LeakyReLU (no normalization)
    x = conv2d_pallas(x, params["w1"], params["b1"], stride=2, pad=1, leaky=True)

    # blocks 2-4: conv(s=2, p=1) -> InstanceNorm2d -> LeakyReLU
    for wk, bk in (("w2", "b2"), ("w3", "b3"), ("w4", "b4")):
        x = conv2d_pallas(x, params[wk], params[bk], stride=2, pad=1, leaky=False)
        N, OH, OW, C = x.shape
        x = _inorm_lrelu_pallas(x.reshape(N, OH * OW, C)).reshape(N, OH, OW, C)

    # nn.ZeroPad2d((1, 0, 1, 0)): left=1, right=0, top=1, bottom=0
    x = jnp.pad(x, ((0, 0), (1, 0), (1, 0), (0, 0)))

    # final conv: 512 -> 1, k=4, stride=1, pad=1, bias=False
    zero_bias = jnp.zeros((1,), jnp.float32)
    x = conv2d_pallas(x, params["w5"], zero_bias, stride=1, pad=1, leaky=False)

    return jnp.transpose(x, (0, 3, 1, 2))                 # back to NCHW


if __name__ == "__main__":
    N, C, H, W = 2, 3, 32, 32
    key = jax.random.PRNGKey(0)
    ka, kb = jax.random.split(key)
    img_A = jax.random.normal(ka, (N, C, H, W), dtype=jnp.float32)
    img_B = jax.random.normal(kb, (N, C, H, W), dtype=jnp.float32)

    params = init_params(in_channels=C)

    fwd = jax.jit(discriminator_forward)
    out = fwd(params, img_A, img_B)
    out = jax.block_until_ready(out)

    # 32 -> 16 -> 8 -> 4 -> 2 -> (zeropad) 3 -> 2 ; channels 1
    assert out.shape == (N, 1, 2, 2), out.shape
    assert out.dtype == jnp.float32
    print("KERNEL_OK")
</pallas_src>

<mosaic_0001>
module attributes {stable_mosaic.version = 11 : i64} {
  func.func @_conv_matmul_kernel(%arg0: i32, %arg1: i32, %arg2: memref<512x128xbf16, #tpu.memory_space<vmem>>, %arg3: memref<128x128xbf16, #tpu.memory_space<vmem>>, %arg4: memref<1x128xf32, #tpu.memory_space<vmem>>, %arg5: memref<512x128xf32, #tpu.memory_space<vmem>>, %arg6: memref<512x128xf32, #tpu.memory_space<vmem>>) attributes {dimension_semantics = [#tpu.dimension_semantics<parallel>, #tpu.dimension_semantics<arbitrary>], iteration_bounds = array<i64: 1, 1>, scalar_prefetch = 0 : i64, scratch_operands = 1 : i64, tpu.core_type = #tpu.core_type<tc>, window_params = [{transform_indices = @transform_0, window_bounds = array<i64: 512, 128>}, {transform_indices = @transform_1, window_bounds = array<i64: 128, 128>}, {pipeline_mode = #tpu.pipeline_mode<synchronous>, transform_indices = @transform_2, window_bounds = array<i64: 1, 128>}, {transform_indices = @transform_3, window_bounds = array<i64: 512, 128>}]} {
    %c0_i32 = arith.constant 0 : i32
    %0 = arith.cmpi eq, %arg1, %c0_i32 : i32
    %1 = arith.extui %0 : i1 to i32
    %c0_i32_0 = arith.constant 0 : i32
    %2 = arith.cmpi ne, %1, %c0_i32_0 : i32
    scf.if %2 {
      %cst_10 = arith.constant 0.000000e+00 : f32
      %12 = vector.broadcast %cst_10 : f32 to vector<512x128xf32>
      %c0_11 = arith.constant 0 : index
      %c0_12 = arith.constant 0 : index
      %13 = vector.load %arg6[%c0_11, %c0_12] : memref<512x128xf32, #tpu.memory_space<vmem>>, vector<512x128xf32>
      tpu.vector_store %arg6[%c0_11, %c0_12], %12 {strides = array<i32>} : memref<512x128xf32, #tpu.memory_space<vmem>>, vector<512x128xf32>,
    } else {
    }
    %c0 = arith.constant 0 : index
    %c0_1 = arith.constant 0 : index
    %3 = vector.load %arg6[%c0, %c0_1] : memref<512x128xf32, #tpu.memory_space<vmem>>, vector<512x128xf32>
    %c0_2 = arith.constant 0 : index
    %c0_3 = arith.constant 0 : index
    %4 = vector.load %arg2[%c0_2, %c0_3] : memref<512x128xbf16, #tpu.memory_space<vmem>>, vector<512x128xbf16>
    %c0_4 = arith.constant 0 : index
    %c0_5 = arith.constant 0 : index
    %5 = vector.load %arg3[%c0_4, %c0_5] : memref<128x128xbf16, #tpu.memory_space<vmem>>, vector<128x128xbf16>
    %cst = arith.constant dense<0.000000e+00> : vector<512x128xf32>
    %6 = tpu.matmul %4, %5, %cst {dimension_numbers = #tpu.dot_dimension_numbers<[1], [0], [0], [1], [0, 0, 1, 1], [], []>} : vector<512x128xbf16>, vector<128x128xbf16>, vector<512x128xf32> -> vector<512x128xf32>
    %7 = arith.addf %3, %6 : vector<512x128xf32>
    %c0_6 = arith.constant 0 : index
    %c0_7 = arith.constant 0 : index
    %8 = vector.load %arg6[%c0_6, %c0_7] : memref<512x128xf32, #tpu.memory_space<vmem>>, vector<512x128xf32>
    tpu.vector_store %arg6[%c0_6, %c0_7], %7 {strides = array<i32>} : memref<512x128xf32, #tpu.memory_space<vmem>>, vector<512x128xf32>,
    %c0_i32_8 = arith.constant 0 : i32
    %9 = arith.cmpi eq, %arg1, %c0_i32_8 : i32
    %10 = arith.extui %9 : i1 to i32
    %c0_i32_9 = arith.constant 0 : i32
    %11 = arith.cmpi ne, %10, %c0_i32_9 : i32
    scf.if %11 {
      %c0_10 = arith.constant 0 : index
      %c0_11 = arith.constant 0 : index
      %12 = vector.load %arg6[%c0_10, %c0_11] : memref<512x128xf32, #tpu.memory_space<vmem>>, vector<512x128xf32>
      %c0_12 = arith.constant 0 : index
      %c0_13 = arith.constant 0 : index
      %13 = vector.load %arg4[%c0_12, %c0_13] : memref<1x128xf32, #tpu.memory_space<vmem>>, vector<1x128xf32>
      %14 = vector.broadcast %13 : vector<1x128xf32> to vector<512x128xf32>
      %15 = arith.addf %12, %14 : vector<512x128xf32>
      %cst_14 = arith.constant 0.000000e+00 : f32
      %16 = vector.broadcast %cst_14 : f32 to vector<512x128xf32>
      %17 = arith.cmpf ogt, %15, %16 : vector<512x128xf32>
      %cst_15 = arith.constant 2.000000e-01 : f32
      %18 = vector.broadcast %cst_15 : f32 to vector<512x128xf32>
      %19 = arith.mulf %18, %15 : vector<512x128xf32>
      %20 = arith.select %17, %15, %19 : vector<512x128xi1>, vector<512x128xf32>
      %c0_16 = arith.constant 0 : index
      %c0_17 = arith.constant 0 : index
      %21 = vector.load %arg5[%c0_16, %c0_17] : memref<512x128xf32, #tpu.memory_space<vmem>>, vector<512x128xf32>
      tpu.vector_store %arg5[%c0_16, %c0_17], %20 {strides = array<i32>} : memref<512x128xf32, #tpu.memory_space<vmem>>, vector<512x128xf32>,
    } else {
    }
    return
  }
  func.func @transform_0(%arg0: i32, %arg1: i32) -> (i32, i32) {
    %c0_i32 = arith.constant 0 : i32
    return %arg0, %arg1 : i32, i32
  }
  func.func @transform_1(%arg0: i32, %arg1: i32) -> (i32, i32) {
    %c0_i32 = arith.constant 0 : i32
    %c0_i32_0 = arith.constant 0 : i32
    return %arg1, %c0_i32 : i32, i32
  }
  func.func @transform_2(%arg0: i32, %arg1: i32) -> (i32, i32) {
    %c0_i32 = arith.constant 0 : i32
    %c0_i32_0 = arith.constant 0 : i32
    %c0_i32_1 = arith.constant 0 : i32
    return %c0_i32, %c0_i32_0 : i32, i32
  }
  func.func @transform_3(%arg0: i32, %arg1: i32) -> (i32, i32) {
    %c0_i32 = arith.constant 0 : i32
    %c0_i32_0 = arith.constant 0 : i32
    return %arg0, %c0_i32 : i32, i32
  }
}

module attributes {stable_mosaic.version = 11 : i64} {
  func.func @_conv_matmul_kernel(%arg0: i32, %arg1: i32, %arg2: memref<128x1024xbf16, #tpu.memory_space<vmem>>, %arg3: memref<1024x128xbf16, #tpu.memory_space<vmem>>, %arg4: memref<1x128xf32, #tpu.memory_space<vmem>>, %arg5: memref<128x128xf32, #tpu.memory_space<vmem>>, %arg6: memref<128x128xf32, #tpu.memory_space<vmem>>) attributes {dimension_semantics = [#tpu.dimension_semantics<parallel>, #tpu.dimension_semantics<arbitrary>], iteration_bounds = array<i64: 1, 1>, scalar_prefetch = 0 : i64, scratch_operands = 1 : i64, tpu.core_type = #tpu.core_type<tc>, window_params = [{transform_indices = @transform_0, window_bounds = array<i64: 128, 1024>}, {transform_indices = @transform_1, window_bounds = array<i64: 1024, 128>}, {pipeline_mode = #tpu.pipeline_mode<synchronous>, transform_indices = @transform_2, window_bounds = array<i64: 1, 128>}, {transform_indices = @transform_3, window_bounds = array<i64: 128, 128>}]} {
    %c0_i32 = arith.constant 0 : i32
    %0 = arith.cmpi eq, %arg1, %c0_i32 : i32
    %1 = arith.extui %0 : i1 to i32
    %c0_i32_0 = arith.constant 0 : i32
    %2 = arith.cmpi ne, %1, %c0_i32_0 : i32
    scf.if %2 {
      %cst_10 = arith.constant 0.000000e+00 : f32
      %12 = vector.broadcast %cst_10 : f32 to vector<128x128xf32>
      %c0_11 = arith.constant 0 : index
      %c0_12 = arith.constant 0 : index
      %13 = vector.load %arg6[%c0_11, %c0_12] : memref<128x128xf32, #tpu.memory_space<vmem>>, vector<128x128xf32>
      tpu.vector_store %arg6[%c0_11, %c0_12], %12 {strides = array<i32>} : memref<128x128xf32, #tpu.memory_space<vmem>>, vector<128x128xf32>,
    } else {
    }
    %c0 = arith.constant 0 : index
    %c0_1 = arith.constant 0 : index
    %3 = vector.load %arg6[%c0, %c0_1] : memref<128x128xf32, #tpu.memory_space<vmem>>, vector<128x128xf32>
    %c0_2 = arith.constant 0 : index
    %c0_3 = arith.constant 0 : index
    %4 = vector.load %arg2[%c0_2, %c0_3] : memref<128x1024xbf16, #tpu.memory_space<vmem>>, vector<128x1024xbf16>
    %c0_4 = arith.constant 0 : index
    %c0_5 = arith.constant 0 : index
    %5 = vector.load %arg3[%c0_4, %c0_5] : memref<1024x128xbf16, #tpu.memory_space<vmem>>, vector<1024x128xbf16>
    %cst = arith.constant dense<0.000000e+00> : vector<128x128xf32>
    %6 = tpu.matmul %4, %5, %cst {dimension_numbers = #tpu.dot_dimension_numbers<[1], [0], [0], [1], [0, 0, 1, 1], [], []>} : vector<128x1024xbf16>, vector<1024x128xbf16>, vector<128x128xf32> -> vector<128x128xf32>
    %7 = arith.addf %3, %6 : vector<128x128xf32>
    %c0_6 = arith.constant 0 : index
    %c0_7 = arith.constant 0 : index
    %8 = vector.load %arg6[%c0_6, %c0_7] : memref<128x128xf32, #tpu.memory_space<vmem>>, vector<128x128xf32>
    tpu.vector_store %arg6[%c0_6, %c0_7], %7 {strides = array<i32>} : memref<128x128xf32, #tpu.memory_space<vmem>>, vector<128x128xf32>,
    %c0_i32_8 = arith.constant 0 : i32
    %9 = arith.cmpi eq, %arg1, %c0_i32_8 : i32
    %10 = arith.extui %9 : i1 to i32
    %c0_i32_9 = arith.constant 0 : i32
    %11 = arith.cmpi ne, %10, %c0_i32_9 : i32
    scf.if %11 {
      %c0_10 = arith.constant 0 : index
      %c0_11 = arith.constant 0 : index
      %12 = vector.load %arg6[%c0_10, %c0_11] : memref<128x128xf32, #tpu.memory_space<vmem>>, vector<128x128xf32>
      %c0_12 = arith.constant 0 : index
      %c0_13 = arith.constant 0 : index
      %13 = vector.load %arg4[%c0_12, %c0_13] : memref<1x128xf32, #tpu.memory_space<vmem>>, vector<1x128xf32>
      %14 = vector.broadcast %13 : vector<1x128xf32> to vector<128x128xf32>
      %15 = arith.addf %12, %14 : vector<128x128xf32>
      %c0_14 = arith.constant 0 : index
      %c0_15 = arith.constant 0 : index
      %16 = vector.load %arg5[%c0_14, %c0_15] : memref<128x128xf32, #tpu.memory_space<vmem>>, vector<128x128xf32>
      tpu.vector_store %arg5[%c0_14, %c0_15], %15 {strides = array<i32>} : memref<128x128xf32, #tpu.memory_space<vmem>>, vector<128x128xf32>,
    } else {
    }
    return
  }
  func.func @transform_0(%arg0: i32, %arg1: i32) -> (i32, i32) {
    %c0_i32 = arith.constant 0 : i32
    return %arg0, %arg1 : i32, i32
  }
  func.func @transform_1(%arg0: i32, %arg1: i32) -> (i32, i32) {
    %c0_i32 = arith.constant 0 : i32
    %c0_i32_0 = arith.constant 0 : i32
    return %arg1, %c0_i32 : i32, i32
  }
  func.func @transform_2(%arg0: i32, %arg1: i32) -> (i32, i32) {
    %c0_i32 = arith.constant 0 : i32
    %c0_i32_0 = arith.constant 0 : i32
    %c0_i32_1 = arith.constant 0 : i32
    return %c0_i32, %c0_i32_0 : i32, i32
  }
  func.func @transform_3(%arg0: i32, %arg1: i32) -> (i32, i32) {
    %c0_i32 = arith.constant 0 : i32
    %c0_i32_0 = arith.constant 0 : i32
    return %arg0, %c0_i32 : i32, i32
  }
}

module attributes {stable_mosaic.version = 11 : i64} {
  func.func @_inorm_lrelu_kernel(%arg0: i32, %arg1: i32, %arg2: memref<1x64x128xf32, #tpu.memory_space<vmem>>, %arg3: memref<1x64x128xf32, #tpu.memory_space<vmem>>) attributes {dimension_semantics = [#tpu.dimension_semantics<parallel>, #tpu.dimension_semantics<parallel>], iteration_bounds = array<i64: 2, 1>, scalar_prefetch = 0 : i64, scratch_operands = 0 : i64, tpu.core_type = #tpu.core_type<tc>, window_params = [{transform_indices = @transform_0, window_bounds = array<i64: 1, 64, 128>}, {transform_indices = @transform_1, window_bounds = array<i64: 1, 64, 128>}]} {
    %c0 = arith.constant 0 : index
    %c0_0 = arith.constant 0 : index
    %c0_1 = arith.constant 0 : index
    %0 = vector.load %arg2[%c0, %c0_0, %c0_1] : memref<1x64x128xf32, #tpu.memory_space<vmem>>, vector<1x64x128xf32>
    %cst = arith.constant dense<0.000000e+00> : vector<1x128xf32>
    %1 = vector.multi_reduction <add>, %0, %cst [1] : vector<1x64x128xf32> to vector<1x128xf32>
    %2 = vector.shape_cast %1 : vector<1x128xf32> to vector<1x1x128xf32>
    %cst_2 = arith.constant 6.400000e+01 : f32
    %3 = vector.broadcast %cst_2 : f32 to vector<1x1x128xf32>
    %4 = arith.divf %2, %3 : vector<1x1x128xf32>
    %5 = arith.mulf %0, %0 : vector<1x64x128xf32>
    %cst_3 = arith.constant dense<0.000000e+00> : vector<1x128xf32>
    %6 = vector.multi_reduction <add>, %5, %cst_3 [1] : vector<1x64x128xf32> to vector<1x128xf32>
    %7 = vector.shape_cast %6 : vector<1x128xf32> to vector<1x1x128xf32>
    %cst_4 = arith.constant 6.400000e+01 : f32
    %8 = vector.broadcast %cst_4 : f32 to vector<1x1x128xf32>
    %9 = arith.divf %7, %8 : vector<1x1x128xf32>
    %10 = arith.mulf %4, %4 : vector<1x1x128xf32>
    %11 = arith.subf %9, %10 : vector<1x1x128xf32>
    %cst_5 = arith.constant 0.000000e+00 : f32
    %12 = vector.broadcast %cst_5 : f32 to vector<1x1x128xf32>
    %13 = arith.maximumf %11, %12 : vector<1x1x128xf32>
    %14 = vector.broadcast %4 : vector<1x1x128xf32> to vector<1x64x128xf32>
    %15 = arith.subf %0, %14 : vector<1x64x128xf32>
    %cst_6 = arith.constant 9.99999974E-6 : f32
    %16 = vector.broadcast %cst_6 : f32 to vector<1x1x128xf32>
    %17 = arith.addf %13, %16 : vector<1x1x128xf32>
    %18 = math.rsqrt %17 : vector<1x1x128xf32>
    %19 = vector.broadcast %18 : vector<1x1x128xf32> to vector<1x64x128xf32>
    %20 = arith.mulf %15, %19 : vector<1x64x128xf32>
    %cst_7 = arith.constant 0.000000e+00 : f32
    %21 = vector.broadcast %cst_7 : f32 to vector<1x64x128xf32>
    %22 = arith.cmpf ogt, %20, %21 : vector<1x64x128xf32>
    %cst_8 = arith.constant 2.000000e-01 : f32
    %23 = vector.broadcast %cst_8 : f32 to vector<1x64x128xf32>
    %24 = arith.mulf %23, %20 : vector<1x64x128xf32>
    %25 = arith.select %22, %20, %24 : vector<1x64x128xi1>, vector<1x64x128xf32>
    %c0_9 = arith.constant 0 : index
    %c0_10 = arith.constant 0 : index
    %c0_11 = arith.constant 0 : index
    %26 = vector.load %arg3[%c0_9, %c0_10, %c0_11] : memref<1x64x128xf32, #tpu.memory_space<vmem>>, vector<1x64x128xf32>
    tpu.vector_store %arg3[%c0_9, %c0_10, %c0_11], %25 {strides = array<i32>} : memref<1x64x128xf32, #tpu.memory_space<vmem>>, vector<1x64x128xf32>,
    return
  }
  func.func @transform_0(%arg0: i32, %arg1: i32) -> (i32, i32, i32) {
    %c0_i32 = arith.constant 0 : i32
    %c0_i32_0 = arith.constant 0 : i32
    return %arg0, %c0_i32, %arg1 : i32, i32, i32
  }
  func.func @transform_1(%arg0: i32, %arg1: i32) -> (i32, i32, i32) {
    %c0_i32 = arith.constant 0 : i32
    %c0_i32_0 = arith.constant 0 : i32
    return %arg0, %c0_i32, %arg1 : i32, i32, i32
  }
}

module attributes {stable_mosaic.version = 11 : i64} {
  func.func @_conv_matmul_kernel(%arg0: i32, %arg1: i32, %arg2: memref<32x2048xbf16, #tpu.memory_space<vmem>>, %arg3: memref<2048x256xbf16, #tpu.memory_space<vmem>>, %arg4: memref<1x256xf32, #tpu.memory_space<vmem>>, %arg5: memref<32x256xf32, #tpu.memory_space<vmem>>, %arg6: memref<32x256xf32, #tpu.memory_space<vmem>>) attributes {dimension_semantics = [#tpu.dimension_semantics<parallel>, #tpu.dimension_semantics<arbitrary>], iteration_bounds = array<i64: 1, 1>, scalar_prefetch = 0 : i64, scratch_operands = 1 : i64, tpu.core_type = #tpu.core_type<tc>, window_params = [{transform_indices = @transform_0, window_bounds = array<i64: 32, 2048>}, {transform_indices = @transform_1, window_bounds = array<i64: 2048, 256>}, {pipeline_mode = #tpu.pipeline_mode<synchronous>, transform_indices = @transform_2, window_bounds = array<i64: 1, 256>}, {transform_indices = @transform_3, window_bounds = array<i64: 32, 256>}]} {
    %c0_i32 = arith.constant 0 : i32
    %0 = arith.cmpi eq, %arg1, %c0_i32 : i32
    %1 = arith.extui %0 : i1 to i32
    %c0_i32_0 = arith.constant 0 : i32
    %2 = arith.cmpi ne, %1, %c0_i32_0 : i32
    scf.if %2 {
      %cst_10 = arith.constant 0.000000e+00 : f32
      %12 = vector.broadcast %cst_10 : f32 to vector<32x256xf32>
      %c0_11 = arith.constant 0 : index
      %c0_12 = arith.constant 0 : index
      %13 = vector.load %arg6[%c0_11, %c0_12] : memref<32x256xf32, #tpu.memory_space<vmem>>, vector<32x256xf32>
      tpu.vector_store %arg6[%c0_11, %c0_12], %12 {strides = array<i32>} : memref<32x256xf32, #tpu.memory_space<vmem>>, vector<32x256xf32>,
    } else {
    }
    %c0 = arith.constant 0 : index
    %c0_1 = arith.constant 0 : index
    %3 = vector.load %arg6[%c0, %c0_1] : memref<32x256xf32, #tpu.memory_space<vmem>>, vector<32x256xf32>
    %c0_2 = arith.constant 0 : index
    %c0_3 = arith.constant 0 : index
    %4 = vector.load %arg2[%c0_2, %c0_3] : memref<32x2048xbf16, #tpu.memory_space<vmem>>, vector<32x2048xbf16>
    %c0_4 = arith.constant 0 : index
    %c0_5 = arith.constant 0 : index
    %5 = vector.load %arg3[%c0_4, %c0_5] : memref<2048x256xbf16, #tpu.memory_space<vmem>>, vector<2048x256xbf16>
    %cst = arith.constant dense<0.000000e+00> : vector<32x256xf32>
    %6 = tpu.matmul %4, %5, %cst {dimension_numbers = #tpu.dot_dimension_numbers<[1], [0], [0], [1], [0, 0, 1, 1], [], []>} : vector<32x2048xbf16>, vector<2048x256xbf16>, vector<32x256xf32> -> vector<32x256xf32>
    %7 = arith.addf %3, %6 : vector<32x256xf32>
    %c0_6 = arith.constant 0 : index
    %c0_7 = arith.constant 0 : index
    %8 = vector.load %arg6[%c0_6, %c0_7] : memref<32x256xf32, #tpu.memory_space<vmem>>, vector<32x256xf32>
    tpu.vector_store %arg6[%c0_6, %c0_7], %7 {strides = array<i32>} : memref<32x256xf32, #tpu.memory_space<vmem>>, vector<32x256xf32>,
    %c0_i32_8 = arith.constant 0 : i32
    %9 = arith.cmpi eq, %arg1, %c0_i32_8 : i32
    %10 = arith.extui %9 : i1 to i32
    %c0_i32_9 = arith.constant 0 : i32
    %11 = arith.cmpi ne, %10, %c0_i32_9 : i32
    scf.if %11 {
      %c0_10 = arith.constant 0 : index
      %c0_11 = arith.constant 0 : index
      %12 = vector.load %arg6[%c0_10, %c0_11] : memref<32x256xf32, #tpu.memory_space<vmem>>, vector<32x256xf32>
      %c0_12 = arith.constant 0 : index
      %c0_13 = arith.constant 0 : index
      %13 = vector.load %arg4[%c0_12, %c0_13] : memref<1x256xf32, #tpu.memory_space<vmem>>, vector<1x256xf32>
      %14 = vector.broadcast %13 : vector<1x256xf32> to vector<32x256xf32>
      %15 = arith.addf %12, %14 : vector<32x256xf32>
      %c0_14 = arith.constant 0 : index
      %c0_15 = arith.constant 0 : index
      %16 = vector.load %arg5[%c0_14, %c0_15] : memref<32x256xf32, #tpu.memory_space<vmem>>, vector<32x256xf32>
      tpu.vector_store %arg5[%c0_14, %c0_15], %15 {strides = array<i32>} : memref<32x256xf32, #tpu.memory_space<vmem>>, vector<32x256xf32>,
    } else {
    }
    return
  }
  func.func @transform_0(%arg0: i32, %arg1: i32) -> (i32, i32) {
    %c0_i32 = arith.constant 0 : i32
    return %arg0, %arg1 : i32, i32
  }
  func.func @transform_1(%arg0: i32, %arg1: i32) -> (i32, i32) {
    %c0_i32 = arith.constant 0 : i32
    %c0_i32_0 = arith.constant 0 : i32
    return %arg1, %c0_i32 : i32, i32
  }
  func.func @transform_2(%arg0: i32, %arg1: i32) -> (i32, i32) {
    %c0_i32 = arith.constant 0 : i32
    %c0_i32_0 = arith.constant 0 : i32
    %c0_i32_1 = arith.constant 0 : i32
    return %c0_i32, %c0_i32_0 : i32, i32
  }
  func.func @transform_3(%arg0: i32, %arg1: i32) -> (i32, i32) {
    %c0_i32 = arith.constant 0 : i32
    %c0_i32_0 = arith.constant 0 : i32
    return %arg0, %c0_i32 : i32, i32
  }
}

module attributes {stable_mosaic.version = 11 : i64} {
  func.func @_inorm_lrelu_kernel(%arg0: i32, %arg1: i32, %arg2: memref<1x16x128xf32, #tpu.memory_space<vmem>>, %arg3: memref<1x16x128xf32, #tpu.memory_space<vmem>>) attributes {dimension_semantics = [#tpu.dimension_semantics<parallel>, #tpu.dimension_semantics<parallel>], iteration_bounds = array<i64: 2, 2>, scalar_prefetch = 0 : i64, scratch_operands = 0 : i64, tpu.core_type = #tpu.core_type<tc>, window_params = [{transform_indices = @transform_0, window_bounds = array<i64: 1, 16, 128>}, {transform_indices = @transform_1, window_bounds = array<i64: 1, 16, 128>}]} {
    %c0 = arith.constant 0 : index
    %c0_0 = arith.constant 0 : index
    %c0_1 = arith.constant 0 : index
    %0 = vector.load %arg2[%c0, %c0_0, %c0_1] : memref<1x16x128xf32, #tpu.memory_space<vmem>>, vector<1x16x128xf32>
    %cst = arith.constant dense<0.000000e+00> : vector<1x128xf32>
    %1 = vector.multi_reduction <add>, %0, %cst [1] : vector<1x16x128xf32> to vector<1x128xf32>
    %2 = vector.shape_cast %1 : vector<1x128xf32> to vector<1x1x128xf32>
    %cst_2 = arith.constant 1.600000e+01 : f32
    %3 = vector.broadcast %cst_2 : f32 to vector<1x1x128xf32>
    %4 = arith.divf %2, %3 : vector<1x1x128xf32>
    %5 = arith.mulf %0, %0 : vector<1x16x128xf32>
    %cst_3 = arith.constant dense<0.000000e+00> : vector<1x128xf32>
    %6 = vector.multi_reduction <add>, %5, %cst_3 [1] : vector<1x16x128xf32> to vector<1x128xf32>
    %7 = vector.shape_cast %6 : vector<1x128xf32> to vector<1x1x128xf32>
    %cst_4 = arith.constant 1.600000e+01 : f32
    %8 = vector.broadcast %cst_4 : f32 to vector<1x1x128xf32>
    %9 = arith.divf %7, %8 : vector<1x1x128xf32>
    %10 = arith.mulf %4, %4 : vector<1x1x128xf32>
    %11 = arith.subf %9, %10 : vector<1x1x128xf32>
    %cst_5 = arith.constant 0.000000e+00 : f32
    %12 = vector.broadcast %cst_5 : f32 to vector<1x1x128xf32>
    %13 = arith.maximumf %11, %12 : vector<1x1x128xf32>
    %14 = vector.broadcast %4 : vector<1x1x128xf32> to vector<1x16x128xf32>
    %15 = arith.subf %0, %14 : vector<1x16x128xf32>
    %cst_6 = arith.constant 9.99999974E-6 : f32
    %16 = vector.broadcast %cst_6 : f32 to vector<1x1x128xf32>
    %17 = arith.addf %13, %16 : vector<1x1x128xf32>
    %18 = math.rsqrt %17 : vector<1x1x128xf32>
    %19 = vector.broadcast %18 : vector<1x1x128xf32> to vector<1x16x128xf32>
    %20 = arith.mulf %15, %19 : vector<1x16x128xf32>
    %cst_7 = arith.constant 0.000000e+00 : f32
    %21 = vector.broadcast %cst_7 : f32 to vector<1x16x128xf32>
    %22 = arith.cmpf ogt, %20, %21 : vector<1x16x128xf32>
    %cst_8 = arith.constant 2.000000e-01 : f32
    %23 = vector.broadcast %cst_8 : f32 to vector<1x16x128xf32>
    %24 = arith.mulf %23, %20 : vector<1x16x128xf32>
    %25 = arith.select %22, %20, %24 : vector<1x16x128xi1>, vector<1x16x128xf32>
    %c0_9 = arith.constant 0 : index
    %c0_10 = arith.constant 0 : index
    %c0_11 = arith.constant 0 : index
    %26 = vector.load %arg3[%c0_9, %c0_10, %c0_11] : memref<1x16x128xf32, #tpu.memory_space<vmem>>, vector<1x16x128xf32>
    tpu.vector_store %arg3[%c0_9, %c0_10, %c0_11], %25 {strides = array<i32>} : memref<1x16x128xf32, #tpu.memory_space<vmem>>, vector<1x16x128xf32>,
    return
  }
  func.func @transform_0(%arg0: i32, %arg1: i32) -> (i32, i32, i32) {
    %c0_i32 = arith.constant 0 : i32
    %c0_i32_0 = arith.constant 0 : i32
    return %arg0, %c0_i32, %arg1 : i32, i32, i32
  }
  func.func @transform_1(%arg0: i32, %arg1: i32) -> (i32, i32, i32) {
    %c0_i32 = arith.constant 0 : i32
    %c0_i32_0 = arith.constant 0 : i32
    return %arg0, %c0_i32, %arg1 : i32, i32, i32
  }
}

module attributes {stable_mosaic.version = 11 : i64} {
  func.func @_conv_matmul_kernel(%arg0: i32, %arg1: i32, %arg2: memref<8x2048xbf16, #tpu.memory_space<vmem>>, %arg3: memref<2048x512xbf16, #tpu.memory_space<vmem>>, %arg4: memref<1x512xf32, #tpu.memory_space<vmem>>, %arg5: memref<8x512xf32, #tpu.memory_space<vmem>>, %arg6: memref<8x512xf32, #tpu.memory_space<vmem>>) attributes {dimension_semantics = [#tpu.dimension_semantics<parallel>, #tpu.dimension_semantics<arbitrary>], iteration_bounds = array<i64: 1, 2>, scalar_prefetch = 0 : i64, scratch_operands = 1 : i64, tpu.core_type = #tpu.core_type<tc>, window_params = [{transform_indices = @transform_0, window_bounds = array<i64: 8, 2048>}, {transform_indices = @transform_1, window_bounds = array<i64: 2048, 512>}, {pipeline_mode = #tpu.pipeline_mode<synchronous>, transform_indices = @transform_2, window_bounds = array<i64: 1, 512>}, {transform_indices = @transform_3, window_bounds = array<i64: 8, 512>}]} {
    %c0_i32 = arith.constant 0 : i32
    %0 = arith.cmpi eq, %arg1, %c0_i32 : i32
    %1 = arith.extui %0 : i1 to i32
    %c0_i32_0 = arith.constant 0 : i32
    %2 = arith.cmpi ne, %1, %c0_i32_0 : i32
    scf.if %2 {
      %cst_9 = arith.constant 0.000000e+00 : f32
      %12 = vector.broadcast %cst_9 : f32 to vector<8x512xf32>
      %c0_10 = arith.constant 0 : index
      %c0_11 = arith.constant 0 : index
      %13 = vector.load %arg6[%c0_10, %c0_11] : memref<8x512xf32, #tpu.memory_space<vmem>>, vector<8x512xf32>
      tpu.vector_store %arg6[%c0_10, %c0_11], %12 {strides = array<i32>} : memref<8x512xf32, #tpu.memory_space<vmem>>, vector<8x512xf32>,
    } else {
    }
    %c0 = arith.constant 0 : index
    %c0_1 = arith.constant 0 : index
    %3 = vector.load %arg6[%c0, %c0_1] : memref<8x512xf32, #tpu.memory_space<vmem>>, vector<8x512xf32>
    %c0_2 = arith.constant 0 : index
    %c0_3 = arith.constant 0 : index
    %4 = vector.load %arg2[%c0_2, %c0_3] : memref<8x2048xbf16, #tpu.memory_space<vmem>>, vector<8x2048xbf16>
    %c0_4 = arith.constant 0 : index
    %c0_5 = arith.constant 0 : index
    %5 = vector.load %arg3[%c0_4, %c0_5] : memref<2048x512xbf16, #tpu.memory_space<vmem>>, vector<2048x512xbf16>
    %cst = arith.constant dense<0.000000e+00> : vector<8x512xf32>
    %6 = tpu.matmul %4, %5, %cst {dimension_numbers = #tpu.dot_dimension_numbers<[1], [0], [0], [1], [0, 0, 1, 1], [], []>} : vector<8x2048xbf16>, vector<2048x512xbf16>, vector<8x512xf32> -> vector<8x512xf32>
    %7 = arith.addf %3, %6 : vector<8x512xf32>
    %c0_6 = arith.constant 0 : index
    %c0_7 = arith.constant 0 : index
    %8 = vector.load %arg6[%c0_6, %c0_7] : memref<8x512xf32, #tpu.memory_space<vmem>>, vector<8x512xf32>
    tpu.vector_store %arg6[%c0_6, %c0_7], %7 {strides = array<i32>} : memref<8x512xf32, #tpu.memory_space<vmem>>, vector<8x512xf32>,
    %c1_i32 = arith.constant 1 : i32
    %9 = arith.cmpi eq, %arg1, %c1_i32 : i32
    %10 = arith.extui %9 : i1 to i32
    %c0_i32_8 = arith.constant 0 : i32
    %11 = arith.cmpi ne, %10, %c0_i32_8 : i32
    scf.if %11 {
      %c0_9 = arith.constant 0 : index
      %c0_10 = arith.constant 0 : index
      %12 = vector.load %arg6[%c0_9, %c0_10] : memref<8x512xf32, #tpu.memory_space<vmem>>, vector<8x512xf32>
      %c0_11 = arith.constant 0 : index
      %c0_12 = arith.constant 0 : index
      %13 = vector.load %arg4[%c0_11, %c0_12] : memref<1x512xf32, #tpu.memory_space<vmem>>, vector<1x512xf32>
      %14 = vector.broadcast %13 : vector<1x512xf32> to vector<8x512xf32>
      %15 = arith.addf %12, %14 : vector<8x512xf32>
      %c0_13 = arith.constant 0 : index
      %c0_14 = arith.constant 0 : index
      %16 = vector.load %arg5[%c0_13, %c0_14] : memref<8x512xf32, #tpu.memory_space<vmem>>, vector<8x512xf32>
      tpu.vector_store %arg5[%c0_13, %c0_14], %15 {strides = array<i32>} : memref<8x512xf32, #tpu.memory_space<vmem>>, vector<8x512xf32>,
    } else {
    }
    return
  }
  func.func @transform_0(%arg0: i32, %arg1: i32) -> (i32, i32) {
    %c0_i32 = arith.constant 0 : i32
    return %arg0, %arg1 : i32, i32
  }
  func.func @transform_1(%arg0: i32, %arg1: i32) -> (i32, i32) {
    %c0_i32 = arith.constant 0 : i32
    %c0_i32_0 = arith.constant 0 : i32
    return %arg1, %c0_i32 : i32, i32
  }
  func.func @transform_2(%arg0: i32, %arg1: i32) -> (i32, i32) {
    %c0_i32 = arith.constant 0 : i32
    %c0_i32_0 = arith.constant 0 : i32
    %c0_i32_1 = arith.constant 0 : i32
    return %c0_i32, %c0_i32_0 : i32, i32
  }
  func.func @transform_3(%arg0: i32, %arg1: i32) -> (i32, i32) {
    %c0_i32 = arith.constant 0 : i32
    %c0_i32_0 = arith.constant 0 : i32
    return %arg0, %c0_i32 : i32, i32
  }
}

module attributes {stable_mosaic.version = 11 : i64} {
  func.func @_inorm_lrelu_kernel(%arg0: i32, %arg1: i32, %arg2: memref<1x4x128xf32, #tpu.memory_space<vmem>>, %arg3: memref<1x4x128xf32, #tpu.memory_space<vmem>>) attributes {dimension_semantics = [#tpu.dimension_semantics<parallel>, #tpu.dimension_semantics<parallel>], iteration_bounds = array<i64: 2, 4>, scalar_prefetch = 0 : i64, scratch_operands = 0 : i64, tpu.core_type = #tpu.core_type<tc>, window_params = [{transform_indices = @transform_0, window_bounds = array<i64: 1, 4, 128>}, {transform_indices = @transform_1, window_bounds = array<i64: 1, 4, 128>}]} {
    %c0 = arith.constant 0 : index
    %c0_0 = arith.constant 0 : index
    %c0_1 = arith.constant 0 : index
    %0 = vector.load %arg2[%c0, %c0_0, %c0_1] : memref<1x4x128xf32, #tpu.memory_space<vmem>>, vector<1x4x128xf32>
    %cst = arith.constant dense<0.000000e+00> : vector<1x128xf32>
    %1 = vector.multi_reduction <add>, %0, %cst [1] : vector<1x4x128xf32> to vector<1x128xf32>
    %2 = vector.shape_cast %1 : vector<1x128xf32> to vector<1x1x128xf32>
    %cst_2 = arith.constant 4.000000e+00 : f32
    %3 = vector.broadcast %cst_2 : f32 to vector<1x1x128xf32>
    %4 = arith.divf %2, %3 : vector<1x1x128xf32>
    %5 = arith.mulf %0, %0 : vector<1x4x128xf32>
    %cst_3 = arith.constant dense<0.000000e+00> : vector<1x128xf32>
    %6 = vector.multi_reduction <add>, %5, %cst_3 [1] : vector<1x4x128xf32> to vector<1x128xf32>
    %7 = vector.shape_cast %6 : vector<1x128xf32> to vector<1x1x128xf32>
    %cst_4 = arith.constant 4.000000e+00 : f32
    %8 = vector.broadcast %cst_4 : f32 to vector<1x1x128xf32>
    %9 = arith.divf %7, %8 : vector<1x1x128xf32>
    %10 = arith.mulf %4, %4 : vector<1x1x128xf32>
    %11 = arith.subf %9, %10 : vector<1x1x128xf32>
    %cst_5 = arith.constant 0.000000e+00 : f32
    %12 = vector.broadcast %cst_5 : f32 to vector<1x1x128xf32>
    %13 = arith.maximumf %11, %12 : vector<1x1x128xf32>
    %14 = vector.broadcast %4 : vector<1x1x128xf32> to vector<1x4x128xf32>
    %15 = arith.subf %0, %14 : vector<1x4x128xf32>
    %cst_6 = arith.constant 9.99999974E-6 : f32
    %16 = vector.broadcast %cst_6 : f32 to vector<1x1x128xf32>
    %17 = arith.addf %13, %16 : vector<1x1x128xf32>
    %18 = math.rsqrt %17 : vector<1x1x128xf32>
    %19 = vector.broadcast %18 : vector<1x1x128xf32> to vector<1x4x128xf32>
    %20 = arith.mulf %15, %19 : vector<1x4x128xf32>
    %cst_7 = arith.constant 0.000000e+00 : f32
    %21 = vector.broadcast %cst_7 : f32 to vector<1x4x128xf32>
    %22 = arith.cmpf ogt, %20, %21 : vector<1x4x128xf32>
    %cst_8 = arith.constant 2.000000e-01 : f32
    %23 = vector.broadcast %cst_8 : f32 to vector<1x4x128xf32>
    %24 = arith.mulf %23, %20 : vector<1x4x128xf32>
    %25 = arith.select %22, %20, %24 : vector<1x4x128xi1>, vector<1x4x128xf32>
    %c0_9 = arith.constant 0 : index
    %c0_10 = arith.constant 0 : index
    %c0_11 = arith.constant 0 : index
    %26 = vector.load %arg3[%c0_9, %c0_10, %c0_11] : memref<1x4x128xf32, #tpu.memory_space<vmem>>, vector<1x4x128xf32>
    tpu.vector_store %arg3[%c0_9, %c0_10, %c0_11], %25 {strides = array<i32>} : memref<1x4x128xf32, #tpu.memory_space<vmem>>, vector<1x4x128xf32>,
    return
  }
  func.func @transform_0(%arg0: i32, %arg1: i32) -> (i32, i32, i32) {
    %c0_i32 = arith.constant 0 : i32
    %c0_i32_0 = arith.constant 0 : i32
    return %arg0, %c0_i32, %arg1 : i32, i32, i32
  }
  func.func @transform_1(%arg0: i32, %arg1: i32) -> (i32, i32, i32) {
    %c0_i32 = arith.constant 0 : i32
    %c0_i32_0 = arith.constant 0 : i32
    return %arg0, %c0_i32, %arg1 : i32, i32, i32
  }
}

module attributes {stable_mosaic.version = 11 : i64} {
  func.func @_conv_matmul_kernel(%arg0: i32, %arg1: i32, %arg2: memref<8x2048xbf16, #tpu.memory_space<vmem>>, %arg3: memref<2048x128xbf16, #tpu.memory_space<vmem>>, %arg4: memref<1x128xf32, #tpu.memory_space<vmem>>, %arg5: memref<8x128xf32, #tpu.memory_space<vmem>>, %arg6: memref<8x128xf32, #tpu.memory_space<vmem>>) attributes {dimension_semantics = [#tpu.dimension_semantics<parallel>, #tpu.dimension_semantics<arbitrary>], iteration_bounds = array<i64: 1, 4>, scalar_prefetch = 0 : i64, scratch_operands = 1 : i64, tpu.core_type = #tpu.core_type<tc>, window_params = [{transform_indices = @transform_0, window_bounds = array<i64: 8, 2048>}, {transform_indices = @transform_1, window_bounds = array<i64: 2048, 128>}, {pipeline_mode = #tpu.pipeline_mode<synchronous>, transform_indices = @transform_2, window_bounds = array<i64: 1, 128>}, {transform_indices = @transform_3, window_bounds = array<i64: 8, 128>}]} {
    %c0_i32 = arith.constant 0 : i32
    %0 = arith.cmpi eq, %arg1, %c0_i32 : i32
    %1 = arith.extui %0 : i1 to i32
    %c0_i32_0 = arith.constant 0 : i32
    %2 = arith.cmpi ne, %1, %c0_i32_0 : i32
    scf.if %2 {
      %cst_9 = arith.constant 0.000000e+00 : f32
      %12 = vector.broadcast %cst_9 : f32 to vector<8x128xf32>
      %c0_10 = arith.constant 0 : index
      %c0_11 = arith.constant 0 : index
      %13 = vector.load %arg6[%c0_10, %c0_11] : memref<8x128xf32, #tpu.memory_space<vmem>>, vector<8x128xf32>
      tpu.vector_store %arg6[%c0_10, %c0_11], %12 {strides = array<i32>} : memref<8x128xf32, #tpu.memory_space<vmem>>, vector<8x128xf32>,
    } else {
    }
    %c0 = arith.constant 0 : index
    %c0_1 = arith.constant 0 : index
    %3 = vector.load %arg6[%c0, %c0_1] : memref<8x128xf32, #tpu.memory_space<vmem>>, vector<8x128xf32>
    %c0_2 = arith.constant 0 : index
    %c0_3 = arith.constant 0 : index
    %4 = vector.load %arg2[%c0_2, %c0_3] : memref<8x2048xbf16, #tpu.memory_space<vmem>>, vector<8x2048xbf16>
    %c0_4 = arith.constant 0 : index
    %c0_5 = arith.constant 0 : index
    %5 = vector.load %arg3[%c0_4, %c0_5] : memref<2048x128xbf16, #tpu.memory_space<vmem>>, vector<2048x128xbf16>
    %cst = arith.constant dense<0.000000e+00> : vector<8x128xf32>
    %6 = tpu.matmul %4, %5, %cst {dimension_numbers = #tpu.dot_dimension_numbers<[1], [0], [0], [1], [0, 0, 1, 1], [], []>} : vector<8x2048xbf16>, vector<2048x128xbf16>, vector<8x128xf32> -> vector<8x128xf32>
    %7 = arith.addf %3, %6 : vector<8x128xf32>
    %c0_6 = arith.constant 0 : index
    %c0_7 = arith.constant 0 : index
    %8 = vector.load %arg6[%c0_6, %c0_7] : memref<8x128xf32, #tpu.memory_space<vmem>>, vector<8x128xf32>
    tpu.vector_store %arg6[%c0_6, %c0_7], %7 {strides = array<i32>} : memref<8x128xf32, #tpu.memory_space<vmem>>, vector<8x128xf32>,
    %c3_i32 = arith.constant 3 : i32
    %9 = arith.cmpi eq, %arg1, %c3_i32 : i32
    %10 = arith.extui %9 : i1 to i32
    %c0_i32_8 = arith.constant 0 : i32
    %11 = arith.cmpi ne, %10, %c0_i32_8 : i32
    scf.if %11 {
      %c0_9 = arith.constant 0 : index
      %c0_10 = arith.constant 0 : index
      %12 = vector.load %arg6[%c0_9, %c0_10] : memref<8x128xf32, #tpu.memory_space<vmem>>, vector<8x128xf32>
      %c0_11 = arith.constant 0 : index
      %c0_12 = arith.constant 0 : index
      %13 = vector.load %arg4[%c0_11, %c0_12] : memref<1x128xf32, #tpu.memory_space<vmem>>, vector<1x128xf32>
      %14 = vector.broadcast %13 : vector<1x128xf32> to vector<8x128xf32>
      %15 = arith.addf %12, %14 : vector<8x128xf32>
      %c0_13 = arith.constant 0 : index
      %c0_14 = arith.constant 0 : index
      %16 = vector.load %arg5[%c0_13, %c0_14] : memref<8x128xf32, #tpu.memory_space<vmem>>, vector<8x128xf32>
      tpu.vector_store %arg5[%c0_13, %c0_14], %15 {strides = array<i32>} : memref<8x128xf32, #tpu.memory_space<vmem>>, vector<8x128xf32>,
    } else {
    }
    return
  }
  func.func @transform_0(%arg0: i32, %arg1: i32) -> (i32, i32) {
    %c0_i32 = arith.constant 0 : i32
    return %arg0, %arg1 : i32, i32
  }
  func.func @transform_1(%arg0: i32, %arg1: i32) -> (i32, i32) {
    %c0_i32 = arith.constant 0 : i32
    %c0_i32_0 = arith.constant 0 : i32
    return %arg1, %c0_i32 : i32, i32
  }
  func.func @transform_2(%arg0: i32, %arg1: i32) -> (i32, i32) {
    %c0_i32 = arith.constant 0 : i32
    %c0_i32_0 = arith.constant 0 : i32
    %c0_i32_1 = arith.constant 0 : i32
    return %c0_i32, %c0_i32_0 : i32, i32
  }
  func.func @transform_3(%arg0: i32, %arg1: i32) -> (i32, i32) {
    %c0_i32 = arith.constant 0 : i32
    %c0_i32_0 = arith.constant 0 : i32
    return %arg0, %c0_i32 : i32, i32
  }
}

</mosaic_0001>

<bundles_post_ra>
// kernel: discriminator_forward.8
= control target key start
LH: loop header
LB: loop body
LE: loop exit
PB: predicated region body
PF: predicated region fallthrough
CT: control target
= control target key end

     0   :  { %s1900_s1 = inlined_call_operand.vmem [shape: bf16[128,128], index: 1, kind: input, shape index: {}]   ;;  %s1901_s0 = inlined_call_operand.vmem [shape: bf16[512,128], index: 0, kind: input, shape index: {}]   ;;  %s1902_s2 = inlined_call_operand.vmem [shape: f32[1,128], index: 2, kind: input, shape index: {}]   ;;  %s1903_s3 = inlined_call_operand.vmem [shape: f32[512,128], index: 3, kind: output, shape index: {}]  }
   0x1   :  { %v1459_v0 = vld [vmem:[%s1900_s1 + $0x38] sm:$0xff]   ;;  %v1460_v1 = vld [vmem:[%s1900_s1 + $0x30] sm:$0xff]   ;;  %v1461_v2 = vld [vmem:[%s1900_s1 + $0x28] sm:$0xff]  }
   0x2   :  { %1363 = vmatprep.subr.bf16.mxu0 %v1459_v0  ;;  %1443 = vmatprep.subr.bf16.mxu1 %v1459_v0  ;;  %v1462_v3 = vld [vmem:[%s1900_s1 + $0x20] sm:$0xff]   ;;  %v1463_v6 = vld [vmem:[%s1900_s1 + $0x18] sm:$0xff]   ;;  %v1464_v7 = vld [vmem:[%s1900_s1 + $0x10] sm:$0xff]  }
   0x3   :  { %1364 = vmatpush3.bf16.msra.mxu0 %v1459_v0  ;;  %1451 = vmatpush3.bf16.msra.mxu1 %v1459_v0  ;;  %v1467_v4 = vld [vmem:[%s1901_s0] sm:$0xff]   ;;  %v1465_v8 = vld [vmem:[%s1900_s1 + $0x8] sm:$0xff]   ;;  %v1471_v12 = vld [vmem:[%s1901_s0 + $0x10] sm:$0xff]  }
   0x4   :  { %1365 = vmatprep.subr.bf16.mxu0 %v1460_v1  ;;  %1444 = vmatprep.subr.bf16.mxu1 %v1460_v1  ;;  %v1468_v5 = vld [vmem:[%s1901_s0 + $0x80] sm:$0xff]   ;;  %v1469_v10 = vld [vmem:[%s1901_s0 + $0x8] sm:$0xff]   ;;  %v1472_v13 = vld [vmem:[%s1901_s0 + $0x90] sm:$0xff]  }
   0x5   :  { %1379 = vmatprep.mubr.bf16.mxu0 %v1467_v4  ;;  %1411 = vmatprep.mubr.bf16.mxu1 %v1468_v5  ;;  %v1466_v9 = vld [vmem:[%s1900_s1] sm:$0xff]   ;;  %v1470_v11 = vld [vmem:[%s1901_s0 + $0x88] sm:$0xff]   ;;  %v1473_v14 = vld [vmem:[%s1901_s0 + $0x18] sm:$0xff]  }
   0x6   :  { %v1474_v15 = vld [vmem:[%s1901_s0 + $0x98] sm:$0xff]   ;;  %v1475_v16 = vld [vmem:[%s1901_s0 + $0x20] sm:$0xff]   ;;  %v1477_v18 = vld [vmem:[%s1901_s0 + $0x28] sm:$0xff]  }
   0x7   :  { %1366 = vmatpush3.bf16.msra.mxu0 %v1460_v1  ;;  %1452 = vmatpush3.bf16.msra.mxu1 %v1460_v1  ;;  %v1476_v17 = vld [vmem:[%s1901_s0 + $0xa0] sm:$0xff]   ;;  %v1478_v19 = vld [vmem:[%s1901_s0 + $0xa8] sm:$0xff]   ;;  %v1479_v20 = vld [vmem:[%s1901_s0 + $0x30] sm:$0xff]  }
   0x8   :  { %1367 = vmatprep.subr.bf16.mxu0 %v1461_v2  ;;  %1445 = vmatprep.subr.bf16.mxu1 %v1461_v2  ;;  %v1480_v21 = vld [vmem:[%s1901_s0 + $0xb0] sm:$0xff]   ;;  %v1481_v22 = vld [vmem:[%s1901_s0 + $0x38] sm:$0xff]   ;;  %v1483_v24 = vld [vmem:[%s1901_s0 + $0x40] sm:$0xff]  }
   0x9   :  { %v1482_v23 = vld [vmem:[%s1901_s0 + $0xb8] sm:$0xff]   ;;  %v1484_v25 = vld [vmem:[%s1901_s0 + $0xc0] sm:$0xff]   ;;  %v1485_v26 = vld [vmem:[%s1901_s0 + $0x48] sm:$0xff]  }
   0xa   :  { %v1486_v27 = vld [vmem:[%s1901_s0 + $0xc8] sm:$0xff]   ;;  %v1487_v28 = vld [vmem:[%s1901_s0 + $0x50] sm:$0xff]   ;;  %v1489_v30 = vld [vmem:[%s1901_s0 + $0x58] sm:$0xff]  }
   0xb   :  { %1368 = vmatpush3.bf16.msra.mxu0 %v1461_v2  ;;  %1453 = vmatpush3.bf16.msra.mxu1 %v1461_v2  ;;  %v1488_v29 = vld [vmem:[%s1901_s0 + $0xd0] sm:$0xff]   ;;  %v1490_v31 = vld [vmem:[%s1901_s0 + $0xd8] sm:$0xff]   ;;  %v1491_v32 = vld [vmem:[%s1901_s0 + $0x60] sm:$0xff]  }
   0xc   :  { %1369 = vmatprep.subr.bf16.mxu0 %v1462_v3  ;;  %1446 = vmatprep.subr.bf16.mxu1 %v1462_v3  ;;  %v1492_v33 = vld [vmem:[%s1901_s0 + $0xe0] sm:$0xff]   ;;  %v1493_v34 = vld [vmem:[%s1901_s0 + $0x68] sm:$0xff]   ;;  %v1495_v36 = vld [vmem:[%s1901_s0 + $0x70] sm:$0xff]  }
   0xd   :  { %v1494_v35 = vld [vmem:[%s1901_s0 + $0xe8] sm:$0xff]   ;;  %v1496_v37 = vld [vmem:[%s1901_s0 + $0xf0] sm:$0xff]   ;;  %v1497_v38 = vld [vmem:[%s1901_s0 + $0x78] sm:$0xff]  }
   0xe   :  { %v1498_v39 = vld [vmem:[%s1901_s0 + $0xf8] sm:$0xff]   ;;  %v1642_v40 = vld [vmem:[%s1902_s2] ss:$0 sm:$0xff] }
   0xf   :  { %1370 = vmatpush3.bf16.msra.mxu0 %v1462_v3  ;;  %1454 = vmatpush3.bf16.msra.mxu1 %v1462_v3 }
  0x10   :  { %1371 = vmatprep.subr.bf16.mxu0 %v1463_v6  ;;  %1447 = vmatprep.subr.bf16.mxu1 %v1463_v6 }
  0x13   :  { %1372 = vmatpush3.bf16.msra.mxu0 %v1463_v6  ;;  %1455 = vmatpush3.bf16.msra.mxu1 %v1463_v6 }
  0x14   :  { %1373 = vmatprep.subr.bf16.mxu0 %v1464_v7  ;;  %1448 = vmatprep.subr.bf16.mxu1 %v1464_v7 }
  0x17   :  { %1374 = vmatpush3.bf16.msra.mxu0 %v1464_v7  ;;  %1456 = vmatpush3.bf16.msra.mxu1 %v1464_v7 }
  0x18   :  { %1375 = vmatprep.subr.bf16.mxu0 %v1465_v8  ;;  %1449 = vmatprep.subr.bf16.mxu1 %v1465_v8 }
  0x1b   :  { %1376 = vmatpush3.bf16.msra.mxu0 %v1465_v8  ;;  %1457 = vmatpush3.bf16.msra.mxu1 %v1465_v8 }
  0x1c   :  { %1377 = vmatprep.subr.bf16.mxu0 %v1466_v9  ;;  %1450 = vmatprep.subr.bf16.mxu1 %v1466_v9 }
  0x1f   :  { %1378 = vmatpush3.bf16.msra.mxu0 %v1466_v9  ;;  %1458 = vmatpush3.bf16.msra.mxu1 %v1466_v9 }
  0x22   :  { %1380 = vmatmul.mubr.bf16.vlgmr.msra.gmra.mxu0 %v1469_v10  ;;  %1412 = vmatmul.mubr.bf16.vlgmr.msra.gmra.mxu1 %v1470_v11 }
  0x23   :  { %1383 = vmatprep.mubr.bf16.mxu0 %v1471_v12  ;;  %1415 = vmatprep.mubr.bf16.mxu1 %v1472_v13 }
  0x2a   :  { %1384 = vmatmul.mubr.bf16.gmra.mxu0 %v1473_v14  ;;  %1416 = vmatmul.mubr.bf16.gmra.mxu1 %v1474_v15 }
  0x2b   :  { %1387 = vmatprep.mubr.bf16.mxu0 %v1475_v16  ;;  %1419 = vmatprep.mubr.bf16.mxu1 %v1476_v17 }
  0x32   :  { %1388 = vmatmul.mubr.bf16.gmra.mxu0 %v1477_v18  ;;  %1420 = vmatmul.mubr.bf16.gmra.mxu1 %v1478_v19 }
  0x33   :  { %1391 = vmatprep.mubr.bf16.mxu0 %v1479_v20  ;;  %1423 = vmatprep.mubr.bf16.mxu1 %v1480_v21 }
  0x3a   :  { %1392 = vmatmul.mubr.bf16.gmra.mxu0 %v1481_v22  ;;  %1424 = vmatmul.mubr.bf16.gmra.mxu1 %v1482_v23 }
  0x3b   :  { %1395 = vmatprep.mubr.bf16.mxu0 %v1483_v24  ;;  %1427 = vmatprep.mubr.bf16.mxu1 %v1484_v25 }
  0x42   :  { %1396 = vmatmul.mubr.bf16.gmra.mxu0 %v1485_v26  ;;  %1428 = vmatmul.mubr.bf16.gmra.mxu1 %v1486_v27 }
  0x43   :  { %1399 = vmatprep.mubr.bf16.mxu0 %v1487_v28  ;;  %1431 = vmatprep.mubr.bf16.mxu1 %v1488_v29 }
  0x4a   :  { %1400 = vmatmul.mubr.bf16.gmra.mxu0 %v1489_v30  ;;  %1432 = vmatmul.mubr.bf16.gmra.mxu1 %v1490_v31 }
  0x4b   :  { %1403 = vmatprep.mubr.bf16.mxu0 %v1491_v32  ;;  %1435 = vmatprep.mubr.bf16.mxu1 %v1492_v33 }
  0x52   :  { %1404 = vmatmul.mubr.bf16.gmra.mxu0 %v1493_v34  ;;  %1436 = vmatmul.mubr.bf16.gmra.mxu1 %v1494_v35 }
  0x53   :  { %1407 = vmatprep.mubr.bf16.mxu0 %v1495_v36  ;;  %1439 = vmatprep.mubr.bf16.mxu1 %v1496_v37 }
  0x5a   :  { %1408 = vmatmul.mubr.bf16.gmra.mxu0 %v1497_v38  ;;  %1440 = vmatmul.mubr.bf16.gmra.mxu1 %v1498_v39 }
  0xe2   :  { %v1381_v41 = vpop.f32.mrf.mxu0  ;;  %v1413_v42 = vpop.f32.mrf.mxu1 }
  0xe3   :  { %v960_v43 = vadd.f32 %v1381_v41, %v1642_v40  ;;  %v992_v44 = vadd.f32 %v1413_v42, %v1642_v40 }
  0xe4   :  { %v501_v45 = vpop.f32.mrf.mxu0  ;;  %v629_v46 = vpop.f32.mrf.mxu1 }
  0xe5   :  { %vm1024_vm0 = vcmp.gt.f32.partialorder %v960_v43, 0.0  ;;  %v1088_v47 = vmul.f32 0.2, %v960_v43  ;;  %vm1056_vm1 = vcmp.gt.f32.partialorder %v992_v44, 0.0  ;;  %v1120_v48 = vmul.f32 0.2, %v992_v44 }
  0xe6   :  { %v958_v49 = vadd.f32 %v1642_v40, %v501_v45  ;;  %v990_v50 = vadd.f32 %v1642_v40, %v629_v46  ;;  %v1382_v51 = vpop.f32.mrf.mxu0  ;;  %v1414_v52 = vpop.f32.mrf.mxu1 }
  0xe7   :  { %v1152_v53 = vsel %vm1024_vm0, %v960_v43, %v1088_v47  ;;  %v1184_v54 = vsel %vm1056_vm1, %v992_v44, %v1120_v48  ;;  %v961_v55 = vadd.f32 %v1382_v51, %v1642_v40  ;;  %v993_v56 = vadd.f32 %v1414_v52, %v1642_v40 }
  0xe8   :  { %1216 = vst [vmem:[%s1903_s3 + $0x10] sm:$0xff] %v1152_v53  ;;  %1248 = vst [vmem:[%s1903_s3 + $0x110] sm:$0xff] %v1184_v54  ;;  %vm1022_vm2 = vcmp.gt.f32.partialorder %v958_v49, 0.0  ;;  %v1086_v57 = vmul.f32 0.2, %v958_v49  ;;  %vm1054_vm3 = vcmp.gt.f32.partialorder %v990_v50, 0.0  ;;  %v504_v59 = vpop.f32.mrf.mxu0  ;;  %v632_v60 = vpop.f32.mrf.mxu1 }
  0xe9   :  { %v1118_v58 = vmul.f32 0.2, %v990_v50  ;;  %vm1025_vm4 = vcmp.gt.f32.partialorder %v961_v55, 0.0  ;;  %v1089_v61 = vmul.f32 0.2, %v961_v55  ;;  %vm1057_vm5 = vcmp.gt.f32.partialorder %v993_v56, 0.0 }
  0xea   :  { %v1121_v62 = vmul.f32 0.2, %v993_v56  ;;  %v1150_v63 = vsel %vm1022_vm2, %v958_v49, %v1086_v57  ;;  %v959_v1 = vadd.f32 %v1642_v40, %v504_v59  ;;  %v991_v2 = vadd.f32 %v1642_v40, %v632_v60  ;;  %v1385_v3 = vpop.f32.mrf.mxu0  ;;  %v1417_v4 = vpop.f32.mrf.mxu1 }
  0xeb   :  { %v1182_v0 = vsel %vm1054_vm3, %v990_v50, %v1118_v58  ;;  %1214 = vst [vmem:[%s1903_s3] sm:$0xff] %v1150_v63  ;;  %v1153_v5 = vsel %vm1025_vm4, %v961_v55, %v1089_v61  ;;  %v964_v7 = vadd.f32 %v1385_v3, %v1642_v40  ;;  %v996_v8 = vadd.f32 %v1417_v4, %v1642_v40 }
  0xec   :  { %1246 = vst [vmem:[%s1903_s3 + $0x100] sm:$0xff] %v1182_v0  ;;  %v1185_v6 = vsel %vm1057_vm5, %v993_v56, %v1121_v62  ;;  %1217 = vst [vmem:[%s1903_s3 + $0x18] sm:$0xff] %v1153_v5  ;;  %vm1023_vm6 = vcmp.gt.f32.partialorder %v959_v1, 0.0  ;;  %v1087_v9 = vmul.f32 0.2, %v959_v1  ;;  %vm1055_vm7 = vcmp.gt.f32.partialorder %v991_v2, 0.0  ;;  %v517_v11 = vpop.f32.mrf.mxu0  ;;  %v645_v12 = vpop.f32.mrf.mxu1 }
  0xed   :  { %1249 = vst [vmem:[%s1903_s3 + $0x118] sm:$0xff] %v1185_v6  ;;  %v1119_v10 = vmul.f32 0.2, %v991_v2  ;;  %vm1028_vm8 = vcmp.gt.f32.partialorder %v964_v7, 0.0  ;;  %v1092_v13 = vmul.f32 0.2, %v964_v7  ;;  %v962_v17 = vadd.f32 %v1642_v40, %v517_v11 }
  0xee   :  { %vm1060_vm9 = vcmp.gt.f32.partialorder %v996_v8, 0.0  ;;  %v1124_v14 = vmul.f32 0.2, %v996_v8  ;;  %v1151_v15 = vsel %vm1023_vm6, %v959_v1, %v1087_v9  ;;  %v994_v18 = vadd.f32 %v1642_v40, %v645_v12  ;;  %v1386_v19 = vpop.f32.mrf.mxu0  ;;  %v1418_v20 = vpop.f32.mrf.mxu1 }
  0xef   :  { %v1183_v16 = vsel %vm1055_vm7, %v991_v2, %v1119_v10  ;;  %1215 = vst [vmem:[%s1903_s3 + $0x8] sm:$0xff] %v1151_v15  ;;  %v1156_v21 = vsel %vm1028_vm8, %v964_v7, %v1092_v13  ;;  %v965_v23 = vadd.f32 %v1386_v19, %v1642_v40  ;;  %v997_v24 = vadd.f32 %v1418_v20, %v1642_v40 }
  0xf0   :  { %1247 = vst [vmem:[%s1903_s3 + $0x108] sm:$0xff] %v1183_v16  ;;  %v1188_v22 = vsel %vm1060_vm9, %v996_v8, %v1124_v14  ;;  %1220 = vst [vmem:[%s1903_s3 + $0x30] sm:$0xff] %v1156_v21  ;;  %vm1026_vm10 = vcmp.gt.f32.partialorder %v962_v17, 0.0  ;;  %v1090_v25 = vmul.f32 0.2, %v962_v17  ;;  %vm1058_vm11 = vcmp.gt.f32.partialorder %v994_v18, 0.0  ;;  %v520_v27 = vpop.f32.mrf.mxu0  ;;  %v648_v28 = vpop.f32.mrf.mxu1 }
  0xf1   :  { %1252 = vst [vmem:[%s1903_s3 + $0x130] sm:$0xff] %v1188_v22  ;;  %v1122_v26 = vmul.f32 0.2, %v994_v18  ;;  %vm1029_vm12 = vcmp.gt.f32.partialorder %v965_v23, 0.0  ;;  %v1093_v29 = vmul.f32 0.2, %v965_v23  ;;  %v963_v33 = vadd.f32 %v1642_v40, %v520_v27 }
  0xf2   :  { %vm1061_vm13 = vcmp.gt.f32.partialorder %v997_v24, 0.0  ;;  %v1125_v30 = vmul.f32 0.2, %v997_v24  ;;  %v1154_v31 = vsel %vm1026_vm10, %v962_v17, %v1090_v25  ;;  %v995_v34 = vadd.f32 %v1642_v40, %v648_v28  ;;  %v1389_v35 = vpop.f32.mrf.mxu0  ;;  %v1421_v36 = vpop.f32.mrf.mxu1 }
  0xf3   :  { %v1186_v32 = vsel %vm1058_vm11, %v994_v18, %v1122_v26  ;;  %1218 = vst [vmem:[%s1903_s3 + $0x20] sm:$0xff] %v1154_v31  ;;  %v1157_v37 = vsel %vm1029_vm12, %v965_v23, %v1093_v29  ;;  %v968_v39 = vadd.f32 %v1389_v35, %v1642_v40  ;;  %v1000_v41 = vadd.f32 %v1421_v36, %v1642_v40 }
  0xf4   :  { %1250 = vst [vmem:[%s1903_s3 + $0x120] sm:$0xff] %v1186_v32  ;;  %v1189_v38 = vsel %vm1061_vm13, %v997_v24, %v1125_v30  ;;  %1221 = vst [vmem:[%s1903_s3 + $0x38] sm:$0xff] %v1157_v37  ;;  %vm1027_vm14 = vcmp.gt.f32.partialorder %v963_v33, 0.0  ;;  %v1091_v42 = vmul.f32 0.2, %v963_v33  ;;  %vm1059_vm15 = vcmp.gt.f32.partialorder %v995_v34, 0.0  ;;  %v533_v44 = vpop.f32.mrf.mxu0  ;;  %v661_v45 = vpop.f32.mrf.mxu1 }
  0xf5   :  { %1253 = vst [vmem:[%s1903_s3 + $0x138] sm:$0xff] %v1189_v38  ;;  %v1123_v43 = vmul.f32 0.2, %v995_v34  ;;  %vm1032_vm0 = vcmp.gt.f32.partialorder %v968_v39, 0.0  ;;  %v1096_v46 = vmul.f32 0.2, %v968_v39  ;;  %v966_v50 = vadd.f32 %v1642_v40, %v533_v44 }
  0xf6   :  { %vm1064_vm1 = vcmp.gt.f32.partialorder %v1000_v41, 0.0  ;;  %v1128_v47 = vmul.f32 0.2, %v1000_v41  ;;  %v1155_v48 = vsel %vm1027_vm14, %v963_v33, %v1091_v42  ;;  %v998_v51 = vadd.f32 %v1642_v40, %v661_v45  ;;  %v1390_v52 = vpop.f32.mrf.mxu0  ;;  %v1422_v53 = vpop.f32.mrf.mxu1 }
  0xf7   :  { %v1187_v49 = vsel %vm1059_vm15, %v995_v34, %v1123_v43  ;;  %1219 = vst [vmem:[%s1903_s3 + $0x28] sm:$0xff] %v1155_v48  ;;  %v1160_v54 = vsel %vm1032_vm0, %v968_v39, %v1096_v46  ;;  %v969_v56 = vadd.f32 %v1390_v52, %v1642_v40  ;;  %v1001_v57 = vadd.f32 %v1422_v53, %v1642_v40 }
  0xf8   :  { %1251 = vst [vmem:[%s1903_s3 + $0x128] sm:$0xff] %v1187_v49  ;;  %v1192_v55 = vsel %vm1064_vm1, %v1000_v41, %v1128_v47  ;;  %1224 = vst [vmem:[%s1903_s3 + $0x50] sm:$0xff] %v1160_v54  ;;  %vm1030_vm2 = vcmp.gt.f32.partialorder %v966_v50, 0.0  ;;  %v1094_v58 = vmul.f32 0.2, %v966_v50  ;;  %vm1062_vm3 = vcmp.gt.f32.partialorder %v998_v51, 0.0  ;;  %v536_v60 = vpop.f32.mrf.mxu0  ;;  %v664_v61 = vpop.f32.mrf.mxu1 }
  0xf9   :  { %1256 = vst [vmem:[%s1903_s3 + $0x150] sm:$0xff] %v1192_v55  ;;  %v1126_v59 = vmul.f32 0.2, %v998_v51  ;;  %vm1033_vm4 = vcmp.gt.f32.partialorder %v969_v56, 0.0  ;;  %v1097_v62 = vmul.f32 0.2, %v969_v56  ;;  %v967_v2 = vadd.f32 %v1642_v40, %v536_v60 }
  0xfa   :  { %vm1065_vm5 = vcmp.gt.f32.partialorder %v1001_v57, 0.0  ;;  %v1129_v63 = vmul.f32 0.2, %v1001_v57  ;;  %v1158_v0 = vsel %vm1030_vm2, %v966_v50, %v1094_v58  ;;  %v999_v3 = vadd.f32 %v1642_v40, %v664_v61  ;;  %v1393_v4 = vpop.f32.mrf.mxu0  ;;  %v1425_v5 = vpop.f32.mrf.mxu1 }
  0xfb   :  { %v1190_v1 = vsel %vm1062_vm3, %v998_v51, %v1126_v59  ;;  %1222 = vst [vmem:[%s1903_s3 + $0x40] sm:$0xff] %v1158_v0  ;;  %v1161_v6 = vsel %vm1033_vm4, %v969_v56, %v1097_v62  ;;  %v972_v8 = vadd.f32 %v1393_v4, %v1642_v40  ;;  %v1004_v9 = vadd.f32 %v1425_v5, %v1642_v40 }
  0xfc   :  { %1254 = vst [vmem:[%s1903_s3 + $0x140] sm:$0xff] %v1190_v1  ;;  %v1193_v7 = vsel %vm1065_vm5, %v1001_v57, %v1129_v63  ;;  %1225 = vst [vmem:[%s1903_s3 + $0x58] sm:$0xff] %v1161_v6  ;;  %vm1031_vm6 = vcmp.gt.f32.partialorder %v967_v2, 0.0  ;;  %v1095_v10 = vmul.f32 0.2, %v967_v2  ;;  %vm1063_vm7 = vcmp.gt.f32.partialorder %v999_v3, 0.0  ;;  %v549_v12 = vpop.f32.mrf.mxu0  ;;  %v677_v13 = vpop.f32.mrf.mxu1 }
  0xfd   :  { %1257 = vst [vmem:[%s1903_s3 + $0x158] sm:$0xff] %v1193_v7  ;;  %v1127_v11 = vmul.f32 0.2, %v999_v3  ;;  %vm1036_vm8 = vcmp.gt.f32.partialorder %v972_v8, 0.0  ;;  %v1100_v14 = vmul.f32 0.2, %v972_v8  ;;  %v970_v18 = vadd.f32 %v1642_v40, %v549_v12 }
  0xfe   :  { %vm1068_vm9 = vcmp.gt.f32.partialorder %v1004_v9, 0.0  ;;  %v1132_v15 = vmul.f32 0.2, %v1004_v9  ;;  %v1159_v16 = vsel %vm1031_vm6, %v967_v2, %v1095_v10  ;;  %v1002_v19 = vadd.f32 %v1642_v40, %v677_v13  ;;  %v1394_v20 = vpop.f32.mrf.mxu0  ;;  %v1426_v21 = vpop.f32.mrf.mxu1 }
  0xff   :  { %v1191_v17 = vsel %vm1063_vm7, %v999_v3, %v1127_v11  ;;  %1223 = vst [vmem:[%s1903_s3 + $0x48] sm:$0xff] %v1159_v16  ;;  %v1164_v22 = vsel %vm1036_vm8, %v972_v8, %v1100_v14  ;;  %v973_v24 = vadd.f32 %v1394_v20, %v1642_v40  ;;  %v1005_v25 = vadd.f32 %v1426_v21, %v1642_v40 }
 0x100   :  { %1255 = vst [vmem:[%s1903_s3 + $0x148] sm:$0xff] %v1191_v17  ;;  %v1196_v23 = vsel %vm1068_vm9, %v1004_v9, %v1132_v15  ;;  %1228 = vst [vmem:[%s1903_s3 + $0x70] sm:$0xff] %v1164_v22  ;;  %vm1034_vm10 = vcmp.gt.f32.partialorder %v970_v18, 0.0  ;;  %v1098_v26 = vmul.f32 0.2, %v970_v18  ;;  %vm1066_vm11 = vcmp.gt.f32.partialorder %v1002_v19, 0.0  ;;  %v552_v28 = vpop.f32.mrf.mxu0  ;;  %v680_v29 = vpop.f32.mrf.mxu1 }
 0x101   :  { %1260 = vst [vmem:[%s1903_s3 + $0x170] sm:$0xff] %v1196_v23  ;;  %v1130_v27 = vmul.f32 0.2, %v1002_v19  ;;  %vm1037_vm12 = vcmp.gt.f32.partialorder %v973_v24, 0.0  ;;  %v1101_v30 = vmul.f32 0.2, %v973_v24  ;;  %v971_v34 = vadd.f32 %v1642_v40, %v552_v28 }
 0x102   :  { %vm1069_vm13 = vcmp.gt.f32.partialorder %v1005_v25, 0.0  ;;  %v1133_v31 = vmul.f32 0.2, %v1005_v25  ;;  %v1162_v32 = vsel %vm1034_vm10, %v970_v18, %v1098_v26  ;;  %v1003_v35 = vadd.f32 %v1642_v40, %v680_v29  ;;  %v1397_v36 = vpop.f32.mrf.mxu0  ;;  %v1429_v37 = vpop.f32.mrf.mxu1 }
 0x103   :  { %v1194_v33 = vsel %vm1066_vm11, %v1002_v19, %v1130_v27  ;;  %1226 = vst [vmem:[%s1903_s3 + $0x60] sm:$0xff] %v1162_v32  ;;  %v1165_v38 = vsel %vm1037_vm12, %v973_v24, %v1101_v30  ;;  %v976_v41 = vadd.f32 %v1397_v36, %v1642_v40  ;;  %v1008_v42 = vadd.f32 %v1429_v37, %v1642_v40 }
 0x104   :  { %1258 = vst [vmem:[%s1903_s3 + $0x160] sm:$0xff] %v1194_v33  ;;  %v1197_v39 = vsel %vm1069_vm13, %v1005_v25, %v1133_v31  ;;  %1229 = vst [vmem:[%s1903_s3 + $0x78] sm:$0xff] %v1165_v38  ;;  %vm1035_vm14 = vcmp.gt.f32.partialorder %v971_v34, 0.0  ;;  %v1099_v43 = vmul.f32 0.2, %v971_v34  ;;  %vm1067_vm15 = vcmp.gt.f32.partialorder %v1003_v35, 0.0  ;;  %v565_v45 = vpop.f32.mrf.mxu0  ;;  %v693_v46 = vpop.f32.mrf.mxu1 }
 0x105   :  { %1261 = vst [vmem:[%s1903_s3 + $0x178] sm:$0xff] %v1197_v39  ;;  %v1131_v44 = vmul.f32 0.2, %v1003_v35  ;;  %vm1040_vm0 = vcmp.gt.f32.partialorder %v976_v41, 0.0  ;;  %v1104_v47 = vmul.f32 0.2, %v976_v41  ;;  %v974_v51 = vadd.f32 %v1642_v40, %v565_v45 }
 0x106   :  { %vm1072_vm1 = vcmp.gt.f32.partialorder %v1008_v42, 0.0  ;;  %v1136_v48 = vmul.f32 0.2, %v1008_v42  ;;  %v1163_v49 = vsel %vm1035_vm14, %v971_v34, %v1099_v43  ;;  %v1006_v52 = vadd.f32 %v1642_v40, %v693_v46  ;;  %v1398_v53 = vpop.f32.mrf.mxu0  ;;  %v1430_v54 = vpop.f32.mrf.mxu1 }
 0x107   :  { %v1195_v50 = vsel %vm1067_vm15, %v1003_v35, %v1131_v44  ;;  %1227 = vst [vmem:[%s1903_s3 + $0x68] sm:$0xff] %v1163_v49  ;;  %v1168_v55 = vsel %vm1040_vm0, %v976_v41, %v1104_v47  ;;  %v977_v57 = vadd.f32 %v1398_v53, %v1642_v40  ;;  %v1009_v58 = vadd.f32 %v1430_v54, %v1642_v40 }
 0x108   :  { %1259 = vst [vmem:[%s1903_s3 + $0x168] sm:$0xff] %v1195_v50  ;;  %v1200_v56 = vsel %vm1072_vm1, %v1008_v42, %v1136_v48  ;;  %1232 = vst [vmem:[%s1903_s3 + $0x90] sm:$0xff] %v1168_v55  ;;  %vm1038_vm2 = vcmp.gt.f32.partialorder %v974_v51, 0.0  ;;  %v1102_v59 = vmul.f32 0.2, %v974_v51  ;;  %vm1070_vm3 = vcmp.gt.f32.partialorder %v1006_v52, 0.0  ;;  %v568_v61 = vpop.f32.mrf.mxu0  ;;  %v696_v62 = vpop.f32.mrf.mxu1 }
 0x109   :  { %1264 = vst [vmem:[%s1903_s3 + $0x190] sm:$0xff] %v1200_v56  ;;  %v1134_v60 = vmul.f32 0.2, %v1006_v52  ;;  %vm1041_vm4 = vcmp.gt.f32.partialorder %v977_v57, 0.0  ;;  %v1105_v63 = vmul.f32 0.2, %v977_v57  ;;  %v975_v3 = vadd.f32 %v1642_v40, %v568_v61 }
 0x10a   :  { %vm1073_vm5 = vcmp.gt.f32.partialorder %v1009_v58, 0.0  ;;  %v1137_v0 = vmul.f32 0.2, %v1009_v58  ;;  %v1166_v1 = vsel %vm1038_vm2, %v974_v51, %v1102_v59  ;;  %v1007_v4 = vadd.f32 %v1642_v40, %v696_v62  ;;  %v1401_v5 = vpop.f32.mrf.mxu0  ;;  %v1433_v6 = vpop.f32.mrf.mxu1 }
 0x10b   :  { %v1198_v2 = vsel %vm1070_vm3, %v1006_v52, %v1134_v60  ;;  %1230 = vst [vmem:[%s1903_s3 + $0x80] sm:$0xff] %v1166_v1  ;;  %v1169_v7 = vsel %vm1041_vm4, %v977_v57, %v1105_v63  ;;  %v980_v9 = vadd.f32 %v1401_v5, %v1642_v40  ;;  %v1012_v10 = vadd.f32 %v1433_v6, %v1642_v40 }
 0x10c   :  { %1262 = vst [vmem:[%s1903_s3 + $0x180] sm:$0xff] %v1198_v2  ;;  %v1201_v8 = vsel %vm1073_vm5, %v1009_v58, %v1137_v0  ;;  %1233 = vst [vmem:[%s1903_s3 + $0x98] sm:$0xff] %v1169_v7  ;;  %vm1039_vm6 = vcmp.gt.f32.partialorder %v975_v3, 0.0  ;;  %v1103_v11 = vmul.f32 0.2, %v975_v3  ;;  %vm1071_vm7 = vcmp.gt.f32.partialorder %v1007_v4, 0.0  ;;  %v581_v13 = vpop.f32.mrf.mxu0  ;;  %v709_v14 = vpop.f32.mrf.mxu1 }
 0x10d   :  { %1265 = vst [vmem:[%s1903_s3 + $0x198] sm:$0xff] %v1201_v8  ;;  %v1135_v12 = vmul.f32 0.2, %v1007_v4  ;;  %vm1044_vm8 = vcmp.gt.f32.partialorder %v980_v9, 0.0  ;;  %v1108_v15 = vmul.f32 0.2, %v980_v9  ;;  %v978_v19 = vadd.f32 %v1642_v40, %v581_v13 }
 0x10e   :  { %vm1076_vm9 = vcmp.gt.f32.partialorder %v1012_v10, 0.0  ;;  %v1140_v16 = vmul.f32 0.2, %v1012_v10  ;;  %v1167_v17 = vsel %vm1039_vm6, %v975_v3, %v1103_v11  ;;  %v1010_v20 = vadd.f32 %v1642_v40, %v709_v14  ;;  %v1402_v21 = vpop.f32.mrf.mxu0  ;;  %v1434_v22 = vpop.f32.mrf.mxu1 }
 0x10f   :  { %v1199_v18 = vsel %vm1071_vm7, %v1007_v4, %v1135_v12  ;;  %1231 = vst [vmem:[%s1903_s3 + $0x88] sm:$0xff] %v1167_v17  ;;  %v1172_v23 = vsel %vm1044_vm8, %v980_v9, %v1108_v15  ;;  %v981_v25 = vadd.f32 %v1402_v21, %v1642_v40  ;;  %v1013_v26 = vadd.f32 %v1434_v22, %v1642_v40 }
 0x110   :  { %1263 = vst [vmem:[%s1903_s3 + $0x188] sm:$0xff] %v1199_v18  ;;  %v1204_v24 = vsel %vm1076_vm9, %v1012_v10, %v1140_v16  ;;  %1236 = vst [vmem:[%s1903_s3 + $0xb0] sm:$0xff] %v1172_v23  ;;  %vm1042_vm10 = vcmp.gt.f32.partialorder %v978_v19, 0.0  ;;  %v1106_v27 = vmul.f32 0.2, %v978_v19  ;;  %vm1074_vm11 = vcmp.gt.f32.partialorder %v1010_v20, 0.0  ;;  %v584_v29 = vpop.f32.mrf.mxu0  ;;  %v712_v30 = vpop.f32.mrf.mxu1 }
 0x111   :  { %1268 = vst [vmem:[%s1903_s3 + $0x1b0] sm:$0xff] %v1204_v24  ;;  %v1138_v28 = vmul.f32 0.2, %v1010_v20  ;;  %vm1045_vm12 = vcmp.gt.f32.partialorder %v981_v25, 0.0  ;;  %v1109_v31 = vmul.f32 0.2, %v981_v25  ;;  %v979_v35 = vadd.f32 %v1642_v40, %v584_v29 }
 0x112   :  { %vm1077_vm13 = vcmp.gt.f32.partialorder %v1013_v26, 0.0  ;;  %v1141_v32 = vmul.f32 0.2, %v1013_v26  ;;  %v1170_v33 = vsel %vm1042_vm10, %v978_v19, %v1106_v27  ;;  %v1011_v36 = vadd.f32 %v1642_v40, %v712_v30  ;;  %v1405_v37 = vpop.f32.mrf.mxu0  ;;  %v1437_v38 = vpop.f32.mrf.mxu1 }
 0x113   :  { %v1202_v34 = vsel %vm1074_vm11, %v1010_v20, %v1138_v28  ;;  %1234 = vst [vmem:[%s1903_s3 + $0xa0] sm:$0xff] %v1170_v33  ;;  %v1173_v39 = vsel %vm1045_vm12, %v981_v25, %v1109_v31  ;;  %v984_v42 = vadd.f32 %v1405_v37, %v1642_v40  ;;  %v1016_v43 = vadd.f32 %v1437_v38, %v1642_v40 }
 0x114   :  { %1266 = vst [vmem:[%s1903_s3 + $0x1a0] sm:$0xff] %v1202_v34  ;;  %v1205_v41 = vsel %vm1077_vm13, %v1013_v26, %v1141_v32  ;;  %1237 = vst [vmem:[%s1903_s3 + $0xb8] sm:$0xff] %v1173_v39  ;;  %vm1043_vm14 = vcmp.gt.f32.partialorder %v979_v35, 0.0  ;;  %v1107_v44 = vmul.f32 0.2, %v979_v35  ;;  %vm1075_vm15 = vcmp.gt.f32.partialorder %v1011_v36, 0.0  ;;  %v597_v46 = vpop.f32.mrf.mxu0  ;;  %v725_v47 = vpop.f32.mrf.mxu1 }
 0x115   :  { %1269 = vst [vmem:[%s1903_s3 + $0x1b8] sm:$0xff] %v1205_v41  ;;  %v1139_v45 = vmul.f32 0.2, %v1011_v36  ;;  %vm1048_vm0 = vcmp.gt.f32.partialorder %v984_v42, 0.0  ;;  %v1112_v48 = vmul.f32 0.2, %v984_v42  ;;  %v982_v52 = vadd.f32 %v1642_v40, %v597_v46 }
 0x116   :  { %vm1080_vm1 = vcmp.gt.f32.partialorder %v1016_v43, 0.0  ;;  %v1144_v49 = vmul.f32 0.2, %v1016_v43  ;;  %v1171_v50 = vsel %vm1043_vm14, %v979_v35, %v1107_v44  ;;  %v1014_v53 = vadd.f32 %v1642_v40, %v725_v47  ;;  %v1406_v54 = vpop.f32.mrf.mxu0  ;;  %v1438_v55 = vpop.f32.mrf.mxu1 }
 0x117   :  { %v1203_v51 = vsel %vm1075_vm15, %v1011_v36, %v1139_v45  ;;  %1235 = vst [vmem:[%s1903_s3 + $0xa8] sm:$0xff] %v1171_v50  ;;  %v1176_v56 = vsel %vm1048_vm0, %v984_v42, %v1112_v48  ;;  %v985_v58 = vadd.f32 %v1406_v54, %v1642_v40  ;;  %v1017_v59 = vadd.f32 %v1438_v55, %v1642_v40 }
 0x118   :  { %1267 = vst [vmem:[%s1903_s3 + $0x1a8] sm:$0xff] %v1203_v51  ;;  %v1208_v57 = vsel %vm1080_vm1, %v1016_v43, %v1144_v49  ;;  %1240 = vst [vmem:[%s1903_s3 + $0xd0] sm:$0xff] %v1176_v56  ;;  %vm1046_vm2 = vcmp.gt.f32.partialorder %v982_v52, 0.0  ;;  %v1110_v60 = vmul.f32 0.2, %v982_v52  ;;  %vm1078_vm3 = vcmp.gt.f32.partialorder %v1014_v53, 0.0  ;;  %v600_v62 = vpop.f32.mrf.mxu0  ;;  %v728_v63 = vpop.f32.mrf.mxu1 }
 0x119   :  { %1272 = vst [vmem:[%s1903_s3 + $0x1d0] sm:$0xff] %v1208_v57  ;;  %v1142_v61 = vmul.f32 0.2, %v1014_v53  ;;  %vm1049_vm4 = vcmp.gt.f32.partialorder %v985_v58, 0.0  ;;  %v1113_v0 = vmul.f32 0.2, %v985_v58  ;;  %v983_v4 = vadd.f32 %v1642_v40, %v600_v62 }
 0x11a   :  { %vm1081_vm5 = vcmp.gt.f32.partialorder %v1017_v59, 0.0  ;;  %v1145_v1 = vmul.f32 0.2, %v1017_v59  ;;  %v1174_v2 = vsel %vm1046_vm2, %v982_v52, %v1110_v60  ;;  %v1015_v5 = vadd.f32 %v1642_v40, %v728_v63  ;;  %v1409_v6 = vpop.f32.mrf.mxu0  ;;  %v1441_v7 = vpop.f32.mrf.mxu1 }
 0x11b   :  { %v1206_v3 = vsel %vm1078_vm3, %v1014_v53, %v1142_v61  ;;  %1238 = vst [vmem:[%s1903_s3 + $0xc0] sm:$0xff] %v1174_v2  ;;  %v1177_v8 = vsel %vm1049_vm4, %v985_v58, %v1113_v0  ;;  %v988_v10 = vadd.f32 %v1409_v6, %v1642_v40  ;;  %v1020_v11 = vadd.f32 %v1441_v7, %v1642_v40 }
 0x11c   :  { %1270 = vst [vmem:[%s1903_s3 + $0x1c0] sm:$0xff] %v1206_v3  ;;  %v1209_v9 = vsel %vm1081_vm5, %v1017_v59, %v1145_v1  ;;  %1241 = vst [vmem:[%s1903_s3 + $0xd8] sm:$0xff] %v1177_v8  ;;  %vm1047_vm6 = vcmp.gt.f32.partialorder %v983_v4, 0.0  ;;  %v1111_v12 = vmul.f32 0.2, %v983_v4  ;;  %vm1079_vm7 = vcmp.gt.f32.partialorder %v1015_v5, 0.0  ;;  %v613_v14 = vpop.f32.mrf.mxu0  ;;  %v741_v15 = vpop.f32.mrf.mxu1 }
 0x11d   :  { %1273 = vst [vmem:[%s1903_s3 + $0x1d8] sm:$0xff] %v1209_v9  ;;  %v1143_v13 = vmul.f32 0.2, %v1015_v5  ;;  %vm1052_vm8 = vcmp.gt.f32.partialorder %v988_v10, 0.0  ;;  %v1116_v16 = vmul.f32 0.2, %v988_v10  ;;  %v986_v20 = vadd.f32 %v1642_v40, %v613_v14 }
 0x11e   :  { %vm1084_vm9 = vcmp.gt.f32.partialorder %v1020_v11, 0.0  ;;  %v1148_v17 = vmul.f32 0.2, %v1020_v11  ;;  %v1175_v18 = vsel %vm1047_vm6, %v983_v4, %v1111_v12  ;;  %v1018_v21 = vadd.f32 %v1642_v40, %v741_v15  ;;  %v1410_v22 = vpop.f32.mrf.mxu0  ;;  %v1442_v23 = vpop.f32.mrf.mxu1 }
 0x11f   :  { %v1207_v19 = vsel %vm1079_vm7, %v1015_v5, %v1143_v13  ;;  %1239 = vst [vmem:[%s1903_s3 + $0xc8] sm:$0xff] %v1175_v18  ;;  %v1180_v24 = vsel %vm1052_vm8, %v988_v10, %v1116_v16  ;;  %v989_v26 = vadd.f32 %v1410_v22, %v1642_v40  ;;  %v1021_v27 = vadd.f32 %v1442_v23, %v1642_v40 }
 0x120   :  { %1271 = vst [vmem:[%s1903_s3 + $0x1c8] sm:$0xff] %v1207_v19  ;;  %v1212_v25 = vsel %vm1084_vm9, %v1020_v11, %v1148_v17  ;;  %1244 = vst [vmem:[%s1903_s3 + $0xf0] sm:$0xff] %v1180_v24  ;;  %vm1050_vm10 = vcmp.gt.f32.partialorder %v986_v20, 0.0  ;;  %v1114_v28 = vmul.f32 0.2, %v986_v20  ;;  %vm1082_vm11 = vcmp.gt.f32.partialorder %v1018_v21, 0.0  ;;  %v616_v30 = vpop.f32.mrf.mxu0  ;;  %v744_v31 = vpop.f32.mrf.mxu1 }
 0x121   :  { %1276 = vst [vmem:[%s1903_s3 + $0x1f0] sm:$0xff] %v1212_v25  ;;  %v1146_v29 = vmul.f32 0.2, %v1018_v21  ;;  %vm1053_vm12 = vcmp.gt.f32.partialorder %v989_v26, 0.0  ;;  %v1117_v32 = vmul.f32 0.2, %v989_v26  ;;  %v987_v36 = vadd.f32 %v1642_v40, %v616_v30 }
 0x122   :  { %vm1085_vm13 = vcmp.gt.f32.partialorder %v1021_v27, 0.0  ;;  %v1149_v33 = vmul.f32 0.2, %v1021_v27  ;;  %v1178_v34 = vsel %vm1050_vm10, %v986_v20, %v1114_v28  ;;  %v1019_v37 = vadd.f32 %v1642_v40, %v744_v31 }
 0x123   :  { %v1210_v35 = vsel %vm1082_vm11, %v1018_v21, %v1146_v29  ;;  %1242 = vst [vmem:[%s1903_s3 + $0xe0] sm:$0xff] %v1178_v34  ;;  %v1181_v38 = vsel %vm1053_vm12, %v989_v26, %v1117_v32  ;;  %vm1051_vm14 = vcmp.gt.f32.partialorder %v987_v36, 0.0  ;;  %v1115_v40 = vmul.f32 0.2, %v987_v36 }
 0x124   :  { %1274 = vst [vmem:[%s1903_s3 + $0x1e0] sm:$0xff] %v1210_v35  ;;  %v1213_v39 = vsel %vm1085_vm13, %v1021_v27, %v1149_v33  ;;  %1245 = vst [vmem:[%s1903_s3 + $0xf8] sm:$0xff] %v1181_v38  ;;  %vm1083_vm15 = vcmp.gt.f32.partialorder %v1019_v37, 0.0  ;;  %v1147_v41 = vmul.f32 0.2, %v1019_v37 }
 0x125   :  { %1277 = vst [vmem:[%s1903_s3 + $0x1f8] sm:$0xff] %v1213_v39  ;;  %v1179_v42 = vsel %vm1051_vm14, %v987_v36, %v1115_v40 }
 0x126   :  { %v1211_v43 = vsel %vm1083_vm15, %v1019_v37, %v1147_v41  ;;  %1243 = vst [vmem:[%s1903_s3 + $0xe8] sm:$0xff] %v1179_v42 }
 0x127   :  { %1275 = vst [vmem:[%s1903_s3 + $0x1e8] sm:$0xff] %v1211_v43 }

// kernel: discriminator_forward.10
= control target key start
LH: loop header
LB: loop body
LE: loop exit
PB: predicated region body
PF: predicated region fallthrough
CT: control target
= control target key end

     0   :  { %s402_s6 = smov 0   ;;  %s404_s7 = smov 0   ;;  %s452_s0 = inlined_call_operand.vmem [shape: f32[2,64,128], index: 0, kind: input, shape index: {}]   ;;  %s453_s1 = inlined_call_operand.vmem [shape: f32[2,64,128], index: 1, kind: output, shape index: {}]  }
   0x1   :  { %s406_s8 = smov 0  }
   0x2 LB: > { %s23_s9 = sadd.s32 1, %s386_s7  ;;  %p333_p0 = scmp.ge.s32.totalorder %s390_s8, 1  ;;  %s390_s8 = sphi %s406_s8, %s11_s8   ;;  %s386_s7 = sphi %s404_s7, %s455_s7   ;;  %s382_s6 = sphi %s402_s6, %s454_s6  }
   0x3   : > { %p25_p1 = scmp.ge.s32.totalorder %s23_s9, 2  ;;  %p106_p2 = scmp.lt.s32.totalorder %s390_s8, 3 }
   0x5   : > { %s457_s9 = smov (%p25_p1, %s23_s9), 0  ;;  %p107_p3 = pnand %p333_p0, %p106_p2 }
   0x6   : > { %p132_p4 = scmp.lt.s32.totalorder (!%p107_p3), %s382_s6, 1 }
   0x7   : > { %110 = sbr.rel (%p107_p3) target bundleno = 77 (0x4d), region = 24 }
   0xc   : > { %s459_s6 = smov (!%p132_p4, %s382_s6), 1 }
   0xd   : > { %s340_s10 = sshll.u32 %s459_s6, 6 }
   0xe   : > { %s139_s13 = scalar_lea.vmem %s452_s0, %s340_s10  ;;  %s433_s16 = scalar_lea.vmem %s453_s1, %s340_s10 }
   0xf   : > { %v148_v0 = vld [vmem:[%s139_s13] sm:$0xff]  ;;  %v149_v1 = vld [vmem:[%s139_s13 + $0x8] sm:$0xff]  ;;  %v150_v2 = vld [vmem:[%s139_s13 + $0x10] sm:$0xff] }
  0x10   : > { %v151_v3 = vld [vmem:[%s139_s13 + $0x18] sm:$0xff]  ;;  %v156_v4 = vadd.f32 %v149_v1, %v148_v0  ;;  %v171_v5 = vmul.f32 %v148_v0, %v148_v0  ;;  %v172_v6 = vmul.f32 %v149_v1, %v149_v1  ;;  %v173_v7 = vmul.f32 %v150_v2, %v150_v2  ;;  %v152_v8 = vld [vmem:[%s139_s13 + $0x20] sm:$0xff]  ;;  %v153_v12 = vld [vmem:[%s139_s13 + $0x28] sm:$0xff] }
  0x11   : > { %v174_v10 = vmul.f32 %v151_v3, %v151_v3  ;;  %v175_v14 = vmul.f32 %v152_v8, %v152_v8  ;;  %v154_v16 = vld [vmem:[%s139_s13 + $0x30] sm:$0xff]  ;;  %v176_v18 = vmul.f32 %v153_v12, %v153_v12  ;;  %v155_v20 = vld [vmem:[%s139_s13 + $0x38] sm:$0xff] }
  0x12   : > { %v157_v9 = vadd.f32 %v156_v4, %v150_v2  ;;  %v179_v11 = vadd.f32 %v172_v6, %v171_v5  ;;  %v177_v22 = vmul.f32 %v154_v16, %v154_v16  ;;  %v178_v25 = vmul.f32 %v155_v20, %v155_v20 }
  0x14   : > { %v158_v13 = vadd.f32 %v157_v9, %v151_v3  ;;  %v180_v15 = vadd.f32 %v179_v11, %v173_v7 }
  0x16   : > { %v159_v17 = vadd.f32 %v158_v13, %v152_v8  ;;  %v181_v19 = vadd.f32 %v180_v15, %v174_v10 }
  0x18   : > { %v160_v21 = vadd.f32 %v159_v17, %v153_v12  ;;  %v182_v23 = vadd.f32 %v181_v19, %v175_v14 }
  0x1a   : > { %v161_v24 = vadd.f32 %v160_v21, %v154_v16  ;;  %v183_v26 = vadd.f32 %v182_v23, %v176_v18 }
  0x1c   : > { %v162_v27 = vadd.f32 %v161_v24, %v155_v20  ;;  %v184_v28 = vadd.f32 %v183_v26, %v177_v22 }
  0x1e   : > { %v163_v29 = vrot.slane %v162_v27, 4  ;;  %v185_v30 = vadd.f32 %v184_v28, %v178_v25 }
  0x20   : > { %v164_v31 = vadd.f32 %v163_v29, %v162_v27  ;;  %v186_v32 = vrot.slane %v185_v30, 4 }
  0x22   : > { %v165_v33 = vrot.slane %v164_v31, 2  ;;  %v187_v34 = vadd.f32 %v186_v32, %v185_v30 }
  0x24   : > { %v166_v35 = vadd.f32 %v165_v33, %v164_v31  ;;  %v188_v36 = vrot.slane %v187_v34, 2 }
  0x26   : > { %v167_v37 = vrot.slane %v166_v35, 1  ;;  %v189_v38 = vadd.f32 %v188_v36, %v187_v34 }
  0x28   : > { %v168_v39 = vadd.f32 %v167_v37, %v166_v35  ;;  %v190_v40 = vrot.slane %v189_v38, 1 }
  0x2a   : > { %v170_v41 = vmul.f32 0.015625, %v168_v39  ;;  %v191_v42 = vadd.f32 %v190_v40, %v189_v38 }
  0x2c   : > { %v192_v43 = vmul.f32 0.015625, %v191_v42  ;;  %v193_v44 = vmul.f32 %v170_v41, %v170_v41  ;;  %v196_v48 = vsub.f32 %v148_v0, %v170_v41  ;;  %v197_v49 = vsub.f32 %v149_v1, %v170_v41 }
  0x2d   : > { %v198_v50 = vsub.f32 %v150_v2, %v170_v41  ;;  %v199_v51 = vsub.f32 %v151_v3, %v170_v41  ;;  %v200_v52 = vsub.f32 %v152_v8, %v170_v41  ;;  %v201_v53 = vsub.f32 %v153_v12, %v170_v41 }
  0x2e   : > { %v194_v45 = vsub.f32 %v192_v43, %v193_v44  ;;  %v202_v54 = vsub.f32 %v154_v16, %v170_v41  ;;  %v203_v55 = vsub.f32 %v155_v20, %v170_v41 }
  0x30   : > { %v195_v46 = vmax.f32 %v194_v45, 0.0 }
  0x32   : > { %v204_v47 = vadd.f32 1e-05, %v195_v46 }
  0x34   : > { %366 = vrsqrt.f32 %v204_v47 }
  0x41   : > { %v367_v56 = vpop.eup %366 }
  0x42   : > { %v206_v57 = vmul.f32 %v367_v56, %v196_v48  ;;  %v207_v58 = vmul.f32 %v367_v56, %v197_v49  ;;  %v208_v59 = vmul.f32 %v367_v56, %v198_v50  ;;  %v209_v60 = vmul.f32 %v367_v56, %v199_v51 }
  0x43   : > { %v210_v61 = vmul.f32 %v367_v56, %v200_v52  ;;  %v211_v62 = vmul.f32 %v367_v56, %v201_v53  ;;  %v212_v63 = vmul.f32 %v367_v56, %v202_v54  ;;  %v213_v4 = vmul.f32 %v367_v56, %v203_v55 }
  0x44   : > { %vm214_vm0 = vcmp.gt.f32.partialorder %v206_v57, 0.0  ;;  %v222_v0 = vmul.f32 0.2, %v206_v57  ;;  %vm215_vm1 = vcmp.gt.f32.partialorder %v207_v58, 0.0  ;;  %v223_v1 = vmul.f32 0.2, %v207_v58 }
  0x45   : > { %vm216_vm2 = vcmp.gt.f32.partialorder %v208_v59, 0.0  ;;  %v224_v2 = vmul.f32 0.2, %v208_v59  ;;  %vm217_vm3 = vcmp.gt.f32.partialorder %v209_v60, 0.0  ;;  %v225_v3 = vmul.f32 0.2, %v209_v60 }
  0x46   : > { %v230_v5 = vsel %vm214_vm0, %v206_v57, %v222_v0  ;;  %v231_v6 = vsel %vm215_vm1, %v207_v58, %v223_v1  ;;  %vm218_vm4 = vcmp.gt.f32.partialorder %v210_v61, 0.0  ;;  %v226_v7 = vmul.f32 0.2, %v210_v61 }
  0x47   : > { %238 = vst [vmem:[%s433_s16] sm:$0xff] %v230_v5  ;;  %239 = vst [vmem:[%s433_s16 + $0x8] sm:$0xff] %v231_v6  ;;  %v232_v8 = vsel %vm216_vm2, %v208_v59, %v224_v2  ;;  %v233_v9 = vsel %vm217_vm3, %v209_v60, %v225_v3  ;;  %vm219_vm5 = vcmp.gt.f32.partialorder %v211_v62, 0.0  ;;  %v227_v10 = vmul.f32 0.2, %v211_v62 }
  0x48   : > { %240 = vst [vmem:[%s433_s16 + $0x10] sm:$0xff] %v232_v8  ;;  %241 = vst [vmem:[%s433_s16 + $0x18] sm:$0xff] %v233_v9  ;;  %v234_v11 = vsel %vm218_vm4, %v210_v61, %v226_v7  ;;  %vm220_vm6 = vcmp.gt.f32.partialorder %v212_v63, 0.0  ;;  %v228_v12 = vmul.f32 0.2, %v212_v63  ;;  %vm221_vm7 = vcmp.gt.f32.partialorder %v213_v4, 0.0 }
  0x49   : > { %242 = vst [vmem:[%s433_s16 + $0x20] sm:$0xff] %v234_v11  ;;  %v235_v13 = vsel %vm219_vm5, %v211_v62, %v227_v10  ;;  %v229_v14 = vmul.f32 0.2, %v213_v4 }
  0x4a   : > { %243 = vst [vmem:[%s433_s16 + $0x28] sm:$0xff] %v235_v13  ;;  %v236_v15 = vsel %vm220_vm6, %v212_v63, %v228_v12 }
  0x4b   : > { %244 = vst [vmem:[%s433_s16 + $0x30] sm:$0xff] %v236_v15  ;;  %v237_v16 = vsel %vm221_vm7, %v213_v4, %v229_v14 }
  0x4c   : > { %245 = vst [vmem:[%s433_s16 + $0x38] sm:$0xff] %v237_v16 }
  0x4d PF: > { %s11_s8 = sadd.s32 1, %s390_s8   ;;  %s454_s6 = smov %s386_s7 }
  0x4e   : > { %p8_p5 = scmp.ge.s32.totalorder %s11_s8, 4   ;;  %s455_s7 = smov %s457_s9 }
  0x50   :  { %10 = sbr.rel (!%p8_p5) target bundleno = 2 (0x2), region = 54 }

// kernel: discriminator_forward.9
= control target key start
LH: loop header
LB: loop body
LE: loop exit
PB: predicated region body
PF: predicated region fallthrough
CT: control target
= control target key end

     0   :  { %s2537_s1 = inlined_call_operand.vmem [shape: bf16[1024,128], index: 1, kind: input, shape index: {}]   ;;  %s2538_s0 = inlined_call_operand.vmem [shape: bf16[128,1024], index: 0, kind: input, shape index: {}]   ;;  %s2539_s2 = inlined_call_operand.vmem [shape: f32[1,128], index: 2, kind: input, shape index: {}]   ;;  %s2540_s3 = inlined_call_operand.vmem [shape: f32[128,128], index: 3, kind: output, shape index: {}]  }
   0x1   :  { %v1814_v0 = vld [vmem:[%s2537_s1 + $0x78] sm:$0xff]   ;;  %v1818_v4 = vld [vmem:[%s2537_s1 + $0x70] sm:$0xff]   ;;  %v1822_v8 = vld [vmem:[%s2537_s1 + $0x68] sm:$0xff]  }
   0x2   :  { %v1815_v1 = vld [vmem:[%s2537_s1 + $0xf8] sm:$0xff]   ;;  %1558 = vmatprep.subr.bf16.mxu0 %v1814_v0  ;;  %v1819_v5 = vld [vmem:[%s2537_s1 + $0xf0] sm:$0xff]   ;;  %v1823_v9 = vld [vmem:[%s2537_s1 + $0xe8] sm:$0xff]  }
   0x3   :  { %v1816_v2 = vld [vmem:[%s2537_s1 + $0x38] sm:$0xff]   ;;  %1622 = vmatprep.subr.bf16.mxu1 %v1815_v1  ;;  %v1820_v6 = vld [vmem:[%s2537_s1 + $0x30] sm:$0xff]   ;;  %v1824_v10 = vld [vmem:[%s2537_s1 + $0x28] sm:$0xff]  }
   0x4   :  { %v1817_v3 = vld [vmem:[%s2537_s1 + $0xb8] sm:$0xff]   ;;  %1559 = vmatpush3.bf16.msra.mxu0 %v1816_v2  ;;  %v1821_v7 = vld [vmem:[%s2537_s1 + $0xb0] sm:$0xff]   ;;  %v1825_v11 = vld [vmem:[%s2537_s1 + $0xa8] sm:$0xff]  }
   0x5   :  { %1623 = vmatpush3.bf16.msra.mxu1 %v1817_v3  ;;  %1560 = vmatprep.subr.bf16.mxu0 %v1818_v4  ;;  %v1826_v12 = vld [vmem:[%s2537_s1 + $0x60] sm:$0xff]   ;;  %v1830_v16 = vld [vmem:[%s2537_s1 + $0x58] sm:$0xff]   ;;  %v1834_v20 = vld [vmem:[%s2537_s1 + $0x50] sm:$0xff]  }
   0x6   :  { %1624 = vmatprep.subr.bf16.mxu1 %v1819_v5  ;;  %v1827_v13 = vld [vmem:[%s2537_s1 + $0xe0] sm:$0xff]   ;;  %v1831_v17 = vld [vmem:[%s2537_s1 + $0xd8] sm:$0xff]   ;;  %v1835_v21 = vld [vmem:[%s2537_s1 + $0xd0] sm:$0xff]  }
   0x7   :  { %v1828_v14 = vld [vmem:[%s2537_s1 + $0x20] sm:$0xff]   ;;  %v1832_v18 = vld [vmem:[%s2537_s1 + $0x18] sm:$0xff]   ;;  %v1836_v22 = vld [vmem:[%s2537_s1 + $0x10] sm:$0xff]  }
   0x8   :  { %1561 = vmatpush3.bf16.msra.mxu0 %v1820_v6  ;;  %v1829_v15 = vld [vmem:[%s2537_s1 + $0xa0] sm:$0xff]   ;;  %v1833_v19 = vld [vmem:[%s2537_s1 + $0x98] sm:$0xff]   ;;  %v1837_v23 = vld [vmem:[%s2537_s1 + $0x90] sm:$0xff]  }
   0x9   :  { %1625 = vmatpush3.bf16.msra.mxu1 %v1821_v7  ;;  %1562 = vmatprep.subr.bf16.mxu0 %v1822_v8  ;;  %v1838_v24 = vld [vmem:[%s2537_s1 + $0x48] sm:$0xff]   ;;  %v1842_v28 = vld [vmem:[%s2537_s1 + $0x40] sm:$0xff]   ;;  %v1846_v40 = vld [vmem:[%s2537_s1 + $0x178] sm:$0xff]  }
   0xa   :  { %1626 = vmatprep.subr.bf16.mxu1 %v1823_v9  ;;  %v1839_v25 = vld [vmem:[%s2537_s1 + $0xc8] sm:$0xff]   ;;  %v1843_v29 = vld [vmem:[%s2537_s1 + $0xc0] sm:$0xff]   ;;  %v1847_v41 = vld [vmem:[%s2537_s1 + $0x138] sm:$0xff]  }
   0xb   :  { %v1840_v26 = vld [vmem:[%s2537_s1 + $0x8] sm:$0xff]   ;;  %v1844_v30 = vld [vmem:[%s2537_s1] sm:$0xff]   ;;  %v1848_v42 = vld [vmem:[%s2537_s1 + $0x1f8] sm:$0xff]  }
   0xc   :  { %1563 = vmatpush3.bf16.msra.mxu0 %v1824_v10  ;;  %v1841_v27 = vld [vmem:[%s2537_s1 + $0x88] sm:$0xff]   ;;  %v1845_v31 = vld [vmem:[%s2537_s1 + $0x80] sm:$0xff]   ;;  %v1849_v43 = vld [vmem:[%s2537_s1 + $0x1b8] sm:$0xff]  }
   0xd   :  { %1627 = vmatpush3.bf16.msra.mxu1 %v1825_v11  ;;  %1564 = vmatprep.subr.bf16.mxu0 %v1826_v12  ;;  %v51_v32 = vld [vmem:[%s2538_s0] sm:$0xff]  ;;  %v52_v34 = vld [vmem:[%s2538_s0 + $0x8] sm:$0xff]  ;;  %v1850_v50 = vld [vmem:[%s2537_s1 + $0x170] sm:$0xff]  }
   0xe   :  { %1628 = vmatprep.subr.bf16.mxu1 %v1827_v13  ;;  %v55_v33 = vld [vmem:[%s2538_s0 + $0x20] sm:$0xff]  ;;  %v56_v37 = vld [vmem:[%s2538_s0 + $0x28] sm:$0xff]  ;;  %v1851_v52 = vld [vmem:[%s2537_s1 + $0x130] sm:$0xff]  }
   0xf   :  { %v1429_v35 = vcombine.low %v51_v32, %v55_v33  ;;  %v1430_v36 = vcombine.high %v51_v32, %v55_v33  ;;  %v1431_v38 = vcombine.low %v52_v34, %v56_v37  ;;  %v1432_v39 = vcombine.high %v52_v34, %v56_v37  ;;  %v59_v44 = vld [vmem:[%s2538_s0 + $0x40] sm:$0xff]  ;;  %v60_v47 = vld [vmem:[%s2538_s0 + $0x48] sm:$0xff]  ;;  %v1852_v54 = vld [vmem:[%s2537_s1 + $0x1f0] sm:$0xff]  }
  0x10   :  { %1565 = vmatpush3.bf16.msra.mxu0 %v1828_v14  ;;  %v63_v45 = vld [vmem:[%s2538_s0 + $0x60] sm:$0xff]  ;;  %v64_v48 = vld [vmem:[%s2538_s0 + $0x68] sm:$0xff]  ;;  %v1853_v55 = vld [vmem:[%s2537_s1 + $0x1b0] sm:$0xff]  }
  0x11   :  { %1629 = vmatpush3.bf16.msra.mxu1 %v1829_v15  ;;  %1566 = vmatprep.subr.bf16.mxu0 %v1830_v16  ;;  %v1438_v46 = vcombine.high %v59_v44, %v63_v45  ;;  %v1440_v49 = vcombine.high %v60_v47, %v64_v48  ;;  %v1437_v51 = vcombine.low %v59_v44, %v63_v45  ;;  %v67_v56 = vld [vmem:[%s2538_s0 + $0x80] sm:$0xff]  ;;  %v68_v58 = vld [vmem:[%s2538_s0 + $0x88] sm:$0xff]  ;;  %v1868_v32 = vld [vmem:[%s2537_s1 + $0x1d0] sm:$0xff]  }
  0x12   :  { %1630 = vmatprep.subr.bf16.mxu1 %v1831_v17  ;;  %979 = vmatprep.mubr.bf16.mxu0 %v1430_v36  ;;  %v1439_v53 = vcombine.low %v60_v47, %v64_v48  ;;  %v71_v57 = vld [vmem:[%s2538_s0 + $0xa0] sm:$0xff]  ;;  %v72_v59 = vld [vmem:[%s2538_s0 + $0xa8] sm:$0xff]  ;;  %v1869_v33 = vld [vmem:[%s2537_s1 + $0x190] sm:$0xff]  }
  0x13   :  { %1076 = vmatprep.mubr.bf16.mxu1 %v1432_v39  ;;  %v1446_v60 = vcombine.high %v67_v56, %v71_v57  ;;  %v1448_v61 = vcombine.high %v68_v58, %v72_v59  ;;  %v1854_v62 = vld [vmem:[%s2537_s1 + $0x168] sm:$0xff]   ;;  %v1445_v2 = vcombine.low %v67_v56, %v71_v57  ;;  %v75_v3 = vld [vmem:[%s2538_s0 + $0xc0] sm:$0xff]  ;;  %v1447_v6 = vcombine.low %v68_v58, %v72_v59 }
  0x14   :  { %1567 = vmatpush3.bf16.msra.mxu0 %v1832_v18  ;;  %v1855_v63 = vld [vmem:[%s2537_s1 + $0x128] sm:$0xff]   ;;  %v79_v4 = vld [vmem:[%s2538_s0 + $0xe0] sm:$0xff]  ;;  %v1862_v18 = vld [vmem:[%s2537_s1 + $0x158] sm:$0xff]  }
  0x15   :  { %1631 = vmatpush3.bf16.msra.mxu1 %v1833_v19  ;;  %1568 = vmatprep.subr.bf16.mxu0 %v1834_v20  ;;  %v1856_v0 = vld [vmem:[%s2537_s1 + $0x1e8] sm:$0xff]   ;;  %v1454_v7 = vcombine.high %v75_v3, %v79_v4  ;;  %v1858_v10 = vld [vmem:[%s2537_s1 + $0x160] sm:$0xff]   ;;  %v1453_v19 = vcombine.low %v75_v3, %v79_v4  ;;  %v1863_v20 = vld [vmem:[%s2537_s1 + $0x118] sm:$0xff]  }
  0x16   :  { %1632 = vmatprep.subr.bf16.mxu1 %v1835_v21  ;;  %v1857_v1 = vld [vmem:[%s2537_s1 + $0x1a8] sm:$0xff]   ;;  %v1859_v11 = vld [vmem:[%s2537_s1 + $0x120] sm:$0xff]  }
  0x17   :  { %v76_v5 = vld [vmem:[%s2538_s0 + $0xc8] sm:$0xff]  ;;  %v1860_v12 = vld [vmem:[%s2537_s1 + $0x1e0] sm:$0xff]  }
  0x18   :  { %1569 = vmatpush3.bf16.msra.mxu0 %v1836_v22  ;;  %v80_v8 = vld [vmem:[%s2538_s0 + $0xe8] sm:$0xff]  ;;  %v1861_v13 = vld [vmem:[%s2537_s1 + $0x1a0] sm:$0xff]  }
  0x19   :  { %1633 = vmatpush3.bf16.msra.mxu1 %v1837_v23  ;;  %1570 = vmatprep.subr.bf16.mxu0 %v1838_v24  ;;  %v1456_v9 = vcombine.high %v76_v5, %v80_v8  ;;  %v83_v14 = vld [vmem:[%s2538_s0 + $0x100] sm:$0xff]  ;;  %v84_v16 = vld [vmem:[%s2538_s0 + $0x108] sm:$0xff]  ;;  %v1455_v21 = vcombine.low %v76_v5, %v80_v8  ;;  %v1864_v23 = vld [vmem:[%s2537_s1 + $0x1d8] sm:$0xff]  }
  0x1a   :  { %1634 = vmatprep.subr.bf16.mxu1 %v1839_v25  ;;  %v87_v15 = vld [vmem:[%s2538_s0 + $0x120] sm:$0xff]  ;;  %v88_v17 = vld [vmem:[%s2538_s0 + $0x128] sm:$0xff]  ;;  %v1865_v25 = vld [vmem:[%s2537_s1 + $0x198] sm:$0xff]  }
  0x1b   :  { %v1462_v22 = vcombine.high %v83_v14, %v87_v15  ;;  %v1464_v24 = vcombine.high %v84_v16, %v88_v17  ;;  %v1461_v34 = vcombine.low %v83_v14, %v87_v15  ;;  %v1871_v39 = vld [vmem:[%s2537_s1 + $0x108] sm:$0xff]   ;;  %v1875_v48 = vld [vmem:[%s2537_s1 + $0x100] sm:$0xff]   ;;  %v62_v8 = vld [vmem:[%s2538_s0 + $0x58] sm:$0xff] }
  0x1c   :  { %1571 = vmatpush3.bf16.msra.mxu0 %v1840_v26  ;;  %v91_v26 = vld [vmem:[%s2538_s0 + $0x140] sm:$0xff]  ;;  %v100_v44 = vld [vmem:[%s2538_s0 + $0x188] sm:$0xff]  ;;  %v69_v14 = vld [vmem:[%s2538_s0 + $0x90] sm:$0xff] }
  0x1d   :  { %1635 = vmatpush3.bf16.msra.mxu1 %v1841_v27  ;;  %1572 = vmatprep.subr.bf16.mxu0 %v1842_v28  ;;  %v95_v27 = vld [vmem:[%s2538_s0 + $0x160] sm:$0xff]  ;;  %v1866_v28 = vld [vmem:[%s2537_s1 + $0x150] sm:$0xff]   ;;  %v104_v45 = vld [vmem:[%s2538_s0 + $0x1a8] sm:$0xff] }
  0x1e   :  { %1636 = vmatprep.subr.bf16.mxu1 %v1843_v29  ;;  %v92_v29 = vld [vmem:[%s2538_s0 + $0x148] sm:$0xff]  ;;  %v1470_v36 = vcombine.high %v91_v26, %v95_v27  ;;  %v1469_v47 = vcombine.low %v91_v26, %v95_v27  ;;  %v1479_v59 = vcombine.low %v100_v44, %v104_v45  ;;  %v73_v15 = vld [vmem:[%s2538_s0 + $0xb0] sm:$0xff] }
  0x1f   :  { %v108_v56 = vld [vmem:[%s2538_s0 + $0x1c8] sm:$0xff]  ;;  %v1449_v26 = vcombine.low %v69_v14, %v73_v15 }
  0x20   :  { %1573 = vmatpush3.bf16.msra.mxu0 %v1844_v30  ;;  %v96_v30 = vld [vmem:[%s2538_s0 + $0x168] sm:$0xff] }
  0x21   :  { %1637 = vmatpush3.bf16.msra.mxu1 %v1845_v31  ;;  %1686 = vmatprep.subr.bf16.mxu0 %v1846_v40  ;;  %v1867_v31 = vld [vmem:[%s2537_s1 + $0x110] sm:$0xff]   ;;  %v1472_v37 = vcombine.high %v92_v29, %v96_v30  ;;  %v1872_v40 = vld [vmem:[%s2537_s1 + $0x1c8] sm:$0xff]  }
  0x22   :  { %1750 = vmatprep.subr.bf16.mxu1 %v1848_v42  ;;  %v103_v42 = vld [vmem:[%s2538_s0 + $0x1a0] sm:$0xff]  ;;  %v112_v57 = vld [vmem:[%s2538_s0 + $0x1e8] sm:$0xff] }
  0x23   :  { %980 = vmatmul.mubr.bf16.vlgmr.msra.gmra.mxu0 %v1429_v35  ;;  %v1463_v35 = vcombine.low %v84_v16, %v88_v17  ;;  %v1487_v3 = vcombine.low %v108_v56, %v112_v57  ;;  %v70_v16 = vld [vmem:[%s2538_s0 + $0x98] sm:$0xff] }
  0x24   :  { %1077 = vmatmul.mubr.bf16.vlgmr.msra.gmra.mxu1 %v1431_v38  ;;  %1687 = vmatpush3.bf16.msra.mxu0 %v1847_v41  ;;  %v1870_v38 = vld [vmem:[%s2537_s1 + $0x148] sm:$0xff]   ;;  %v99_v41 = vld [vmem:[%s2538_s0 + $0x180] sm:$0xff]  ;;  %v74_v17 = vld [vmem:[%s2538_s0 + $0xb8] sm:$0xff] }
  0x25   :  { %1751 = vmatpush3.bf16.msra.mxu1 %v1849_v43  ;;  %987 = vmatprep.mubr.bf16.mxu0 %v1438_v46  ;;  %v1873_v43 = vld [vmem:[%s2537_s1 + $0x188] sm:$0xff]   ;;  %v1874_v46 = vld [vmem:[%s2537_s1 + $0x140] sm:$0xff]   ;;  %v1477_v58 = vcombine.low %v99_v41, %v103_v42  ;;  %v1451_v27 = vcombine.low %v70_v16, %v74_v17 }
  0x26   :  { %1084 = vmatprep.mubr.bf16.mxu1 %v1440_v49  ;;  %1688 = vmatprep.subr.bf16.mxu0 %v1850_v50  ;;  %v1471_v49 = vcombine.low %v92_v29, %v96_v30  ;;  %v1478_v50 = vcombine.high %v99_v41, %v103_v42  ;;  %v85_v30 = vld [vmem:[%s2538_s0 + $0x110] sm:$0xff]  ;;  %v98_v41 = vld [vmem:[%s2538_s0 + $0x178] sm:$0xff] }
  0x27   :  { %1752 = vmatprep.subr.bf16.mxu1 %v1852_v54  ;;  %v107_v54 = vld [vmem:[%s2538_s0 + $0x1c0] sm:$0xff] }
  0x28   :  { %1689 = vmatpush3.bf16.msra.mxu0 %v1851_v52  ;;  %v1480_v52 = vcombine.high %v100_v44, %v104_v45 }
  0x29   :  { %1753 = vmatpush3.bf16.msra.mxu1 %v1853_v55  ;;  %1690 = vmatprep.subr.bf16.mxu0 %v1854_v62  ;;  %v111_v55 = vld [vmem:[%s2538_s0 + $0x1e0] sm:$0xff]  ;;  %v53_v62 = vld [vmem:[%s2538_s0 + $0x10] sm:$0xff] }
  0x2a   :  { %1754 = vmatprep.subr.bf16.mxu1 %v1856_v0  ;;  %v54_v0 = vld [vmem:[%s2538_s0 + $0x18] sm:$0xff] }
  0x2b   :  { %988 = vmatmul.mubr.bf16.gmra.mxu0 %v1437_v51  ;;  %v1876_v51 = vld [vmem:[%s2537_s1 + $0x1c0] sm:$0xff]  }
  0x2c   :  { %1085 = vmatmul.mubr.bf16.gmra.mxu1 %v1439_v53  ;;  %995 = vmatprep.mubr.bf16.mxu0 %v1446_v60  ;;  %v1877_v53 = vld [vmem:[%s2537_s1 + $0x180] sm:$0xff]   ;;  %v1486_v60 = vcombine.high %v107_v54, %v111_v55 }
  0x2d   :  { %1092 = vmatprep.mubr.bf16.mxu1 %v1448_v61  ;;  %1691 = vmatpush3.bf16.msra.mxu0 %v1855_v63  ;;  %v1488_v61 = vcombine.high %v108_v56, %v112_v57  ;;  %v57_v63 = vld [vmem:[%s2538_s0 + $0x30] sm:$0xff]  ;;  %v110_v56 = vld [vmem:[%s2538_s0 + $0x1d8] sm:$0xff] }
  0x2e   :  { %1755 = vmatpush3.bf16.msra.mxu1 %v1857_v1  ;;  %1692 = vmatprep.subr.bf16.mxu0 %v1858_v10  ;;  %v58_v1 = vld [vmem:[%s2538_s0 + $0x38] sm:$0xff]  ;;  %v1434_v4 = vcombine.high %v53_v62, %v57_v63  ;;  %v1433_v10 = vcombine.low %v53_v62, %v57_v63 }
  0x2f   :  { %1756 = vmatprep.subr.bf16.mxu1 %v1860_v12  ;;  %v1436_v5 = vcombine.high %v54_v0, %v58_v1  ;;  %v114_v57 = vld [vmem:[%s2538_s0 + $0x1f8] sm:$0xff] }
  0x30   :  { %v1491_v63 = vcombine.low %v110_v56, %v114_v57 }
  0x31   :  { %1693 = vmatpush3.bf16.msra.mxu0 %v1859_v11  ;;  %v1435_v11 = vcombine.low %v54_v0, %v58_v1 }
  0x32   :  { %1757 = vmatpush3.bf16.msra.mxu1 %v1861_v13  ;;  %1694 = vmatprep.subr.bf16.mxu0 %v1862_v18 }
  0x33   :  { %996 = vmatmul.mubr.bf16.gmra.mxu0 %v1445_v2  ;;  %1758 = vmatprep.subr.bf16.mxu1 %v1864_v23  ;;  %v1485_v2 = vcombine.low %v107_v54, %v111_v55  ;;  %v81_v23 = vld [vmem:[%s2538_s0 + $0xf0] sm:$0xff] }
  0x34   :  { %1093 = vmatmul.mubr.bf16.gmra.mxu1 %v1447_v6  ;;  %1003 = vmatprep.mubr.bf16.mxu0 %v1454_v7  ;;  %v61_v6 = vld [vmem:[%s2538_s0 + $0x50] sm:$0xff] }
  0x35   :  { %1100 = vmatprep.mubr.bf16.mxu1 %v1456_v9  ;;  %1695 = vmatpush3.bf16.msra.mxu0 %v1863_v20  ;;  %v65_v7 = vld [vmem:[%s2538_s0 + $0x70] sm:$0xff]  ;;  %v66_v9 = vld [vmem:[%s2538_s0 + $0x78] sm:$0xff]  ;;  %v1450_v20 = vcombine.high %v69_v14, %v73_v15 }
  0x36   :  { %1759 = vmatpush3.bf16.msra.mxu1 %v1865_v25  ;;  %1696 = vmatprep.subr.bf16.mxu0 %v1866_v28  ;;  %v1442_v12 = vcombine.high %v61_v6, %v65_v7  ;;  %v1444_v13 = vcombine.high %v62_v8, %v66_v9  ;;  %v1441_v18 = vcombine.low %v61_v6, %v65_v7  ;;  %v82_v25 = vld [vmem:[%s2538_s0 + $0xf8] sm:$0xff]  ;;  %v109_v54 = vld [vmem:[%s2538_s0 + $0x1d0] sm:$0xff] }
  0x37   :  { %1760 = vmatprep.subr.bf16.mxu1 %v1868_v32  ;;  %v86_v32 = vld [vmem:[%s2538_s0 + $0x118] sm:$0xff]  ;;  %v113_v55 = vld [vmem:[%s2538_s0 + $0x1f0] sm:$0xff] }
  0x38   :  { %v1489_v62 = vcombine.low %v109_v54, %v113_v55 }
  0x39   :  { %1697 = vmatpush3.bf16.msra.mxu0 %v1867_v31  ;;  %v89_v31 = vld [vmem:[%s2538_s0 + $0x130] sm:$0xff] }
  0x3a   :  { %1761 = vmatpush3.bf16.msra.mxu1 %v1869_v33  ;;  %1698 = vmatprep.subr.bf16.mxu0 %v1870_v38  ;;  %v90_v33 = vld [vmem:[%s2538_s0 + $0x138] sm:$0xff]  ;;  %v93_v38 = vld [vmem:[%s2538_s0 + $0x150] sm:$0xff]  ;;  %v1465_v42 = vcombine.low %v85_v30, %v89_v31 }
  0x3b   :  { %1004 = vmatmul.mubr.bf16.gmra.mxu0 %v1453_v19  ;;  %1762 = vmatprep.subr.bf16.mxu1 %v1872_v40  ;;  %v1443_v19 = vcombine.low %v62_v8, %v66_v9  ;;  %v94_v40 = vld [vmem:[%s2538_s0 + $0x158] sm:$0xff] }
  0x3c   :  { %1101 = vmatmul.mubr.bf16.gmra.mxu1 %v1455_v21  ;;  %1011 = vmatprep.mubr.bf16.mxu0 %v1462_v22  ;;  %v1452_v21 = vcombine.high %v70_v16, %v74_v17  ;;  %v77_v22 = vld [vmem:[%s2538_s0 + $0xd0] sm:$0xff]  ;;  %v1476_v45 = vcombine.high %v94_v40, %v98_v41 }
  0x3d   :  { %1108 = vmatprep.mubr.bf16.mxu1 %v1464_v24  ;;  %1699 = vmatpush3.bf16.msra.mxu0 %v1871_v39  ;;  %v78_v24 = vld [vmem:[%s2538_s0 + $0xd8] sm:$0xff]  ;;  %v1458_v28 = vcombine.high %v77_v22, %v81_v23  ;;  %v97_v39 = vld [vmem:[%s2538_s0 + $0x170] sm:$0xff] }
  0x3e   :  { %1763 = vmatpush3.bf16.msra.mxu1 %v1873_v43  ;;  %1700 = vmatprep.subr.bf16.mxu0 %v1874_v46  ;;  %v1460_v29 = vcombine.high %v78_v24, %v82_v25  ;;  %v1467_v43 = vcombine.low %v86_v32, %v90_v33  ;;  %v1474_v44 = vcombine.high %v93_v38, %v97_v39  ;;  %v101_v46 = vld [vmem:[%s2538_s0 + $0x190] sm:$0xff] }
  0x3f   :  { %1764 = vmatprep.subr.bf16.mxu1 %v1876_v51  ;;  %v1475_v51 = vcombine.low %v94_v40, %v98_v41 }
  0x41   :  { %1701 = vmatpush3.bf16.msra.mxu0 %v1875_v48  ;;  %v102_v48 = vld [vmem:[%s2538_s0 + $0x198] sm:$0xff] }
  0x42   :  { %1765 = vmatpush3.bf16.msra.mxu1 %v1877_v53 }
  0x43   :  { %1012 = vmatmul.mubr.bf16.gmra.mxu0 %v1461_v34  ;;  %v1457_v34 = vcombine.low %v77_v22, %v81_v23 }
  0x44   :  { %1109 = vmatmul.mubr.bf16.gmra.mxu1 %v1463_v35  ;;  %1019 = vmatprep.mubr.bf16.mxu0 %v1470_v36  ;;  %v1459_v35 = vcombine.low %v78_v24, %v82_v25  ;;  %v1466_v36 = vcombine.high %v85_v30, %v89_v31 }
  0x45   :  { %1116 = vmatprep.mubr.bf16.mxu1 %v1472_v37  ;;  %v1468_v37 = vcombine.high %v86_v32, %v90_v33 }
  0x4b   :  { %1020 = vmatmul.mubr.bf16.gmra.mxu0 %v1469_v47  ;;  %v105_v47 = vld [vmem:[%s2538_s0 + $0x1b0] sm:$0xff] }
  0x4c   :  { %1117 = vmatmul.mubr.bf16.gmra.mxu1 %v1471_v49  ;;  %1027 = vmatprep.mubr.bf16.mxu0 %v1478_v50  ;;  %v106_v49 = vld [vmem:[%s2538_s0 + $0x1b8] sm:$0xff]  ;;  %v1473_v50 = vcombine.low %v93_v38, %v97_v39 }
  0x4d   :  { %1124 = vmatprep.mubr.bf16.mxu1 %v1480_v52  ;;  %v1482_v52 = vcombine.high %v101_v46, %v105_v47  ;;  %v1484_v53 = vcombine.high %v102_v48, %v106_v49 }
  0x53   :  { %1028 = vmatmul.mubr.bf16.gmra.mxu0 %v1477_v58  ;;  %v1481_v58 = vcombine.low %v101_v46, %v105_v47 }
  0x54   :  { %1125 = vmatmul.mubr.bf16.gmra.mxu1 %v1479_v59  ;;  %1035 = vmatprep.mubr.bf16.mxu0 %v1486_v60  ;;  %v1483_v59 = vcombine.low %v102_v48, %v106_v49  ;;  %v1490_v60 = vcombine.high %v109_v54, %v113_v55 }
  0x55   :  { %1132 = vmatprep.mubr.bf16.mxu1 %v1488_v61  ;;  %v1492_v61 = vcombine.high %v110_v56, %v114_v57 }
  0x5b   :  { %1036 = vmatmul.mubr.bf16.gmra.mxu0 %v1485_v2 }
  0x5c   :  { %1133 = vmatmul.mubr.bf16.gmra.mxu1 %v1487_v3  ;;  %1173 = vmatprep.mubr.bf16.mxu0 %v1434_v4 }
  0x5d   :  { %1270 = vmatprep.mubr.bf16.mxu1 %v1436_v5 }
  0x63   :  { %1174 = vmatmul.mubr.bf16.vlgmr.msra.gmra.mxu0 %v1433_v10 }
  0x64   :  { %1271 = vmatmul.mubr.bf16.vlgmr.msra.gmra.mxu1 %v1435_v11  ;;  %1181 = vmatprep.mubr.bf16.mxu0 %v1442_v12 }
  0x65   :  { %1278 = vmatprep.mubr.bf16.mxu1 %v1444_v13 }
  0x6b   :  { %1182 = vmatmul.mubr.bf16.gmra.mxu0 %v1441_v18 }
  0x6c   :  { %1279 = vmatmul.mubr.bf16.gmra.mxu1 %v1443_v19  ;;  %1189 = vmatprep.mubr.bf16.mxu0 %v1450_v20 }
  0x6d   :  { %1286 = vmatprep.mubr.bf16.mxu1 %v1452_v21 }
  0x73   :  { %1190 = vmatmul.mubr.bf16.gmra.mxu0 %v1449_v26 }
  0x74   :  { %1287 = vmatmul.mubr.bf16.gmra.mxu1 %v1451_v27  ;;  %1197 = vmatprep.mubr.bf16.mxu0 %v1458_v28 }
  0x75   :  { %1294 = vmatprep.mubr.bf16.mxu1 %v1460_v29 }
  0x7b   :  { %1198 = vmatmul.mubr.bf16.gmra.mxu0 %v1457_v34 }
  0x7c   :  { %1295 = vmatmul.mubr.bf16.gmra.mxu1 %v1459_v35  ;;  %1205 = vmatprep.mubr.bf16.mxu0 %v1466_v36 }
  0x7d   :  { %1302 = vmatprep.mubr.bf16.mxu1 %v1468_v37 }
  0x83   :  { %1206 = vmatmul.mubr.bf16.gmra.mxu0 %v1465_v42 }
  0x84   :  { %1303 = vmatmul.mubr.bf16.gmra.mxu1 %v1467_v43  ;;  %1213 = vmatprep.mubr.bf16.mxu0 %v1474_v44 }
  0x85   :  { %1310 = vmatprep.mubr.bf16.mxu1 %v1476_v45 }
  0x8b   :  { %1214 = vmatmul.mubr.bf16.gmra.mxu0 %v1473_v50 }
  0x8c   :  { %1311 = vmatmul.mubr.bf16.gmra.mxu1 %v1475_v51  ;;  %1221 = vmatprep.mubr.bf16.mxu0 %v1482_v52 }
  0x8d   :  { %1318 = vmatprep.mubr.bf16.mxu1 %v1484_v53 }
  0x93   :  { %1222 = vmatmul.mubr.bf16.gmra.mxu0 %v1481_v58 }
  0x94   :  { %1319 = vmatmul.mubr.bf16.gmra.mxu1 %v1483_v59  ;;  %1229 = vmatprep.mubr.bf16.mxu0 %v1490_v60 }
  0x95   :  { %1326 = vmatprep.mubr.bf16.mxu1 %v1492_v61 }
  0x9b   :  { %1230 = vmatmul.mubr.bf16.gmra.mxu0 %v1489_v62 }
  0x9c   :  { %1327 = vmatmul.mubr.bf16.gmra.mxu1 %v1491_v63 }
  0xe3   :  { %v2282_v0 = vpop.f32.mrf.mxu0 }
  0xe4   :  { %v2284_v1 = vpop.f32.mrf.mxu1 }
  0xe5   :  { %v1575_v2 = vpop.f32.mrf.mxu0 }
  0xe6   :  { %v1639_v3 = vpop.f32.mrf.mxu1  ;;  %v1576_v63 = vadd.f32 %v1575_v2, %v2282_v0 }
  0xe7   :  { %v2286_v4 = vpop.f32.mrf.mxu0 }
  0xe8   :  { %v2288_v5 = vpop.f32.mrf.mxu1 }
  0xe9   :  { %v2290_v6 = vpop.f32.mrf.mxu0 }
  0xea   :  { %v2292_v7 = vpop.f32.mrf.mxu1 }
  0xeb   :  { %v2294_v8 = vpop.f32.mrf.mxu0 }
  0xec   :  { %v2296_v9 = vpop.f32.mrf.mxu1 }
  0xed   :  { %v2298_v10 = vpop.f32.mrf.mxu0 }
  0xee   :  { %v2300_v11 = vpop.f32.mrf.mxu1 }
  0xef   :  { %v2302_v12 = vpop.f32.mrf.mxu0  ;;  %v1646_v2 = vadd.f32 %v2300_v11, %v2296_v9 }
  0xf0   :  { %v2304_v13 = vpop.f32.mrf.mxu1 }
  0xf1   :  { %v2306_v14 = vpop.f32.mrf.mxu0 }
  0xf2   :  { %v2308_v15 = vpop.f32.mrf.mxu1  ;;  %v1585_v9 = vadd.f32 %v2306_v14, %v2302_v12 }
  0xf3   :  { %v2310_v16 = vpop.f32.mrf.mxu0  ;;  %v1649_v11 = vadd.f32 %v2308_v15, %v2304_v13 }
  0xf4   :  { %v2312_v17 = vpop.f32.mrf.mxu1 }
  0xf5   :  { %v2314_v18 = vpop.f32.mrf.mxu0  ;;  %v1090_v14 = vadd.f32 %v1649_v11, %v1585_v9 }
  0xf6   :  { %v2316_v19 = vpop.f32.mrf.mxu1 }
  0xf7   :  { %v2318_v20 = vpop.f32.mrf.mxu0  ;;  %v1652_v12 = vadd.f32 %v2316_v19, %v2312_v17 }
  0xf8   :  { %v2320_v21 = vpop.f32.mrf.mxu1 }
  0xf9   :  { %v2322_v22 = vpop.f32.mrf.mxu0 }
  0xfa   :  { %v2324_v23 = vpop.f32.mrf.mxu1  ;;  %v1591_v17 = vadd.f32 %v2322_v22, %v2318_v20 }
  0xfb   :  { %v2326_v24 = vpop.f32.mrf.mxu0 }
  0xfc   :  { %v2328_v25 = vpop.f32.mrf.mxu1 }
  0xfd   :  { %v2330_v26 = vpop.f32.mrf.mxu0 }
  0xfe   :  { %v2332_v27 = vpop.f32.mrf.mxu1 }
  0xff   :  { %v2334_v28 = vpop.f32.mrf.mxu0  ;;  %v1658_v20 = vadd.f32 %v2332_v27, %v2328_v25 }
 0x100   :  { %v2336_v29 = vpop.f32.mrf.mxu1 }
 0x101   :  { %v2338_v30 = vpop.f32.mrf.mxu0 }
 0x102   :  { %v2340_v31 = vpop.f32.mrf.mxu1  ;;  %v1597_v25 = vadd.f32 %v2338_v30, %v2334_v28 }
 0x103   :  { %v2342_v32 = vpop.f32.mrf.mxu0 }
 0x104   :  { %v2344_v33 = vpop.f32.mrf.mxu1 }
 0x105   :  { %v2346_v34 = vpop.f32.mrf.mxu0 }
 0x106   :  { %v2348_v35 = vpop.f32.mrf.mxu1 }
 0x107   :  { %v2350_v36 = vpop.f32.mrf.mxu0  ;;  %v1664_v28 = vadd.f32 %v2348_v35, %v2344_v33 }
 0x108   :  { %v2352_v37 = vpop.f32.mrf.mxu1 }
 0x109   :  { %v2354_v38 = vpop.f32.mrf.mxu0 }
 0x10a   :  { %v2356_v39 = vpop.f32.mrf.mxu1  ;;  %v1603_v33 = vadd.f32 %v2354_v38, %v2350_v36 }
 0x10b   :  { %v2358_v40 = vpop.f32.mrf.mxu0 }
 0x10c   :  { %v2360_v41 = vpop.f32.mrf.mxu1 }
 0x10d   :  { %v2362_v42 = vpop.f32.mrf.mxu0 }
 0x10e   :  { %v2364_v43 = vpop.f32.mrf.mxu1 }
 0x10f   :  { %v2366_v44 = vpop.f32.mrf.mxu0  ;;  %v1670_v36 = vadd.f32 %v2364_v43, %v2360_v41 }
 0x110   :  { %v2368_v45 = vpop.f32.mrf.mxu1 }
 0x111   :  { %v2370_v46 = vpop.f32.mrf.mxu0 }
 0x112   :  { %v2372_v47 = vpop.f32.mrf.mxu1  ;;  %v1609_v41 = vadd.f32 %v2370_v46, %v2366_v44 }
 0x113   :  { %v2374_v48 = vpop.f32.mrf.mxu0 }
 0x114   :  { %v2376_v49 = vpop.f32.mrf.mxu1 }
 0x115   :  { %2541 = vst [vmem:[#allocation3_spill] sm:$0xff] %v2376_v49  ;;  %v2378_v50 = vpop.f32.mrf.mxu0 }
 0x116   :  { %v2380_v51 = vpop.f32.mrf.mxu1 }
 0x117   :  { %2542 = vst [vmem:[#allocation4_spill] sm:$0xff] %v2380_v51  ;;  %v2382_v52 = vpop.f32.mrf.mxu0 }
 0x118   :  { %2543 = vst [vmem:[#allocation5_spill] sm:$0xff] %v2382_v52  ;;  %v2384_v53 = vpop.f32.mrf.mxu1 }
 0x119   :  { %2544 = vst [vmem:[#allocation6_spill] sm:$0xff] %v2384_v53  ;;  %v2386_v54 = vpop.f32.mrf.mxu0  ;;  %v1640_v53 = vadd.f32 %v1639_v3, %v2284_v1  ;;  %v1582_v1 = vadd.f32 %v2298_v10, %v2294_v8  ;;  %v2419_v3 = vld [vmem:[%s2539_s2] ss:$0 sm:$0xff] }
 0x11a   :  { %2545 = vst [vmem:[#allocation7_spill] sm:$0xff] %v2386_v54  ;;  %v2388_v55 = vpop.f32.mrf.mxu1 }
 0x11b   :  { %2546 = vst [vmem:[#allocation8_spill] sm:$0xff] %v2388_v55  ;;  %v2390_v56 = vpop.f32.mrf.mxu0  ;;  %v1087_v8 = vadd.f32 %v1646_v2, %v1582_v1  ;;  %v1588_v1 = vadd.f32 %v2314_v18, %v2310_v16  ;;  %v1655_v18 = vadd.f32 %v2324_v23, %v2320_v21 }
 0x11c   :  { %2547 = vst [vmem:[#allocation9_spill] sm:$0xff] %v2390_v56  ;;  %v2392_v57 = vpop.f32.mrf.mxu1  ;;  %v2554_v44 = vld [vmem:[#allocation3_spill] sm:$0xff] }
 0x11d   :  { %2548 = vst [vmem:[#allocation10_spill] sm:$0xff] %v2392_v57  ;;  %v2394_v58 = vpop.f32.mrf.mxu0  ;;  %v1079_v57 = vadd.f32 %v1640_v53, %v1576_v63  ;;  %v1098_v22 = vadd.f32 %v1655_v18, %v1591_v17 }
 0x11e   :  { %2549 = vst [vmem:[#allocation11_spill] sm:$0xff] %v2394_v58  ;;  %v2396_v59 = vpop.f32.mrf.mxu1  ;;  %v1579_v58 = vadd.f32 %v2290_v6, %v2286_v4  ;;  %v2555_v46 = vld [vmem:[#allocation4_spill] sm:$0xff] }
 0x11f   :  { %2550 = vst [vmem:[#allocation12_spill] sm:$0xff] %v2396_v59  ;;  %v2398_v60 = vpop.f32.mrf.mxu0 }
 0x120   :  { %2551 = vst [vmem:[#allocation13_spill] sm:$0xff] %v2398_v60  ;;  %v2400_v61 = vpop.f32.mrf.mxu1  ;;  %v1643_v60 = vadd.f32 %v2292_v7, %v2288_v5 }
 0x121   :  { %2552 = vst [vmem:[#allocation14_spill] sm:$0xff] %v2400_v61  ;;  %v2402_v62 = vpop.f32.mrf.mxu0 }
 0x122   :  { %2553 = vst [vmem:[#allocation15_spill] sm:$0xff] %v2402_v62  ;;  %v2406_v54 = vpop.f32.mrf.mxu1  ;;  %v1082_v6 = vadd.f32 %v1643_v60, %v1579_v58 }
 0x123   :  { %v1702_v55 = vpop.f32.mrf.mxu0 }
 0x124   :  { %v1766_v56 = vpop.f32.mrf.mxu1 }
 0x125   :  { %v1703_v52 = vpop.f32.mrf.mxu0 }
 0x126   :  { %v1704_v59 = vadd.f32 %v1703_v52, %v1702_v55  ;;  %v1767_v61 = vpop.f32.mrf.mxu1 }
 0x127   :  { %v1705_v51 = vpop.f32.mrf.mxu0  ;;  %v1768_v49 = vadd.f32 %v1767_v61, %v1766_v56 }
 0x128   :  { %v1176_v62 = vadd.f32 %v1704_v59, %v1079_v57  ;;  %v1769_v0 = vpop.f32.mrf.mxu1 }
 0x129   :  { %v1706_v4 = vpop.f32.mrf.mxu0 }
 0x12a   :  { %v1273_v5 = vadd.f32 %v1768_v49, %v1176_v62  ;;  %v1707_v7 = vadd.f32 %v1706_v4, %v1705_v51  ;;  %v1770_v52 = vpop.f32.mrf.mxu1 }
 0x12b   :  { %v1708_v53 = vpop.f32.mrf.mxu0  ;;  %v1771_v57 = vadd.f32 %v1770_v52, %v1769_v0 }
 0x12c   :  { %v1393_v55 = vadd.f32 %v2419_v3, %v1273_v5  ;;  %v1179_v56 = vadd.f32 %v1707_v7, %v1082_v6  ;;  %v1772_v59 = vpop.f32.mrf.mxu1 }
 0x12d   :  { %v1709_v10 = vpop.f32.mrf.mxu0 }
 0x12e   :  { %1409 = vst [vmem:[%s2540_s3] sm:$0xff] %v1393_v55  ;;  %v1276_v49 = vadd.f32 %v1771_v57, %v1179_v56  ;;  %v1710_v51 = vadd.f32 %v1709_v10, %v1708_v53  ;;  %v1773_v58 = vpop.f32.mrf.mxu1  ;;  %v1095_v55 = vadd.f32 %v1652_v12, %v1588_v1 }
 0x12f   :  { %v1711_v60 = vpop.f32.mrf.mxu0  ;;  %v1774_v63 = vadd.f32 %v1773_v58, %v1772_v59 }
 0x130   :  { %v1394_v61 = vadd.f32 %v2419_v3, %v1276_v49  ;;  %v1184_v62 = vadd.f32 %v1710_v51, %v1087_v8  ;;  %v1775_v0 = vpop.f32.mrf.mxu1  ;;  %v1594_v49 = vadd.f32 %v2330_v26, %v2326_v24  ;;  %v1661_v26 = vadd.f32 %v2340_v31, %v2336_v29 }
 0x131   :  { %v1712_v13 = vpop.f32.mrf.mxu0 }
 0x132   :  { %1410 = vst [vmem:[%s2540_s3 + $0x8] sm:$0xff] %v1394_v61  ;;  %v1281_v15 = vadd.f32 %v1774_v63, %v1184_v62  ;;  %v1713_v2 = vadd.f32 %v1712_v13, %v1711_v60  ;;  %v1776_v4 = vpop.f32.mrf.mxu1  ;;  %v1103_v1 = vadd.f32 %v1658_v20, %v1594_v49  ;;  %v1106_v30 = vadd.f32 %v1661_v26, %v1597_v25 }
 0x133   :  { %v1714_v6 = vpop.f32.mrf.mxu0  ;;  %v1777_v52 = vadd.f32 %v1776_v4, %v1775_v0  ;;  %v1606_v49 = vadd.f32 %v2362_v42, %v2358_v40  ;;  %v1673_v42 = vadd.f32 %v2372_v47, %v2368_v45 }
 0x134   :  { %v1395_v5 = vadd.f32 %v2419_v3, %v1281_v15  ;;  %v1187_v7 = vadd.f32 %v1713_v2, %v1090_v14  ;;  %v1778_v53 = vpop.f32.mrf.mxu1 }
 0x135   :  { %v1715_v16 = vpop.f32.mrf.mxu0  ;;  %v1122_v47 = vadd.f32 %v1673_v42, %v1609_v41 }
 0x136   :  { %1411 = vst [vmem:[%s2540_s3 + $0x10] sm:$0xff] %v1395_v5  ;;  %v1284_v19 = vadd.f32 %v1777_v52, %v1187_v7  ;;  %v1716_v56 = vadd.f32 %v1715_v16, %v1714_v6  ;;  %v1779_v57 = vpop.f32.mrf.mxu1  ;;  %v1600_v5 = vadd.f32 %v2346_v34, %v2342_v32  ;;  %v1667_v34 = vadd.f32 %v2356_v39, %v2352_v37 }
 0x137   :  { %v1717_v59 = vpop.f32.mrf.mxu0  ;;  %v1780_v9 = vadd.f32 %v1779_v57, %v1778_v53 }
 0x138   :  { %v1396_v8 = vadd.f32 %v2419_v3, %v1284_v19  ;;  %v1192_v10 = vadd.f32 %v1716_v56, %v1095_v55  ;;  %v1781_v11 = vpop.f32.mrf.mxu1  ;;  %v1111_v19 = vadd.f32 %v1664_v28, %v1600_v5  ;;  %v1114_v38 = vadd.f32 %v1667_v34, %v1603_v33 }
 0x139   :  { %v1718_v21 = vpop.f32.mrf.mxu0 }
 0x13a   :  { %1412 = vst [vmem:[%s2540_s3 + $0x18] sm:$0xff] %v1396_v8  ;;  %v1289_v23 = vadd.f32 %v1780_v9, %v1192_v10  ;;  %v1719_v51 = vadd.f32 %v1718_v21, %v1717_v59  ;;  %v1782_v58 = vpop.f32.mrf.mxu1 }
 0x13b   :  { %v1720_v60 = vpop.f32.mrf.mxu0  ;;  %v1783_v63 = vadd.f32 %v1782_v58, %v1781_v11 }
 0x13c   :  { %v1397_v61 = vadd.f32 %v2419_v3, %v1289_v23  ;;  %v1195_v62 = vadd.f32 %v1719_v51, %v1098_v22  ;;  %v1784_v0 = vpop.f32.mrf.mxu1 }
 0x13d   :  { %v1721_v24 = vpop.f32.mrf.mxu0 }
 0x13e   :  { %1413 = vst [vmem:[%s2540_s3 + $0x20] sm:$0xff] %v1397_v61  ;;  %v1292_v27 = vadd.f32 %v1783_v63, %v1195_v62  ;;  %v1722_v12 = vadd.f32 %v1721_v24, %v1720_v60  ;;  %v1785_v13 = vpop.f32.mrf.mxu1  ;;  %v1119_v61 = vadd.f32 %v1670_v36, %v1606_v49 }
 0x13f   :  { %v1723_v14 = vpop.f32.mrf.mxu0  ;;  %v1786_v4 = vadd.f32 %v1785_v13, %v1784_v0 }
 0x140   :  { %v1398_v15 = vadd.f32 %v2419_v3, %v1292_v27  ;;  %v1200_v2 = vadd.f32 %v1722_v12, %v1103_v1  ;;  %v1787_v6 = vpop.f32.mrf.mxu1  ;;  %v1612_v27 = vadd.f32 %v2378_v50, %v2374_v48  ;;  %v1676_v12 = vadd.f32 %v2555_v46, %v2554_v44  ;;  %v2556_v50 = vld [vmem:[#allocation5_spill] sm:$0xff] }
 0x141   :  { %v1724_v29 = vpop.f32.mrf.mxu0 }
 0x142   :  { %1414 = vst [vmem:[%s2540_s3 + $0x28] sm:$0xff] %v1398_v15  ;;  %v1297_v31 = vadd.f32 %v1786_v4, %v1200_v2  ;;  %v1725_v7 = vadd.f32 %v1724_v29, %v1723_v14  ;;  %v1788_v52 = vpop.f32.mrf.mxu1  ;;  %v1127_v29 = vadd.f32 %v1676_v12, %v1612_v27 }
 0x143   :  { %v1726_v53 = vpop.f32.mrf.mxu0  ;;  %v1789_v17 = vadd.f32 %v1788_v52, %v1787_v6  ;;  %v2559_v52 = vld [vmem:[#allocation8_spill] sm:$0xff] }
 0x144   :  { %v1399_v55 = vadd.f32 %v2419_v3, %v1297_v31  ;;  %v1203_v16 = vadd.f32 %v1725_v7, %v1106_v30  ;;  %v1790_v18 = vpop.f32.mrf.mxu1  ;;  %v2557_v30 = vld [vmem:[#allocation7_spill] sm:$0xff]  ;;  %v2558_v7 = vld [vmem:[#allocation6_spill] sm:$0xff] }
 0x145   :  { %v1727_v32 = vpop.f32.mrf.mxu0  ;;  %v1615_v31 = vadd.f32 %v2557_v30, %v2556_v50 }
 0x146   :  { %1415 = vst [vmem:[%s2540_s3 + $0x30] sm:$0xff] %v1399_v55  ;;  %v1300_v35 = vadd.f32 %v1789_v17, %v1203_v16  ;;  %v1728_v56 = vadd.f32 %v1727_v32, %v1726_v53  ;;  %v1791_v57 = vpop.f32.mrf.mxu1  ;;  %v1679_v53 = vadd.f32 %v2559_v52, %v2558_v7 }
 0x147   :  { %v1729_v59 = vpop.f32.mrf.mxu0  ;;  %v1792_v9 = vadd.f32 %v1791_v57, %v1790_v18 }
 0x148   :  { %v1400_v8 = vadd.f32 %v2419_v3, %v1300_v35  ;;  %v1208_v10 = vadd.f32 %v1728_v56, %v1111_v19  ;;  %v1793_v11 = vpop.f32.mrf.mxu1  ;;  %v2560_v35 = vld [vmem:[#allocation9_spill] sm:$0xff]  ;;  %v2561_v56 = vld [vmem:[#allocation11_spill] sm:$0xff] }
 0x149   :  { %v1730_v37 = vpop.f32.mrf.mxu0  ;;  %v1618_v57 = vadd.f32 %v2561_v56, %v2560_v35 }
 0x14a   :  { %1416 = vst [vmem:[%s2540_s3 + $0x38] sm:$0xff] %v1400_v8  ;;  %v1305_v39 = vadd.f32 %v1792_v9, %v1208_v10  ;;  %v1731_v20 = vadd.f32 %v1730_v37, %v1729_v59  ;;  %v1794_v21 = vpop.f32.mrf.mxu1  ;;  %v2562_v59 = vld [vmem:[#allocation10_spill] sm:$0xff]  ;;  %v2563_v8 = vld [vmem:[#allocation12_spill] sm:$0xff] }
 0x14b   :  { %v1732_v22 = vpop.f32.mrf.mxu0  ;;  %v1795_v58 = vadd.f32 %v1794_v21, %v1793_v11  ;;  %v1682_v10 = vadd.f32 %v2563_v8, %v2562_v59  ;;  %v1130_v11 = vadd.f32 %v1679_v53, %v1615_v31 }
 0x14c   :  { %v1401_v23 = vadd.f32 %v2419_v3, %v1305_v39  ;;  %v1211_v51 = vadd.f32 %v1731_v20, %v1114_v38  ;;  %v1796_v60 = vpop.f32.mrf.mxu1 }
 0x14d   :  { %v1733_v40 = vpop.f32.mrf.mxu0 }
 0x14e   :  { %1417 = vst [vmem:[%s2540_s3 + $0x40] sm:$0xff] %v1401_v23  ;;  %v1308_v43 = vadd.f32 %v1795_v58, %v1211_v51  ;;  %v1734_v62 = vadd.f32 %v1733_v40, %v1732_v22  ;;  %v1797_v63 = vpop.f32.mrf.mxu1  ;;  %v1135_v23 = vadd.f32 %v1682_v10, %v1618_v57  ;;  %v2564_v58 = vld [vmem:[#allocation13_spill] sm:$0xff]  ;;  %v2566_v40 = vld [vmem:[#allocation14_spill] sm:$0xff] }
 0x14f   :  { %v1735_v0 = vpop.f32.mrf.mxu0  ;;  %v1798_v25 = vadd.f32 %v1797_v63, %v1796_v60  ;;  %v2565_v60 = vld [vmem:[#allocation15_spill] sm:$0xff]  ;;  %v1685_v41 = vadd.f32 %v2406_v54, %v2566_v40 }
 0x150   :  { %v1402_v1 = vadd.f32 %v2419_v3, %v1308_v43  ;;  %v1216_v24 = vadd.f32 %v1734_v62, %v1119_v61  ;;  %v1799_v26 = vpop.f32.mrf.mxu1  ;;  %v1621_v61 = vadd.f32 %v2565_v60, %v2564_v58 }
 0x151   :  { %v1736_v45 = vpop.f32.mrf.mxu0 }
 0x152   :  { %1418 = vst [vmem:[%s2540_s3 + $0x48] sm:$0xff] %v1402_v1  ;;  %v1313_v13 = vadd.f32 %v1798_v25, %v1216_v24  ;;  %v1737_v14 = vadd.f32 %v1736_v45, %v1735_v0  ;;  %v1800_v15 = vpop.f32.mrf.mxu1  ;;  %v1138_v27 = vadd.f32 %v1685_v41, %v1621_v61 }
 0x153   :  { %v1738_v2 = vpop.f32.mrf.mxu0  ;;  %v1801_v5 = vadd.f32 %v1800_v15, %v1799_v26 }
 0x154   :  { %v1403_v4 = vadd.f32 %v2419_v3, %v1313_v13  ;;  %v1219_v6 = vadd.f32 %v1737_v14, %v1122_v47  ;;  %v1802_v28 = vpop.f32.mrf.mxu1 }
 0x155   :  { %v1739_v48 = vpop.f32.mrf.mxu0 }
 0x156   :  { %1419 = vst [vmem:[%s2540_s3 + $0x50] sm:$0xff] %v1403_v4  ;;  %v1316_v55 = vadd.f32 %v1801_v5, %v1219_v6  ;;  %v1740_v16 = vadd.f32 %v1739_v48, %v1738_v2  ;;  %v1803_v17 = vpop.f32.mrf.mxu1 }
 0x157   :  { %v1741_v18 = vpop.f32.mrf.mxu0  ;;  %v1804_v33 = vadd.f32 %v1803_v17, %v1802_v28 }
 0x158   :  { %v1404_v19 = vadd.f32 %v2419_v3, %v1316_v55  ;;  %v1224_v32 = vadd.f32 %v1740_v16, %v1127_v29  ;;  %v1805_v34 = vpop.f32.mrf.mxu1 }
 0x159   :  { %v1742_v9 = vpop.f32.mrf.mxu0 }
 0x15a   :  { %1420 = vst [vmem:[%s2540_s3 + $0x58] sm:$0xff] %v1404_v19  ;;  %v1321_v49 = vadd.f32 %v1804_v33, %v1224_v32  ;;  %v1743_v36 = vadd.f32 %v1742_v9, %v1741_v18  ;;  %v1806_v37 = vpop.f32.mrf.mxu1 }
 0x15b   :  { %v1744_v38 = vpop.f32.mrf.mxu0  ;;  %v1807_v21 = vadd.f32 %v1806_v37, %v1805_v34 }
 0x15c   :  { %v1405_v39 = vadd.f32 %v2419_v3, %v1321_v49  ;;  %v1227_v20 = vadd.f32 %v1743_v36, %v1130_v11  ;;  %v1808_v22 = vpop.f32.mrf.mxu1 }
 0x15d   :  { %v1745_v51 = vpop.f32.mrf.mxu0 }
 0x15e   :  { %1421 = vst [vmem:[%s2540_s3 + $0x60] sm:$0xff] %v1405_v39  ;;  %v1324_v42 = vadd.f32 %v1807_v21, %v1227_v20  ;;  %v1746_v43 = vadd.f32 %v1745_v51, %v1744_v38  ;;  %v1809_v62 = vpop.f32.mrf.mxu1 }
 0x15f   :  { %v1747_v63 = vpop.f32.mrf.mxu0  ;;  %v1810_v24 = vadd.f32 %v1809_v62, %v1808_v22 }
 0x160   :  { %v1406_v0 = vadd.f32 %v2419_v3, %v1324_v42  ;;  %v1232_v1 = vadd.f32 %v1746_v43, %v1135_v23  ;;  %v1811_v25 = vpop.f32.mrf.mxu1 }
 0x161   :  { %v1748_v26 = vpop.f32.mrf.mxu0 }
 0x162   :  { %1422 = vst [vmem:[%s2540_s3 + $0x68] sm:$0xff] %v1406_v0  ;;  %v1329_v54 = vadd.f32 %v1810_v24, %v1232_v1  ;;  %v1749_v44 = vadd.f32 %v1748_v26, %v1747_v63  ;;  %v1812_v46 = vpop.f32.mrf.mxu1 }
 0x163   :  { %v1813_v47 = vadd.f32 %v1812_v46, %v1811_v25 }
 0x164   :  { %v1407_v12 = vadd.f32 %v2419_v3, %v1329_v54  ;;  %v1235_v45 = vadd.f32 %v1749_v44, %v1138_v27 }
 0x166   :  { %1423 = vst [vmem:[%s2540_s3 + $0x70] sm:$0xff] %v1407_v12  ;;  %v1332_v13 = vadd.f32 %v1813_v47, %v1235_v45 }
 0x168   :  { %v1408_v14 = vadd.f32 %v2419_v3, %v1332_v13 }
 0x16a   :  { %1424 = vst [vmem:[%s2540_s3 + $0x78] sm:$0xff] %v1408_v14 }

// kernel: discriminator_forward.12
= control target key start
LH: loop header
LB: loop body
LE: loop exit
PB: predicated region body
PF: predicated region fallthrough
CT: control target
= control target key end

     0   :  { %s465_s6 = smov 0   ;;  %s467_s7 = smov 0   ;;  %s565_s0 = inlined_call_operand.vmem [shape: f32[2,16,256], index: 0, kind: input, shape index: {}]   ;;  %s566_s1 = inlined_call_operand.vmem [shape: f32[2,16,256], index: 1, kind: output, shape index: {}]  }
   0x1   :  { %s469_s8 = smov 0   ;;  %s471_s9 = smov 0  }
   0x2   :  { %s473_s10 = smov 0   ;;  %s475_s11 = smov 0  }
   0x3   :  { %s477_s12 = smov 0  }
   0x4 LB: > { %s20_s13 = sadd.s32 1, %s445_s10  ;;  %s23_s14 = sadd.s32 1, %s449_s11  ;;  %s453_s12 = sphi %s477_s12, %s11_s12   ;;  %s449_s11 = sphi %s475_s11, %s573_s11   ;;  %s445_s10 = sphi %s473_s10, %s572_s10   ;;  %s441_s9 = sphi %s471_s9, %s571_s9   ;;  %s437_s8 = sphi %s469_s8, %s570_s8   ;;  %s433_s7 = sphi %s467_s7, %s569_s7   ;;  %s429_s6 = sphi %s465_s6, %s568_s6  }
   0x5   : > { %p21_p0 = scmp.ge.s32.totalorder %s20_s13, 2  ;;  %s326_s15 = sadd.s32 4294967295, %s453_s12  }
   0x6   : > { %p39_p1 = scmp.ne.s32.totalorder %s433_s7, %s429_s6  ;;  %p40_p2 = scmp.eq.s32.totalorder %s453_s12, 0 }
   0x7   : > { %s575_s13 = smov (%p21_p0, %s20_s13), 0  ;;  %s577_s14 = smov (!%p21_p0, %s23_s14), %s449_s11 }
   0x8   : > { %p25_p3 = scmp.ge.s32.totalorder %s577_s14, 2  ;;  %p71_p4 = scmp.eq.s32.totalorder %s326_s15, 3 }
   0x9   : > { %s28_s16 = ssub.s32 %s445_s10, %s575_s13  ;;  %p41_p5 = por %p40_p2, %p39_p1 }
   0xa   : > { %s579_s14 = smov (%p25_p3, %s577_s14), 0  ;;  %p513_p6 = por %p71_p4, %p39_p1 }
   0xb   : > { %s27_s18 = ssub.s32 %s449_s11, %s579_s14  ;;  %s32_s20 = sadd.s32 1, %s433_s7 }
   0xc   : > { %s29_s19 = sor.u32 %s28_s16, %s27_s18  ;;  %p329_p8 = scmp.ge.s32.totalorder %s453_s12, 4 }
   0xd   : > { %p30_p7 = scmp.eq.s32.totalorder %s29_s19, 0 }
   0xe   : > { %93 = sbr.rel (%p329_p8) target bundleno = 26 (0x1a), region = 16 }
   0xf   : > { %s521_s21 = scalar_select %p30_p7, %s433_s7, %s32_s20  }
  0x13   : > { %96 = sbr.rel (!%p41_p5) target bundleno = 26 (0x1a), region = 20  ;;  %s98_s22 = sand.u32 (%p41_p5), 1, %s433_s7  }
  0x14   : > { %s331_s23 = sshll.u32 (%p41_p5), %s449_s11, 2  ;;  %s330_s24 = sshll.u32 (%p41_p5), %s98_s22, 4 }
  0x15   : > { %s102_s25 = sadd.s32 (%p41_p5), %s445_s10, %s331_s23  ;;  %s100_s30 = scalar_lea.vmem (%p41_p5), [#allocation2], %s330_s24 }
  0x16   : > { %s332_s26 = sshll.u32 (%p41_p5), %s102_s25, 3 }
  0x17   : > { %s104_s29 = scalar_lea.vmem (%p41_p5), %s565_s0, %s332_s26 }
  0x18   : > { %v135_v0 = vld [vmem:[%s104_s29] sm:$0xff]  ;;  %v137_v1 = vld [vmem:[%s104_s29 + $0x10] sm:$0xff] }
  0x19   : > { %136 = vst [vmem:[%s100_s30] sm:$0xff] %v135_v0  ;;  %138 = vst [vmem:[%s100_s30 + $0x8] sm:$0xff] %v137_v1 }
  0x1a PF: > { %p333_p9 = scmp.ge.s32.totalorder %s453_s12, 1  ;;  %p143_p10 = scmp.lt.s32.totalorder %s453_s12, 5 }
  0x1c   : > { %p144_p11 = pnand %p333_p9, %p143_p10 }
  0x1d   : > { %s150_s2 = sand.u32 (!%p144_p11), 1, %s429_s6  }
  0x1e   : > { %147 = sbr.rel (%p144_p11) target bundleno = 88 (0x58), region = 58  ;;  %s533_s3 = sshll.u32 (!%p144_p11), %s150_s2, 4 }
  0x1f   : > { %s152_s4 = scalar_lea.vmem (!%p144_p11), [#allocation2], %s533_s3  ;;  %s167_s5 = scalar_lea.vmem (!%p144_p11), [#allocation3], %s533_s3 }
  0x23   : > { %v168_v2 = vld [vmem:[%s152_s4] sm:$0xff]  ;;  %v169_v3 = vld [vmem:[%s152_s4 + $0x8] sm:$0xff]  ;;  %s337_s6 = sshll.u32 (%p513_p6), %s441_s9, 2 }
  0x24   : > { %v170_v4 = vadd.f32 %v169_v3, %v168_v2  ;;  %v179_v5 = vmul.f32 %v168_v2, %v168_v2  ;;  %v180_v6 = vmul.f32 %v169_v3, %v169_v3  ;;  %s214_s15 = sadd.s32 (%p513_p6), %s437_s8, %s337_s6 }
  0x25   : > { %s338_s16 = sshll.u32 (%p513_p6), %s214_s15, 3 }
  0x26   : > { %v171_v7 = vrot.slane %v170_v4, 4  ;;  %v181_v8 = vadd.f32 %v180_v6, %v179_v5  ;;  %s216_s20 = scalar_lea.vmem (%p513_p6), %s566_s1, %s338_s16 }
  0x28   : > { %v172_v9 = vadd.f32 %v171_v7, %v170_v4  ;;  %v182_v10 = vrot.slane %v181_v8, 4 }
  0x2a   : > { %v173_v11 = vrot.slane %v172_v9, 2  ;;  %v183_v12 = vadd.f32 %v182_v10, %v181_v8 }
  0x2c   : > { %v174_v13 = vadd.f32 %v173_v11, %v172_v9  ;;  %v184_v14 = vrot.slane %v183_v12, 2 }
  0x2e   : > { %v175_v15 = vrot.slane %v174_v13, 1  ;;  %v185_v16 = vadd.f32 %v184_v14, %v183_v12 }
  0x30   : > { %v176_v17 = vadd.f32 %v175_v15, %v174_v13  ;;  %v186_v18 = vrot.slane %v185_v16, 1 }
  0x32   : > { %v178_v19 = vmul.f32 0.0625, %v176_v17  ;;  %v187_v20 = vadd.f32 %v186_v18, %v185_v16 }
  0x34   : > { %v188_v21 = vmul.f32 0.0625, %v187_v20  ;;  %v189_v22 = vmul.f32 %v178_v19, %v178_v19  ;;  %v192_v26 = vsub.f32 %v168_v2, %v178_v19  ;;  %v193_v27 = vsub.f32 %v169_v3, %v178_v19 }
  0x36   : > { %v190_v23 = vsub.f32 %v188_v21, %v189_v22 }
  0x38   : > { %v191_v24 = vmax.f32 %v190_v23, 0.0 }
  0x3a   : > { %v194_v25 = vadd.f32 1e-05, %v191_v24 }
  0x3c   : > { %397 = vrsqrt.f32 %v194_v25 }
  0x49   : > { %v398_v28 = vpop.eup %397 }
  0x4a   : > { %v196_v29 = vmul.f32 %v398_v28, %v192_v26  ;;  %v197_v30 = vmul.f32 %v398_v28, %v193_v27 }
  0x4b   : > { %212 = sbr.rel (!%p513_p6) target bundleno = 88 (0x58), region = 66 }
  0x4c   : > { %vm198_vm0 = vcmp.gt.f32.partialorder %v196_v29, 0.0  ;;  %v200_v31 = vmul.f32 0.2, %v196_v29  ;;  %vm199_vm1 = vcmp.gt.f32.partialorder %v197_v30, 0.0  ;;  %v201_v32 = vmul.f32 0.2, %v197_v30 }
  0x4e   : > { %v202_v33 = vsel %vm198_vm0, %v196_v29, %v200_v31  ;;  %v203_v34 = vsel %vm199_vm1, %v197_v30, %v201_v32 }
  0x4f   : > { %204 = vst [vmem:[%s167_s5] sm:$0xff] %v202_v33  ;;  %205 = vst [vmem:[%s167_s5 + $0x8] sm:$0xff] %v203_v34 }
  0x56   : > { %v247_v35 = vld [vmem:[%s167_s5] sm:$0xff]  ;;  %v249_v36 = vld [vmem:[%s167_s5 + $0x8] sm:$0xff] }
  0x57   : > { %248 = vst [vmem:[%s216_s20] sm:$0xff] %v247_v35  ;;  %250 = vst [vmem:[%s216_s20 + $0x10] sm:$0xff] %v249_v36 }
  0x58 PF: > { %s11_s12 = sadd.s32 1, %s453_s12   ;;  %s568_s6 = smov %s433_s7 }
  0x59   : > { %p8_p12 = scmp.ge.s32.totalorder %s11_s12, 6   ;;  %s569_s7 = smov %s521_s21 }
  0x5a   : > { %s570_s8 = smov %s445_s10  ;;  %s571_s9 = smov %s449_s11 }
  0x5b   : > { %s572_s10 = smov %s575_s13  ;;  %s573_s11 = smov %s579_s14 }
  0x5c   :  { %10 = sbr.rel (!%p8_p12) target bundleno = 4 (0x4), region = 135 }

// kernel: discriminator_forward.11
= control target key start
LH: loop header
LB: loop body
LE: loop exit
PB: predicated region body
PF: predicated region fallthrough
CT: control target
= control target key end

     0   :  { %s3888_s1 = inlined_call_operand.vmem [shape: bf16[2048,256], index: 1, kind: input, shape index: {}]   ;;  %s3889_s0 = inlined_call_operand.vmem [shape: bf16[32,2048], index: 0, kind: input, shape index: {}]   ;;  %s3890_s2 = inlined_call_operand.vmem [shape: f32[1,256], index: 2, kind: input, shape index: {}]   ;;  %s3891_s3 = inlined_call_operand.vmem [shape: f32[32,256], index: 3, kind: output, shape index: {}]  }
   0x1   :  { %v2533_v0 = vld [vmem:[%s3888_s1 + $0x74] ss:$8 sps:$4 sm:$0xff]   ;;  %v2537_v2 = vld [vmem:[%s3888_s1 + $0x70] ss:$8 sps:$4 sm:$0xff]   ;;  %v2539_v4 = vld [vmem:[%s3888_s1 + $0x64] ss:$8 sps:$4 sm:$0xff]  }
   0x2   :  { %v2535_v1 = vld [vmem:[%s3888_s1 + $0x174] ss:$8 sps:$4 sm:$0xff]   ;;  %1762 = vmatprep.subr.bf16.mxu0 %v2533_v0  ;;  %v2538_v3 = vld [vmem:[%s3888_s1 + $0x170] ss:$8 sps:$4 sm:$0xff]   ;;  %v2541_v5 = vld [vmem:[%s3888_s1 + $0x164] ss:$8 sps:$4 sm:$0xff]  }
   0x3   :  { %1815 = vmatprep.subr.bf16.mxu1 %v2535_v1  ;;  %1763 = vmatpush1.bf16.msra.mxu0 %v2537_v2  ;;  %v2543_v6 = vld [vmem:[%s3888_s1 + $0x60] ss:$8 sps:$4 sm:$0xff]   ;;  %v2545_v8 = vld [vmem:[%s3888_s1 + $0x54] ss:$8 sps:$4 sm:$0xff]   ;;  %v2549_v10 = vld [vmem:[%s3888_s1 + $0x50] ss:$8 sps:$4 sm:$0xff]  }
   0x4   :  { %1816 = vmatpush1.bf16.msra.mxu1 %v2538_v3  ;;  %1764 = vmatprep.subr.bf16.mxu0 %v2539_v4  ;;  %v2544_v7 = vld [vmem:[%s3888_s1 + $0x160] ss:$8 sps:$4 sm:$0xff]   ;;  %v2547_v9 = vld [vmem:[%s3888_s1 + $0x154] ss:$8 sps:$4 sm:$0xff]   ;;  %v2550_v11 = vld [vmem:[%s3888_s1 + $0x150] ss:$8 sps:$4 sm:$0xff]  }
   0x5   :  { %1817 = vmatprep.subr.bf16.mxu1 %v2541_v5  ;;  %v2551_v12 = vld [vmem:[%s3888_s1 + $0x44] ss:$8 sps:$4 sm:$0xff]   ;;  %v2555_v14 = vld [vmem:[%s3888_s1 + $0x40] ss:$8 sps:$4 sm:$0xff]   ;;  %v2557_v16 = vld [vmem:[%s3888_s1 + $0x34] ss:$8 sps:$4 sm:$0xff]  }
   0x6   :  { %v2553_v13 = vld [vmem:[%s3888_s1 + $0x144] ss:$8 sps:$4 sm:$0xff]   ;;  %v2556_v15 = vld [vmem:[%s3888_s1 + $0x140] ss:$8 sps:$4 sm:$0xff]   ;;  %v2559_v17 = vld [vmem:[%s3888_s1 + $0x134] ss:$8 sps:$4 sm:$0xff]  }
   0x7   :  { %1765 = vmatpush1.bf16.msra.mxu0 %v2543_v6  ;;  %v2561_v18 = vld [vmem:[%s3888_s1 + $0x30] ss:$8 sps:$4 sm:$0xff]   ;;  %v2563_v20 = vld [vmem:[%s3888_s1 + $0x24] ss:$8 sps:$4 sm:$0xff]   ;;  %v2567_v22 = vld [vmem:[%s3888_s1 + $0x20] ss:$8 sps:$4 sm:$0xff]  }
   0x8   :  { %1818 = vmatpush1.bf16.msra.mxu1 %v2544_v7  ;;  %1766 = vmatprep.subr.bf16.mxu0 %v2545_v8  ;;  %v2562_v19 = vld [vmem:[%s3888_s1 + $0x130] ss:$8 sps:$4 sm:$0xff]   ;;  %v2565_v21 = vld [vmem:[%s3888_s1 + $0x124] ss:$8 sps:$4 sm:$0xff]   ;;  %v2568_v23 = vld [vmem:[%s3888_s1 + $0x120] ss:$8 sps:$4 sm:$0xff]  }
   0x9   :  { %1819 = vmatprep.subr.bf16.mxu1 %v2547_v9  ;;  %v2569_v24 = vld [vmem:[%s3888_s1 + $0x14] ss:$8 sps:$4 sm:$0xff]   ;;  %v2573_v26 = vld [vmem:[%s3888_s1 + $0x10] ss:$8 sps:$4 sm:$0xff]   ;;  %v2575_v28 = vld [vmem:[%s3888_s1 + $0x4] ss:$8 sps:$4 sm:$0xff]  }
   0xa   :  { %v2571_v25 = vld [vmem:[%s3888_s1 + $0x114] ss:$8 sps:$4 sm:$0xff]   ;;  %v2574_v27 = vld [vmem:[%s3888_s1 + $0x110] ss:$8 sps:$4 sm:$0xff]   ;;  %v2577_v29 = vld [vmem:[%s3888_s1 + $0x104] ss:$8 sps:$4 sm:$0xff]  }
   0xb   :  { %1767 = vmatpush1.bf16.msra.mxu0 %v2549_v10  ;;  %v2579_v30 = vld [vmem:[%s3888_s1] ss:$8 sps:$4 sm:$0xff]   ;;  %v2581_v32 = vld [vmem:[%s3888_s1 + $0xf4] ss:$8 sps:$4 sm:$0xff]   ;;  %v2585_v34 = vld [vmem:[%s3888_s1 + $0xf0] ss:$8 sps:$4 sm:$0xff]  }
   0xc   :  { %1820 = vmatpush1.bf16.msra.mxu1 %v2550_v11  ;;  %1768 = vmatprep.subr.bf16.mxu0 %v2551_v12  ;;  %v2580_v31 = vld [vmem:[%s3888_s1 + $0x100] ss:$8 sps:$4 sm:$0xff]   ;;  %v2583_v33 = vld [vmem:[%s3888_s1 + $0x1f4] ss:$8 sps:$4 sm:$0xff]   ;;  %v2586_v35 = vld [vmem:[%s3888_s1 + $0x1f0] ss:$8 sps:$4 sm:$0xff]  }
   0xd   :  { %1821 = vmatprep.subr.bf16.mxu1 %v2553_v13  ;;  %v2587_v36 = vld [vmem:[%s3888_s1 + $0xe4] ss:$8 sps:$4 sm:$0xff]   ;;  %v2591_v38 = vld [vmem:[%s3888_s1 + $0xe0] ss:$8 sps:$4 sm:$0xff]   ;;  %v2593_v40 = vld [vmem:[%s3888_s1 + $0xd4] ss:$8 sps:$4 sm:$0xff]  }
   0xe   :  { %v2589_v37 = vld [vmem:[%s3888_s1 + $0x1e4] ss:$8 sps:$4 sm:$0xff]   ;;  %v2592_v39 = vld [vmem:[%s3888_s1 + $0x1e0] ss:$8 sps:$4 sm:$0xff]   ;;  %v2595_v41 = vld [vmem:[%s3888_s1 + $0x1d4] ss:$8 sps:$4 sm:$0xff]  }
   0xf   :  { %1769 = vmatpush1.bf16.msra.mxu0 %v2555_v14  ;;  %v2597_v42 = vld [vmem:[%s3888_s1 + $0xd0] ss:$8 sps:$4 sm:$0xff]   ;;  %v2599_v44 = vld [vmem:[%s3888_s1 + $0xc4] ss:$8 sps:$4 sm:$0xff]   ;;  %v2603_v46 = vld [vmem:[%s3888_s1 + $0xc0] ss:$8 sps:$4 sm:$0xff]  }
  0x10   :  { %1822 = vmatpush1.bf16.msra.mxu1 %v2556_v15  ;;  %1770 = vmatprep.subr.bf16.mxu0 %v2557_v16  ;;  %v2598_v43 = vld [vmem:[%s3888_s1 + $0x1d0] ss:$8 sps:$4 sm:$0xff]   ;;  %v2601_v45 = vld [vmem:[%s3888_s1 + $0x1c4] ss:$8 sps:$4 sm:$0xff]   ;;  %v2604_v47 = vld [vmem:[%s3888_s1 + $0x1c0] ss:$8 sps:$4 sm:$0xff]  }
  0x11   :  { %1823 = vmatprep.subr.bf16.mxu1 %v2559_v17  ;;  %v34_v48 = vld [vmem:[%s3889_s0] sm:$0xff]  ;;  %v35_v50 = vld [vmem:[%s3889_s0 + $0x8] sm:$0xff]  ;;  %v2605_v52 = vld [vmem:[%s3888_s1 + $0xb4] ss:$8 sps:$4 sm:$0xff]  }
  0x12   :  { %v42_v49 = vld [vmem:[%s3889_s0 + $0x40] sm:$0xff]  ;;  %v43_v51 = vld [vmem:[%s3889_s0 + $0x48] sm:$0xff]  ;;  %v2607_v54 = vld [vmem:[%s3888_s1 + $0x1b4] ss:$8 sps:$4 sm:$0xff]  }
  0x13   :  { %1771 = vmatpush1.bf16.msra.mxu0 %v2561_v18  ;;  %v2246_v53 = vcombine.high %v34_v48, %v42_v49  ;;  %v2248_v55 = vcombine.high %v35_v50, %v43_v51  ;;  %v2609_v56 = vld [vmem:[%s3888_s1 + $0xb0] ss:$8 sps:$4 sm:$0xff]   ;;  %v2611_v58 = vld [vmem:[%s3888_s1 + $0xa4] ss:$8 sps:$4 sm:$0xff]   ;;  %v2615_v60 = vld [vmem:[%s3888_s1 + $0xa0] ss:$8 sps:$4 sm:$0xff]   ;;  %v2245_v8 = vcombine.low %v34_v48, %v42_v49  ;;  %v2247_v9 = vcombine.low %v35_v50, %v43_v51 }
  0x14   :  { %1824 = vmatpush1.bf16.msra.mxu1 %v2562_v19  ;;  %1772 = vmatprep.subr.bf16.mxu0 %v2563_v20  ;;  %v2610_v57 = vld [vmem:[%s3888_s1 + $0x1b0] ss:$8 sps:$4 sm:$0xff]   ;;  %v2613_v59 = vld [vmem:[%s3888_s1 + $0x1a4] ss:$8 sps:$4 sm:$0xff]   ;;  %v2616_v61 = vld [vmem:[%s3888_s1 + $0x1a0] ss:$8 sps:$4 sm:$0xff]  }
  0x15   :  { %1825 = vmatprep.subr.bf16.mxu1 %v2565_v21  ;;  %1794 = vmatprep.mubr.bf16.mxu0 %v2246_v53  ;;  %v2617_v62 = vld [vmem:[%s3888_s1 + $0x94] ss:$8 sps:$4 sm:$0xff]   ;;  %v2621_v0 = vld [vmem:[%s3888_s1 + $0x90] ss:$8 sps:$4 sm:$0xff]   ;;  %v2623_v2 = vld [vmem:[%s3888_s1 + $0x84] ss:$8 sps:$4 sm:$0xff]  }
  0x16   :  { %1847 = vmatprep.mubr.bf16.mxu1 %v2248_v55  ;;  %v2619_v63 = vld [vmem:[%s3888_s1 + $0x194] ss:$8 sps:$4 sm:$0xff]   ;;  %v2622_v1 = vld [vmem:[%s3888_s1 + $0x190] ss:$8 sps:$4 sm:$0xff]   ;;  %v2625_v3 = vld [vmem:[%s3888_s1 + $0x184] ss:$8 sps:$4 sm:$0xff]  }
  0x17   :  { %1773 = vmatpush1.bf16.msra.mxu0 %v2567_v22  ;;  %v2627_v4 = vld [vmem:[%s3888_s1 + $0x80] ss:$8 sps:$4 sm:$0xff]   ;;  %v2631_v6 = vld [vmem:[%s3888_s1 + $0x274] ss:$8 sps:$4 sm:$0xff]   ;;  %v2629_v10 = vld [vmem:[%s3888_s1 + $0x270] ss:$8 sps:$4 sm:$0xff]  }
  0x18   :  { %1826 = vmatpush1.bf16.msra.mxu1 %v2568_v23  ;;  %1774 = vmatprep.subr.bf16.mxu0 %v2569_v24  ;;  %v2628_v5 = vld [vmem:[%s3888_s1 + $0x180] ss:$8 sps:$4 sm:$0xff]   ;;  %v2634_v7 = vld [vmem:[%s3888_s1 + $0x374] ss:$8 sps:$4 sm:$0xff]   ;;  %v2632_v11 = vld [vmem:[%s3888_s1 + $0x370] ss:$8 sps:$4 sm:$0xff]  }
  0x19   :  { %1827 = vmatprep.subr.bf16.mxu1 %v2571_v25  ;;  %v2637_v12 = vld [vmem:[%s3888_s1 + $0x264] ss:$8 sps:$4 sm:$0xff]   ;;  %v2635_v14 = vld [vmem:[%s3888_s1 + $0x260] ss:$8 sps:$4 sm:$0xff]   ;;  %v2643_v16 = vld [vmem:[%s3888_s1 + $0x254] ss:$8 sps:$4 sm:$0xff]  }
  0x1a   :  { %v2640_v13 = vld [vmem:[%s3888_s1 + $0x364] ss:$8 sps:$4 sm:$0xff]   ;;  %v2638_v15 = vld [vmem:[%s3888_s1 + $0x360] ss:$8 sps:$4 sm:$0xff]   ;;  %v2646_v17 = vld [vmem:[%s3888_s1 + $0x354] ss:$8 sps:$4 sm:$0xff]  }
  0x1b   :  { %1775 = vmatpush1.bf16.msra.mxu0 %v2573_v26  ;;  %v2641_v18 = vld [vmem:[%s3888_s1 + $0x250] ss:$8 sps:$4 sm:$0xff]   ;;  %v2649_v20 = vld [vmem:[%s3888_s1 + $0x244] ss:$8 sps:$4 sm:$0xff]   ;;  %v2647_v22 = vld [vmem:[%s3888_s1 + $0x240] ss:$8 sps:$4 sm:$0xff]  }
  0x1c   :  { %1828 = vmatpush1.bf16.msra.mxu1 %v2574_v27  ;;  %1776 = vmatprep.subr.bf16.mxu0 %v2575_v28  ;;  %v2644_v19 = vld [vmem:[%s3888_s1 + $0x350] ss:$8 sps:$4 sm:$0xff]   ;;  %v2652_v21 = vld [vmem:[%s3888_s1 + $0x344] ss:$8 sps:$4 sm:$0xff]   ;;  %v2650_v23 = vld [vmem:[%s3888_s1 + $0x340] ss:$8 sps:$4 sm:$0xff]  }
  0x1d   :  { %1829 = vmatprep.subr.bf16.mxu1 %v2577_v29  ;;  %v2655_v24 = vld [vmem:[%s3888_s1 + $0x234] ss:$8 sps:$4 sm:$0xff]   ;;  %v2653_v26 = vld [vmem:[%s3888_s1 + $0x230] ss:$8 sps:$4 sm:$0xff]   ;;  %v50_v28 = vld [vmem:[%s3889_s0 + $0x80] sm:$0xff] }
  0x1e   :  { %v2658_v25 = vld [vmem:[%s3888_s1 + $0x334] ss:$8 sps:$4 sm:$0xff]   ;;  %v2656_v27 = vld [vmem:[%s3888_s1 + $0x330] ss:$8 sps:$4 sm:$0xff]   ;;  %v58_v29 = vld [vmem:[%s3889_s0 + $0xc0] sm:$0xff] }
  0x1f   :  { %1777 = vmatpush1.bf16.msra.mxu0 %v2579_v30  ;;  %v51_v30 = vld [vmem:[%s3889_s0 + $0x88] sm:$0xff]  ;;  %v3256_v48 = vld [vmem:[%s3889_s0 + $0x18] sm:$0xff] }
  0x20   :  { %1830 = vmatpush1.bf16.msra.mxu1 %v2580_v31  ;;  %1778 = vmatprep.subr.bf16.mxu0 %v2581_v32  ;;  %v59_v31 = vld [vmem:[%s3889_s0 + $0xc8] sm:$0xff]  ;;  %v3263_v50 = vld [vmem:[%s3889_s0 + $0x58] sm:$0xff] }
  0x21   :  { %1831 = vmatprep.subr.bf16.mxu1 %v2583_v33  ;;  %v2661_v32 = vld [vmem:[%s3888_s1 + $0x224] ss:$8 sps:$4 sm:$0xff]   ;;  %v2262_v33 = vcombine.high %v50_v28, %v58_v29  ;;  %v2252_v51 = vcombine.high %v3256_v48, %v3263_v50  ;;  %v2674_v53 = vld [vmem:[%s3888_s1 + $0x300] ss:$8 sps:$4 sm:$0xff]   ;;  %v2682_v55 = vld [vmem:[%s3888_s1 + $0x3f4] ss:$8 sps:$4 sm:$0xff]  }
  0x23   :  { %1779 = vmatpush2.bf16.msra.mxu0 %v2585_v34  ;;  %v2264_v34 = vcombine.high %v51_v30, %v59_v31 }
  0x24   :  { %1832 = vmatpush2.bf16.msra.mxu1 %v2586_v35  ;;  %1780 = vmatprep.subr.bf16.mxu0 %v2587_v36  ;;  %v2261_v35 = vcombine.low %v50_v28, %v58_v29  ;;  %v2664_v36 = vld [vmem:[%s3888_s1 + $0x324] ss:$8 sps:$4 sm:$0xff]   ;;  %v2251_v29 = vcombine.low %v3256_v48, %v3263_v50 }
  0x25   :  { %1833 = vmatprep.subr.bf16.mxu1 %v2589_v37  ;;  %v2263_v37 = vcombine.low %v51_v30, %v59_v31  ;;  %v53_v30 = vld [vmem:[%s3889_s0 + $0x98] sm:$0xff]  ;;  %v2745_v48 = vld [vmem:[%s3888_s1 + $0x444] ss:$8 sps:$4 sm:$0xff]  }
  0x26   :  { %v61_v31 = vld [vmem:[%s3889_s0 + $0xd8] sm:$0xff] }
  0x27   :  { %1781 = vmatpush2.bf16.msra.mxu0 %v2591_v38  ;;  %v2659_v38 = vld [vmem:[%s3888_s1 + $0x220] ss:$8 sps:$4 sm:$0xff]  }
  0x28   :  { %1834 = vmatpush2.bf16.msra.mxu1 %v2592_v39  ;;  %1782 = vmatprep.subr.bf16.mxu0 %v2593_v40  ;;  %v2662_v39 = vld [vmem:[%s3888_s1 + $0x320] ss:$8 sps:$4 sm:$0xff]   ;;  %v2667_v40 = vld [vmem:[%s3888_s1 + $0x214] ss:$8 sps:$4 sm:$0xff]  }
  0x29   :  { %1835 = vmatprep.subr.bf16.mxu1 %v2595_v41  ;;  %v2670_v41 = vld [vmem:[%s3888_s1 + $0x314] ss:$8 sps:$4 sm:$0xff]  }
  0x2b   :  { %1783 = vmatpush2.bf16.msra.mxu0 %v2597_v42  ;;  %v2665_v42 = vld [vmem:[%s3888_s1 + $0x210] ss:$8 sps:$4 sm:$0xff]  }
  0x2c   :  { %1836 = vmatpush2.bf16.msra.mxu1 %v2598_v43  ;;  %1784 = vmatprep.subr.bf16.mxu0 %v2599_v44  ;;  %v2668_v43 = vld [vmem:[%s3888_s1 + $0x310] ss:$8 sps:$4 sm:$0xff]   ;;  %v2673_v44 = vld [vmem:[%s3888_s1 + $0x204] ss:$8 sps:$4 sm:$0xff]  }
  0x2d   :  { %1837 = vmatprep.subr.bf16.mxu1 %v2601_v45  ;;  %v2676_v45 = vld [vmem:[%s3888_s1 + $0x304] ss:$8 sps:$4 sm:$0xff]  }
  0x2f   :  { %1785 = vmatpush2.bf16.msra.mxu0 %v2603_v46  ;;  %v3246_v46 = vld [vmem:[%s3889_s0 + $0x10] sm:$0xff] }
  0x30   :  { %1838 = vmatpush2.bf16.msra.mxu1 %v2604_v47  ;;  %1786 = vmatprep.subr.bf16.mxu0 %v2605_v52  ;;  %v3251_v47 = vld [vmem:[%s3889_s0 + $0x50] sm:$0xff]  ;;  %v2671_v52 = vld [vmem:[%s3888_s1 + $0x200] ss:$8 sps:$4 sm:$0xff]  }
  0x31   :  { %1839 = vmatprep.subr.bf16.mxu1 %v2607_v54  ;;  %v2250_v49 = vcombine.high %v3246_v46, %v3251_v47  ;;  %v2679_v54 = vld [vmem:[%s3888_s1 + $0x2f4] ss:$8 sps:$4 sm:$0xff]   ;;  %v2249_v28 = vcombine.low %v3246_v46, %v3251_v47  ;;  %v3434_v46 = vld [vmem:[%s3889_s0 + $0x28] sm:$0xff] }
  0x32   :  { %v3439_v47 = vld [vmem:[%s3889_s0 + $0x68] sm:$0xff] }
  0x33   :  { %1787 = vmatpush2.bf16.msra.mxu0 %v2609_v56  ;;  %v2677_v56 = vld [vmem:[%s3888_s1 + $0x2f0] ss:$8 sps:$4 sm:$0xff]  }
  0x34   :  { %1840 = vmatpush2.bf16.msra.mxu1 %v2610_v57  ;;  %1788 = vmatprep.subr.bf16.mxu0 %v2611_v58  ;;  %v2680_v57 = vld [vmem:[%s3888_s1 + $0x3f0] ss:$8 sps:$4 sm:$0xff]   ;;  %v2685_v58 = vld [vmem:[%s3888_s1 + $0x2e4] ss:$8 sps:$4 sm:$0xff]  }
  0x35   :  { %1841 = vmatprep.subr.bf16.mxu1 %v2613_v59  ;;  %v2688_v59 = vld [vmem:[%s3888_s1 + $0x3e4] ss:$8 sps:$4 sm:$0xff]  }
  0x37   :  { %1789 = vmatpush2.bf16.msra.mxu0 %v2615_v60  ;;  %v2683_v60 = vld [vmem:[%s3888_s1 + $0x2e0] ss:$8 sps:$4 sm:$0xff]  }
  0x38   :  { %1842 = vmatpush2.bf16.msra.mxu1 %v2616_v61  ;;  %1790 = vmatprep.subr.bf16.mxu0 %v2617_v62  ;;  %v2686_v61 = vld [vmem:[%s3888_s1 + $0x3e0] ss:$8 sps:$4 sm:$0xff]   ;;  %v2691_v62 = vld [vmem:[%s3888_s1 + $0x2d4] ss:$8 sps:$4 sm:$0xff]  }
  0x39   :  { %1843 = vmatprep.subr.bf16.mxu1 %v2619_v63  ;;  %v2694_v63 = vld [vmem:[%s3888_s1 + $0x3d4] ss:$8 sps:$4 sm:$0xff]  }
  0x3b   :  { %1791 = vmatpush2.bf16.msra.mxu0 %v2621_v0  ;;  %v2689_v0 = vld [vmem:[%s3888_s1 + $0x2d0] ss:$8 sps:$4 sm:$0xff]  }
  0x3c   :  { %1844 = vmatpush2.bf16.msra.mxu1 %v2622_v1  ;;  %1792 = vmatprep.subr.bf16.mxu0 %v2623_v2  ;;  %v2692_v1 = vld [vmem:[%s3888_s1 + $0x3d0] ss:$8 sps:$4 sm:$0xff]   ;;  %v2697_v2 = vld [vmem:[%s3888_s1 + $0x2c4] ss:$8 sps:$4 sm:$0xff]  }
  0x3d   :  { %1845 = vmatprep.subr.bf16.mxu1 %v2625_v3  ;;  %v2700_v3 = vld [vmem:[%s3888_s1 + $0x3c4] ss:$8 sps:$4 sm:$0xff]  }
  0x3f   :  { %1793 = vmatpush2.bf16.msra.mxu0 %v2627_v4  ;;  %v2695_v4 = vld [vmem:[%s3888_s1 + $0x2c0] ss:$8 sps:$4 sm:$0xff]  }
  0x40   :  { %1846 = vmatpush2.bf16.msra.mxu1 %v2628_v5  ;;  %1868 = vmatprep.subr.bf16.mxu0 %v2631_v6  ;;  %v2698_v5 = vld [vmem:[%s3888_s1 + $0x3c0] ss:$8 sps:$4 sm:$0xff]   ;;  %v2703_v6 = vld [vmem:[%s3888_s1 + $0x2b4] ss:$8 sps:$4 sm:$0xff]  }
  0x41   :  { %1921 = vmatprep.subr.bf16.mxu1 %v2634_v7  ;;  %v2706_v7 = vld [vmem:[%s3888_s1 + $0x3b4] ss:$8 sps:$4 sm:$0xff]  }
  0x42   :  { %1795 = vmatmul.mubr.bf16.vlgmr.msra.gmra.mxu0 %v2245_v8  ;;  %v2701_v8 = vld [vmem:[%s3888_s1 + $0x2b0] ss:$8 sps:$4 sm:$0xff]  }
  0x43   :  { %1848 = vmatmul.mubr.bf16.vlgmr.msra.gmra.mxu1 %v2247_v9  ;;  %1869 = vmatpush1.bf16.msra.mxu0 %v2629_v10  ;;  %v2704_v9 = vld [vmem:[%s3888_s1 + $0x3b0] ss:$8 sps:$4 sm:$0xff]   ;;  %v2709_v10 = vld [vmem:[%s3888_s1 + $0x2a4] ss:$8 sps:$4 sm:$0xff]  }
  0x44   :  { %1922 = vmatpush1.bf16.msra.mxu1 %v2632_v11  ;;  %1870 = vmatprep.subr.bf16.mxu0 %v2637_v12  ;;  %v2712_v11 = vld [vmem:[%s3888_s1 + $0x3a4] ss:$8 sps:$4 sm:$0xff]   ;;  %v2707_v12 = vld [vmem:[%s3888_s1 + $0x2a0] ss:$8 sps:$4 sm:$0xff]  }
  0x45   :  { %1923 = vmatprep.subr.bf16.mxu1 %v2640_v13  ;;  %1804 = vmatprep.mubr.bf16.mxu0 %v2262_v33  ;;  %v2710_v13 = vld [vmem:[%s3888_s1 + $0x3a0] ss:$8 sps:$4 sm:$0xff]   ;;  %v2736_v33 = vld [vmem:[%s3888_s1 + $0x564] ss:$8 sps:$4 sm:$0xff]  }
  0x46   :  { %1857 = vmatprep.mubr.bf16.mxu1 %v2264_v34 }
  0x47   :  { %1871 = vmatpush1.bf16.msra.mxu0 %v2635_v14  ;;  %v2715_v14 = vld [vmem:[%s3888_s1 + $0x294] ss:$8 sps:$4 sm:$0xff]  }
  0x48   :  { %1924 = vmatpush1.bf16.msra.mxu1 %v2638_v15  ;;  %1872 = vmatprep.subr.bf16.mxu0 %v2643_v16  ;;  %v2718_v15 = vld [vmem:[%s3888_s1 + $0x394] ss:$8 sps:$4 sm:$0xff]   ;;  %v2713_v16 = vld [vmem:[%s3888_s1 + $0x290] ss:$8 sps:$4 sm:$0xff]  }
  0x49   :  { %1925 = vmatprep.subr.bf16.mxu1 %v2646_v17  ;;  %v2716_v17 = vld [vmem:[%s3888_s1 + $0x390] ss:$8 sps:$4 sm:$0xff]  }
  0x4a   :  { %1805 = vmatmul.mubr.bf16.gmra.mxu0 %v2261_v35  ;;  %v2268_v35 = vcombine.high %v53_v30, %v61_v31 }
  0x4b   :  { %1873 = vmatpush1.bf16.msra.mxu0 %v2641_v18  ;;  %1858 = vmatmul.mubr.bf16.gmra.mxu1 %v2263_v37  ;;  %v2721_v18 = vld [vmem:[%s3888_s1 + $0x284] ss:$8 sps:$4 sm:$0xff]   ;;  %v2734_v37 = vld [vmem:[%s3888_s1 + $0x560] ss:$8 sps:$4 sm:$0xff]  }
  0x4c   :  { %1926 = vmatpush1.bf16.msra.mxu1 %v2644_v19  ;;  %1874 = vmatprep.subr.bf16.mxu0 %v2649_v20  ;;  %v2724_v19 = vld [vmem:[%s3888_s1 + $0x384] ss:$8 sps:$4 sm:$0xff]   ;;  %v2719_v20 = vld [vmem:[%s3888_s1 + $0x280] ss:$8 sps:$4 sm:$0xff]  }
  0x4d   :  { %1927 = vmatprep.subr.bf16.mxu1 %v2652_v21  ;;  %1900 = vmatprep.mubr.bf16.mxu0 %v2250_v49  ;;  %v2722_v21 = vld [vmem:[%s3888_s1 + $0x380] ss:$8 sps:$4 sm:$0xff]   ;;  %v2748_v49 = vld [vmem:[%s3888_s1 + $0x544] ss:$8 sps:$4 sm:$0xff]  }
  0x4e   :  { %1953 = vmatprep.mubr.bf16.mxu1 %v2252_v51  ;;  %v2256_v51 = vcombine.high %v3434_v46, %v3439_v47 }
  0x4f   :  { %1875 = vmatpush1.bf16.msra.mxu0 %v2647_v22  ;;  %v2727_v22 = vld [vmem:[%s3888_s1 + $0x474] ss:$8 sps:$4 sm:$0xff]  }
  0x50   :  { %1928 = vmatpush1.bf16.msra.mxu1 %v2650_v23  ;;  %1876 = vmatprep.subr.bf16.mxu0 %v2655_v24  ;;  %v2730_v23 = vld [vmem:[%s3888_s1 + $0x574] ss:$8 sps:$4 sm:$0xff]   ;;  %v2725_v24 = vld [vmem:[%s3888_s1 + $0x470] ss:$8 sps:$4 sm:$0xff]  }
  0x51   :  { %1929 = vmatprep.subr.bf16.mxu1 %v2658_v25  ;;  %v2728_v25 = vld [vmem:[%s3888_s1 + $0x570] ss:$8 sps:$4 sm:$0xff]  }
  0x53   :  { %1877 = vmatpush1.bf16.msra.mxu0 %v2653_v26  ;;  %v52_v26 = vld [vmem:[%s3889_s0 + $0x90] sm:$0xff] }
  0x54   :  { %1930 = vmatpush1.bf16.msra.mxu1 %v2656_v27  ;;  %1878 = vmatprep.subr.bf16.mxu0 %v2661_v32  ;;  %v60_v27 = vld [vmem:[%s3889_s0 + $0xd0] sm:$0xff]  ;;  %v2733_v32 = vld [vmem:[%s3888_s1 + $0x464] ss:$8 sps:$4 sm:$0xff]  }
  0x55   :  { %1931 = vmatprep.subr.bf16.mxu1 %v2664_v36  ;;  %v2266_v34 = vcombine.high %v52_v26, %v60_v27  ;;  %v2731_v36 = vld [vmem:[%s3888_s1 + $0x460] ss:$8 sps:$4 sm:$0xff]  }
  0x57   :  { %1879 = vmatpush1.bf16.msra.mxu0 %v2659_v38  ;;  %v2739_v38 = vld [vmem:[%s3888_s1 + $0x454] ss:$8 sps:$4 sm:$0xff]  }
  0x58   :  { %1932 = vmatpush1.bf16.msra.mxu1 %v2662_v39  ;;  %1880 = vmatprep.subr.bf16.mxu0 %v2667_v40  ;;  %v2742_v39 = vld [vmem:[%s3888_s1 + $0x554] ss:$8 sps:$4 sm:$0xff]   ;;  %v2737_v40 = vld [vmem:[%s3888_s1 + $0x450] ss:$8 sps:$4 sm:$0xff]  }
  0x59   :  { %1933 = vmatprep.subr.bf16.mxu1 %v2670_v41  ;;  %v2740_v41 = vld [vmem:[%s3888_s1 + $0x550] ss:$8 sps:$4 sm:$0xff]  }
  0x5b   :  { %1881 = vmatpush1.bf16.msra.mxu0 %v2665_v42  ;;  %v3424_v42 = vld [vmem:[%s3889_s0 + $0x20] sm:$0xff] }
  0x5c   :  { %1934 = vmatpush1.bf16.msra.mxu1 %v2668_v43  ;;  %1882 = vmatprep.subr.bf16.mxu0 %v2673_v44  ;;  %v3429_v43 = vld [vmem:[%s3889_s0 + $0x60] sm:$0xff]  ;;  %v2265_v44 = vcombine.low %v52_v26, %v60_v27 }
  0x5d   :  { %1935 = vmatprep.subr.bf16.mxu1 %v2676_v45  ;;  %v2267_v45 = vcombine.low %v53_v30, %v61_v31  ;;  %v2254_v50 = vcombine.high %v3424_v42, %v3429_v43  ;;  %v2805_v26 = vld [vmem:[%s3888_s1 + $0x4a4] ss:$8 sps:$4 sm:$0xff]   ;;  %v2811_v30 = vld [vmem:[%s3888_s1 + $0x494] ss:$8 sps:$4 sm:$0xff]  }
  0x5e   :  { %v2808_v27 = vld [vmem:[%s3888_s1 + $0x5a4] ss:$8 sps:$4 sm:$0xff]   ;;  %v2814_v31 = vld [vmem:[%s3888_s1 + $0x594] ss:$8 sps:$4 sm:$0xff]  }
  0x5f   :  { %1883 = vmatpush1.bf16.msra.mxu0 %v2671_v52  ;;  %v2743_v52 = vld [vmem:[%s3888_s1 + $0x440] ss:$8 sps:$4 sm:$0xff]  }
  0x60   :  { %1936 = vmatpush1.bf16.msra.mxu1 %v2674_v53  ;;  %1884 = vmatprep.subr.bf16.mxu0 %v2679_v54  ;;  %v2746_v53 = vld [vmem:[%s3888_s1 + $0x540] ss:$8 sps:$4 sm:$0xff]   ;;  %v2751_v54 = vld [vmem:[%s3888_s1 + $0x434] ss:$8 sps:$4 sm:$0xff]  }
  0x61   :  { %1937 = vmatprep.subr.bf16.mxu1 %v2682_v55  ;;  %v2754_v55 = vld [vmem:[%s3888_s1 + $0x534] ss:$8 sps:$4 sm:$0xff]  }
  0x63   :  { %1885 = vmatpush2.bf16.msra.mxu0 %v2677_v56  ;;  %v2749_v56 = vld [vmem:[%s3888_s1 + $0x430] ss:$8 sps:$4 sm:$0xff]  }
  0x64   :  { %1938 = vmatpush2.bf16.msra.mxu1 %v2680_v57  ;;  %1886 = vmatprep.subr.bf16.mxu0 %v2685_v58  ;;  %v2752_v57 = vld [vmem:[%s3888_s1 + $0x530] ss:$8 sps:$4 sm:$0xff]   ;;  %v2757_v58 = vld [vmem:[%s3888_s1 + $0x424] ss:$8 sps:$4 sm:$0xff]  }
  0x65   :  { %1939 = vmatprep.subr.bf16.mxu1 %v2688_v59  ;;  %v2760_v59 = vld [vmem:[%s3888_s1 + $0x524] ss:$8 sps:$4 sm:$0xff]  }
  0x67   :  { %1887 = vmatpush2.bf16.msra.mxu0 %v2683_v60  ;;  %v2755_v60 = vld [vmem:[%s3888_s1 + $0x420] ss:$8 sps:$4 sm:$0xff]  }
  0x68   :  { %1940 = vmatpush2.bf16.msra.mxu1 %v2686_v61  ;;  %1888 = vmatprep.subr.bf16.mxu0 %v2691_v62  ;;  %v2758_v61 = vld [vmem:[%s3888_s1 + $0x520] ss:$8 sps:$4 sm:$0xff]   ;;  %v2763_v62 = vld [vmem:[%s3888_s1 + $0x414] ss:$8 sps:$4 sm:$0xff]  }
  0x69   :  { %1941 = vmatprep.subr.bf16.mxu1 %v2694_v63  ;;  %v2766_v63 = vld [vmem:[%s3888_s1 + $0x514] ss:$8 sps:$4 sm:$0xff]  }
  0x6b   :  { %1889 = vmatpush2.bf16.msra.mxu0 %v2689_v0  ;;  %v2761_v0 = vld [vmem:[%s3888_s1 + $0x410] ss:$8 sps:$4 sm:$0xff]  }
  0x6c   :  { %1942 = vmatpush2.bf16.msra.mxu1 %v2692_v1  ;;  %1890 = vmatprep.subr.bf16.mxu0 %v2697_v2  ;;  %v2764_v1 = vld [vmem:[%s3888_s1 + $0x510] ss:$8 sps:$4 sm:$0xff]   ;;  %v2769_v2 = vld [vmem:[%s3888_s1 + $0x404] ss:$8 sps:$4 sm:$0xff]  }
  0x6d   :  { %1943 = vmatprep.subr.bf16.mxu1 %v2700_v3  ;;  %v2772_v3 = vld [vmem:[%s3888_s1 + $0x504] ss:$8 sps:$4 sm:$0xff]  }
  0x6f   :  { %1891 = vmatpush2.bf16.msra.mxu0 %v2695_v4  ;;  %v2767_v4 = vld [vmem:[%s3888_s1 + $0x400] ss:$8 sps:$4 sm:$0xff]  }
  0x70   :  { %1944 = vmatpush2.bf16.msra.mxu1 %v2698_v5  ;;  %1892 = vmatprep.subr.bf16.mxu0 %v2703_v6  ;;  %v2770_v5 = vld [vmem:[%s3888_s1 + $0x500] ss:$8 sps:$4 sm:$0xff]   ;;  %v2775_v6 = vld [vmem:[%s3888_s1 + $0x4f4] ss:$8 sps:$4 sm:$0xff]  }
  0x71   :  { %1945 = vmatprep.subr.bf16.mxu1 %v2706_v7  ;;  %v2778_v7 = vld [vmem:[%s3888_s1 + $0x5f4] ss:$8 sps:$4 sm:$0xff]  }
  0x73   :  { %1893 = vmatpush2.bf16.msra.mxu0 %v2701_v8  ;;  %v2773_v8 = vld [vmem:[%s3888_s1 + $0x4f0] ss:$8 sps:$4 sm:$0xff]  }
  0x74   :  { %1946 = vmatpush2.bf16.msra.mxu1 %v2704_v9  ;;  %1894 = vmatprep.subr.bf16.mxu0 %v2709_v10  ;;  %v2776_v9 = vld [vmem:[%s3888_s1 + $0x5f0] ss:$8 sps:$4 sm:$0xff]   ;;  %v2781_v10 = vld [vmem:[%s3888_s1 + $0x4e4] ss:$8 sps:$4 sm:$0xff]  }
  0x75   :  { %1947 = vmatprep.subr.bf16.mxu1 %v2712_v11  ;;  %v2784_v11 = vld [vmem:[%s3888_s1 + $0x5e4] ss:$8 sps:$4 sm:$0xff]  }
  0x77   :  { %1895 = vmatpush2.bf16.msra.mxu0 %v2707_v12  ;;  %v2779_v12 = vld [vmem:[%s3888_s1 + $0x4e0] ss:$8 sps:$4 sm:$0xff]  }
  0x78   :  { %1948 = vmatpush2.bf16.msra.mxu1 %v2710_v13  ;;  %1896 = vmatprep.subr.bf16.mxu0 %v2715_v14  ;;  %v2782_v13 = vld [vmem:[%s3888_s1 + $0x5e0] ss:$8 sps:$4 sm:$0xff]   ;;  %v2787_v14 = vld [vmem:[%s3888_s1 + $0x4d4] ss:$8 sps:$4 sm:$0xff]  }
  0x79   :  { %1949 = vmatprep.subr.bf16.mxu1 %v2718_v15  ;;  %v2790_v15 = vld [vmem:[%s3888_s1 + $0x5d4] ss:$8 sps:$4 sm:$0xff]  }
  0x7b   :  { %1897 = vmatpush2.bf16.msra.mxu0 %v2713_v16  ;;  %v2785_v16 = vld [vmem:[%s3888_s1 + $0x4d0] ss:$8 sps:$4 sm:$0xff]  }
  0x7c   :  { %1950 = vmatpush2.bf16.msra.mxu1 %v2716_v17  ;;  %1898 = vmatprep.subr.bf16.mxu0 %v2721_v18  ;;  %v2788_v17 = vld [vmem:[%s3888_s1 + $0x5d0] ss:$8 sps:$4 sm:$0xff]   ;;  %v2793_v18 = vld [vmem:[%s3888_s1 + $0x4c4] ss:$8 sps:$4 sm:$0xff]  }
  0x7d   :  { %1951 = vmatprep.subr.bf16.mxu1 %v2724_v19  ;;  %v2796_v19 = vld [vmem:[%s3888_s1 + $0x5c4] ss:$8 sps:$4 sm:$0xff]  }
  0x7f   :  { %1899 = vmatpush2.bf16.msra.mxu0 %v2719_v20  ;;  %v2791_v20 = vld [vmem:[%s3888_s1 + $0x4c0] ss:$8 sps:$4 sm:$0xff]  }
  0x80   :  { %1952 = vmatpush2.bf16.msra.mxu1 %v2722_v21  ;;  %1974 = vmatprep.subr.bf16.mxu0 %v2727_v22  ;;  %v2794_v21 = vld [vmem:[%s3888_s1 + $0x5c0] ss:$8 sps:$4 sm:$0xff]   ;;  %v2799_v22 = vld [vmem:[%s3888_s1 + $0x4b4] ss:$8 sps:$4 sm:$0xff]  }
  0x81   :  { %2027 = vmatprep.subr.bf16.mxu1 %v2730_v23  ;;  %v2802_v23 = vld [vmem:[%s3888_s1 + $0x5b4] ss:$8 sps:$4 sm:$0xff]  }
  0x82   :  { %1901 = vmatmul.mubr.bf16.vlgmr.msra.gmra.mxu0 %v2249_v28  ;;  %v2803_v28 = vld [vmem:[%s3888_s1 + $0x4a0] ss:$8 sps:$4 sm:$0xff]  }
  0x83   :  { %1954 = vmatmul.mubr.bf16.vlgmr.msra.gmra.mxu1 %v2251_v29  ;;  %1975 = vmatpush1.bf16.msra.mxu0 %v2725_v24  ;;  %v2797_v24 = vld [vmem:[%s3888_s1 + $0x4b0] ss:$8 sps:$4 sm:$0xff]   ;;  %v2806_v29 = vld [vmem:[%s3888_s1 + $0x5a0] ss:$8 sps:$4 sm:$0xff]  }
  0x84   :  { %2028 = vmatpush1.bf16.msra.mxu1 %v2728_v25  ;;  %1976 = vmatprep.subr.bf16.mxu0 %v2733_v32  ;;  %v2800_v25 = vld [vmem:[%s3888_s1 + $0x5b0] ss:$8 sps:$4 sm:$0xff]  }
  0x85   :  { %2029 = vmatprep.subr.bf16.mxu1 %v2736_v33  ;;  %1910 = vmatprep.mubr.bf16.mxu0 %v2266_v34  ;;  %v2809_v32 = vld [vmem:[%s3888_s1 + $0x490] ss:$8 sps:$4 sm:$0xff]   ;;  %v2817_v34 = vld [vmem:[%s3888_s1 + $0x484] ss:$8 sps:$4 sm:$0xff]  }
  0x86   :  { %1963 = vmatprep.mubr.bf16.mxu1 %v2268_v35  ;;  %v2812_v33 = vld [vmem:[%s3888_s1 + $0x590] ss:$8 sps:$4 sm:$0xff]   ;;  %v2820_v35 = vld [vmem:[%s3888_s1 + $0x584] ss:$8 sps:$4 sm:$0xff]  }
  0x87   :  { %1977 = vmatpush1.bf16.msra.mxu0 %v2731_v36  ;;  %v2815_v36 = vld [vmem:[%s3888_s1 + $0x480] ss:$8 sps:$4 sm:$0xff]  }
  0x88   :  { %2030 = vmatpush1.bf16.msra.mxu1 %v2734_v37  ;;  %1978 = vmatprep.subr.bf16.mxu0 %v2739_v38  ;;  %v2818_v37 = vld [vmem:[%s3888_s1 + $0x580] ss:$8 sps:$4 sm:$0xff]   ;;  %v2823_v38 = vld [vmem:[%s3888_s1 + $0x674] ss:$8 sps:$4 sm:$0xff]  }
  0x89   :  { %2031 = vmatprep.subr.bf16.mxu1 %v2742_v39  ;;  %v2826_v39 = vld [vmem:[%s3888_s1 + $0x774] ss:$8 sps:$4 sm:$0xff]  }
  0x8a   :  { %1911 = vmatmul.mubr.bf16.gmra.mxu0 %v2265_v44  ;;  %v2255_v44 = vcombine.low %v3434_v46, %v3439_v47  ;;  %v2829_v46 = vld [vmem:[%s3888_s1 + $0x664] ss:$8 sps:$4 sm:$0xff]  }
  0x8b   :  { %1964 = vmatmul.mubr.bf16.gmra.mxu1 %v2267_v45  ;;  %1979 = vmatpush1.bf16.msra.mxu0 %v2737_v40  ;;  %v54_v40 = vld [vmem:[%s3889_s0 + $0xa0] sm:$0xff] }
  0x8c   :  { %2032 = vmatpush1.bf16.msra.mxu1 %v2740_v41  ;;  %1980 = vmatprep.subr.bf16.mxu0 %v2745_v48  ;;  %v2253_v41 = vcombine.low %v3424_v42, %v3429_v43  ;;  %v62_v45 = vld [vmem:[%s3889_s0 + $0xe0] sm:$0xff]  ;;  %v55_v48 = vld [vmem:[%s3889_s0 + $0xa8] sm:$0xff]  ;;  %v2821_v42 = vld [vmem:[%s3888_s1 + $0x670] ss:$8 sps:$4 sm:$0xff]  }
  0x8d   :  { %2033 = vmatprep.subr.bf16.mxu1 %v2748_v49  ;;  %2006 = vmatprep.mubr.bf16.mxu0 %v2254_v50  ;;  %v63_v49 = vld [vmem:[%s3889_s0 + $0xe8] sm:$0xff]  ;;  %v2824_v43 = vld [vmem:[%s3888_s1 + $0x770] ss:$8 sps:$4 sm:$0xff]   ;;  %v2270_v50 = vcombine.high %v54_v40, %v62_v45 }
  0x8e   :  { %2059 = vmatprep.mubr.bf16.mxu1 %v2256_v51  ;;  %v2832_v47 = vld [vmem:[%s3888_s1 + $0x764] ss:$8 sps:$4 sm:$0xff]   ;;  %v2272_v51 = vcombine.high %v55_v48, %v63_v49 }
  0x8f   :  { %1981 = vmatpush1.bf16.msra.mxu0 %v2743_v52  ;;  %v2827_v52 = vld [vmem:[%s3888_s1 + $0x660] ss:$8 sps:$4 sm:$0xff]  }
  0x90   :  { %2034 = vmatpush1.bf16.msra.mxu1 %v2746_v53  ;;  %1982 = vmatprep.subr.bf16.mxu0 %v2751_v54  ;;  %v2830_v53 = vld [vmem:[%s3888_s1 + $0x760] ss:$8 sps:$4 sm:$0xff]   ;;  %v2835_v54 = vld [vmem:[%s3888_s1 + $0x654] ss:$8 sps:$4 sm:$0xff]  }
  0x91   :  { %2035 = vmatprep.subr.bf16.mxu1 %v2754_v55  ;;  %v2838_v55 = vld [vmem:[%s3888_s1 + $0x754] ss:$8 sps:$4 sm:$0xff]  }
  0x93   :  { %1983 = vmatpush1.bf16.msra.mxu0 %v2749_v56  ;;  %v3650_v56 = vld [vmem:[%s3889_s0 + $0x30] sm:$0xff] }
  0x94   :  { %2036 = vmatpush1.bf16.msra.mxu1 %v2752_v57  ;;  %1984 = vmatprep.subr.bf16.mxu0 %v2757_v58  ;;  %v2269_v57 = vcombine.low %v54_v40, %v62_v45  ;;  %v2271_v58 = vcombine.low %v55_v48, %v63_v49  ;;  %v2893_v40 = vld [vmem:[%s3888_s1 + $0x6b0] ss:$8 sps:$4 sm:$0xff]   ;;  %v2904_v45 = vld [vmem:[%s3888_s1 + $0x7a4] ss:$8 sps:$4 sm:$0xff]   ;;  %v2899_v48 = vld [vmem:[%s3888_s1 + $0x6a0] ss:$8 sps:$4 sm:$0xff]  }
  0x95   :  { %2037 = vmatprep.subr.bf16.mxu1 %v2760_v59  ;;  %v3655_v59 = vld [vmem:[%s3889_s0 + $0x70] sm:$0xff]  ;;  %v2902_v49 = vld [vmem:[%s3888_s1 + $0x7a0] ss:$8 sps:$4 sm:$0xff]  }
  0x97   :  { %1985 = vmatpush1.bf16.msra.mxu0 %v2755_v60  ;;  %v3660_v60 = vld [vmem:[%s3889_s0 + $0x38] sm:$0xff] }
  0x98   :  { %2038 = vmatpush1.bf16.msra.mxu1 %v2758_v61  ;;  %1986 = vmatprep.subr.bf16.mxu0 %v2763_v62  ;;  %v3665_v61 = vld [vmem:[%s3889_s0 + $0x78] sm:$0xff] }
  0x99   :  { %2039 = vmatprep.subr.bf16.mxu1 %v2766_v63  ;;  %v2833_v62 = vld [vmem:[%s3888_s1 + $0x650] ss:$8 sps:$4 sm:$0xff]  }
  0x9a   :  { %v2836_v63 = vld [vmem:[%s3888_s1 + $0x750] ss:$8 sps:$4 sm:$0xff]  }
  0x9b   :  { %1987 = vmatpush1.bf16.msra.mxu0 %v2761_v0  ;;  %v2841_v0 = vld [vmem:[%s3888_s1 + $0x644] ss:$8 sps:$4 sm:$0xff]  }
  0x9c   :  { %2040 = vmatpush1.bf16.msra.mxu1 %v2764_v1  ;;  %1988 = vmatprep.subr.bf16.mxu0 %v2769_v2  ;;  %v2844_v1 = vld [vmem:[%s3888_s1 + $0x744] ss:$8 sps:$4 sm:$0xff]   ;;  %v2258_v2 = vcombine.high %v3650_v56, %v3655_v59 }
  0x9d   :  { %2041 = vmatprep.subr.bf16.mxu1 %v2772_v3  ;;  %v2260_v3 = vcombine.high %v3660_v60, %v3665_v61 }
  0x9f   :  { %1989 = vmatpush1.bf16.msra.mxu0 %v2767_v4  ;;  %v2839_v4 = vld [vmem:[%s3888_s1 + $0x640] ss:$8 sps:$4 sm:$0xff]  }
  0xa0   :  { %2042 = vmatpush1.bf16.msra.mxu1 %v2770_v5  ;;  %1990 = vmatprep.subr.bf16.mxu0 %v2775_v6  ;;  %v2842_v5 = vld [vmem:[%s3888_s1 + $0x740] ss:$8 sps:$4 sm:$0xff]   ;;  %v2847_v6 = vld [vmem:[%s3888_s1 + $0x634] ss:$8 sps:$4 sm:$0xff]  }
  0xa1   :  { %2043 = vmatprep.subr.bf16.mxu1 %v2778_v7  ;;  %v2850_v7 = vld [vmem:[%s3888_s1 + $0x734] ss:$8 sps:$4 sm:$0xff]  }
  0xa3   :  { %1991 = vmatpush2.bf16.msra.mxu0 %v2773_v8  ;;  %v2845_v8 = vld [vmem:[%s3888_s1 + $0x630] ss:$8 sps:$4 sm:$0xff]  }
  0xa4   :  { %2044 = vmatpush2.bf16.msra.mxu1 %v2776_v9  ;;  %1992 = vmatprep.subr.bf16.mxu0 %v2781_v10  ;;  %v2848_v9 = vld [vmem:[%s3888_s1 + $0x730] ss:$8 sps:$4 sm:$0xff]   ;;  %v2853_v10 = vld [vmem:[%s3888_s1 + $0x624] ss:$8 sps:$4 sm:$0xff]  }
  0xa5   :  { %2045 = vmatprep.subr.bf16.mxu1 %v2784_v11  ;;  %v2856_v11 = vld [vmem:[%s3888_s1 + $0x724] ss:$8 sps:$4 sm:$0xff]  }
  0xa7   :  { %1993 = vmatpush2.bf16.msra.mxu0 %v2779_v12  ;;  %v2851_v12 = vld [vmem:[%s3888_s1 + $0x620] ss:$8 sps:$4 sm:$0xff]  }
  0xa8   :  { %2046 = vmatpush2.bf16.msra.mxu1 %v2782_v13  ;;  %1994 = vmatprep.subr.bf16.mxu0 %v2787_v14  ;;  %v2854_v13 = vld [vmem:[%s3888_s1 + $0x720] ss:$8 sps:$4 sm:$0xff]   ;;  %v2859_v14 = vld [vmem:[%s3888_s1 + $0x614] ss:$8 sps:$4 sm:$0xff]  }
  0xa9   :  { %2047 = vmatprep.subr.bf16.mxu1 %v2790_v15  ;;  %v2862_v15 = vld [vmem:[%s3888_s1 + $0x714] ss:$8 sps:$4 sm:$0xff]  }
  0xab   :  { %1995 = vmatpush2.bf16.msra.mxu0 %v2785_v16  ;;  %v2857_v16 = vld [vmem:[%s3888_s1 + $0x610] ss:$8 sps:$4 sm:$0xff]  }
  0xac   :  { %2048 = vmatpush2.bf16.msra.mxu1 %v2788_v17  ;;  %1996 = vmatprep.subr.bf16.mxu0 %v2793_v18  ;;  %v2860_v17 = vld [vmem:[%s3888_s1 + $0x710] ss:$8 sps:$4 sm:$0xff]   ;;  %v2865_v18 = vld [vmem:[%s3888_s1 + $0x604] ss:$8 sps:$4 sm:$0xff]  }
  0xad   :  { %2049 = vmatprep.subr.bf16.mxu1 %v2796_v19  ;;  %v2868_v19 = vld [vmem:[%s3888_s1 + $0x704] ss:$8 sps:$4 sm:$0xff]  }
  0xaf   :  { %1997 = vmatpush2.bf16.msra.mxu0 %v2791_v20  ;;  %v2863_v20 = vld [vmem:[%s3888_s1 + $0x600] ss:$8 sps:$4 sm:$0xff]  }
  0xb0   :  { %2050 = vmatpush2.bf16.msra.mxu1 %v2794_v21  ;;  %1998 = vmatprep.subr.bf16.mxu0 %v2799_v22  ;;  %v2866_v21 = vld [vmem:[%s3888_s1 + $0x700] ss:$8 sps:$4 sm:$0xff]   ;;  %v2871_v22 = vld [vmem:[%s3888_s1 + $0x6f4] ss:$8 sps:$4 sm:$0xff]  }
  0xb1   :  { %2051 = vmatprep.subr.bf16.mxu1 %v2802_v23  ;;  %v2874_v23 = vld [vmem:[%s3888_s1 + $0x7f4] ss:$8 sps:$4 sm:$0xff]  }
  0xb3   :  { %1999 = vmatpush2.bf16.msra.mxu0 %v2797_v24  ;;  %v2869_v24 = vld [vmem:[%s3888_s1 + $0x6f0] ss:$8 sps:$4 sm:$0xff]  }
  0xb4   :  { %2052 = vmatpush2.bf16.msra.mxu1 %v2800_v25  ;;  %2000 = vmatprep.subr.bf16.mxu0 %v2805_v26  ;;  %v2872_v25 = vld [vmem:[%s3888_s1 + $0x7f0] ss:$8 sps:$4 sm:$0xff]   ;;  %v2877_v26 = vld [vmem:[%s3888_s1 + $0x6e4] ss:$8 sps:$4 sm:$0xff]  }
  0xb5   :  { %2053 = vmatprep.subr.bf16.mxu1 %v2808_v27  ;;  %v2880_v27 = vld [vmem:[%s3888_s1 + $0x7e4] ss:$8 sps:$4 sm:$0xff]  }
  0xb7   :  { %2001 = vmatpush2.bf16.msra.mxu0 %v2803_v28  ;;  %v2875_v28 = vld [vmem:[%s3888_s1 + $0x6e0] ss:$8 sps:$4 sm:$0xff]  }
  0xb8   :  { %2054 = vmatpush2.bf16.msra.mxu1 %v2806_v29  ;;  %2002 = vmatprep.subr.bf16.mxu0 %v2811_v30  ;;  %v2878_v29 = vld [vmem:[%s3888_s1 + $0x7e0] ss:$8 sps:$4 sm:$0xff]   ;;  %v2883_v30 = vld [vmem:[%s3888_s1 + $0x6d4] ss:$8 sps:$4 sm:$0xff]  }
  0xb9   :  { %2055 = vmatprep.subr.bf16.mxu1 %v2814_v31  ;;  %v2886_v31 = vld [vmem:[%s3888_s1 + $0x7d4] ss:$8 sps:$4 sm:$0xff]  }
  0xbb   :  { %2003 = vmatpush2.bf16.msra.mxu0 %v2809_v32  ;;  %v2881_v32 = vld [vmem:[%s3888_s1 + $0x6d0] ss:$8 sps:$4 sm:$0xff]  }
  0xbc   :  { %2056 = vmatpush2.bf16.msra.mxu1 %v2812_v33  ;;  %2004 = vmatprep.subr.bf16.mxu0 %v2817_v34  ;;  %v2884_v33 = vld [vmem:[%s3888_s1 + $0x7d0] ss:$8 sps:$4 sm:$0xff]   ;;  %v2889_v34 = vld [vmem:[%s3888_s1 + $0x6c4] ss:$8 sps:$4 sm:$0xff]  }
  0xbd   :  { %2057 = vmatprep.subr.bf16.mxu1 %v2820_v35  ;;  %v2892_v35 = vld [vmem:[%s3888_s1 + $0x7c4] ss:$8 sps:$4 sm:$0xff]  }
  0xbf   :  { %2005 = vmatpush2.bf16.msra.mxu0 %v2815_v36  ;;  %v2887_v36 = vld [vmem:[%s3888_s1 + $0x6c0] ss:$8 sps:$4 sm:$0xff]  }
  0xc0   :  { %2058 = vmatpush2.bf16.msra.mxu1 %v2818_v37  ;;  %2080 = vmatprep.subr.bf16.mxu0 %v2823_v38  ;;  %v2890_v37 = vld [vmem:[%s3888_s1 + $0x7c0] ss:$8 sps:$4 sm:$0xff]   ;;  %v2895_v38 = vld [vmem:[%s3888_s1 + $0x6b4] ss:$8 sps:$4 sm:$0xff]  }
  0xc1   :  { %2133 = vmatprep.subr.bf16.mxu1 %v2826_v39  ;;  %v2898_v39 = vld [vmem:[%s3888_s1 + $0x7b4] ss:$8 sps:$4 sm:$0xff]  }
  0xc2   :  { %2007 = vmatmul.mubr.bf16.vlgmr.msra.gmra.mxu0 %v2253_v41  ;;  %v2896_v41 = vld [vmem:[%s3888_s1 + $0x7b0] ss:$8 sps:$4 sm:$0xff]  }
  0xc3   :  { %2060 = vmatmul.mubr.bf16.vlgmr.msra.gmra.mxu1 %v2255_v44  ;;  %2081 = vmatpush1.bf16.msra.mxu0 %v2821_v42  ;;  %v2901_v44 = vld [vmem:[%s3888_s1 + $0x6a4] ss:$8 sps:$4 sm:$0xff]   ;;  %v2907_v42 = vld [vmem:[%s3888_s1 + $0x694] ss:$8 sps:$4 sm:$0xff]  }
  0xc4   :  { %2134 = vmatpush1.bf16.msra.mxu1 %v2824_v43  ;;  %2082 = vmatprep.subr.bf16.mxu0 %v2829_v46  ;;  %v2910_v43 = vld [vmem:[%s3888_s1 + $0x794] ss:$8 sps:$4 sm:$0xff]   ;;  %v2905_v46 = vld [vmem:[%s3888_s1 + $0x690] ss:$8 sps:$4 sm:$0xff]  }
  0xc5   :  { %2135 = vmatprep.subr.bf16.mxu1 %v2832_v47  ;;  %2016 = vmatprep.mubr.bf16.mxu0 %v2270_v50  ;;  %v2908_v47 = vld [vmem:[%s3888_s1 + $0x790] ss:$8 sps:$4 sm:$0xff]   ;;  %v2913_v50 = vld [vmem:[%s3888_s1 + $0x684] ss:$8 sps:$4 sm:$0xff]  }
  0xc6   :  { %2069 = vmatprep.mubr.bf16.mxu1 %v2272_v51  ;;  %v2916_v51 = vld [vmem:[%s3888_s1 + $0x784] ss:$8 sps:$4 sm:$0xff]  }
  0xc7   :  { %2083 = vmatpush1.bf16.msra.mxu0 %v2827_v52  ;;  %v2911_v52 = vld [vmem:[%s3888_s1 + $0x680] ss:$8 sps:$4 sm:$0xff]  }
  0xc8   :  { %2136 = vmatpush1.bf16.msra.mxu1 %v2830_v53  ;;  %2084 = vmatprep.subr.bf16.mxu0 %v2835_v54  ;;  %v2914_v53 = vld [vmem:[%s3888_s1 + $0x780] ss:$8 sps:$4 sm:$0xff]   ;;  %v56_v54 = vld [vmem:[%s3889_s0 + $0xb0] sm:$0xff] }
  0xc9   :  { %2137 = vmatprep.subr.bf16.mxu1 %v2838_v55  ;;  %v64_v55 = vld [vmem:[%s3889_s0 + $0xf0] sm:$0xff] }
  0xca   :  { %2017 = vmatmul.mubr.bf16.gmra.mxu0 %v2269_v57  ;;  %v57_v57 = vld [vmem:[%s3889_s0 + $0xb8] sm:$0xff] }
  0xcb   :  { %2070 = vmatmul.mubr.bf16.gmra.mxu1 %v2271_v58  ;;  %2085 = vmatpush1.bf16.msra.mxu0 %v2833_v62  ;;  %v65_v58 = vld [vmem:[%s3889_s0 + $0xf8] sm:$0xff]  ;;  %v2257_v62 = vcombine.low %v3650_v56, %v3655_v59 }
  0xcc   :  { %2138 = vmatpush1.bf16.msra.mxu1 %v2836_v63  ;;  %2086 = vmatprep.subr.bf16.mxu0 %v2841_v0  ;;  %v2259_v63 = vcombine.low %v3660_v60, %v3665_v61  ;;  %v2274_v0 = vcombine.high %v56_v54, %v64_v55 }
  0xcd   :  { %2139 = vmatprep.subr.bf16.mxu1 %v2844_v1  ;;  %2112 = vmatprep.mubr.bf16.mxu0 %v2258_v2  ;;  %v2276_v1 = vcombine.high %v57_v57, %v65_v58  ;;  %v2273_v2 = vcombine.low %v56_v54, %v64_v55 }
  0xce   :  { %2165 = vmatprep.mubr.bf16.mxu1 %v2260_v3  ;;  %v2275_v3 = vcombine.low %v57_v57, %v65_v58 }
  0xcf   :  { %2087 = vmatpush1.bf16.msra.mxu0 %v2839_v4 }
  0xd0   :  { %2140 = vmatpush1.bf16.msra.mxu1 %v2842_v5  ;;  %2088 = vmatprep.subr.bf16.mxu0 %v2847_v6 }
  0xd1   :  { %2141 = vmatprep.subr.bf16.mxu1 %v2850_v7 }
  0xd3   :  { %2089 = vmatpush1.bf16.msra.mxu0 %v2845_v8 }
  0xd4   :  { %2142 = vmatpush1.bf16.msra.mxu1 %v2848_v9  ;;  %2090 = vmatprep.subr.bf16.mxu0 %v2853_v10 }
  0xd5   :  { %2143 = vmatprep.subr.bf16.mxu1 %v2856_v11 }
  0xd7   :  { %2091 = vmatpush1.bf16.msra.mxu0 %v2851_v12 }
  0xd8   :  { %2144 = vmatpush1.bf16.msra.mxu1 %v2854_v13  ;;  %2092 = vmatprep.subr.bf16.mxu0 %v2859_v14 }
  0xd9   :  { %2145 = vmatprep.subr.bf16.mxu1 %v2862_v15 }
  0xdb   :  { %2093 = vmatpush1.bf16.msra.mxu0 %v2857_v16 }
  0xdc   :  { %2146 = vmatpush1.bf16.msra.mxu1 %v2860_v17  ;;  %2094 = vmatprep.subr.bf16.mxu0 %v2865_v18 }
  0xdd   :  { %2147 = vmatprep.subr.bf16.mxu1 %v2868_v19 }
  0xdf   :  { %2095 = vmatpush1.bf16.msra.mxu0 %v2863_v20 }
  0xe0   :  { %2148 = vmatpush1.bf16.msra.mxu1 %v2866_v21  ;;  %2096 = vmatprep.subr.bf16.mxu0 %v2871_v22 }
  0xe1   :  { %2149 = vmatprep.subr.bf16.mxu1 %v2874_v23 }
  0xe3   :  { %2097 = vmatpush2.bf16.msra.mxu0 %v2869_v24 }
  0xe4   :  { %2150 = vmatpush2.bf16.msra.mxu1 %v2872_v25  ;;  %2098 = vmatprep.subr.bf16.mxu0 %v2877_v26 }
  0xe5   :  { %2151 = vmatprep.subr.bf16.mxu1 %v2880_v27 }
  0xe7   :  { %2099 = vmatpush2.bf16.msra.mxu0 %v2875_v28 }
  0xe8   :  { %2152 = vmatpush2.bf16.msra.mxu1 %v2878_v29  ;;  %2100 = vmatprep.subr.bf16.mxu0 %v2883_v30 }
  0xe9   :  { %2153 = vmatprep.subr.bf16.mxu1 %v2886_v31 }
  0xeb   :  { %2101 = vmatpush2.bf16.msra.mxu0 %v2881_v32 }
  0xec   :  { %2154 = vmatpush2.bf16.msra.mxu1 %v2884_v33  ;;  %2102 = vmatprep.subr.bf16.mxu0 %v2889_v34 }
  0xed   :  { %2155 = vmatprep.subr.bf16.mxu1 %v2892_v35 }
  0xef   :  { %2103 = vmatpush2.bf16.msra.mxu0 %v2887_v36 }
  0xf0   :  { %2156 = vmatpush2.bf16.msra.mxu1 %v2890_v37  ;;  %2104 = vmatprep.subr.bf16.mxu0 %v2895_v38 }
  0xf1   :  { %2157 = vmatprep.subr.bf16.mxu1 %v2898_v39 }
  0xf3   :  { %2105 = vmatpush2.bf16.msra.mxu0 %v2893_v40 }
  0xf4   :  { %2158 = vmatpush2.bf16.msra.mxu1 %v2896_v41  ;;  %2106 = vmatprep.subr.bf16.mxu0 %v2901_v44 }
  0xf5   :  { %2159 = vmatprep.subr.bf16.mxu1 %v2904_v45 }
  0xf7   :  { %2107 = vmatpush2.bf16.msra.mxu0 %v2899_v48 }
  0xf8   :  { %2160 = vmatpush2.bf16.msra.mxu1 %v2902_v49  ;;  %2108 = vmatprep.subr.bf16.mxu0 %v2907_v42  ;;  %v2215_v49 = vlaneseq }
  0xf9   :  { %2161 = vmatprep.subr.bf16.mxu1 %v2910_v43 }
  0xfb   :  { %2109 = vmatpush2.bf16.msra.mxu0 %v2905_v46 }
  0xfc   :  { %2162 = vmatpush2.bf16.msra.mxu1 %v2908_v47  ;;  %2110 = vmatprep.subr.bf16.mxu0 %v2913_v50 }
  0xfd   :  { %2163 = vmatprep.subr.bf16.mxu1 %v2916_v51 }
  0xff   :  { %2111 = vmatpush2.bf16.msra.mxu0 %v2911_v52 }
 0x100   :  { %2164 = vmatpush2.bf16.msra.mxu1 %v2914_v53  ;;  %v2216_v53 = vshrl.u32 %v2215_v49, 7 }
 0x102   :  { %2113 = vmatmul.mubr.bf16.vlgmr.msra.gmra.mxu0 %v2257_v62  ;;  %v1796_v4 = vpop.f32.mrf.mxu0 }
 0x103   :  { %2166 = vmatmul.mubr.bf16.vlgmr.msra.gmra.mxu1 %v2259_v63  ;;  %2122 = vmatprep.mubr.bf16.mxu0 %v2274_v0  ;;  %v1849_v5 = vpop.f32.mrf.mxu1 }
 0x104   :  { %2175 = vmatprep.mubr.bf16.mxu1 %v2276_v1  ;;  %v1798_v6 = vpop.f32.mrf.mxu0  ;;  %v1850_v44 = vadd.f32 %v1849_v5, %v1796_v4  ;;  %v2217_v4 = vsub.s32 0, %v2216_v53 }
 0x105   :  { %v1851_v7 = vpop.f32.mrf.mxu1 }
 0x106   :  { %v1800_v56 = vpop.f32.mrf.mxu0  ;;  %v1852_v45 = vadd.f32 %v1851_v7, %v1798_v6 }
 0x107   :  { %v1853_v59 = vpop.f32.mrf.mxu1 }
 0x108   :  { %v1802_v8 = vpop.f32.mrf.mxu0  ;;  %v1854_v46 = vadd.f32 %v1853_v59, %v1800_v56  ;;  %v2213_v59 = vld [vmem:[%s3890_s2] sm:$0x3] }
 0x109   :  { %v1855_v61 = vpop.f32.mrf.mxu1 }
 0x10a   :  { %2123 = vmatmul.mubr.bf16.gmra.mxu0 %v2273_v2  ;;  %v1806_v60 = vpop.f32.mrf.mxu0  ;;  %v1856_v50 = vadd.f32 %v1855_v61, %v1802_v8 }
 0x10b   :  { %2176 = vmatmul.mubr.bf16.gmra.mxu1 %v2275_v3  ;;  %v1859_v9 = vpop.f32.mrf.mxu1 }
 0x10c   :  { %v1808_v10 = vpop.f32.mrf.mxu0  ;;  %v1860_v54 = vadd.f32 %v1859_v9, %v1806_v60  ;;  %v2221_v9 = vsub.s32 1, %v2216_v53 }
 0x10d   :  { %v1861_v11 = vpop.f32.mrf.mxu1 }
 0x10e   :  { %v1810_v12 = vpop.f32.mrf.mxu0  ;;  %v1862_v0 = vadd.f32 %v1861_v11, %v1808_v10 }
 0x10f   :  { %v1863_v13 = vpop.f32.mrf.mxu1 }
 0x110   :  { %v1812_v14 = vpop.f32.mrf.mxu0  ;;  %v1864_v5 = vadd.f32 %v1863_v13, %v1810_v12  ;;  %v2218_v12 = vrot.slane %v2213_v59, %v2217_v4 }
 0x111   :  { %v1865_v16 = vpop.f32.mrf.mxu1 }
 0x142   :  { %v1902_v15 = vpop.f32.mrf.mxu0 }
 0x143   :  { %v1955_v17 = vpop.f32.mrf.mxu1  ;;  %v1903_v48 = vadd.f32 %v1902_v15, %v1850_v44  ;;  %v1866_v15 = vadd.f32 %v1865_v16, %v1812_v14 }
 0x144   :  { %v1904_v18 = vpop.f32.mrf.mxu0 }
 0x145   :  { %v1957_v19 = vpop.f32.mrf.mxu1  ;;  %v1905_v47 = vadd.f32 %v1904_v18, %v1852_v45  ;;  %v1956_v51 = vadd.f32 %v1955_v17, %v1903_v48 }
 0x146   :  { %v1906_v20 = vpop.f32.mrf.mxu0 }
 0x147   :  { %v1959_v21 = vpop.f32.mrf.mxu1  ;;  %v1907_v52 = vadd.f32 %v1906_v20, %v1854_v46  ;;  %v1958_v58 = vadd.f32 %v1957_v19, %v1905_v47 }
 0x148   :  { %v1908_v22 = vpop.f32.mrf.mxu0 }
 0x149   :  { %v1961_v23 = vpop.f32.mrf.mxu1  ;;  %v1909_v62 = vadd.f32 %v1908_v22, %v1856_v50  ;;  %v1960_v2 = vadd.f32 %v1959_v21, %v1907_v52 }
 0x14a   :  { %v1912_v24 = vpop.f32.mrf.mxu0 }
 0x14b   :  { %v1965_v25 = vpop.f32.mrf.mxu1  ;;  %v1913_v1 = vadd.f32 %v1912_v24, %v1860_v54  ;;  %v1962_v8 = vadd.f32 %v1961_v23, %v1909_v62 }
 0x14c   :  { %v1914_v26 = vpop.f32.mrf.mxu0 }
 0x14d   :  { %v1967_v27 = vpop.f32.mrf.mxu1  ;;  %v1915_v6 = vadd.f32 %v1914_v26, %v1862_v0  ;;  %v1966_v17 = vadd.f32 %v1965_v25, %v1913_v1 }
 0x14e   :  { %v1916_v28 = vpop.f32.mrf.mxu0 }
 0x14f   :  { %v3849_v29 = vpop.f32.mrf.mxu1  ;;  %v1917_v18 = vadd.f32 %v1916_v28, %v1864_v5  ;;  %v1968_v13 = vadd.f32 %v1967_v27, %v1915_v6 }
 0x150   :  { %v1918_v30 = vpop.f32.mrf.mxu0 }
 0x151   :  { %v3851_v31 = vpop.f32.mrf.mxu1  ;;  %v1919_v22 = vadd.f32 %v1918_v30, %v1866_v15 }
 0x153   :  { %v1972_v48 = vadd.f32 %v3851_v31, %v1919_v22 }
 0x182   :  { %v2008_v32 = vpop.f32.mrf.mxu0 }
 0x183   :  { %v2061_v33 = vpop.f32.mrf.mxu1  ;;  %v2009_v63 = vadd.f32 %v2008_v32, %v1956_v51 }
 0x184   :  { %v2010_v34 = vpop.f32.mrf.mxu0 }
 0x185   :  { %v2063_v35 = vpop.f32.mrf.mxu1  ;;  %v2011_v3 = vadd.f32 %v2010_v34, %v1958_v58  ;;  %v2062_v60 = vadd.f32 %v2061_v33, %v2009_v63  ;;  %v2222_v33 = vrot.slane %v2213_v59, %v2221_v9 }
 0x186   :  { %v2012_v36 = vpop.f32.mrf.mxu0 }
 0x187   :  { %v2065_v37 = vpop.f32.mrf.mxu1  ;;  %v2013_v61 = vadd.f32 %v2012_v36, %v1960_v2  ;;  %v2064_v19 = vadd.f32 %v2063_v35, %v2011_v3  ;;  %v1970_v36 = vadd.f32 %v3849_v29, %v1917_v18 }
 0x188   :  { %v2014_v38 = vpop.f32.mrf.mxu0 }
 0x189   :  { %v2067_v39 = vpop.f32.mrf.mxu1  ;;  %v2015_v20 = vadd.f32 %v2014_v38, %v1962_v8  ;;  %v2066_v34 = vadd.f32 %v2065_v37, %v2013_v61 }
 0x18a   :  { %v2018_v40 = vpop.f32.mrf.mxu0 }
 0x18b   :  { %v2071_v41 = vpop.f32.mrf.mxu1  ;;  %v2019_v24 = vadd.f32 %v2018_v40, %v1966_v17  ;;  %v2068_v28 = vadd.f32 %v2067_v39, %v2015_v20 }
 0x18c   :  { %v2020_v42 = vpop.f32.mrf.mxu0 }
 0x18d   :  { %v3853_v43 = vpop.f32.mrf.mxu1  ;;  %v2021_v14 = vadd.f32 %v2020_v42, %v1968_v13  ;;  %v2072_v27 = vadd.f32 %v2071_v41, %v2019_v24 }
 0x18e   :  { %v2022_v55 = vpop.f32.mrf.mxu0 }
 0x18f   :  { %v3855_v57 = vpop.f32.mrf.mxu1  ;;  %v2023_v49 = vadd.f32 %v2022_v55, %v1970_v36  ;;  %v2074_v42 = vadd.f32 %v3853_v43, %v2021_v14 }
 0x190   :  { %v2024_v7 = vpop.f32.mrf.mxu0 }
 0x191   :  { %v2077_v56 = vpop.f32.mrf.mxu1  ;;  %v2025_v50 = vadd.f32 %v2024_v7, %v1972_v48  ;;  %v2076_v54 = vadd.f32 %v3855_v57, %v2023_v49 }
 0x193   :  { %v2078_v0 = vadd.f32 %v2077_v56, %v2025_v50 }
 0x1c2   :  { %v2114_v10 = vpop.f32.mrf.mxu0 }
 0x1c3   :  { %v2167_v11 = vpop.f32.mrf.mxu1  ;;  %v2115_v21 = vadd.f32 %v2114_v10, %v2062_v60 }
 0x1c4   :  { %v2116_v26 = vpop.f32.mrf.mxu0 }
 0x1c5   :  { %v2169_v32 = vpop.f32.mrf.mxu1  ;;  %v2168_v44 = vadd.f32 %v2167_v11, %v2115_v21  ;;  %v2117_v23 = vadd.f32 %v2116_v26, %v2064_v19 }
 0x1c6   :  { %v2118_v16 = vpop.f32.mrf.mxu0 }
 0x1c7   :  { %v2171_v25 = vpop.f32.mrf.mxu1  ;;  %v2225_v45 = vadd.f32 %v2218_v12, %v2168_v44  ;;  %v2170_v35 = vadd.f32 %v2169_v32, %v2117_v23  ;;  %v2119_v38 = vadd.f32 %v2118_v16, %v2066_v34 }
 0x1c8   :  { %v2120_v30 = vpop.f32.mrf.mxu0 }
 0x1c9   :  { %v2173_v40 = vpop.f32.mrf.mxu1  ;;  %2233 = vst [vmem:[%s3891_s3] sm:$0xff] %v2225_v45  ;;  %v2226_v37 = vadd.f32 %v2222_v33, %v2170_v35  ;;  %v2172_v46 = vadd.f32 %v2171_v25, %v2119_v38  ;;  %v2121_v29 = vadd.f32 %v2120_v30, %v2068_v28 }
 0x1ca   :  { %v2124_v47 = vpop.f32.mrf.mxu0 }
 0x1cb   :  { %v2177_v39 = vpop.f32.mrf.mxu1  ;;  %2234 = vst [vmem:[%s3891_s3 + $0x8] sm:$0xff] %v2226_v37  ;;  %v2227_v31 = vadd.f32 %v2218_v12, %v2172_v46  ;;  %v2174_v41 = vadd.f32 %v2173_v40, %v2121_v29  ;;  %v2125_v51 = vadd.f32 %v2124_v47, %v2072_v27 }
 0x1cc   :  { %v2126_v52 = vpop.f32.mrf.mxu0 }
 0x1cd   :  { %v2179_v53 = vpop.f32.mrf.mxu1  ;;  %2235 = vst [vmem:[%s3891_s3 + $0x10] sm:$0xff] %v2227_v31  ;;  %v2228_v55 = vadd.f32 %v2222_v33, %v2174_v41  ;;  %v2178_v43 = vadd.f32 %v2177_v39, %v2125_v51  ;;  %v2127_v58 = vadd.f32 %v2126_v52, %v2074_v42 }
 0x1ce   :  { %v2128_v62 = vpop.f32.mrf.mxu0 }
 0x1cf   :  { %v2181_v63 = vpop.f32.mrf.mxu1  ;;  %2236 = vst [vmem:[%s3891_s3 + $0x18] sm:$0xff] %v2228_v55  ;;  %v2229_v1 = vadd.f32 %v2218_v12, %v2178_v43  ;;  %v2180_v2 = vadd.f32 %v2179_v53, %v2127_v58  ;;  %v2129_v3 = vadd.f32 %v2128_v62, %v2076_v54 }
 0x1d0   :  { %v2130_v4 = vpop.f32.mrf.mxu0 }
 0x1d1   :  { %2237 = vst [vmem:[%s3891_s3 + $0x20] sm:$0xff] %v2229_v1  ;;  %v2230_v57 = vadd.f32 %v2222_v33, %v2180_v2  ;;  %v2182_v5 = vadd.f32 %v2181_v63, %v2129_v3  ;;  %v2131_v6 = vadd.f32 %v2130_v4, %v2078_v0  ;;  %v2183_v7 = vpop.f32.mrf.mxu1 }
 0x1d3   :  { %2238 = vst [vmem:[%s3891_s3 + $0x28] sm:$0xff] %v2230_v57  ;;  %v2231_v56 = vadd.f32 %v2218_v12, %v2182_v5  ;;  %v2184_v59 = vadd.f32 %v2183_v7, %v2131_v6 }
 0x1d5   :  { %2239 = vst [vmem:[%s3891_s3 + $0x30] sm:$0xff] %v2231_v56  ;;  %v2232_v8 = vadd.f32 %v2222_v33, %v2184_v59 }
 0x1d7   :  { %2240 = vst [vmem:[%s3891_s3 + $0x38] sm:$0xff] %v2232_v8 }

// kernel: discriminator_forward.14
= control target key start
LH: loop header
LB: loop body
LE: loop exit
PB: predicated region body
PF: predicated region fallthrough
CT: control target
= control target key end

     0   :  { %s368_s6 = smov 0   ;;  %s370_s7 = smov 0   ;;  %s426_s0 = inlined_call_operand.vmem [shape: f32[2,4,512], index: 0, kind: input, shape index: {}]   ;;  %s427_s1 = inlined_call_operand.vmem [shape: f32[2,4,512], index: 1, kind: output, shape index: {}]  }
   0x1   :  { %s372_s8 = smov 0   ;;  %s374_s9 = smov 0  }
   0x2   :  { %s376_s10 = smov 0  }
   0x3 LB: > { %s20_s11 = sadd.s32 1, %s348_s8  ;;  %s23_s12 = sadd.s32 1, %s352_s9  ;;  %s356_s10 = sphi %s376_s10, %s11_s10   ;;  %s352_s9 = sphi %s374_s9, %s431_s9   ;;  %s348_s8 = sphi %s372_s8, %s430_s8   ;;  %s344_s7 = sphi %s370_s7, %s429_s7   ;;  %s340_s6 = sphi %s368_s6, %s428_s6  }
   0x4   : > { %p21_p0 = scmp.ge.s32.totalorder %s20_s11, 4  ;;  %p269_p1 = scmp.ge.s32.totalorder %s356_s10, 1 }
   0x5   : > { %p106_p2 = scmp.lt.s32.totalorder %s356_s10, 9 }
   0x6   : > { %s433_s11 = smov (%p21_p0, %s20_s11), 0  ;;  %s435_s12 = smov (!%p21_p0, %s23_s12), %s352_s9 }
   0x7   : > { %p107_p3 = pnand %p269_p1, %p106_p2  ;;  %p25_p4 = scmp.ge.s32.totalorder %s435_s12, 2 }
   0x8   : > { %p132_p5 = scmp.lt.s32.totalorder (!%p107_p3), %s344_s7, 1  ;;  %p134_p6 = scmp.lt.s32.totalorder (!%p107_p3), %s340_s6, 3 }
   0x9   : > { %s437_s12 = smov (%p25_p4, %s435_s12), 0  ;;  %110 = sbr.rel (%p107_p3) target bundleno = 63 (0x3f), region = 24 }
   0xe   : > { %s439_s7 = smov (!%p132_p5, %s344_s7), 1  ;;  %s441_s6 = smov (!%p134_p6, %s340_s6), 3  ;;  %vm149_vm0 = vcmask 1043456  }
   0xf   : > { %s270_s13 = sshll.u32 %s439_s7, 2 }
  0x10   : > { %s398_s14 = sadd.s32 %s270_s13, %s441_s6 }
  0x11   : > { %s271_s15 = sshll.u32 %s398_s14, 2 }
  0x12   : > { %s139_s18 = scalar_lea.vmem %s426_s0, %s271_s15  ;;  %s147_s21 = scalar_lea.vmem %s427_s1, %s271_s15 }
  0x13   : > { %v148_v0 = vld [vmem:[%s139_s18] sm:$0xf] }
  0x14   : > { %v150_v1 = vsel %vm149_vm0, %v148_v0, 0.0  ;;  %v159_v2 = vmul.f32 %v148_v0, %v148_v0 }
  0x15   : > { %v151_v3 = vrot.slane %v150_v1, 4 }
  0x16   : > { %v160_v4 = vsel %vm149_vm0, %v159_v2, 0.0 }
  0x17   : > { %v152_v5 = vadd.f32 %v151_v3, %v150_v1  ;;  %v161_v6 = vrot.slane %v160_v4, 4 }
  0x19   : > { %v153_v7 = vrot.slane %v152_v5, 2  ;;  %v162_v8 = vadd.f32 %v161_v6, %v160_v4 }
  0x1b   : > { %v154_v9 = vadd.f32 %v153_v7, %v152_v5  ;;  %v163_v10 = vrot.slane %v162_v8, 2 }
  0x1d   : > { %v155_v11 = vrot.slane %v154_v9, 1  ;;  %v164_v12 = vadd.f32 %v163_v10, %v162_v8 }
  0x1f   : > { %v156_v13 = vadd.f32 %v155_v11, %v154_v9  ;;  %v165_v14 = vrot.slane %v164_v12, 1 }
  0x21   : > { %v158_v15 = vmul.f32 0.25, %v156_v13  ;;  %v166_v16 = vadd.f32 %v165_v14, %v164_v12 }
  0x23   : > { %v167_v17 = vmul.f32 0.25, %v166_v16  ;;  %v168_v18 = vmul.f32 %v158_v15, %v158_v15  ;;  %v171_v22 = vsub.f32 %v148_v0, %v158_v15 }
  0x25   : > { %v169_v19 = vsub.f32 %v167_v17, %v168_v18 }
  0x27   : > { %v170_v20 = vmax.f32 %v169_v19, 0.0 }
  0x29   : > { %v172_v21 = vadd.f32 1e-05, %v170_v20 }
  0x2b   : > { %316 = vrsqrt.f32 %v172_v21 }
  0x38   : > { %v317_v23 = vpop.eup %316 }
  0x39   : > { %v174_v24 = vmul.f32 %v317_v23, %v171_v22 }
  0x3b   : > { %vm175_vm1 = vcmp.gt.f32.partialorder %v174_v24, 0.0  ;;  %v176_v25 = vmul.f32 0.2, %v174_v24 }
  0x3d   : > { %v177_v26 = vsel %vm175_vm1, %v174_v24, %v176_v25 }
  0x3e   : > { %178 = vst [vmem:[%s147_s21] sm:$0xf] %v177_v26 }
  0x3f PF: > { %s11_s10 = sadd.s32 1, %s356_s10   ;;  %s428_s6 = smov %s348_s8 }
  0x40   : > { %p8_p7 = scmp.ge.s32.totalorder %s11_s10, 10   ;;  %s429_s7 = smov %s352_s9 }
  0x41   : > { %s430_s8 = smov %s433_s11  ;;  %s431_s9 = smov %s437_s12 }
  0x42   :  { %10 = sbr.rel (!%p8_p7) target bundleno = 3 (0x3), region = 54 }

// kernel: discriminator_forward.13
= control target key start
LH: loop header
LB: loop body
LE: loop exit
PB: predicated region body
PF: predicated region fallthrough
CT: control target
= control target key end

     0   :  { %s5550_s12 = smov 0   ;;  %s5552_s13 = smov 0   ;;  %s6252_s0 = inlined_call_operand.vmem [shape: bf16[8,4096], index: 0, kind: input, shape index: {}]   ;;  %s6253_s1 = inlined_call_operand.vmem [shape: bf16[4096,512], index: 1, kind: input, shape index: {}]   ;;  %s6254_s2 = inlined_call_operand.vmem [shape: f32[1,512], index: 2, kind: input, shape index: {}]   ;;  %s6255_s3 = inlined_call_operand.vmem [shape: f32[8,512], index: 3, kind: output, shape index: {}]  }
   0x1   :  { %s5554_s14 = smov 0  }
   0x2 LB: > { %s22_s15 = sadd.s32 1, %s5523_s13  ;;  %p4156_p0 = scmp.ge.s32.totalorder %s5527_s14, 1  ;;  %s5527_s14 = sphi %s5554_s14, %s13_s14   ;;  %s5523_s13 = sphi %s5552_s13, %s6257_s13   ;;  %s5519_s12 = sphi %s5550_s12, %s6256_s12  }
   0x3   : > { %p23_p1 = scmp.ge.s32.totalorder %s22_s15, 2  ;;  %p168_p2 = scmp.lt.s32.totalorder %s5527_s14, 3 }
   0x5   : > { %s6259_s15 = smov (%p23_p1, %s22_s15), 0  ;;  %p169_p3 = pnand %p4156_p0, %p168_p2 }
   0x6   : > { %s4157_s16 = sshll.u32 (!%p169_p3), %s5519_s12, 4  ;;  %s4159_s17 = sshll.u32 (!%p169_p3), %s5519_s12, 8 }
   0x7   : > { %172 = sbr.rel (%p169_p3) target bundleno = 750 (0x2ee), region = 32  ;;  %p205_p4 = scmp.lt.s32.totalorder (!%p169_p3), %s4157_s16, 31 }
   0x8   : > { %p213_p5 = scmp.lt.s32.totalorder (!%p169_p3), %s4159_s17, 511  ;;  %p4162_p6 = scmp.ne.s32.totalorder (!%p169_p3), %s5519_s12, 0 }
   0xc   : > { %s6261_s16 = smov (!%p205_p4, %s4157_s16), 31  ;;  %s6263_s17 = smov (!%p213_p5, %s4159_s17), 511 }
   0xd   : > { %s4158_s18 = sshll.u32 %s6261_s16, 2  ;;  %s4695_s22 = sshll.u32 %s6263_s17, 4 }
   0xe   : > { %s5575_s21 = scalar_lea.vmem %s6252_s0, %s4158_s18  ;;  %s5580_s25 = scalar_lea.vmem %s6253_s1, %s4695_s22 }
   0xf   : > { %227 = sbr.rel (%p4162_p6) target bundleno = 23 (0x17), region = 36 }
  0x14   : > { %v5529_v0 = vmov 0.0  }
  0x15   : > { %228 = vst [vmem:[#allocation2 + $0x10] sm:$0xff] %v5529_v0  ;;  %229 = vst [vmem:[#allocation2] sm:$0xff] %v5529_v0 }
  0x16   : > { %230 = vst [vmem:[#allocation2 + $0x18] sm:$0xff] %v5529_v0  ;;  %231 = vst [vmem:[#allocation2 + $0x8] sm:$0xff] %v5529_v0 }
  0x17 PF: > { %v4721_v1 = vld [vmem:[%s5580_s25 + $0xe4] ss:$16 sps:$4 sm:$0xff]   ;;  %v4725_v3 = vld [vmem:[%s5580_s25 + $0xe0] ss:$16 sps:$4 sm:$0xff]   ;;  %v237_v49 = vld [vmem:[%s5575_s21 + $0x8] sm:$0xff]  ;;  %p4691_p7 = scmp.ne.s32.totalorder %s5519_s12, 1 }
  0x18   : > { %v4723_v2 = vld [vmem:[%s5580_s25 + $0x2e4] ss:$16 sps:$4 sm:$0xff]   ;;  %3372 = vmatprep.subr.bf16.mxu0 %v4721_v1  ;;  %v4726_v4 = vld [vmem:[%s5580_s25 + $0x2e0] ss:$16 sps:$4 sm:$0xff]   ;;  %v5635_v52 = vcombine.high %v237_v49, %v237_v49 }
  0x19   : > { %3413 = vmatprep.subr.bf16.mxu1 %v4723_v2  ;;  %v4727_v5 = vld [vmem:[%s5580_s25 + $0xc4] ss:$16 sps:$4 sm:$0xff]   ;;  %3373 = vmatpush1.bf16.msra.mxu0 %v4725_v3  ;;  %v4731_v7 = vld [vmem:[%s5580_s25 + $0xc0] ss:$16 sps:$4 sm:$0xff]  }
  0x1a   : > { %3414 = vmatpush1.bf16.msra.mxu1 %v4726_v4  ;;  %v4729_v6 = vld [vmem:[%s5580_s25 + $0x2c4] ss:$16 sps:$4 sm:$0xff]   ;;  %3374 = vmatprep.subr.bf16.mxu0 %v4727_v5  ;;  %v4732_v8 = vld [vmem:[%s5580_s25 + $0x2c0] ss:$16 sps:$4 sm:$0xff]  }
  0x1b   : > { %3415 = vmatprep.subr.bf16.mxu1 %v4729_v6  ;;  %v4733_v9 = vld [vmem:[%s5580_s25 + $0xa4] ss:$16 sps:$4 sm:$0xff]   ;;  %v4737_v11 = vld [vmem:[%s5580_s25 + $0xa0] ss:$16 sps:$4 sm:$0xff]   ;;  %3445 = vmatprep.mubr.bf16.mxu1 %v5635_v52 }
  0x1c   : > { %v4735_v10 = vld [vmem:[%s5580_s25 + $0x2a4] ss:$16 sps:$4 sm:$0xff]   ;;  %v4738_v12 = vld [vmem:[%s5580_s25 + $0x2a0] ss:$16 sps:$4 sm:$0xff]  }
  0x1d   : > { %3375 = vmatpush1.bf16.msra.mxu0 %v4731_v7  ;;  %v4739_v13 = vld [vmem:[%s5580_s25 + $0x84] ss:$16 sps:$4 sm:$0xff]   ;;  %v4743_v15 = vld [vmem:[%s5580_s25 + $0x80] ss:$16 sps:$4 sm:$0xff]  }
  0x1e   : > { %3416 = vmatpush1.bf16.msra.mxu1 %v4732_v8  ;;  %3376 = vmatprep.subr.bf16.mxu0 %v4733_v9  ;;  %v4741_v14 = vld [vmem:[%s5580_s25 + $0x284] ss:$16 sps:$4 sm:$0xff]   ;;  %v4744_v16 = vld [vmem:[%s5580_s25 + $0x280] ss:$16 sps:$4 sm:$0xff]   ;;  %v5659_v8 = vcombine.low %v237_v49, %v237_v49 }
  0x1f   : > { %3417 = vmatprep.subr.bf16.mxu1 %v4735_v10  ;;  %v4745_v17 = vld [vmem:[%s5580_s25 + $0x64] ss:$16 sps:$4 sm:$0xff]   ;;  %v4749_v19 = vld [vmem:[%s5580_s25 + $0x60] ss:$16 sps:$4 sm:$0xff]  }
  0x20   : > { %v4747_v18 = vld [vmem:[%s5580_s25 + $0x264] ss:$16 sps:$4 sm:$0xff]   ;;  %v4750_v20 = vld [vmem:[%s5580_s25 + $0x260] ss:$16 sps:$4 sm:$0xff]  }
  0x21   : > { %3377 = vmatpush1.bf16.msra.mxu0 %v4737_v11  ;;  %v4751_v21 = vld [vmem:[%s5580_s25 + $0x44] ss:$16 sps:$4 sm:$0xff]   ;;  %v4755_v23 = vld [vmem:[%s5580_s25 + $0x40] ss:$16 sps:$4 sm:$0xff]  }
  0x22   : > { %3418 = vmatpush1.bf16.msra.mxu1 %v4738_v12  ;;  %3378 = vmatprep.subr.bf16.mxu0 %v4739_v13  ;;  %v4753_v22 = vld [vmem:[%s5580_s25 + $0x244] ss:$16 sps:$4 sm:$0xff]   ;;  %v4756_v24 = vld [vmem:[%s5580_s25 + $0x240] ss:$16 sps:$4 sm:$0xff]  }
  0x23   : > { %3419 = vmatprep.subr.bf16.mxu1 %v4741_v14  ;;  %v4757_v25 = vld [vmem:[%s5580_s25 + $0x24] ss:$16 sps:$4 sm:$0xff]   ;;  %v4761_v27 = vld [vmem:[%s5580_s25 + $0x20] ss:$16 sps:$4 sm:$0xff]  }
  0x24   : > { %v4759_v26 = vld [vmem:[%s5580_s25 + $0x224] ss:$16 sps:$4 sm:$0xff]   ;;  %v4762_v28 = vld [vmem:[%s5580_s25 + $0x220] ss:$16 sps:$4 sm:$0xff]  }
  0x25   : > { %3379 = vmatpush1.bf16.msra.mxu0 %v4743_v15  ;;  %v4763_v29 = vld [vmem:[%s5580_s25 + $0x4] ss:$16 sps:$4 sm:$0xff]   ;;  %v4767_v31 = vld [vmem:[%s5580_s25] ss:$16 sps:$4 sm:$0xff]  }
  0x26   : > { %3420 = vmatpush1.bf16.msra.mxu1 %v4744_v16  ;;  %3380 = vmatprep.subr.bf16.mxu0 %v4745_v17  ;;  %v4765_v30 = vld [vmem:[%s5580_s25 + $0x204] ss:$16 sps:$4 sm:$0xff]   ;;  %v4768_v32 = vld [vmem:[%s5580_s25 + $0x200] ss:$16 sps:$4 sm:$0xff]  }
  0x27   : > { %3421 = vmatprep.subr.bf16.mxu1 %v4747_v18  ;;  %v4769_v33 = vld [vmem:[%s5580_s25 + $0x1e4] ss:$16 sps:$4 sm:$0xff]   ;;  %v4773_v35 = vld [vmem:[%s5580_s25 + $0x1e0] ss:$16 sps:$4 sm:$0xff]  }
  0x28   : > { %v4771_v34 = vld [vmem:[%s5580_s25 + $0x3e4] ss:$16 sps:$4 sm:$0xff]   ;;  %v4774_v36 = vld [vmem:[%s5580_s25 + $0x3e0] ss:$16 sps:$4 sm:$0xff]  }
  0x29   : > { %3381 = vmatpush1.bf16.msra.mxu0 %v4749_v19  ;;  %v4775_v37 = vld [vmem:[%s5580_s25 + $0x1c4] ss:$16 sps:$4 sm:$0xff]   ;;  %v4779_v39 = vld [vmem:[%s5580_s25 + $0x1c0] ss:$16 sps:$4 sm:$0xff]  }
  0x2a   : > { %3422 = vmatpush1.bf16.msra.mxu1 %v4750_v20  ;;  %3382 = vmatprep.subr.bf16.mxu0 %v4751_v21  ;;  %v4777_v38 = vld [vmem:[%s5580_s25 + $0x3c4] ss:$16 sps:$4 sm:$0xff]   ;;  %v4780_v40 = vld [vmem:[%s5580_s25 + $0x3c0] ss:$16 sps:$4 sm:$0xff]  }
  0x2b   : > { %3423 = vmatprep.subr.bf16.mxu1 %v4753_v22  ;;  %v4781_v41 = vld [vmem:[%s5580_s25 + $0x1a4] ss:$16 sps:$4 sm:$0xff]   ;;  %v4785_v43 = vld [vmem:[%s5580_s25 + $0x1a0] ss:$16 sps:$4 sm:$0xff]  }
  0x2c   : > { %v4783_v42 = vld [vmem:[%s5580_s25 + $0x3a4] ss:$16 sps:$4 sm:$0xff]   ;;  %v4786_v44 = vld [vmem:[%s5580_s25 + $0x3a0] ss:$16 sps:$4 sm:$0xff]  }
  0x2d   : > { %3383 = vmatpush1.bf16.msra.mxu0 %v4755_v23  ;;  %v4787_v45 = vld [vmem:[%s5580_s25 + $0x184] ss:$16 sps:$4 sm:$0xff]   ;;  %v4791_v50 = vld [vmem:[%s5580_s25 + $0x180] ss:$16 sps:$4 sm:$0xff]  }
  0x2e   : > { %3424 = vmatpush1.bf16.msra.mxu1 %v4756_v24  ;;  %3384 = vmatprep.subr.bf16.mxu0 %v4757_v25  ;;  %v4789_v46 = vld [vmem:[%s5580_s25 + $0x384] ss:$16 sps:$4 sm:$0xff]   ;;  %v4792_v51 = vld [vmem:[%s5580_s25 + $0x380] ss:$16 sps:$4 sm:$0xff]  }
  0x2f   : > { %3425 = vmatprep.subr.bf16.mxu1 %v4759_v26  ;;  %v236_v47 = vld [vmem:[%s5575_s21] sm:$0xff] }
  0x30   : > { %v5630_v48 = vcombine.high %v236_v47, %v236_v47  ;;  %v4793_v53 = vld [vmem:[%s5580_s25 + $0x164] ss:$16 sps:$4 sm:$0xff]   ;;  %v4797_v55 = vld [vmem:[%s5580_s25 + $0x160] ss:$16 sps:$4 sm:$0xff]   ;;  %v5657_v7 = vcombine.low %v236_v47, %v236_v47 }
  0x31   : > { %3385 = vmatpush1.bf16.msra.mxu0 %v4761_v27  ;;  %v4795_v54 = vld [vmem:[%s5580_s25 + $0x364] ss:$16 sps:$4 sm:$0xff]   ;;  %v4798_v56 = vld [vmem:[%s5580_s25 + $0x360] ss:$16 sps:$4 sm:$0xff]  }
  0x32   : > { %3426 = vmatpush1.bf16.msra.mxu1 %v4762_v28  ;;  %3386 = vmatprep.subr.bf16.mxu0 %v4763_v29  ;;  %v4799_v57 = vld [vmem:[%s5580_s25 + $0x144] ss:$16 sps:$4 sm:$0xff]   ;;  %v4803_v59 = vld [vmem:[%s5580_s25 + $0x140] ss:$16 sps:$4 sm:$0xff]  }
  0x33   : > { %3427 = vmatprep.subr.bf16.mxu1 %v4765_v30  ;;  %3404 = vmatprep.mubr.bf16.mxu0 %v5630_v48  ;;  %v4801_v58 = vld [vmem:[%s5580_s25 + $0x344] ss:$16 sps:$4 sm:$0xff]   ;;  %v4804_v60 = vld [vmem:[%s5580_s25 + $0x340] ss:$16 sps:$4 sm:$0xff]  }
  0x34   : > { %v4805_v61 = vld [vmem:[%s5580_s25 + $0x124] ss:$16 sps:$4 sm:$0xff]   ;;  %v4809_v63 = vld [vmem:[%s5580_s25 + $0x120] ss:$16 sps:$4 sm:$0xff]  }
  0x35   : > { %3387 = vmatpush1.bf16.msra.mxu0 %v4767_v31  ;;  %v4807_v62 = vld [vmem:[%s5580_s25 + $0x324] ss:$16 sps:$4 sm:$0xff]   ;;  %v4810_v0 = vld [vmem:[%s5580_s25 + $0x320] ss:$16 sps:$4 sm:$0xff]  }
  0x36   : > { %3428 = vmatpush1.bf16.msra.mxu1 %v4768_v32  ;;  %3388 = vmatprep.subr.bf16.mxu0 %v4769_v33  ;;  %v4811_v1 = vld [vmem:[%s5580_s25 + $0x104] ss:$16 sps:$4 sm:$0xff]   ;;  %v4815_v3 = vld [vmem:[%s5580_s25 + $0x100] ss:$16 sps:$4 sm:$0xff]  }
  0x37   : > { %3429 = vmatprep.subr.bf16.mxu1 %v4771_v34  ;;  %v4813_v2 = vld [vmem:[%s5580_s25 + $0x304] ss:$16 sps:$4 sm:$0xff]   ;;  %v4816_v4 = vld [vmem:[%s5580_s25 + $0x300] ss:$16 sps:$4 sm:$0xff]   ;;  %v5691_v34 = vld [vmem:[%s5575_s21 + $0x18] sm:$0xff] }
  0x38   : > { %v4823_v5 = vld [vmem:[%s5580_s25 + $0x4e4] ss:$16 sps:$4 sm:$0xff]   ;;  %v4821_v9 = vld [vmem:[%s5580_s25 + $0x4e0] ss:$16 sps:$4 sm:$0xff]  }
  0x39   : > { %3389 = vmatpush2.bf16.msra.mxu0 %v4773_v35  ;;  %v4826_v6 = vld [vmem:[%s5580_s25 + $0x6e4] ss:$16 sps:$4 sm:$0xff]   ;;  %v4824_v10 = vld [vmem:[%s5580_s25 + $0x6e0] ss:$16 sps:$4 sm:$0xff]  }
  0x3a   : > { %3430 = vmatpush2.bf16.msra.mxu1 %v4774_v36  ;;  %3390 = vmatprep.subr.bf16.mxu0 %v4775_v37  ;;  %v4829_v11 = vld [vmem:[%s5580_s25 + $0x4c4] ss:$16 sps:$4 sm:$0xff]   ;;  %v4827_v13 = vld [vmem:[%s5580_s25 + $0x4c0] ss:$16 sps:$4 sm:$0xff]  }
  0x3b   : > { %3431 = vmatprep.subr.bf16.mxu1 %v4777_v38  ;;  %v4832_v12 = vld [vmem:[%s5580_s25 + $0x6c4] ss:$16 sps:$4 sm:$0xff]   ;;  %v4830_v14 = vld [vmem:[%s5580_s25 + $0x6c0] ss:$16 sps:$4 sm:$0xff]   ;;  %v5701_v38 = vcombine.high %v5691_v34, %v5691_v34 }
  0x3c   : > { %v4835_v15 = vld [vmem:[%s5580_s25 + $0x4a4] ss:$16 sps:$4 sm:$0xff]   ;;  %v4833_v17 = vld [vmem:[%s5580_s25 + $0x4a0] ss:$16 sps:$4 sm:$0xff]  }
  0x3d   : > { %3391 = vmatpush2.bf16.msra.mxu0 %v4779_v39  ;;  %v4838_v16 = vld [vmem:[%s5580_s25 + $0x6a4] ss:$16 sps:$4 sm:$0xff]   ;;  %v4836_v18 = vld [vmem:[%s5580_s25 + $0x6a0] ss:$16 sps:$4 sm:$0xff]  }
  0x3e   : > { %3432 = vmatpush2.bf16.msra.mxu1 %v4780_v40  ;;  %3392 = vmatprep.subr.bf16.mxu0 %v4781_v41  ;;  %v4841_v19 = vld [vmem:[%s5580_s25 + $0x484] ss:$16 sps:$4 sm:$0xff]   ;;  %v4839_v21 = vld [vmem:[%s5580_s25 + $0x480] ss:$16 sps:$4 sm:$0xff]  }
  0x3f   : > { %3433 = vmatprep.subr.bf16.mxu1 %v4783_v42  ;;  %v4844_v20 = vld [vmem:[%s5580_s25 + $0x684] ss:$16 sps:$4 sm:$0xff]   ;;  %v4842_v22 = vld [vmem:[%s5580_s25 + $0x680] ss:$16 sps:$4 sm:$0xff]  }
  0x40   : > { %v4847_v23 = vld [vmem:[%s5580_s25 + $0x464] ss:$16 sps:$4 sm:$0xff]   ;;  %v4845_v25 = vld [vmem:[%s5580_s25 + $0x460] ss:$16 sps:$4 sm:$0xff]  }
  0x41   : > { %3393 = vmatpush2.bf16.msra.mxu0 %v4785_v43  ;;  %v4850_v24 = vld [vmem:[%s5580_s25 + $0x664] ss:$16 sps:$4 sm:$0xff]   ;;  %v4848_v26 = vld [vmem:[%s5580_s25 + $0x660] ss:$16 sps:$4 sm:$0xff]  }
  0x42   : > { %3434 = vmatpush2.bf16.msra.mxu1 %v4786_v44  ;;  %3394 = vmatprep.subr.bf16.mxu0 %v4787_v45  ;;  %v4853_v27 = vld [vmem:[%s5580_s25 + $0x444] ss:$16 sps:$4 sm:$0xff]   ;;  %v4851_v29 = vld [vmem:[%s5580_s25 + $0x440] ss:$16 sps:$4 sm:$0xff]  }
  0x43   : > { %3435 = vmatprep.subr.bf16.mxu1 %v4789_v46  ;;  %v4856_v28 = vld [vmem:[%s5580_s25 + $0x644] ss:$16 sps:$4 sm:$0xff]   ;;  %v4854_v30 = vld [vmem:[%s5580_s25 + $0x640] ss:$16 sps:$4 sm:$0xff]  }
  0x44   : > { %v4859_v31 = vld [vmem:[%s5580_s25 + $0x424] ss:$16 sps:$4 sm:$0xff]   ;;  %v4857_v35 = vld [vmem:[%s5580_s25 + $0x420] ss:$16 sps:$4 sm:$0xff]  }
  0x45   : > { %3395 = vmatpush2.bf16.msra.mxu0 %v4791_v50  ;;  %v4862_v32 = vld [vmem:[%s5580_s25 + $0x624] ss:$16 sps:$4 sm:$0xff]   ;;  %v4860_v36 = vld [vmem:[%s5580_s25 + $0x620] ss:$16 sps:$4 sm:$0xff]  }
  0x46   : > { %3436 = vmatpush2.bf16.msra.mxu1 %v4792_v51  ;;  %3396 = vmatprep.subr.bf16.mxu0 %v4793_v53  ;;  %v5688_v33 = vld [vmem:[%s5575_s21 + $0x10] sm:$0xff] }
  0x47   : > { %3437 = vmatprep.subr.bf16.mxu1 %v4795_v54  ;;  %v5697_v37 = vcombine.high %v5688_v33, %v5688_v33  ;;  %v4865_v39 = vld [vmem:[%s5580_s25 + $0x404] ss:$16 sps:$4 sm:$0xff]   ;;  %v4863_v41 = vld [vmem:[%s5580_s25 + $0x400] ss:$16 sps:$4 sm:$0xff]  }
  0x48   : > { %v4868_v40 = vld [vmem:[%s5580_s25 + $0x604] ss:$16 sps:$4 sm:$0xff]   ;;  %v4866_v42 = vld [vmem:[%s5580_s25 + $0x600] ss:$16 sps:$4 sm:$0xff]  }
  0x49   : > { %3397 = vmatpush2.bf16.msra.mxu0 %v4797_v55  ;;  %v4871_v43 = vld [vmem:[%s5580_s25 + $0x5e4] ss:$16 sps:$4 sm:$0xff]   ;;  %v4869_v45 = vld [vmem:[%s5580_s25 + $0x5e0] ss:$16 sps:$4 sm:$0xff]  }
  0x4a   : > { %3438 = vmatpush2.bf16.msra.mxu1 %v4798_v56  ;;  %3398 = vmatprep.subr.bf16.mxu0 %v4799_v57  ;;  %v4874_v44 = vld [vmem:[%s5580_s25 + $0x7e4] ss:$16 sps:$4 sm:$0xff]   ;;  %v4872_v46 = vld [vmem:[%s5580_s25 + $0x7e0] ss:$16 sps:$4 sm:$0xff]  }
  0x4b   : > { %3439 = vmatprep.subr.bf16.mxu1 %v4801_v58  ;;  %v4877_v47 = vld [vmem:[%s5580_s25 + $0x5c4] ss:$16 sps:$4 sm:$0xff]   ;;  %v4875_v50 = vld [vmem:[%s5580_s25 + $0x5c0] ss:$16 sps:$4 sm:$0xff]  }
  0x4c   : > { %v4880_v49 = vld [vmem:[%s5580_s25 + $0x7c4] ss:$16 sps:$4 sm:$0xff]   ;;  %v4878_v51 = vld [vmem:[%s5580_s25 + $0x7c0] ss:$16 sps:$4 sm:$0xff]  }
  0x4d   : > { %3399 = vmatpush2.bf16.msra.mxu0 %v4803_v59  ;;  %v4883_v53 = vld [vmem:[%s5580_s25 + $0x5a4] ss:$16 sps:$4 sm:$0xff]   ;;  %v4881_v55 = vld [vmem:[%s5580_s25 + $0x5a0] ss:$16 sps:$4 sm:$0xff]  }
  0x4e   : > { %3440 = vmatpush2.bf16.msra.mxu1 %v4804_v60  ;;  %3400 = vmatprep.subr.bf16.mxu0 %v4805_v61  ;;  %v4886_v54 = vld [vmem:[%s5580_s25 + $0x7a4] ss:$16 sps:$4 sm:$0xff]   ;;  %v4884_v56 = vld [vmem:[%s5580_s25 + $0x7a0] ss:$16 sps:$4 sm:$0xff]  }
  0x4f   : > { %3441 = vmatprep.subr.bf16.mxu1 %v4807_v62  ;;  %v4889_v57 = vld [vmem:[%s5580_s25 + $0x584] ss:$16 sps:$4 sm:$0xff]   ;;  %v4887_v59 = vld [vmem:[%s5580_s25 + $0x580] ss:$16 sps:$4 sm:$0xff]  }
  0x50   : > { %v4892_v58 = vld [vmem:[%s5580_s25 + $0x784] ss:$16 sps:$4 sm:$0xff]   ;;  %v4890_v60 = vld [vmem:[%s5580_s25 + $0x780] ss:$16 sps:$4 sm:$0xff]  }
  0x51   : > { %3401 = vmatpush2.bf16.msra.mxu0 %v4809_v63  ;;  %v4895_v61 = vld [vmem:[%s5580_s25 + $0x564] ss:$16 sps:$4 sm:$0xff]   ;;  %v4893_v63 = vld [vmem:[%s5580_s25 + $0x560] ss:$16 sps:$4 sm:$0xff]  }
  0x52   : > { %3442 = vmatpush2.bf16.msra.mxu1 %v4810_v0  ;;  %3402 = vmatprep.subr.bf16.mxu0 %v4811_v1  ;;  %v4898_v62 = vld [vmem:[%s5580_s25 + $0x764] ss:$16 sps:$4 sm:$0xff]   ;;  %v4896_v0 = vld [vmem:[%s5580_s25 + $0x760] ss:$16 sps:$4 sm:$0xff]  }
  0x53   : > { %3443 = vmatprep.subr.bf16.mxu1 %v4813_v2  ;;  %v4901_v1 = vld [vmem:[%s5580_s25 + $0x544] ss:$16 sps:$4 sm:$0xff]  }
  0x54   : > { %v4904_v2 = vld [vmem:[%s5580_s25 + $0x744] ss:$16 sps:$4 sm:$0xff]  }
  0x55   : > { %3403 = vmatpush2.bf16.msra.mxu0 %v4815_v3  ;;  %v4899_v3 = vld [vmem:[%s5580_s25 + $0x540] ss:$16 sps:$4 sm:$0xff]  }
  0x56   : > { %3444 = vmatpush2.bf16.msra.mxu1 %v4816_v4  ;;  %3454 = vmatprep.subr.bf16.mxu0 %v4823_v5  ;;  %v4902_v4 = vld [vmem:[%s5580_s25 + $0x740] ss:$16 sps:$4 sm:$0xff]   ;;  %v4907_v5 = vld [vmem:[%s5580_s25 + $0x524] ss:$16 sps:$4 sm:$0xff]  }
  0x57   : > { %3495 = vmatprep.subr.bf16.mxu1 %v4826_v6  ;;  %v4910_v6 = vld [vmem:[%s5580_s25 + $0x724] ss:$16 sps:$4 sm:$0xff]  }
  0x58   : > { %3405 = vmatmul.mubr.bf16.vlgmr.msra.gmra.mxu0 %v5657_v7 }
  0x59   : > { %3446 = vmatmul.mubr.bf16.vlgmr.msra.gmra.mxu1 %v5659_v8  ;;  %3455 = vmatpush1.bf16.msra.mxu0 %v4821_v9  ;;  %v4905_v9 = vld [vmem:[%s5580_s25 + $0x520] ss:$16 sps:$4 sm:$0xff]  }
  0x5a   : > { %3496 = vmatpush1.bf16.msra.mxu1 %v4824_v10  ;;  %3456 = vmatprep.subr.bf16.mxu0 %v4829_v11  ;;  %v4908_v10 = vld [vmem:[%s5580_s25 + $0x720] ss:$16 sps:$4 sm:$0xff]   ;;  %v4913_v11 = vld [vmem:[%s5580_s25 + $0x504] ss:$16 sps:$4 sm:$0xff]  }
  0x5b   : > { %3497 = vmatprep.subr.bf16.mxu1 %v4832_v12  ;;  %3486 = vmatprep.mubr.bf16.mxu0 %v5697_v37  ;;  %v4916_v12 = vld [vmem:[%s5580_s25 + $0x704] ss:$16 sps:$4 sm:$0xff]  }
  0x5c   : > { %3527 = vmatprep.mubr.bf16.mxu1 %v5701_v38 }
  0x5d   : > { %3457 = vmatpush1.bf16.msra.mxu0 %v4827_v13  ;;  %v4911_v13 = vld [vmem:[%s5580_s25 + $0x500] ss:$16 sps:$4 sm:$0xff]  }
  0x5e   : > { %3498 = vmatpush1.bf16.msra.mxu1 %v4830_v14  ;;  %3458 = vmatprep.subr.bf16.mxu0 %v4835_v15  ;;  %v4914_v14 = vld [vmem:[%s5580_s25 + $0x700] ss:$16 sps:$4 sm:$0xff]   ;;  %v4923_v15 = vld [vmem:[%s5580_s25 + $0x8e4] ss:$16 sps:$4 sm:$0xff]  }
  0x5f   : > { %3499 = vmatprep.subr.bf16.mxu1 %v4838_v16  ;;  %v4926_v16 = vld [vmem:[%s5580_s25 + $0xae4] ss:$16 sps:$4 sm:$0xff]  }
  0x61   : > { %3459 = vmatpush1.bf16.msra.mxu0 %v4833_v17  ;;  %v5745_v17 = vcombine.low %v5688_v33, %v5688_v33  ;;  %v4941_v33 = vld [vmem:[%s5580_s25 + $0x884] ss:$16 sps:$4 sm:$0xff]  }
  0x62   : > { %3500 = vmatpush1.bf16.msra.mxu1 %v4836_v18  ;;  %3460 = vmatprep.subr.bf16.mxu0 %v4841_v19  ;;  %v5749_v18 = vcombine.low %v5691_v34, %v5691_v34  ;;  %v4921_v19 = vld [vmem:[%s5580_s25 + $0x8e0] ss:$16 sps:$4 sm:$0xff]   ;;  %v4944_v34 = vld [vmem:[%s5580_s25 + $0xa84] ss:$16 sps:$4 sm:$0xff]  }
  0x63   : > { %3501 = vmatprep.subr.bf16.mxu1 %v4844_v20  ;;  %v4924_v20 = vld [vmem:[%s5580_s25 + $0xae0] ss:$16 sps:$4 sm:$0xff]  }
  0x65   : > { %3461 = vmatpush1.bf16.msra.mxu0 %v4839_v21  ;;  %v4929_v21 = vld [vmem:[%s5580_s25 + $0x8c4] ss:$16 sps:$4 sm:$0xff]  }
  0x66   : > { %3502 = vmatpush1.bf16.msra.mxu1 %v4842_v22  ;;  %3462 = vmatprep.subr.bf16.mxu0 %v4847_v23  ;;  %v4932_v22 = vld [vmem:[%s5580_s25 + $0xac4] ss:$16 sps:$4 sm:$0xff]  }
  0x67   : > { %3503 = vmatprep.subr.bf16.mxu1 %v4850_v24  ;;  %v5756_v23 = vld [vmem:[%s5575_s21 + $0x20] sm:$0xff]  ;;  %v5759_v24 = vld [vmem:[%s5575_s21 + $0x28] sm:$0xff] }
  0x69   : > { %3463 = vmatpush1.bf16.msra.mxu0 %v4845_v25  ;;  %v5763_v25 = vcombine.high %v5756_v23, %v5756_v23 }
  0x6a   : > { %3504 = vmatpush1.bf16.msra.mxu1 %v4848_v26  ;;  %3464 = vmatprep.subr.bf16.mxu0 %v4853_v27  ;;  %v5767_v26 = vcombine.high %v5759_v24, %v5759_v24  ;;  %v4927_v27 = vld [vmem:[%s5580_s25 + $0x8c0] ss:$16 sps:$4 sm:$0xff]  }
  0x6b   : > { %3505 = vmatprep.subr.bf16.mxu1 %v4856_v28  ;;  %v4930_v28 = vld [vmem:[%s5580_s25 + $0xac0] ss:$16 sps:$4 sm:$0xff]  }
  0x6d   : > { %3465 = vmatpush1.bf16.msra.mxu0 %v4851_v29  ;;  %v4935_v29 = vld [vmem:[%s5580_s25 + $0x8a4] ss:$16 sps:$4 sm:$0xff]  }
  0x6e   : > { %3506 = vmatpush1.bf16.msra.mxu1 %v4854_v30  ;;  %3466 = vmatprep.subr.bf16.mxu0 %v4859_v31  ;;  %v4938_v30 = vld [vmem:[%s5580_s25 + $0xaa4] ss:$16 sps:$4 sm:$0xff]   ;;  %v4933_v31 = vld [vmem:[%s5580_s25 + $0x8a0] ss:$16 sps:$4 sm:$0xff]  }
  0x6f   : > { %3507 = vmatprep.subr.bf16.mxu1 %v4862_v32  ;;  %v4936_v32 = vld [vmem:[%s5580_s25 + $0xaa0] ss:$16 sps:$4 sm:$0xff]  }
  0x71   : > { %3467 = vmatpush1.bf16.msra.mxu0 %v4857_v35  ;;  %v4939_v35 = vld [vmem:[%s5580_s25 + $0x880] ss:$16 sps:$4 sm:$0xff]  }
  0x72   : > { %3508 = vmatpush1.bf16.msra.mxu1 %v4860_v36  ;;  %3468 = vmatprep.subr.bf16.mxu0 %v4865_v39  ;;  %v4942_v36 = vld [vmem:[%s5580_s25 + $0xa80] ss:$16 sps:$4 sm:$0xff]   ;;  %v4947_v39 = vld [vmem:[%s5580_s25 + $0x864] ss:$16 sps:$4 sm:$0xff]  }
  0x73   : > { %3509 = vmatprep.subr.bf16.mxu1 %v4868_v40  ;;  %v4950_v40 = vld [vmem:[%s5580_s25 + $0xa64] ss:$16 sps:$4 sm:$0xff]  }
  0x75   : > { %3469 = vmatpush1.bf16.msra.mxu0 %v4863_v41  ;;  %v4945_v41 = vld [vmem:[%s5580_s25 + $0x860] ss:$16 sps:$4 sm:$0xff]  }
  0x76   : > { %3510 = vmatpush1.bf16.msra.mxu1 %v4866_v42  ;;  %3470 = vmatprep.subr.bf16.mxu0 %v4871_v43  ;;  %v4948_v42 = vld [vmem:[%s5580_s25 + $0xa60] ss:$16 sps:$4 sm:$0xff]   ;;  %v4953_v43 = vld [vmem:[%s5580_s25 + $0x844] ss:$16 sps:$4 sm:$0xff]  }
  0x77   : > { %3511 = vmatprep.subr.bf16.mxu1 %v4874_v44  ;;  %v4956_v44 = vld [vmem:[%s5580_s25 + $0xa44] ss:$16 sps:$4 sm:$0xff]  }
  0x79   : > { %3471 = vmatpush2.bf16.msra.mxu0 %v4869_v45  ;;  %v4951_v45 = vld [vmem:[%s5580_s25 + $0x840] ss:$16 sps:$4 sm:$0xff]  }
  0x7a   : > { %3512 = vmatpush2.bf16.msra.mxu1 %v4872_v46  ;;  %3472 = vmatprep.subr.bf16.mxu0 %v4877_v47  ;;  %v4954_v46 = vld [vmem:[%s5580_s25 + $0xa40] ss:$16 sps:$4 sm:$0xff]   ;;  %v4959_v47 = vld [vmem:[%s5580_s25 + $0x824] ss:$16 sps:$4 sm:$0xff]  }
  0x7b   : > { %3513 = vmatprep.subr.bf16.mxu1 %v4880_v49  ;;  %v4962_v49 = vld [vmem:[%s5580_s25 + $0xa24] ss:$16 sps:$4 sm:$0xff]  }
  0x7d   : > { %3473 = vmatpush2.bf16.msra.mxu0 %v4875_v50  ;;  %v4957_v50 = vld [vmem:[%s5580_s25 + $0x820] ss:$16 sps:$4 sm:$0xff]  }
  0x7e   : > { %3514 = vmatpush2.bf16.msra.mxu1 %v4878_v51  ;;  %3474 = vmatprep.subr.bf16.mxu0 %v4883_v53  ;;  %v4960_v51 = vld [vmem:[%s5580_s25 + $0xa20] ss:$16 sps:$4 sm:$0xff]   ;;  %v4965_v53 = vld [vmem:[%s5580_s25 + $0x804] ss:$16 sps:$4 sm:$0xff]  }
  0x7f   : > { %3515 = vmatprep.subr.bf16.mxu1 %v4886_v54  ;;  %v4968_v54 = vld [vmem:[%s5580_s25 + $0xa04] ss:$16 sps:$4 sm:$0xff]  }
  0x81   : > { %3475 = vmatpush2.bf16.msra.mxu0 %v4881_v55  ;;  %v4963_v55 = vld [vmem:[%s5580_s25 + $0x800] ss:$16 sps:$4 sm:$0xff]  }
  0x82   : > { %3516 = vmatpush2.bf16.msra.mxu1 %v4884_v56  ;;  %3476 = vmatprep.subr.bf16.mxu0 %v4889_v57  ;;  %v4966_v56 = vld [vmem:[%s5580_s25 + $0xa00] ss:$16 sps:$4 sm:$0xff]   ;;  %v4971_v57 = vld [vmem:[%s5580_s25 + $0x9e4] ss:$16 sps:$4 sm:$0xff]  }
  0x83   : > { %3517 = vmatprep.subr.bf16.mxu1 %v4892_v58  ;;  %v4974_v58 = vld [vmem:[%s5580_s25 + $0xbe4] ss:$16 sps:$4 sm:$0xff]  }
  0x85   : > { %3477 = vmatpush2.bf16.msra.mxu0 %v4887_v59  ;;  %v4969_v59 = vld [vmem:[%s5580_s25 + $0x9e0] ss:$16 sps:$4 sm:$0xff]  }
  0x86   : > { %3518 = vmatpush2.bf16.msra.mxu1 %v4890_v60  ;;  %3478 = vmatprep.subr.bf16.mxu0 %v4895_v61  ;;  %v4972_v60 = vld [vmem:[%s5580_s25 + $0xbe0] ss:$16 sps:$4 sm:$0xff]   ;;  %v4977_v61 = vld [vmem:[%s5580_s25 + $0x9c4] ss:$16 sps:$4 sm:$0xff]  }
  0x87   : > { %3519 = vmatprep.subr.bf16.mxu1 %v4898_v62  ;;  %v4980_v62 = vld [vmem:[%s5580_s25 + $0xbc4] ss:$16 sps:$4 sm:$0xff]  }
  0x89   : > { %3479 = vmatpush2.bf16.msra.mxu0 %v4893_v63  ;;  %v4975_v63 = vld [vmem:[%s5580_s25 + $0x9c0] ss:$16 sps:$4 sm:$0xff]  }
  0x8a   : > { %3520 = vmatpush2.bf16.msra.mxu1 %v4896_v0  ;;  %3480 = vmatprep.subr.bf16.mxu0 %v4901_v1  ;;  %v4978_v0 = vld [vmem:[%s5580_s25 + $0xbc0] ss:$16 sps:$4 sm:$0xff]   ;;  %v4983_v1 = vld [vmem:[%s5580_s25 + $0x9a4] ss:$16 sps:$4 sm:$0xff]  }
  0x8b   : > { %3521 = vmatprep.subr.bf16.mxu1 %v4904_v2  ;;  %v4986_v2 = vld [vmem:[%s5580_s25 + $0xba4] ss:$16 sps:$4 sm:$0xff]  }
  0x8d   : > { %3481 = vmatpush2.bf16.msra.mxu0 %v4899_v3  ;;  %v4981_v3 = vld [vmem:[%s5580_s25 + $0x9a0] ss:$16 sps:$4 sm:$0xff]  }
  0x8e   : > { %3522 = vmatpush2.bf16.msra.mxu1 %v4902_v4  ;;  %3482 = vmatprep.subr.bf16.mxu0 %v4907_v5  ;;  %v4984_v4 = vld [vmem:[%s5580_s25 + $0xba0] ss:$16 sps:$4 sm:$0xff]   ;;  %v4989_v5 = vld [vmem:[%s5580_s25 + $0x984] ss:$16 sps:$4 sm:$0xff]  }
  0x8f   : > { %3523 = vmatprep.subr.bf16.mxu1 %v4910_v6  ;;  %v4992_v6 = vld [vmem:[%s5580_s25 + $0xb84] ss:$16 sps:$4 sm:$0xff]  }
  0x91   : > { %3483 = vmatpush2.bf16.msra.mxu0 %v4905_v9  ;;  %v4987_v9 = vld [vmem:[%s5580_s25 + $0x980] ss:$16 sps:$4 sm:$0xff]  }
  0x92   : > { %3524 = vmatpush2.bf16.msra.mxu1 %v4908_v10  ;;  %3484 = vmatprep.subr.bf16.mxu0 %v4913_v11  ;;  %v4990_v10 = vld [vmem:[%s5580_s25 + $0xb80] ss:$16 sps:$4 sm:$0xff]   ;;  %v4995_v11 = vld [vmem:[%s5580_s25 + $0x964] ss:$16 sps:$4 sm:$0xff]  }
  0x93   : > { %3525 = vmatprep.subr.bf16.mxu1 %v4916_v12  ;;  %v4998_v12 = vld [vmem:[%s5580_s25 + $0xb64] ss:$16 sps:$4 sm:$0xff]  }
  0x95   : > { %3485 = vmatpush2.bf16.msra.mxu0 %v4911_v13  ;;  %v4993_v13 = vld [vmem:[%s5580_s25 + $0x960] ss:$16 sps:$4 sm:$0xff]  }
  0x96   : > { %3526 = vmatpush2.bf16.msra.mxu1 %v4914_v14  ;;  %3536 = vmatprep.subr.bf16.mxu0 %v4923_v15  ;;  %v4996_v14 = vld [vmem:[%s5580_s25 + $0xb60] ss:$16 sps:$4 sm:$0xff]   ;;  %v5001_v15 = vld [vmem:[%s5580_s25 + $0x944] ss:$16 sps:$4 sm:$0xff]  }
  0x97   : > { %3577 = vmatprep.subr.bf16.mxu1 %v4926_v16  ;;  %v5004_v16 = vld [vmem:[%s5580_s25 + $0xb44] ss:$16 sps:$4 sm:$0xff]  }
  0x98   : > { %3487 = vmatmul.mubr.bf16.vlgmr.msra.gmra.mxu0 %v5745_v17 }
  0x99   : > { %3528 = vmatmul.mubr.bf16.vlgmr.msra.gmra.mxu1 %v5749_v18  ;;  %3537 = vmatpush1.bf16.msra.mxu0 %v4921_v19  ;;  %v4999_v19 = vld [vmem:[%s5580_s25 + $0x940] ss:$16 sps:$4 sm:$0xff]  }
  0x9a   : > { %3578 = vmatpush1.bf16.msra.mxu1 %v4924_v20  ;;  %3538 = vmatprep.subr.bf16.mxu0 %v4929_v21  ;;  %v5002_v20 = vld [vmem:[%s5580_s25 + $0xb40] ss:$16 sps:$4 sm:$0xff]   ;;  %v5007_v21 = vld [vmem:[%s5580_s25 + $0x924] ss:$16 sps:$4 sm:$0xff]  }
  0x9b   : > { %3579 = vmatprep.subr.bf16.mxu1 %v4932_v22  ;;  %3568 = vmatprep.mubr.bf16.mxu0 %v5763_v25  ;;  %v5010_v22 = vld [vmem:[%s5580_s25 + $0xb24] ss:$16 sps:$4 sm:$0xff]  }
  0x9c   : > { %3609 = vmatprep.mubr.bf16.mxu1 %v5767_v26 }
  0x9d   : > { %3539 = vmatpush1.bf16.msra.mxu0 %v4927_v27  ;;  %v5005_v27 = vld [vmem:[%s5580_s25 + $0x920] ss:$16 sps:$4 sm:$0xff]  }
  0x9e   : > { %3580 = vmatpush1.bf16.msra.mxu1 %v4930_v28  ;;  %3540 = vmatprep.subr.bf16.mxu0 %v4935_v29  ;;  %v5008_v28 = vld [vmem:[%s5580_s25 + $0xb20] ss:$16 sps:$4 sm:$0xff]   ;;  %v5013_v29 = vld [vmem:[%s5580_s25 + $0x904] ss:$16 sps:$4 sm:$0xff]  }
  0x9f   : > { %3581 = vmatprep.subr.bf16.mxu1 %v4938_v30  ;;  %v5016_v30 = vld [vmem:[%s5580_s25 + $0xb04] ss:$16 sps:$4 sm:$0xff]  }
  0xa1   : > { %3541 = vmatpush1.bf16.msra.mxu0 %v4933_v31  ;;  %v5011_v31 = vld [vmem:[%s5580_s25 + $0x900] ss:$16 sps:$4 sm:$0xff]  }
  0xa2   : > { %3582 = vmatpush1.bf16.msra.mxu1 %v4936_v32  ;;  %3542 = vmatprep.subr.bf16.mxu0 %v4941_v33  ;;  %v5014_v32 = vld [vmem:[%s5580_s25 + $0xb00] ss:$16 sps:$4 sm:$0xff]   ;;  %v5023_v33 = vld [vmem:[%s5580_s25 + $0xce4] ss:$16 sps:$4 sm:$0xff]  }
  0xa3   : > { %3583 = vmatprep.subr.bf16.mxu1 %v4944_v34  ;;  %v5026_v34 = vld [vmem:[%s5580_s25 + $0xee4] ss:$16 sps:$4 sm:$0xff]  }
  0xa5   : > { %3543 = vmatpush1.bf16.msra.mxu0 %v4939_v35  ;;  %v5021_v35 = vld [vmem:[%s5580_s25 + $0xce0] ss:$16 sps:$4 sm:$0xff]  }
  0xa6   : > { %3584 = vmatpush1.bf16.msra.mxu1 %v4942_v36  ;;  %3544 = vmatprep.subr.bf16.mxu0 %v4947_v39  ;;  %v5024_v36 = vld [vmem:[%s5580_s25 + $0xee0] ss:$16 sps:$4 sm:$0xff]   ;;  %v5837_v39 = vcombine.low %v5756_v23, %v5756_v23 }
  0xa7   : > { %3585 = vmatprep.subr.bf16.mxu1 %v4950_v40  ;;  %v5841_v40 = vcombine.low %v5759_v24, %v5759_v24 }
  0xa9   : > { %3545 = vmatpush1.bf16.msra.mxu0 %v4945_v41  ;;  %v5844_v41 = vld [vmem:[%s5575_s21 + $0x30] sm:$0xff] }
  0xaa   : > { %3586 = vmatpush1.bf16.msra.mxu1 %v4948_v42  ;;  %3546 = vmatprep.subr.bf16.mxu0 %v4953_v43  ;;  %v5847_v42 = vld [vmem:[%s5575_s21 + $0x38] sm:$0xff]  ;;  %v5029_v43 = vld [vmem:[%s5580_s25 + $0xcc4] ss:$16 sps:$4 sm:$0xff]   ;;  %v5853_v23 = vcombine.high %v5844_v41, %v5844_v41 }
  0xab   : > { %3587 = vmatprep.subr.bf16.mxu1 %v4956_v44  ;;  %v5032_v44 = vld [vmem:[%s5580_s25 + $0xec4] ss:$16 sps:$4 sm:$0xff]   ;;  %v5857_v24 = vcombine.high %v5847_v42, %v5847_v42 }
  0xad   : > { %3547 = vmatpush1.bf16.msra.mxu0 %v4951_v45  ;;  %v5027_v45 = vld [vmem:[%s5580_s25 + $0xcc0] ss:$16 sps:$4 sm:$0xff]  }
  0xae   : > { %3588 = vmatpush1.bf16.msra.mxu1 %v4954_v46  ;;  %3548 = vmatprep.subr.bf16.mxu0 %v4959_v47  ;;  %v5030_v46 = vld [vmem:[%s5580_s25 + $0xec0] ss:$16 sps:$4 sm:$0xff]   ;;  %v5035_v47 = vld [vmem:[%s5580_s25 + $0xca4] ss:$16 sps:$4 sm:$0xff]  }
  0xaf   : > { %3589 = vmatprep.subr.bf16.mxu1 %v4962_v49  ;;  %v5038_v49 = vld [vmem:[%s5580_s25 + $0xea4] ss:$16 sps:$4 sm:$0xff]  }
  0xb1   : > { %3549 = vmatpush1.bf16.msra.mxu0 %v4957_v50  ;;  %v5033_v50 = vld [vmem:[%s5580_s25 + $0xca0] ss:$16 sps:$4 sm:$0xff]  }
  0xb2   : > { %3590 = vmatpush1.bf16.msra.mxu1 %v4960_v51  ;;  %3550 = vmatprep.subr.bf16.mxu0 %v4965_v53  ;;  %v5036_v51 = vld [vmem:[%s5580_s25 + $0xea0] ss:$16 sps:$4 sm:$0xff]   ;;  %v5041_v53 = vld [vmem:[%s5580_s25 + $0xc84] ss:$16 sps:$4 sm:$0xff]  }
  0xb3   : > { %3591 = vmatprep.subr.bf16.mxu1 %v4968_v54  ;;  %v5044_v54 = vld [vmem:[%s5580_s25 + $0xe84] ss:$16 sps:$4 sm:$0xff]  }
  0xb5   : > { %3551 = vmatpush1.bf16.msra.mxu0 %v4963_v55  ;;  %v5039_v55 = vld [vmem:[%s5580_s25 + $0xc80] ss:$16 sps:$4 sm:$0xff]  }
  0xb6   : > { %3592 = vmatpush1.bf16.msra.mxu1 %v4966_v56  ;;  %3552 = vmatprep.subr.bf16.mxu0 %v4971_v57  ;;  %v5042_v56 = vld [vmem:[%s5580_s25 + $0xe80] ss:$16 sps:$4 sm:$0xff]   ;;  %v5047_v57 = vld [vmem:[%s5580_s25 + $0xc64] ss:$16 sps:$4 sm:$0xff]  }
  0xb7   : > { %3593 = vmatprep.subr.bf16.mxu1 %v4974_v58  ;;  %v5050_v58 = vld [vmem:[%s5580_s25 + $0xe64] ss:$16 sps:$4 sm:$0xff]  }
  0xb9   : > { %3553 = vmatpush2.bf16.msra.mxu0 %v4969_v59  ;;  %v5045_v59 = vld [vmem:[%s5580_s25 + $0xc60] ss:$16 sps:$4 sm:$0xff]  }
  0xba   : > { %3594 = vmatpush2.bf16.msra.mxu1 %v4972_v60  ;;  %3554 = vmatprep.subr.bf16.mxu0 %v4977_v61  ;;  %v5048_v60 = vld [vmem:[%s5580_s25 + $0xe60] ss:$16 sps:$4 sm:$0xff]   ;;  %v5053_v61 = vld [vmem:[%s5580_s25 + $0xc44] ss:$16 sps:$4 sm:$0xff]  }
  0xbb   : > { %3595 = vmatprep.subr.bf16.mxu1 %v4980_v62  ;;  %v5056_v62 = vld [vmem:[%s5580_s25 + $0xe44] ss:$16 sps:$4 sm:$0xff]  }
  0xbd   : > { %3555 = vmatpush2.bf16.msra.mxu0 %v4975_v63  ;;  %v5051_v63 = vld [vmem:[%s5580_s25 + $0xc40] ss:$16 sps:$4 sm:$0xff]  }
  0xbe   : > { %3596 = vmatpush2.bf16.msra.mxu1 %v4978_v0  ;;  %3556 = vmatprep.subr.bf16.mxu0 %v4983_v1  ;;  %v5054_v0 = vld [vmem:[%s5580_s25 + $0xe40] ss:$16 sps:$4 sm:$0xff]   ;;  %v5059_v1 = vld [vmem:[%s5580_s25 + $0xc24] ss:$16 sps:$4 sm:$0xff]  }
  0xbf   : > { %3597 = vmatprep.subr.bf16.mxu1 %v4986_v2  ;;  %v5062_v2 = vld [vmem:[%s5580_s25 + $0xe24] ss:$16 sps:$4 sm:$0xff]  }
  0xc1   : > { %3557 = vmatpush2.bf16.msra.mxu0 %v4981_v3  ;;  %v5057_v3 = vld [vmem:[%s5580_s25 + $0xc20] ss:$16 sps:$4 sm:$0xff]  }
  0xc2   : > { %3598 = vmatpush2.bf16.msra.mxu1 %v4984_v4  ;;  %3558 = vmatprep.subr.bf16.mxu0 %v4989_v5  ;;  %v5060_v4 = vld [vmem:[%s5580_s25 + $0xe20] ss:$16 sps:$4 sm:$0xff]   ;;  %v5065_v5 = vld [vmem:[%s5580_s25 + $0xc04] ss:$16 sps:$4 sm:$0xff]  }
  0xc3   : > { %3599 = vmatprep.subr.bf16.mxu1 %v4992_v6  ;;  %v5068_v6 = vld [vmem:[%s5580_s25 + $0xe04] ss:$16 sps:$4 sm:$0xff]  }
  0xc5   : > { %3559 = vmatpush2.bf16.msra.mxu0 %v4987_v9  ;;  %v5063_v9 = vld [vmem:[%s5580_s25 + $0xc00] ss:$16 sps:$4 sm:$0xff]  }
  0xc6   : > { %3600 = vmatpush2.bf16.msra.mxu1 %v4990_v10  ;;  %3560 = vmatprep.subr.bf16.mxu0 %v4995_v11  ;;  %v5066_v10 = vld [vmem:[%s5580_s25 + $0xe00] ss:$16 sps:$4 sm:$0xff]   ;;  %v5071_v11 = vld [vmem:[%s5580_s25 + $0xde4] ss:$16 sps:$4 sm:$0xff]  }
  0xc7   : > { %3601 = vmatprep.subr.bf16.mxu1 %v4998_v12  ;;  %v5074_v12 = vld [vmem:[%s5580_s25 + $0xfe4] ss:$16 sps:$4 sm:$0xff]  }
  0xc9   : > { %3561 = vmatpush2.bf16.msra.mxu0 %v4993_v13  ;;  %v5069_v13 = vld [vmem:[%s5580_s25 + $0xde0] ss:$16 sps:$4 sm:$0xff]  }
  0xca   : > { %3602 = vmatpush2.bf16.msra.mxu1 %v4996_v14  ;;  %3562 = vmatprep.subr.bf16.mxu0 %v5001_v15  ;;  %v5072_v14 = vld [vmem:[%s5580_s25 + $0xfe0] ss:$16 sps:$4 sm:$0xff]   ;;  %v5077_v15 = vld [vmem:[%s5580_s25 + $0xdc4] ss:$16 sps:$4 sm:$0xff]  }
  0xcb   : > { %3603 = vmatprep.subr.bf16.mxu1 %v5004_v16  ;;  %v5080_v16 = vld [vmem:[%s5580_s25 + $0xfc4] ss:$16 sps:$4 sm:$0xff]  }
  0xcd   : > { %3563 = vmatpush2.bf16.msra.mxu0 %v4999_v19  ;;  %v5075_v19 = vld [vmem:[%s5580_s25 + $0xdc0] ss:$16 sps:$4 sm:$0xff]  }
  0xce   : > { %3604 = vmatpush2.bf16.msra.mxu1 %v5002_v20  ;;  %3564 = vmatprep.subr.bf16.mxu0 %v5007_v21  ;;  %v5078_v20 = vld [vmem:[%s5580_s25 + $0xfc0] ss:$16 sps:$4 sm:$0xff]   ;;  %v5083_v21 = vld [vmem:[%s5580_s25 + $0xda4] ss:$16 sps:$4 sm:$0xff]  }
  0xcf   : > { %3605 = vmatprep.subr.bf16.mxu1 %v5010_v22  ;;  %v5086_v22 = vld [vmem:[%s5580_s25 + $0xfa4] ss:$16 sps:$4 sm:$0xff]  }
  0xd1   : > { %3565 = vmatpush2.bf16.msra.mxu0 %v5005_v27  ;;  %v5081_v27 = vld [vmem:[%s5580_s25 + $0xda0] ss:$16 sps:$4 sm:$0xff]  }
  0xd2   : > { %3606 = vmatpush2.bf16.msra.mxu1 %v5008_v28  ;;  %3566 = vmatprep.subr.bf16.mxu0 %v5013_v29  ;;  %v5084_v28 = vld [vmem:[%s5580_s25 + $0xfa0] ss:$16 sps:$4 sm:$0xff]   ;;  %v5089_v29 = vld [vmem:[%s5580_s25 + $0xd84] ss:$16 sps:$4 sm:$0xff]  }
  0xd3   : > { %3607 = vmatprep.subr.bf16.mxu1 %v5016_v30  ;;  %v5092_v30 = vld [vmem:[%s5580_s25 + $0xf84] ss:$16 sps:$4 sm:$0xff]  }
  0xd5   : > { %3567 = vmatpush2.bf16.msra.mxu0 %v5011_v31  ;;  %v5087_v31 = vld [vmem:[%s5580_s25 + $0xd80] ss:$16 sps:$4 sm:$0xff]  }
  0xd6   : > { %3608 = vmatpush2.bf16.msra.mxu1 %v5014_v32  ;;  %3618 = vmatprep.subr.bf16.mxu0 %v5023_v33  ;;  %v5090_v32 = vld [vmem:[%s5580_s25 + $0xf80] ss:$16 sps:$4 sm:$0xff]   ;;  %v5095_v33 = vld [vmem:[%s5580_s25 + $0xd64] ss:$16 sps:$4 sm:$0xff]  }
  0xd7   : > { %3659 = vmatprep.subr.bf16.mxu1 %v5026_v34  ;;  %v5098_v34 = vld [vmem:[%s5580_s25 + $0xf64] ss:$16 sps:$4 sm:$0xff]  }
  0xd8   : > { %3569 = vmatmul.mubr.bf16.vlgmr.msra.gmra.mxu0 %v5837_v39 }
  0xd9   : > { %3610 = vmatmul.mubr.bf16.vlgmr.msra.gmra.mxu1 %v5841_v40  ;;  %3619 = vmatpush1.bf16.msra.mxu0 %v5021_v35  ;;  %v5093_v35 = vld [vmem:[%s5580_s25 + $0xd60] ss:$16 sps:$4 sm:$0xff]  }
  0xda   : > { %3660 = vmatpush1.bf16.msra.mxu1 %v5024_v36  ;;  %3620 = vmatprep.subr.bf16.mxu0 %v5029_v43  ;;  %v5096_v36 = vld [vmem:[%s5580_s25 + $0xf60] ss:$16 sps:$4 sm:$0xff]   ;;  %v5101_v43 = vld [vmem:[%s5580_s25 + $0xd44] ss:$16 sps:$4 sm:$0xff]  }
  0xdb   : > { %3661 = vmatprep.subr.bf16.mxu1 %v5032_v44  ;;  %3650 = vmatprep.mubr.bf16.mxu0 %v5853_v23  ;;  %v5104_v44 = vld [vmem:[%s5580_s25 + $0xf44] ss:$16 sps:$4 sm:$0xff]  }
  0xdc   : > { %3691 = vmatprep.mubr.bf16.mxu1 %v5857_v24 }
  0xdd   : > { %3621 = vmatpush1.bf16.msra.mxu0 %v5027_v45  ;;  %v5099_v45 = vld [vmem:[%s5580_s25 + $0xd40] ss:$16 sps:$4 sm:$0xff]  }
  0xde   : > { %3662 = vmatpush1.bf16.msra.mxu1 %v5030_v46  ;;  %3622 = vmatprep.subr.bf16.mxu0 %v5035_v47  ;;  %v5102_v46 = vld [vmem:[%s5580_s25 + $0xf40] ss:$16 sps:$4 sm:$0xff]   ;;  %v5107_v47 = vld [vmem:[%s5580_s25 + $0xd24] ss:$16 sps:$4 sm:$0xff]  }
  0xdf   : > { %3663 = vmatprep.subr.bf16.mxu1 %v5038_v49  ;;  %v5110_v49 = vld [vmem:[%s5580_s25 + $0xf24] ss:$16 sps:$4 sm:$0xff]  }
  0xe1   : > { %3623 = vmatpush1.bf16.msra.mxu0 %v5033_v50  ;;  %v5105_v50 = vld [vmem:[%s5580_s25 + $0xd20] ss:$16 sps:$4 sm:$0xff]  }
  0xe2   : > { %3664 = vmatpush1.bf16.msra.mxu1 %v5036_v51  ;;  %3624 = vmatprep.subr.bf16.mxu0 %v5041_v53  ;;  %v5108_v51 = vld [vmem:[%s5580_s25 + $0xf20] ss:$16 sps:$4 sm:$0xff]   ;;  %v5113_v53 = vld [vmem:[%s5580_s25 + $0xd04] ss:$16 sps:$4 sm:$0xff]  }
  0xe3   : > { %3665 = vmatprep.subr.bf16.mxu1 %v5044_v54  ;;  %v5116_v54 = vld [vmem:[%s5580_s25 + $0xf04] ss:$16 sps:$4 sm:$0xff]  }
  0xe5   : > { %3625 = vmatpush1.bf16.msra.mxu0 %v5039_v55  ;;  %v5111_v55 = vld [vmem:[%s5580_s25 + $0xd00] ss:$16 sps:$4 sm:$0xff]  }
  0xe6   : > { %3666 = vmatpush1.bf16.msra.mxu1 %v5042_v56  ;;  %3626 = vmatprep.subr.bf16.mxu0 %v5047_v57  ;;  %v5114_v56 = vld [vmem:[%s5580_s25 + $0xf00] ss:$16 sps:$4 sm:$0xff]   ;;  %v5123_v57 = vld [vmem:[%s5580_s25 + $0xec] ss:$16 sps:$4 sm:$0xff]  }
  0xe7   : > { %3667 = vmatprep.subr.bf16.mxu1 %v5050_v58  ;;  %v5126_v58 = vld [vmem:[%s5580_s25 + $0x2ec] ss:$16 sps:$4 sm:$0xff]  }
  0xe9   : > { %3627 = vmatpush1.bf16.msra.mxu0 %v5045_v59  ;;  %v5925_v59 = vcombine.low %v5844_v41, %v5844_v41  ;;  %v5127_v41 = vld [vmem:[%s5580_s25 + $0xc8] ss:$16 sps:$4 sm:$0xff]  }
  0xea   : > { %3668 = vmatpush1.bf16.msra.mxu1 %v5048_v60  ;;  %3628 = vmatprep.subr.bf16.mxu0 %v5053_v61  ;;  %v5929_v60 = vcombine.low %v5847_v42, %v5847_v42  ;;  %v5121_v61 = vld [vmem:[%s5580_s25 + $0xe8] ss:$16 sps:$4 sm:$0xff]  }
  0xeb   : > { %3669 = vmatprep.subr.bf16.mxu1 %v5056_v62  ;;  %v5124_v62 = vld [vmem:[%s5580_s25 + $0x2e8] ss:$16 sps:$4 sm:$0xff]  }
  0xec   : > { %v5130_v42 = vld [vmem:[%s5580_s25 + $0x2c8] ss:$16 sps:$4 sm:$0xff]  }
  0xed   : > { %3629 = vmatpush1.bf16.msra.mxu0 %v5051_v63  ;;  %v5129_v63 = vld [vmem:[%s5580_s25 + $0xcc] ss:$16 sps:$4 sm:$0xff]  }
  0xee   : > { %3670 = vmatpush1.bf16.msra.mxu1 %v5054_v0  ;;  %3630 = vmatprep.subr.bf16.mxu0 %v5059_v1  ;;  %v5132_v0 = vld [vmem:[%s5580_s25 + $0x2cc] ss:$16 sps:$4 sm:$0xff]  }
  0xef   : > { %3671 = vmatprep.subr.bf16.mxu1 %v5062_v2 }
  0xf1   : > { %3631 = vmatpush1.bf16.msra.mxu0 %v5057_v3 }
  0xf2   : > { %3672 = vmatpush1.bf16.msra.mxu1 %v5060_v4  ;;  %3632 = vmatprep.subr.bf16.mxu0 %v5065_v5  ;;  %v5135_v4 = vld [vmem:[%s5580_s25 + $0xac] ss:$16 sps:$4 sm:$0xff]  }
  0xf3   : > { %3673 = vmatprep.subr.bf16.mxu1 %v5068_v6 }
  0xf5   : > { %3633 = vmatpush1.bf16.msra.mxu0 %v5063_v9  ;;  %v5138_v9 = vld [vmem:[%s5580_s25 + $0x2ac] ss:$16 sps:$4 sm:$0xff]  }
  0xf6   : > { %3674 = vmatpush1.bf16.msra.mxu1 %v5066_v10  ;;  %3634 = vmatprep.subr.bf16.mxu0 %v5071_v11 }
  0xf7   : > { %3675 = vmatprep.subr.bf16.mxu1 %v5074_v12 }
  0xf9   : > { %3635 = vmatpush2.bf16.msra.mxu0 %v5069_v13  ;;  %v5133_v13 = vld [vmem:[%s5580_s25 + $0xa8] ss:$16 sps:$4 sm:$0xff]  }
  0xfa   : > { %3676 = vmatpush2.bf16.msra.mxu1 %v5072_v14  ;;  %3636 = vmatprep.subr.bf16.mxu0 %v5077_v15  ;;  %v5136_v14 = vld [vmem:[%s5580_s25 + $0x2a8] ss:$16 sps:$4 sm:$0xff]  }
  0xfb   : > { %3677 = vmatprep.subr.bf16.mxu1 %v5080_v16 }
  0xfd   : > { %3637 = vmatpush2.bf16.msra.mxu0 %v5075_v19  ;;  %v5141_v19 = vld [vmem:[%s5580_s25 + $0x8c] ss:$16 sps:$4 sm:$0xff]  }
  0xfe   : > { %3678 = vmatpush2.bf16.msra.mxu1 %v5078_v20  ;;  %3638 = vmatprep.subr.bf16.mxu0 %v5083_v21  ;;  %v5142_v20 = vld [vmem:[%s5580_s25 + $0x288] ss:$16 sps:$4 sm:$0xff]   ;;  %v5147_v21 = vld [vmem:[%s5580_s25 + $0x6c] ss:$16 sps:$4 sm:$0xff]  }
  0xff   : > { %3679 = vmatprep.subr.bf16.mxu1 %v5086_v22  ;;  %v5150_v22 = vld [vmem:[%s5580_s25 + $0x26c] ss:$16 sps:$4 sm:$0xff]  }
 0x101   : > { %3639 = vmatpush2.bf16.msra.mxu0 %v5081_v27  ;;  %v5145_v27 = vld [vmem:[%s5580_s25 + $0x68] ss:$16 sps:$4 sm:$0xff]  }
 0x102   : > { %3680 = vmatpush2.bf16.msra.mxu1 %v5084_v28  ;;  %3640 = vmatprep.subr.bf16.mxu0 %v5089_v29  ;;  %v5148_v28 = vld [vmem:[%s5580_s25 + $0x268] ss:$16 sps:$4 sm:$0xff]   ;;  %v5153_v29 = vld [vmem:[%s5580_s25 + $0x4c] ss:$16 sps:$4 sm:$0xff]  }
 0x103   : > { %3681 = vmatprep.subr.bf16.mxu1 %v5092_v30  ;;  %v5156_v30 = vld [vmem:[%s5580_s25 + $0x24c] ss:$16 sps:$4 sm:$0xff]  }
 0x105   : > { %3641 = vmatpush2.bf16.msra.mxu0 %v5087_v31  ;;  %v5151_v31 = vld [vmem:[%s5580_s25 + $0x48] ss:$16 sps:$4 sm:$0xff]  }
 0x106   : > { %3682 = vmatpush2.bf16.msra.mxu1 %v5090_v32  ;;  %3642 = vmatprep.subr.bf16.mxu0 %v5095_v33  ;;  %v5154_v32 = vld [vmem:[%s5580_s25 + $0x248] ss:$16 sps:$4 sm:$0xff]   ;;  %v5159_v33 = vld [vmem:[%s5580_s25 + $0x2c] ss:$16 sps:$4 sm:$0xff]  }
 0x107   : > { %3683 = vmatprep.subr.bf16.mxu1 %v5098_v34  ;;  %v5162_v34 = vld [vmem:[%s5580_s25 + $0x22c] ss:$16 sps:$4 sm:$0xff]  }
 0x109   : > { %3643 = vmatpush2.bf16.msra.mxu0 %v5093_v35  ;;  %v5157_v35 = vld [vmem:[%s5580_s25 + $0x28] ss:$16 sps:$4 sm:$0xff]  }
 0x10a   : > { %3684 = vmatpush2.bf16.msra.mxu1 %v5096_v36  ;;  %3644 = vmatprep.subr.bf16.mxu0 %v5101_v43  ;;  %v5160_v36 = vld [vmem:[%s5580_s25 + $0x228] ss:$16 sps:$4 sm:$0xff]   ;;  %v5165_v43 = vld [vmem:[%s5580_s25 + $0xc] ss:$16 sps:$4 sm:$0xff]  }
 0x10b   : > { %3685 = vmatprep.subr.bf16.mxu1 %v5104_v44  ;;  %v5168_v44 = vld [vmem:[%s5580_s25 + $0x20c] ss:$16 sps:$4 sm:$0xff]  }
 0x10d   : > { %3645 = vmatpush2.bf16.msra.mxu0 %v5099_v45  ;;  %v5163_v45 = vld [vmem:[%s5580_s25 + $0x8] ss:$16 sps:$4 sm:$0xff]  }
 0x10e   : > { %3686 = vmatpush2.bf16.msra.mxu1 %v5102_v46  ;;  %3646 = vmatprep.subr.bf16.mxu0 %v5107_v47  ;;  %v5166_v46 = vld [vmem:[%s5580_s25 + $0x208] ss:$16 sps:$4 sm:$0xff]   ;;  %v5171_v47 = vld [vmem:[%s5580_s25 + $0x1ec] ss:$16 sps:$4 sm:$0xff]  }
 0x10f   : > { %3687 = vmatprep.subr.bf16.mxu1 %v5110_v49  ;;  %v5174_v49 = vld [vmem:[%s5580_s25 + $0x3ec] ss:$16 sps:$4 sm:$0xff]  }
 0x111   : > { %3647 = vmatpush2.bf16.msra.mxu0 %v5105_v50  ;;  %v5169_v50 = vld [vmem:[%s5580_s25 + $0x1e8] ss:$16 sps:$4 sm:$0xff]  }
 0x112   : > { %3688 = vmatpush2.bf16.msra.mxu1 %v5108_v51  ;;  %3648 = vmatprep.subr.bf16.mxu0 %v5113_v53  ;;  %v5172_v51 = vld [vmem:[%s5580_s25 + $0x3e8] ss:$16 sps:$4 sm:$0xff]   ;;  %v5177_v53 = vld [vmem:[%s5580_s25 + $0x1cc] ss:$16 sps:$4 sm:$0xff]  }
 0x113   : > { %3689 = vmatprep.subr.bf16.mxu1 %v5116_v54  ;;  %v5180_v54 = vld [vmem:[%s5580_s25 + $0x3cc] ss:$16 sps:$4 sm:$0xff]  }
 0x115   : > { %3649 = vmatpush2.bf16.msra.mxu0 %v5111_v55  ;;  %v5175_v55 = vld [vmem:[%s5580_s25 + $0x1c8] ss:$16 sps:$4 sm:$0xff]  }
 0x116   : > { %3690 = vmatpush2.bf16.msra.mxu1 %v5114_v56  ;;  %3700 = vmatprep.subr.bf16.mxu0 %v5123_v57  ;;  %v5178_v56 = vld [vmem:[%s5580_s25 + $0x3c8] ss:$16 sps:$4 sm:$0xff]   ;;  %v5183_v57 = vld [vmem:[%s5580_s25 + $0x1ac] ss:$16 sps:$4 sm:$0xff]  }
 0x117   : > { %3741 = vmatprep.subr.bf16.mxu1 %v5126_v58  ;;  %v5186_v58 = vld [vmem:[%s5580_s25 + $0x3ac] ss:$16 sps:$4 sm:$0xff]  }
 0x118   : > { %v3406_v1 = vpop.f32.mrf.mxu0  ;;  %3651 = vmatmul.mubr.bf16.vlgmr.msra.gmra.mxu0 %v5925_v59 }
 0x119   : > { %v3447_v2 = vpop.f32.mrf.mxu1  ;;  %3692 = vmatmul.mubr.bf16.vlgmr.msra.gmra.mxu1 %v5929_v60  ;;  %3701 = vmatpush1.bf16.msra.mxu0 %v5121_v61  ;;  %v5181_v61 = vld [vmem:[%s5580_s25 + $0x1a8] ss:$16 sps:$4 sm:$0xff]  }
 0x11a   : > { %v5939_v3 = vadd.f32 %v3447_v2, %v3406_v1  ;;  %3742 = vmatpush1.bf16.msra.mxu1 %v5124_v62  ;;  %v3408_v5 = vpop.f32.mrf.mxu0  ;;  %3702 = vmatprep.subr.bf16.mxu0 %v5129_v63  ;;  %v5184_v62 = vld [vmem:[%s5580_s25 + $0x3a8] ss:$16 sps:$4 sm:$0xff]   ;;  %v5189_v63 = vld [vmem:[%s5580_s25 + $0x18c] ss:$16 sps:$4 sm:$0xff]  }
 0x11b   : > { %v3449_v6 = vpop.f32.mrf.mxu1  ;;  %3743 = vmatprep.subr.bf16.mxu1 %v5132_v0  ;;  %3732 = vmatprep.mubr.bf16.mxu0 %v5630_v48  ;;  %v5144_v48 = vld [vmem:[%s5580_s25 + $0x28c] ss:$16 sps:$4 sm:$0xff]   ;;  %v5187_v1 = vld [vmem:[%s5580_s25 + $0x188] ss:$16 sps:$4 sm:$0xff]  }
 0x11c   : > { %v5943_v10 = vadd.f32 %v3449_v6, %v3408_v5  ;;  %3773 = vmatprep.mubr.bf16.mxu1 %v5635_v52  ;;  %v3410_v11 = vpop.f32.mrf.mxu0  ;;  %v5139_v52 = vld [vmem:[%s5580_s25 + $0x88] ss:$16 sps:$4 sm:$0xff]   ;;  %v5192_v0 = vld [vmem:[%s5580_s25 + $0x38c] ss:$16 sps:$4 sm:$0xff]  }
 0x11d   : > { %v3451_v12 = vpop.f32.mrf.mxu1  ;;  %3703 = vmatpush1.bf16.msra.mxu0 %v5127_v41  ;;  %v5190_v2 = vld [vmem:[%s5580_s25 + $0x388] ss:$16 sps:$4 sm:$0xff]   ;;  %v5195_v41 = vld [vmem:[%s5580_s25 + $0x16c] ss:$16 sps:$4 sm:$0xff]  }
 0x11e   : > { %3744 = vmatpush1.bf16.msra.mxu1 %v5130_v42  ;;  %v3411_v15 = vpop.f32.mrf.mxu0  ;;  %3704 = vmatprep.subr.bf16.mxu0 %v5135_v4  ;;  %v5198_v42 = vld [vmem:[%s5580_s25 + $0x36c] ss:$16 sps:$4 sm:$0xff]   ;;  %v5193_v4 = vld [vmem:[%s5580_s25 + $0x168] ss:$16 sps:$4 sm:$0xff]  }
 0x11f   : > { %v3452_v16 = vpop.f32.mrf.mxu1  ;;  %3745 = vmatprep.subr.bf16.mxu1 %v5138_v9  ;;  %v5196_v5 = vld [vmem:[%s5580_s25 + $0x368] ss:$16 sps:$4 sm:$0xff]   ;;  %v5201_v6 = vld [vmem:[%s5580_s25 + $0x14c] ss:$16 sps:$4 sm:$0xff]  }
 0x120   : > { %v5204_v9 = vld [vmem:[%s5580_s25 + $0x34c] ss:$16 sps:$4 sm:$0xff]   ;;  %v5199_v11 = vld [vmem:[%s5580_s25 + $0x148] ss:$16 sps:$4 sm:$0xff]  }
 0x121   : > { %3705 = vmatpush1.bf16.msra.mxu0 %v5133_v13  ;;  %v5202_v12 = vld [vmem:[%s5580_s25 + $0x348] ss:$16 sps:$4 sm:$0xff]   ;;  %v5207_v13 = vld [vmem:[%s5580_s25 + $0x12c] ss:$16 sps:$4 sm:$0xff]  }
 0x122   : > { %3746 = vmatpush1.bf16.msra.mxu1 %v5136_v14  ;;  %3706 = vmatprep.subr.bf16.mxu0 %v5141_v19  ;;  %v5210_v14 = vld [vmem:[%s5580_s25 + $0x32c] ss:$16 sps:$4 sm:$0xff]   ;;  %v5205_v15 = vld [vmem:[%s5580_s25 + $0x128] ss:$16 sps:$4 sm:$0xff]  }
 0x123   : > { %3747 = vmatprep.subr.bf16.mxu1 %v5144_v48  ;;  %v5208_v16 = vld [vmem:[%s5580_s25 + $0x328] ss:$16 sps:$4 sm:$0xff]   ;;  %v5213_v19 = vld [vmem:[%s5580_s25 + $0x10c] ss:$16 sps:$4 sm:$0xff]  }
 0x124   : > { %v5216_v48 = vld [vmem:[%s5580_s25 + $0x30c] ss:$16 sps:$4 sm:$0xff]  }
 0x125   : > { %3707 = vmatpush1.bf16.msra.mxu0 %v5139_v52  ;;  %v5211_v52 = vld [vmem:[%s5580_s25 + $0x108] ss:$16 sps:$4 sm:$0xff]  }
 0x126   : > { %3748 = vmatpush1.bf16.msra.mxu1 %v5142_v20  ;;  %3708 = vmatprep.subr.bf16.mxu0 %v5147_v21  ;;  %v5214_v20 = vld [vmem:[%s5580_s25 + $0x308] ss:$16 sps:$4 sm:$0xff]   ;;  %v5219_v21 = vld [vmem:[%s5580_s25 + $0x4ec] ss:$16 sps:$4 sm:$0xff]  }
 0x127   : > { %3749 = vmatprep.subr.bf16.mxu1 %v5150_v22  ;;  %v5222_v22 = vld [vmem:[%s5580_s25 + $0x6ec] ss:$16 sps:$4 sm:$0xff]  }
 0x129   : > { %3709 = vmatpush1.bf16.msra.mxu0 %v5145_v27  ;;  %v5217_v27 = vld [vmem:[%s5580_s25 + $0x4e8] ss:$16 sps:$4 sm:$0xff]  }
 0x12a   : > { %3750 = vmatpush1.bf16.msra.mxu1 %v5148_v28  ;;  %3710 = vmatprep.subr.bf16.mxu0 %v5153_v29  ;;  %v5220_v28 = vld [vmem:[%s5580_s25 + $0x6e8] ss:$16 sps:$4 sm:$0xff]   ;;  %v5225_v29 = vld [vmem:[%s5580_s25 + $0x4cc] ss:$16 sps:$4 sm:$0xff]  }
 0x12b   : > { %3751 = vmatprep.subr.bf16.mxu1 %v5156_v30  ;;  %v5228_v30 = vld [vmem:[%s5580_s25 + $0x6cc] ss:$16 sps:$4 sm:$0xff]  }
 0x12d   : > { %3711 = vmatpush1.bf16.msra.mxu0 %v5151_v31 }
 0x12e   : > { %3752 = vmatpush1.bf16.msra.mxu1 %v5154_v32  ;;  %3712 = vmatprep.subr.bf16.mxu0 %v5159_v33 }
 0x12f   : > { %3753 = vmatprep.subr.bf16.mxu1 %v5162_v34  ;;  %v5223_v34 = vld [vmem:[%s5580_s25 + $0x4c8] ss:$16 sps:$4 sm:$0xff]  }
 0x131   : > { %3713 = vmatpush1.bf16.msra.mxu0 %v5157_v35  ;;  %v5226_v35 = vld [vmem:[%s5580_s25 + $0x6c8] ss:$16 sps:$4 sm:$0xff]  }
 0x132   : > { %3754 = vmatpush1.bf16.msra.mxu1 %v5160_v36  ;;  %3714 = vmatprep.subr.bf16.mxu0 %v5165_v43 }
 0x133   : > { %3755 = vmatprep.subr.bf16.mxu1 %v5168_v44  ;;  %v5231_v44 = vld [vmem:[%s5580_s25 + $0x4ac] ss:$16 sps:$4 sm:$0xff]  }
 0x135   : > { %3715 = vmatpush1.bf16.msra.mxu0 %v5163_v45  ;;  %v5234_v45 = vld [vmem:[%s5580_s25 + $0x6ac] ss:$16 sps:$4 sm:$0xff]  }
 0x136   : > { %3756 = vmatpush1.bf16.msra.mxu1 %v5166_v46  ;;  %3716 = vmatprep.subr.bf16.mxu0 %v5171_v47 }
 0x137   : > { %3757 = vmatprep.subr.bf16.mxu1 %v5174_v49  ;;  %v5229_v49 = vld [vmem:[%s5580_s25 + $0x4a8] ss:$16 sps:$4 sm:$0xff]  }
 0x139   : > { %3717 = vmatpush2.bf16.msra.mxu0 %v5169_v50  ;;  %v5232_v50 = vld [vmem:[%s5580_s25 + $0x6a8] ss:$16 sps:$4 sm:$0xff]  }
 0x13a   : > { %3758 = vmatpush2.bf16.msra.mxu1 %v5172_v51  ;;  %3718 = vmatprep.subr.bf16.mxu0 %v5177_v53 }
 0x13b   : > { %3759 = vmatprep.subr.bf16.mxu1 %v5180_v54  ;;  %v5238_v54 = vld [vmem:[%s5580_s25 + $0x688] ss:$16 sps:$4 sm:$0xff]  }
 0x13d   : > { %3719 = vmatpush2.bf16.msra.mxu0 %v5175_v55  ;;  %v5243_v55 = vld [vmem:[%s5580_s25 + $0x46c] ss:$16 sps:$4 sm:$0xff]  }
 0x13e   : > { %3760 = vmatpush2.bf16.msra.mxu1 %v5178_v56  ;;  %3720 = vmatprep.subr.bf16.mxu0 %v5183_v57  ;;  %v5246_v56 = vld [vmem:[%s5580_s25 + $0x66c] ss:$16 sps:$4 sm:$0xff]   ;;  %v5241_v57 = vld [vmem:[%s5580_s25 + $0x468] ss:$16 sps:$4 sm:$0xff]  }
 0x13f   : > { %3761 = vmatprep.subr.bf16.mxu1 %v5186_v58  ;;  %v5244_v58 = vld [vmem:[%s5580_s25 + $0x668] ss:$16 sps:$4 sm:$0xff]  }
 0x141   : > { %3721 = vmatpush2.bf16.msra.mxu0 %v5181_v61  ;;  %v5249_v61 = vld [vmem:[%s5580_s25 + $0x44c] ss:$16 sps:$4 sm:$0xff]  }
 0x142   : > { %3762 = vmatpush2.bf16.msra.mxu1 %v5184_v62  ;;  %3722 = vmatprep.subr.bf16.mxu0 %v5189_v63  ;;  %v5252_v62 = vld [vmem:[%s5580_s25 + $0x64c] ss:$16 sps:$4 sm:$0xff]   ;;  %v5247_v63 = vld [vmem:[%s5580_s25 + $0x448] ss:$16 sps:$4 sm:$0xff]  }
 0x143   : > { %3763 = vmatprep.subr.bf16.mxu1 %v5192_v0  ;;  %v5250_v0 = vld [vmem:[%s5580_s25 + $0x648] ss:$16 sps:$4 sm:$0xff]  }
 0x145   : > { %3723 = vmatpush2.bf16.msra.mxu0 %v5187_v1  ;;  %v5255_v1 = vld [vmem:[%s5580_s25 + $0x42c] ss:$16 sps:$4 sm:$0xff]  }
 0x146   : > { %3764 = vmatpush2.bf16.msra.mxu1 %v5190_v2  ;;  %3724 = vmatprep.subr.bf16.mxu0 %v5195_v41  ;;  %v5258_v2 = vld [vmem:[%s5580_s25 + $0x62c] ss:$16 sps:$4 sm:$0xff]   ;;  %v5253_v41 = vld [vmem:[%s5580_s25 + $0x428] ss:$16 sps:$4 sm:$0xff]  }
 0x147   : > { %3765 = vmatprep.subr.bf16.mxu1 %v5198_v42  ;;  %v5256_v42 = vld [vmem:[%s5580_s25 + $0x628] ss:$16 sps:$4 sm:$0xff]  }
 0x149   : > { %3725 = vmatpush2.bf16.msra.mxu0 %v5193_v4  ;;  %v5261_v4 = vld [vmem:[%s5580_s25 + $0x40c] ss:$16 sps:$4 sm:$0xff]  }
 0x14a   : > { %3766 = vmatpush2.bf16.msra.mxu1 %v5196_v5  ;;  %3726 = vmatprep.subr.bf16.mxu0 %v5201_v6  ;;  %v5264_v5 = vld [vmem:[%s5580_s25 + $0x60c] ss:$16 sps:$4 sm:$0xff]   ;;  %v5259_v6 = vld [vmem:[%s5580_s25 + $0x408] ss:$16 sps:$4 sm:$0xff]  }
 0x14b   : > { %3767 = vmatprep.subr.bf16.mxu1 %v5204_v9  ;;  %v5262_v9 = vld [vmem:[%s5580_s25 + $0x608] ss:$16 sps:$4 sm:$0xff]  }
 0x14d   : > { %3727 = vmatpush2.bf16.msra.mxu0 %v5199_v11  ;;  %v5267_v11 = vld [vmem:[%s5580_s25 + $0x5ec] ss:$16 sps:$4 sm:$0xff]  }
 0x14e   : > { %3768 = vmatpush2.bf16.msra.mxu1 %v5202_v12  ;;  %3728 = vmatprep.subr.bf16.mxu0 %v5207_v13  ;;  %v5270_v12 = vld [vmem:[%s5580_s25 + $0x7ec] ss:$16 sps:$4 sm:$0xff]   ;;  %v5265_v13 = vld [vmem:[%s5580_s25 + $0x5e8] ss:$16 sps:$4 sm:$0xff]  }
 0x14f   : > { %3769 = vmatprep.subr.bf16.mxu1 %v5210_v14  ;;  %v5268_v14 = vld [vmem:[%s5580_s25 + $0x7e8] ss:$16 sps:$4 sm:$0xff]  }
 0x151   : > { %3729 = vmatpush2.bf16.msra.mxu0 %v5205_v15  ;;  %v5273_v15 = vld [vmem:[%s5580_s25 + $0x5cc] ss:$16 sps:$4 sm:$0xff]  }
 0x152   : > { %3770 = vmatpush2.bf16.msra.mxu1 %v5208_v16  ;;  %3730 = vmatprep.subr.bf16.mxu0 %v5213_v19  ;;  %v5276_v16 = vld [vmem:[%s5580_s25 + $0x7cc] ss:$16 sps:$4 sm:$0xff]   ;;  %v5271_v19 = vld [vmem:[%s5580_s25 + $0x5c8] ss:$16 sps:$4 sm:$0xff]  }
 0x153   : > { %3771 = vmatprep.subr.bf16.mxu1 %v5216_v48  ;;  %v5274_v48 = vld [vmem:[%s5580_s25 + $0x7c8] ss:$16 sps:$4 sm:$0xff]  }
 0x155   : > { %3731 = vmatpush2.bf16.msra.mxu0 %v5211_v52  ;;  %v5279_v52 = vld [vmem:[%s5580_s25 + $0x5ac] ss:$16 sps:$4 sm:$0xff]  }
 0x156   : > { %3772 = vmatpush2.bf16.msra.mxu1 %v5214_v20  ;;  %3782 = vmatprep.subr.bf16.mxu0 %v5219_v21  ;;  %v5282_v20 = vld [vmem:[%s5580_s25 + $0x7ac] ss:$16 sps:$4 sm:$0xff]   ;;  %v5277_v21 = vld [vmem:[%s5580_s25 + $0x5a8] ss:$16 sps:$4 sm:$0xff]  }
 0x157   : > { %3823 = vmatprep.subr.bf16.mxu1 %v5222_v22  ;;  %v5280_v22 = vld [vmem:[%s5580_s25 + $0x7a8] ss:$16 sps:$4 sm:$0xff]  }
 0x158   : > { %v3488_v31 = vpop.f32.mrf.mxu0  ;;  %3733 = vmatmul.mubr.bf16.vlgmr.msra.gmra.mxu0 %v5657_v7 }
 0x159   : > { %v3529_v32 = vpop.f32.mrf.mxu1  ;;  %3774 = vmatmul.mubr.bf16.vlgmr.msra.gmra.mxu1 %v5659_v8  ;;  %v3489_v33 = vadd.f32 %v3488_v31, %v5939_v3  ;;  %3783 = vmatpush1.bf16.msra.mxu0 %v5217_v27  ;;  %v5285_v27 = vld [vmem:[%s5580_s25 + $0x58c] ss:$16 sps:$4 sm:$0xff]  }
 0x15a   : > { %3824 = vmatpush1.bf16.msra.mxu1 %v5220_v28  ;;  %v3490_v36 = vpop.f32.mrf.mxu0  ;;  %3784 = vmatprep.subr.bf16.mxu0 %v5225_v29  ;;  %v5288_v28 = vld [vmem:[%s5580_s25 + $0x78c] ss:$16 sps:$4 sm:$0xff]   ;;  %v5283_v29 = vld [vmem:[%s5580_s25 + $0x588] ss:$16 sps:$4 sm:$0xff]  }
 0x15b   : > { %v3531_v43 = vpop.f32.mrf.mxu1  ;;  %3825 = vmatprep.subr.bf16.mxu1 %v5228_v30  ;;  %v6014_v46 = vadd.f32 %v3529_v32, %v3489_v33  ;;  %v3491_v7 = vadd.f32 %v3490_v36, %v5943_v10  ;;  %3814 = vmatprep.mubr.bf16.mxu0 %v5697_v37  ;;  %v5237_v37 = vld [vmem:[%s5580_s25 + $0x48c] ss:$16 sps:$4 sm:$0xff]   ;;  %v5235_v10 = vld [vmem:[%s5580_s25 + $0x488] ss:$16 sps:$4 sm:$0xff]  }
 0x15c   : > { %3855 = vmatprep.mubr.bf16.mxu1 %v5701_v38  ;;  %v3492_v8 = vpop.f32.mrf.mxu0  ;;  %v5240_v38 = vld [vmem:[%s5580_s25 + $0x68c] ss:$16 sps:$4 sm:$0xff]   ;;  %v5286_v30 = vld [vmem:[%s5580_s25 + $0x788] ss:$16 sps:$4 sm:$0xff]  }
 0x15d   : > { %v3533_v3 = vpop.f32.mrf.mxu1  ;;  %v6019_v47 = vadd.f32 %v3531_v43, %v3491_v7  ;;  %3785 = vmatpush1.bf16.msra.mxu0 %v5223_v34  ;;  %v5291_v31 = vld [vmem:[%s5580_s25 + $0x56c] ss:$16 sps:$4 sm:$0xff]   ;;  %v5289_v33 = vld [vmem:[%s5580_s25 + $0x568] ss:$16 sps:$4 sm:$0xff]  }
 0x15e   : > { %3826 = vmatpush1.bf16.msra.mxu1 %v5226_v35  ;;  %v3493_v51 = vpop.f32.mrf.mxu0  ;;  %3786 = vmatprep.subr.bf16.mxu0 %v5231_v44  ;;  %v5294_v32 = vld [vmem:[%s5580_s25 + $0x76c] ss:$16 sps:$4 sm:$0xff]   ;;  %v5292_v34 = vld [vmem:[%s5580_s25 + $0x768] ss:$16 sps:$4 sm:$0xff]  }
 0x15f   : > { %v3534_v53 = vpop.f32.mrf.mxu1  ;;  %3827 = vmatprep.subr.bf16.mxu1 %v5234_v45  ;;  %v5297_v35 = vld [vmem:[%s5580_s25 + $0x54c] ss:$16 sps:$4 sm:$0xff]   ;;  %v5295_v43 = vld [vmem:[%s5580_s25 + $0x548] ss:$16 sps:$4 sm:$0xff]  }
 0x160   : > { %v5300_v36 = vld [vmem:[%s5580_s25 + $0x74c] ss:$16 sps:$4 sm:$0xff]   ;;  %v5298_v44 = vld [vmem:[%s5580_s25 + $0x748] ss:$16 sps:$4 sm:$0xff]  }
 0x161   : > { %3787 = vmatpush1.bf16.msra.mxu0 %v5229_v49  ;;  %v5303_v45 = vld [vmem:[%s5580_s25 + $0x52c] ss:$16 sps:$4 sm:$0xff]   ;;  %v5301_v8 = vld [vmem:[%s5580_s25 + $0x528] ss:$16 sps:$4 sm:$0xff]  }
 0x162   : > { %3828 = vmatpush1.bf16.msra.mxu1 %v5232_v50  ;;  %3788 = vmatprep.subr.bf16.mxu0 %v5237_v37  ;;  %v5306_v7 = vld [vmem:[%s5580_s25 + $0x72c] ss:$16 sps:$4 sm:$0xff]   ;;  %v5304_v3 = vld [vmem:[%s5580_s25 + $0x728] ss:$16 sps:$4 sm:$0xff]  }
 0x163   : > { %3829 = vmatprep.subr.bf16.mxu1 %v5240_v38  ;;  %v5309_v49 = vld [vmem:[%s5580_s25 + $0x50c] ss:$16 sps:$4 sm:$0xff]   ;;  %v5307_v51 = vld [vmem:[%s5580_s25 + $0x508] ss:$16 sps:$4 sm:$0xff]  }
 0x164   : > { %v5312_v50 = vld [vmem:[%s5580_s25 + $0x70c] ss:$16 sps:$4 sm:$0xff]   ;;  %v5310_v53 = vld [vmem:[%s5580_s25 + $0x708] ss:$16 sps:$4 sm:$0xff]  }
 0x165   : > { %3789 = vmatpush1.bf16.msra.mxu0 %v5235_v10  ;;  %v5315_v37 = vld [vmem:[%s5580_s25 + $0x8ec] ss:$16 sps:$4 sm:$0xff]   ;;  %v5313_v10 = vld [vmem:[%s5580_s25 + $0x8e8] ss:$16 sps:$4 sm:$0xff]  }
 0x166   : > { %3830 = vmatpush1.bf16.msra.mxu1 %v5238_v54  ;;  %3790 = vmatprep.subr.bf16.mxu0 %v5243_v55  ;;  %v5318_v38 = vld [vmem:[%s5580_s25 + $0xaec] ss:$16 sps:$4 sm:$0xff]   ;;  %v5316_v54 = vld [vmem:[%s5580_s25 + $0xae8] ss:$16 sps:$4 sm:$0xff]  }
 0x167   : > { %3831 = vmatprep.subr.bf16.mxu1 %v5246_v56  ;;  %v5321_v55 = vld [vmem:[%s5580_s25 + $0x8cc] ss:$16 sps:$4 sm:$0xff]  }
 0x168   : > { %v5324_v56 = vld [vmem:[%s5580_s25 + $0xacc] ss:$16 sps:$4 sm:$0xff]  }
 0x169   : > { %3791 = vmatpush1.bf16.msra.mxu0 %v5241_v57 }
 0x16a   : > { %3832 = vmatpush1.bf16.msra.mxu1 %v5244_v58  ;;  %3792 = vmatprep.subr.bf16.mxu0 %v5249_v61  ;;  %v5319_v61 = vld [vmem:[%s5580_s25 + $0x8c8] ss:$16 sps:$4 sm:$0xff]  }
 0x16b   : > { %3833 = vmatprep.subr.bf16.mxu1 %v5252_v62  ;;  %v5322_v62 = vld [vmem:[%s5580_s25 + $0xac8] ss:$16 sps:$4 sm:$0xff]  }
 0x16d   : > { %3793 = vmatpush1.bf16.msra.mxu0 %v5247_v63 }
 0x16e   : > { %3834 = vmatpush1.bf16.msra.mxu1 %v5250_v0  ;;  %3794 = vmatprep.subr.bf16.mxu0 %v5255_v1  ;;  %v5327_v1 = vld [vmem:[%s5580_s25 + $0x8ac] ss:$16 sps:$4 sm:$0xff]  }
 0x16f   : > { %3835 = vmatprep.subr.bf16.mxu1 %v5258_v2  ;;  %v5330_v2 = vld [vmem:[%s5580_s25 + $0xaac] ss:$16 sps:$4 sm:$0xff]  }
 0x171   : > { %3795 = vmatpush1.bf16.msra.mxu0 %v5253_v41  ;;  %v5325_v41 = vld [vmem:[%s5580_s25 + $0x8a8] ss:$16 sps:$4 sm:$0xff]  }
 0x172   : > { %3836 = vmatpush1.bf16.msra.mxu1 %v5256_v42  ;;  %3796 = vmatprep.subr.bf16.mxu0 %v5261_v4  ;;  %v5328_v42 = vld [vmem:[%s5580_s25 + $0xaa8] ss:$16 sps:$4 sm:$0xff]  }
 0x173   : > { %3837 = vmatprep.subr.bf16.mxu1 %v5264_v5 }
 0x175   : > { %3797 = vmatpush1.bf16.msra.mxu0 %v5259_v6  ;;  %v5333_v6 = vld [vmem:[%s5580_s25 + $0x88c] ss:$16 sps:$4 sm:$0xff]  }
 0x176   : > { %3838 = vmatpush1.bf16.msra.mxu1 %v5262_v9  ;;  %3798 = vmatprep.subr.bf16.mxu0 %v5267_v11  ;;  %v5334_v9 = vld [vmem:[%s5580_s25 + $0xa88] ss:$16 sps:$4 sm:$0xff]   ;;  %v5339_v11 = vld [vmem:[%s5580_s25 + $0x86c] ss:$16 sps:$4 sm:$0xff]  }
 0x177   : > { %3839 = vmatprep.subr.bf16.mxu1 %v5270_v12  ;;  %v5342_v12 = vld [vmem:[%s5580_s25 + $0xa6c] ss:$16 sps:$4 sm:$0xff]  }
 0x179   : > { %3799 = vmatpush2.bf16.msra.mxu0 %v5265_v13  ;;  %v5337_v13 = vld [vmem:[%s5580_s25 + $0x868] ss:$16 sps:$4 sm:$0xff]  }
 0x17a   : > { %3840 = vmatpush2.bf16.msra.mxu1 %v5268_v14  ;;  %3800 = vmatprep.subr.bf16.mxu0 %v5273_v15  ;;  %v5340_v14 = vld [vmem:[%s5580_s25 + $0xa68] ss:$16 sps:$4 sm:$0xff]   ;;  %v5345_v15 = vld [vmem:[%s5580_s25 + $0x84c] ss:$16 sps:$4 sm:$0xff]  }
 0x17b   : > { %3841 = vmatprep.subr.bf16.mxu1 %v5276_v16  ;;  %v5348_v16 = vld [vmem:[%s5580_s25 + $0xa4c] ss:$16 sps:$4 sm:$0xff]  }
 0x17d   : > { %3801 = vmatpush2.bf16.msra.mxu0 %v5271_v19  ;;  %v5343_v19 = vld [vmem:[%s5580_s25 + $0x848] ss:$16 sps:$4 sm:$0xff]  }
 0x17e   : > { %3842 = vmatpush2.bf16.msra.mxu1 %v5274_v48  ;;  %3802 = vmatprep.subr.bf16.mxu0 %v5279_v52  ;;  %v5346_v48 = vld [vmem:[%s5580_s25 + $0xa48] ss:$16 sps:$4 sm:$0xff]   ;;  %v5351_v52 = vld [vmem:[%s5580_s25 + $0x82c] ss:$16 sps:$4 sm:$0xff]  }
 0x17f   : > { %3843 = vmatprep.subr.bf16.mxu1 %v5282_v20  ;;  %v5354_v20 = vld [vmem:[%s5580_s25 + $0xa2c] ss:$16 sps:$4 sm:$0xff]  }
 0x181   : > { %3803 = vmatpush2.bf16.msra.mxu0 %v5277_v21  ;;  %v5349_v21 = vld [vmem:[%s5580_s25 + $0x828] ss:$16 sps:$4 sm:$0xff]  }
 0x182   : > { %3844 = vmatpush2.bf16.msra.mxu1 %v5280_v22  ;;  %3804 = vmatprep.subr.bf16.mxu0 %v5285_v27  ;;  %v5352_v22 = vld [vmem:[%s5580_s25 + $0xa28] ss:$16 sps:$4 sm:$0xff]   ;;  %v5357_v27 = vld [vmem:[%s5580_s25 + $0x80c] ss:$16 sps:$4 sm:$0xff]  }
 0x183   : > { %3845 = vmatprep.subr.bf16.mxu1 %v5288_v28  ;;  %v5360_v28 = vld [vmem:[%s5580_s25 + $0xa0c] ss:$16 sps:$4 sm:$0xff]  }
 0x185   : > { %3805 = vmatpush2.bf16.msra.mxu0 %v5283_v29  ;;  %v5355_v29 = vld [vmem:[%s5580_s25 + $0x808] ss:$16 sps:$4 sm:$0xff]  }
 0x186   : > { %3846 = vmatpush2.bf16.msra.mxu1 %v5286_v30  ;;  %3806 = vmatprep.subr.bf16.mxu0 %v5291_v31  ;;  %v5358_v30 = vld [vmem:[%s5580_s25 + $0xa08] ss:$16 sps:$4 sm:$0xff]   ;;  %v5363_v31 = vld [vmem:[%s5580_s25 + $0x9ec] ss:$16 sps:$4 sm:$0xff]  }
 0x187   : > { %3847 = vmatprep.subr.bf16.mxu1 %v5294_v32  ;;  %v5366_v32 = vld [vmem:[%s5580_s25 + $0xbec] ss:$16 sps:$4 sm:$0xff]  }
 0x189   : > { %3807 = vmatpush2.bf16.msra.mxu0 %v5289_v33  ;;  %v5361_v33 = vld [vmem:[%s5580_s25 + $0x9e8] ss:$16 sps:$4 sm:$0xff]  }
 0x18a   : > { %3848 = vmatpush2.bf16.msra.mxu1 %v5292_v34  ;;  %3808 = vmatprep.subr.bf16.mxu0 %v5297_v35  ;;  %v5364_v34 = vld [vmem:[%s5580_s25 + $0xbe8] ss:$16 sps:$4 sm:$0xff]   ;;  %v5369_v35 = vld [vmem:[%s5580_s25 + $0x9cc] ss:$16 sps:$4 sm:$0xff]  }
 0x18b   : > { %3849 = vmatprep.subr.bf16.mxu1 %v5300_v36  ;;  %v5372_v36 = vld [vmem:[%s5580_s25 + $0xbcc] ss:$16 sps:$4 sm:$0xff]  }
 0x18d   : > { %3809 = vmatpush2.bf16.msra.mxu0 %v5295_v43  ;;  %v5367_v43 = vld [vmem:[%s5580_s25 + $0x9c8] ss:$16 sps:$4 sm:$0xff]  }
 0x18e   : > { %3850 = vmatpush2.bf16.msra.mxu1 %v5298_v44  ;;  %3810 = vmatprep.subr.bf16.mxu0 %v5303_v45  ;;  %v5370_v44 = vld [vmem:[%s5580_s25 + $0xbc8] ss:$16 sps:$4 sm:$0xff]   ;;  %v5375_v45 = vld [vmem:[%s5580_s25 + $0x9ac] ss:$16 sps:$4 sm:$0xff]  }
 0x18f   : > { %3851 = vmatprep.subr.bf16.mxu1 %v5306_v7  ;;  %v5378_v7 = vld [vmem:[%s5580_s25 + $0xbac] ss:$16 sps:$4 sm:$0xff]  }
 0x191   : > { %3811 = vmatpush2.bf16.msra.mxu0 %v5301_v8  ;;  %v5373_v8 = vld [vmem:[%s5580_s25 + $0x9a8] ss:$16 sps:$4 sm:$0xff]  }
 0x192   : > { %3852 = vmatpush2.bf16.msra.mxu1 %v5304_v3  ;;  %3812 = vmatprep.subr.bf16.mxu0 %v5309_v49  ;;  %v5376_v3 = vld [vmem:[%s5580_s25 + $0xba8] ss:$16 sps:$4 sm:$0xff]   ;;  %v5381_v49 = vld [vmem:[%s5580_s25 + $0x98c] ss:$16 sps:$4 sm:$0xff]  }
 0x193   : > { %3853 = vmatprep.subr.bf16.mxu1 %v5312_v50  ;;  %v5384_v50 = vld [vmem:[%s5580_s25 + $0xb8c] ss:$16 sps:$4 sm:$0xff]  }
 0x195   : > { %3813 = vmatpush2.bf16.msra.mxu0 %v5307_v51  ;;  %v5379_v51 = vld [vmem:[%s5580_s25 + $0x988] ss:$16 sps:$4 sm:$0xff]  }
 0x196   : > { %3854 = vmatpush2.bf16.msra.mxu1 %v5310_v53  ;;  %3864 = vmatprep.subr.bf16.mxu0 %v5315_v37  ;;  %v5382_v53 = vld [vmem:[%s5580_s25 + $0xb88] ss:$16 sps:$4 sm:$0xff]   ;;  %v5387_v37 = vld [vmem:[%s5580_s25 + $0x96c] ss:$16 sps:$4 sm:$0xff]  }
 0x197   : > { %3905 = vmatprep.subr.bf16.mxu1 %v5318_v38  ;;  %v5390_v38 = vld [vmem:[%s5580_s25 + $0xb6c] ss:$16 sps:$4 sm:$0xff]  }
 0x198   : > { %v6081_v57 = vpop.f32.mrf.mxu0  ;;  %3815 = vmatmul.mubr.bf16.vlgmr.msra.gmra.mxu0 %v5745_v17 }
 0x199   : > { %v6083_v58 = vpop.f32.mrf.mxu1  ;;  %3856 = vmatmul.mubr.bf16.vlgmr.msra.gmra.mxu1 %v5749_v18  ;;  %3865 = vmatpush1.bf16.msra.mxu0 %v5313_v10  ;;  %v5385_v10 = vld [vmem:[%s5580_s25 + $0x968] ss:$16 sps:$4 sm:$0xff]  }
 0x19a   : > { %3906 = vmatpush1.bf16.msra.mxu1 %v5316_v54  ;;  %v6089_v63 = vpop.f32.mrf.mxu0  ;;  %3866 = vmatprep.subr.bf16.mxu0 %v5321_v55  ;;  %v5388_v54 = vld [vmem:[%s5580_s25 + $0xb68] ss:$16 sps:$4 sm:$0xff]   ;;  %v5393_v55 = vld [vmem:[%s5580_s25 + $0x94c] ss:$16 sps:$4 sm:$0xff]  }
 0x19b   : > { %v6091_v0 = vpop.f32.mrf.mxu1  ;;  %3907 = vmatprep.subr.bf16.mxu1 %v5324_v56  ;;  %3896 = vmatprep.mubr.bf16.mxu0 %v5763_v25  ;;  %v5336_v25 = vld [vmem:[%s5580_s25 + $0xa8c] ss:$16 sps:$4 sm:$0xff]  }
 0x19c   : > { %3937 = vmatprep.mubr.bf16.mxu1 %v5767_v26  ;;  %v3574_v17 = vpop.f32.mrf.mxu0  ;;  %v5331_v26 = vld [vmem:[%s5580_s25 + $0x888] ss:$16 sps:$4 sm:$0xff]   ;;  %v5396_v56 = vld [vmem:[%s5580_s25 + $0xb4c] ss:$16 sps:$4 sm:$0xff]  }
 0x19d   : > { %v3615_v18 = vpop.f32.mrf.mxu1  ;;  %3867 = vmatpush1.bf16.msra.mxu0 %v5319_v61  ;;  %v5391_v61 = vld [vmem:[%s5580_s25 + $0x948] ss:$16 sps:$4 sm:$0xff]  }
 0x19e   : > { %3908 = vmatpush1.bf16.msra.mxu1 %v5322_v62  ;;  %v3575_v4 = vpop.f32.mrf.mxu0  ;;  %3868 = vmatprep.subr.bf16.mxu0 %v5327_v1  ;;  %v5394_v62 = vld [vmem:[%s5580_s25 + $0xb48] ss:$16 sps:$4 sm:$0xff]   ;;  %v5399_v1 = vld [vmem:[%s5580_s25 + $0x92c] ss:$16 sps:$4 sm:$0xff]  }
 0x19f   : > { %v3616_v5 = vpop.f32.mrf.mxu1  ;;  %3909 = vmatprep.subr.bf16.mxu1 %v5330_v2  ;;  %v5402_v2 = vld [vmem:[%s5580_s25 + $0xb2c] ss:$16 sps:$4 sm:$0xff]   ;;  %v5397_v17 = vld [vmem:[%s5580_s25 + $0x928] ss:$16 sps:$4 sm:$0xff]  }
 0x1a0   : > { %v5400_v18 = vld [vmem:[%s5580_s25 + $0xb28] ss:$16 sps:$4 sm:$0xff]  }
 0x1a1   : > { %3869 = vmatpush1.bf16.msra.mxu0 %v5325_v41  ;;  %v5405_v41 = vld [vmem:[%s5580_s25 + $0x90c] ss:$16 sps:$4 sm:$0xff]   ;;  %v5403_v4 = vld [vmem:[%s5580_s25 + $0x908] ss:$16 sps:$4 sm:$0xff]  }
 0x1a2   : > { %3910 = vmatpush1.bf16.msra.mxu1 %v5328_v42  ;;  %3870 = vmatprep.subr.bf16.mxu0 %v5333_v6  ;;  %v5408_v42 = vld [vmem:[%s5580_s25 + $0xb0c] ss:$16 sps:$4 sm:$0xff]   ;;  %v5406_v5 = vld [vmem:[%s5580_s25 + $0xb08] ss:$16 sps:$4 sm:$0xff]  }
 0x1a3   : > { %3911 = vmatprep.subr.bf16.mxu1 %v5336_v25  ;;  %v5411_v6 = vld [vmem:[%s5580_s25 + $0xcec] ss:$16 sps:$4 sm:$0xff]  }
 0x1a4   : > { %v5414_v25 = vld [vmem:[%s5580_s25 + $0xeec] ss:$16 sps:$4 sm:$0xff]  }
 0x1a5   : > { %3871 = vmatpush1.bf16.msra.mxu0 %v5331_v26  ;;  %v3571_v26 = vadd.f32 %v6081_v57, %v6014_v46  ;;  %v5415_v57 = vld [vmem:[%s5580_s25 + $0xcc8] ss:$16 sps:$4 sm:$0xff]  }
 0x1a6   : > { %3912 = vmatpush1.bf16.msra.mxu1 %v5334_v9  ;;  %3872 = vmatprep.subr.bf16.mxu0 %v5339_v11  ;;  %v3573_v9 = vadd.f32 %v6089_v63, %v6019_v47  ;;  %v5409_v11 = vld [vmem:[%s5580_s25 + $0xce8] ss:$16 sps:$4 sm:$0xff]  }
 0x1a7   : > { %3913 = vmatprep.subr.bf16.mxu1 %v5342_v12  ;;  %v5412_v12 = vld [vmem:[%s5580_s25 + $0xee8] ss:$16 sps:$4 sm:$0xff]  }
 0x1a8   : > { %v3614_v46 = vadd.f32 %v6091_v0, %v3573_v9  ;;  %v5418_v63 = vld [vmem:[%s5580_s25 + $0xec8] ss:$16 sps:$4 sm:$0xff]   ;;  %v5480_v9 = vld [vmem:[%s5580_s25 + $0xf8c] ss:$16 sps:$4 sm:$0xff]  }
 0x1a9   : > { %3873 = vmatpush1.bf16.msra.mxu0 %v5337_v13  ;;  %v5417_v13 = vld [vmem:[%s5580_s25 + $0xccc] ss:$16 sps:$4 sm:$0xff]  }
 0x1aa   : > { %3914 = vmatpush1.bf16.msra.mxu1 %v5340_v14  ;;  %3874 = vmatprep.subr.bf16.mxu0 %v5345_v15  ;;  %v5420_v14 = vld [vmem:[%s5580_s25 + $0xecc] ss:$16 sps:$4 sm:$0xff]   ;;  %v3612_v15 = vadd.f32 %v6083_v58, %v3571_v26 }
 0x1ab   : > { %3915 = vmatprep.subr.bf16.mxu1 %v5348_v16  ;;  %v5423_v58 = vld [vmem:[%s5580_s25 + $0xcac] ss:$16 sps:$4 sm:$0xff]  }
 0x1ac   : > { %v5477_v26 = vld [vmem:[%s5580_s25 + $0xd8c] ss:$16 sps:$4 sm:$0xff]  }
 0x1ad   : > { %3875 = vmatpush1.bf16.msra.mxu0 %v5343_v19 }
 0x1ae   : > { %3916 = vmatpush1.bf16.msra.mxu1 %v5346_v48  ;;  %3876 = vmatprep.subr.bf16.mxu0 %v5351_v52  ;;  %v232_v48 = vld [vmem:[#allocation2 + $0x10] sm:$0xff] }
 0x1af   : > { %3917 = vmatprep.subr.bf16.mxu1 %v5354_v20 }
 0x1b1   : > { %3877 = vmatpush1.bf16.msra.mxu0 %v5349_v21  ;;  %v5426_v21 = vld [vmem:[%s5580_s25 + $0xeac] ss:$16 sps:$4 sm:$0xff]  }
 0x1b2   : > { %3918 = vmatpush1.bf16.msra.mxu1 %v5352_v22  ;;  %3878 = vmatprep.subr.bf16.mxu0 %v5357_v27 }
 0x1b3   : > { %3919 = vmatprep.subr.bf16.mxu1 %v5360_v28 }
 0x1b5   : > { %3879 = vmatpush1.bf16.msra.mxu0 %v5355_v29 }
 0x1b6   : > { %3920 = vmatpush1.bf16.msra.mxu1 %v5358_v30  ;;  %3880 = vmatprep.subr.bf16.mxu0 %v5363_v31  ;;  %v5421_v30 = vld [vmem:[%s5580_s25 + $0xca8] ss:$16 sps:$4 sm:$0xff]  }
 0x1b7   : > { %3921 = vmatprep.subr.bf16.mxu1 %v5366_v32  ;;  %v5424_v31 = vld [vmem:[%s5580_s25 + $0xea8] ss:$16 sps:$4 sm:$0xff]  }
 0x1b9   : > { %3881 = vmatpush2.bf16.msra.mxu0 %v5361_v33 }
 0x1ba   : > { %3922 = vmatpush2.bf16.msra.mxu1 %v5364_v34  ;;  %3882 = vmatprep.subr.bf16.mxu0 %v5369_v35  ;;  %v5427_v35 = vld [vmem:[%s5580_s25 + $0xc88] ss:$16 sps:$4 sm:$0xff]  }
 0x1bb   : > { %3923 = vmatprep.subr.bf16.mxu1 %v5372_v36  ;;  %v5430_v36 = vld [vmem:[%s5580_s25 + $0xe88] ss:$16 sps:$4 sm:$0xff]  }
 0x1bd   : > { %3883 = vmatpush2.bf16.msra.mxu0 %v5367_v43  ;;  %v5435_v43 = vld [vmem:[%s5580_s25 + $0xc6c] ss:$16 sps:$4 sm:$0xff]  }
 0x1be   : > { %3924 = vmatpush2.bf16.msra.mxu1 %v5370_v44  ;;  %3884 = vmatprep.subr.bf16.mxu0 %v5375_v45  ;;  %v5438_v44 = vld [vmem:[%s5580_s25 + $0xe6c] ss:$16 sps:$4 sm:$0xff]   ;;  %v5433_v45 = vld [vmem:[%s5580_s25 + $0xc68] ss:$16 sps:$4 sm:$0xff]  }
 0x1bf   : > { %3925 = vmatprep.subr.bf16.mxu1 %v5378_v7  ;;  %v5436_v7 = vld [vmem:[%s5580_s25 + $0xe68] ss:$16 sps:$4 sm:$0xff]  }
 0x1c1   : > { %3885 = vmatpush2.bf16.msra.mxu0 %v5373_v8  ;;  %v5441_v8 = vld [vmem:[%s5580_s25 + $0xc4c] ss:$16 sps:$4 sm:$0xff]  }
 0x1c2   : > { %3926 = vmatpush2.bf16.msra.mxu1 %v5376_v3  ;;  %3886 = vmatprep.subr.bf16.mxu0 %v5381_v49  ;;  %v5444_v3 = vld [vmem:[%s5580_s25 + $0xe4c] ss:$16 sps:$4 sm:$0xff]   ;;  %v5439_v49 = vld [vmem:[%s5580_s25 + $0xc48] ss:$16 sps:$4 sm:$0xff]  }
 0x1c3   : > { %3927 = vmatprep.subr.bf16.mxu1 %v5384_v50  ;;  %v5442_v50 = vld [vmem:[%s5580_s25 + $0xe48] ss:$16 sps:$4 sm:$0xff]  }
 0x1c5   : > { %3887 = vmatpush2.bf16.msra.mxu0 %v5379_v51  ;;  %v5447_v51 = vld [vmem:[%s5580_s25 + $0xc2c] ss:$16 sps:$4 sm:$0xff]  }
 0x1c6   : > { %3928 = vmatpush2.bf16.msra.mxu1 %v5382_v53  ;;  %3888 = vmatprep.subr.bf16.mxu0 %v5387_v37  ;;  %v5450_v53 = vld [vmem:[%s5580_s25 + $0xe2c] ss:$16 sps:$4 sm:$0xff]   ;;  %v5445_v37 = vld [vmem:[%s5580_s25 + $0xc28] ss:$16 sps:$4 sm:$0xff]  }
 0x1c7   : > { %3929 = vmatprep.subr.bf16.mxu1 %v5390_v38  ;;  %v5448_v38 = vld [vmem:[%s5580_s25 + $0xe28] ss:$16 sps:$4 sm:$0xff]  }
 0x1c9   : > { %3889 = vmatpush2.bf16.msra.mxu0 %v5385_v10  ;;  %v5453_v10 = vld [vmem:[%s5580_s25 + $0xc0c] ss:$16 sps:$4 sm:$0xff]  }
 0x1ca   : > { %3930 = vmatpush2.bf16.msra.mxu1 %v5388_v54  ;;  %3890 = vmatprep.subr.bf16.mxu0 %v5393_v55  ;;  %v5456_v54 = vld [vmem:[%s5580_s25 + $0xe0c] ss:$16 sps:$4 sm:$0xff]   ;;  %v5451_v55 = vld [vmem:[%s5580_s25 + $0xc08] ss:$16 sps:$4 sm:$0xff]  }
 0x1cb   : > { %3931 = vmatprep.subr.bf16.mxu1 %v5396_v56  ;;  %v5454_v56 = vld [vmem:[%s5580_s25 + $0xe08] ss:$16 sps:$4 sm:$0xff]  }
 0x1cd   : > { %3891 = vmatpush2.bf16.msra.mxu0 %v5391_v61  ;;  %v5459_v61 = vld [vmem:[%s5580_s25 + $0xdec] ss:$16 sps:$4 sm:$0xff]  }
 0x1ce   : > { %3932 = vmatpush2.bf16.msra.mxu1 %v5394_v62  ;;  %3892 = vmatprep.subr.bf16.mxu0 %v5399_v1  ;;  %v5462_v62 = vld [vmem:[%s5580_s25 + $0xfec] ss:$16 sps:$4 sm:$0xff]   ;;  %v5457_v1 = vld [vmem:[%s5580_s25 + $0xde8] ss:$16 sps:$4 sm:$0xff]  }
 0x1cf   : > { %3933 = vmatprep.subr.bf16.mxu1 %v5402_v2  ;;  %v5460_v2 = vld [vmem:[%s5580_s25 + $0xfe8] ss:$16 sps:$4 sm:$0xff]  }
 0x1d1   : > { %3893 = vmatpush2.bf16.msra.mxu0 %v5397_v17  ;;  %v5465_v17 = vld [vmem:[%s5580_s25 + $0xdcc] ss:$16 sps:$4 sm:$0xff]  }
 0x1d2   : > { %3934 = vmatpush2.bf16.msra.mxu1 %v5400_v18  ;;  %3894 = vmatprep.subr.bf16.mxu0 %v5405_v41  ;;  %v5468_v18 = vld [vmem:[%s5580_s25 + $0xfcc] ss:$16 sps:$4 sm:$0xff]   ;;  %v5463_v41 = vld [vmem:[%s5580_s25 + $0xdc8] ss:$16 sps:$4 sm:$0xff]  }
 0x1d3   : > { %3935 = vmatprep.subr.bf16.mxu1 %v5408_v42  ;;  %v5466_v42 = vld [vmem:[%s5580_s25 + $0xfc8] ss:$16 sps:$4 sm:$0xff]  }
 0x1d5   : > { %3895 = vmatpush2.bf16.msra.mxu0 %v5403_v4  ;;  %v5471_v4 = vld [vmem:[%s5580_s25 + $0xdac] ss:$16 sps:$4 sm:$0xff]  }
 0x1d6   : > { %3936 = vmatpush2.bf16.msra.mxu1 %v5406_v5  ;;  %3946 = vmatprep.subr.bf16.mxu0 %v5411_v6  ;;  %v5474_v5 = vld [vmem:[%s5580_s25 + $0xfac] ss:$16 sps:$4 sm:$0xff]   ;;  %v5469_v6 = vld [vmem:[%s5580_s25 + $0xda8] ss:$16 sps:$4 sm:$0xff]  }
 0x1d7   : > { %3987 = vmatprep.subr.bf16.mxu1 %v5414_v25  ;;  %v5472_v25 = vld [vmem:[%s5580_s25 + $0xfa8] ss:$16 sps:$4 sm:$0xff]  }
 0x1d8   : > { %v3652_v16 = vpop.f32.mrf.mxu0  ;;  %3897 = vmatmul.mubr.bf16.vlgmr.msra.gmra.mxu0 %v5837_v39 }
 0x1d9   : > { %v3693_v19 = vpop.f32.mrf.mxu1  ;;  %3938 = vmatmul.mubr.bf16.vlgmr.msra.gmra.mxu1 %v5841_v40  ;;  %v3653_v47 = vadd.f32 %v3652_v16, %v3612_v15  ;;  %3947 = vmatpush1.bf16.msra.mxu0 %v5409_v11  ;;  %v233_v40 = vld [vmem:[#allocation2] sm:$0xff]  ;;  %v5475_v11 = vld [vmem:[%s5580_s25 + $0xd88] ss:$16 sps:$4 sm:$0xff]  }
 0x1da   : > { %3988 = vmatpush1.bf16.msra.mxu1 %v5412_v12  ;;  %v3654_v52 = vpop.f32.mrf.mxu0  ;;  %3948 = vmatprep.subr.bf16.mxu0 %v5417_v13  ;;  %v5478_v12 = vld [vmem:[%s5580_s25 + $0xf88] ss:$16 sps:$4 sm:$0xff]   ;;  %v5483_v13 = vld [vmem:[%s5580_s25 + $0xd6c] ss:$16 sps:$4 sm:$0xff]  }
 0x1db   : > { %v3695_v20 = vpop.f32.mrf.mxu1  ;;  %3989 = vmatprep.subr.bf16.mxu1 %v5420_v14  ;;  %v3694_v22 = vadd.f32 %v3693_v19, %v3653_v47  ;;  %v3655_v39 = vadd.f32 %v3654_v52, %v3614_v46  ;;  %3978 = vmatprep.mubr.bf16.mxu0 %v5853_v23  ;;  %v5429_v23 = vld [vmem:[%s5580_s25 + $0xc8c] ss:$16 sps:$4 sm:$0xff]   ;;  %v5481_v15 = vld [vmem:[%s5580_s25 + $0xd68] ss:$16 sps:$4 sm:$0xff]  }
 0x1dc   : > { %4019 = vmatprep.mubr.bf16.mxu1 %v5857_v24  ;;  %v3656_v0 = vpop.f32.mrf.mxu0  ;;  %v5432_v24 = vld [vmem:[%s5580_s25 + $0xe8c] ss:$16 sps:$4 sm:$0xff]   ;;  %v5484_v16 = vld [vmem:[%s5580_s25 + $0xf68] ss:$16 sps:$4 sm:$0xff]  }
 0x1dd   : > { %v3697_v27 = vpop.f32.mrf.mxu1  ;;  %v4028_v28 = vadd.f32 %v3694_v22, %v232_v48  ;;  %v3696_v29 = vadd.f32 %v3695_v20, %v3655_v39  ;;  %3949 = vmatpush1.bf16.msra.mxu0 %v5415_v57  ;;  %v5486_v14 = vld [vmem:[%s5580_s25 + $0xf6c] ss:$16 sps:$4 sm:$0xff]   ;;  %v5487_v47 = vld [vmem:[%s5580_s25 + $0xd48] ss:$16 sps:$4 sm:$0xff]  }
 0x1de   : > { %3990 = vmatpush1.bf16.msra.mxu1 %v5418_v63  ;;  %v3657_v32 = vpop.f32.mrf.mxu0  ;;  %3950 = vmatprep.subr.bf16.mxu0 %v5423_v58  ;;  %v5489_v19 = vld [vmem:[%s5580_s25 + $0xd4c] ss:$16 sps:$4 sm:$0xff]   ;;  %v5490_v57 = vld [vmem:[%s5580_s25 + $0xf48] ss:$16 sps:$4 sm:$0xff]  }
 0x1df   : > { %v3698_v33 = vpop.f32.mrf.mxu1  ;;  %3991 = vmatprep.subr.bf16.mxu1 %v5426_v21  ;;  %4032 = vst [vmem:[#allocation2 + $0x10] sm:$0xff] %v4028_v28  ;;  %v4029_v34 = vadd.f32 %v3696_v29, %v233_v40  ;;  %v5492_v46 = vld [vmem:[%s5580_s25 + $0xf4c] ss:$16 sps:$4 sm:$0xff]   ;;  %v5493_v52 = vld [vmem:[%s5580_s25 + $0xd28] ss:$16 sps:$4 sm:$0xff]  }
 0x1e0   : > { %v5495_v63 = vld [vmem:[%s5580_s25 + $0xd2c] ss:$16 sps:$4 sm:$0xff]   ;;  %v5496_v20 = vld [vmem:[%s5580_s25 + $0xf28] ss:$16 sps:$4 sm:$0xff]  }
 0x1e1   : > { %4033 = vst [vmem:[#allocation2] sm:$0xff] %v4029_v34  ;;  %3951 = vmatpush1.bf16.msra.mxu0 %v5421_v30  ;;  %v5498_v48 = vld [vmem:[%s5580_s25 + $0xf2c] ss:$16 sps:$4 sm:$0xff]   ;;  %v5499_v22 = vld [vmem:[%s5580_s25 + $0xd08] ss:$16 sps:$4 sm:$0xff]  }
 0x1e2   : > { %3992 = vmatpush1.bf16.msra.mxu1 %v5424_v31  ;;  %3952 = vmatprep.subr.bf16.mxu0 %v5429_v23  ;;  %v5501_v58 = vld [vmem:[%s5580_s25 + $0xd0c] ss:$16 sps:$4 sm:$0xff]   ;;  %v5502_v39 = vld [vmem:[%s5580_s25 + $0xf08] ss:$16 sps:$4 sm:$0xff]  }
 0x1e3   : > { %3993 = vmatprep.subr.bf16.mxu1 %v5432_v24  ;;  %v5504_v21 = vld [vmem:[%s5580_s25 + $0xf0c] ss:$16 sps:$4 sm:$0xff]  }
 0x1e5   : > { %3953 = vmatpush1.bf16.msra.mxu0 %v5427_v35 }
 0x1e6   : > { %3994 = vmatpush1.bf16.msra.mxu1 %v5430_v36  ;;  %3954 = vmatprep.subr.bf16.mxu0 %v5435_v43 }
 0x1e7   : > { %3995 = vmatprep.subr.bf16.mxu1 %v5438_v44 }
 0x1e9   : > { %3955 = vmatpush1.bf16.msra.mxu0 %v5433_v45 }
 0x1ea   : > { %3996 = vmatpush1.bf16.msra.mxu1 %v5436_v7  ;;  %3956 = vmatprep.subr.bf16.mxu0 %v5441_v8 }
 0x1eb   : > { %3997 = vmatprep.subr.bf16.mxu1 %v5444_v3 }
 0x1ed   : > { %3957 = vmatpush1.bf16.msra.mxu0 %v5439_v49 }
 0x1ee   : > { %3998 = vmatpush1.bf16.msra.mxu1 %v5442_v50  ;;  %3958 = vmatprep.subr.bf16.mxu0 %v5447_v51 }
 0x1ef   : > { %3999 = vmatprep.subr.bf16.mxu1 %v5450_v53 }
 0x1f1   : > { %3959 = vmatpush1.bf16.msra.mxu0 %v5445_v37 }
 0x1f2   : > { %4000 = vmatpush1.bf16.msra.mxu1 %v5448_v38  ;;  %3960 = vmatprep.subr.bf16.mxu0 %v5453_v10 }
 0x1f3   : > { %4001 = vmatprep.subr.bf16.mxu1 %v5456_v54 }
 0x1f5   : > { %3961 = vmatpush1.bf16.msra.mxu0 %v5451_v55 }
 0x1f6   : > { %4002 = vmatpush1.bf16.msra.mxu1 %v5454_v56  ;;  %3962 = vmatprep.subr.bf16.mxu0 %v5459_v61 }
 0x1f7   : > { %4003 = vmatprep.subr.bf16.mxu1 %v5462_v62 }
 0x1f9   : > { %3963 = vmatpush2.bf16.msra.mxu0 %v5457_v1 }
 0x1fa   : > { %4004 = vmatpush2.bf16.msra.mxu1 %v5460_v2  ;;  %3964 = vmatprep.subr.bf16.mxu0 %v5465_v17 }
 0x1fb   : > { %4005 = vmatprep.subr.bf16.mxu1 %v5468_v18  ;;  %v234_v18 = vld [vmem:[#allocation2 + $0x18] sm:$0xff] }
 0x1fd   : > { %3965 = vmatpush2.bf16.msra.mxu0 %v5463_v41 }
 0x1fe   : > { %4006 = vmatpush2.bf16.msra.mxu1 %v5466_v42  ;;  %3966 = vmatprep.subr.bf16.mxu0 %v5471_v4 }
 0x1ff   : > { %4007 = vmatprep.subr.bf16.mxu1 %v5474_v5 }
 0x201   : > { %3967 = vmatpush2.bf16.msra.mxu0 %v5469_v6  ;;  %v235_v6 = vld [vmem:[#allocation2 + $0x8] sm:$0xff] }
 0x202   : > { %4008 = vmatpush2.bf16.msra.mxu1 %v5472_v25  ;;  %3968 = vmatprep.subr.bf16.mxu0 %v5477_v26 }
 0x203   : > { %4009 = vmatprep.subr.bf16.mxu1 %v5480_v9 }
 0x205   : > { %3969 = vmatpush2.bf16.msra.mxu0 %v5475_v11 }
 0x206   : > { %4010 = vmatpush2.bf16.msra.mxu1 %v5478_v12  ;;  %3970 = vmatprep.subr.bf16.mxu0 %v5483_v13 }
 0x207   : > { %4011 = vmatprep.subr.bf16.mxu1 %v5486_v14 }
 0x209   : > { %3971 = vmatpush2.bf16.msra.mxu0 %v5481_v15 }
 0x20a   : > { %4012 = vmatpush2.bf16.msra.mxu1 %v5484_v16  ;;  %3972 = vmatprep.subr.bf16.mxu0 %v5489_v19 }
 0x20b   : > { %4013 = vmatprep.subr.bf16.mxu1 %v5492_v46 }
 0x20d   : > { %3973 = vmatpush2.bf16.msra.mxu0 %v5487_v47 }
 0x20e   : > { %4014 = vmatpush2.bf16.msra.mxu1 %v5490_v57  ;;  %3974 = vmatprep.subr.bf16.mxu0 %v5495_v63 }
 0x20f   : > { %4015 = vmatprep.subr.bf16.mxu1 %v5498_v48 }
 0x211   : > { %3975 = vmatpush2.bf16.msra.mxu0 %v5493_v52 }
 0x212   : > { %4016 = vmatpush2.bf16.msra.mxu1 %v5496_v20  ;;  %3976 = vmatprep.subr.bf16.mxu0 %v5501_v58 }
 0x213   : > { %4017 = vmatprep.subr.bf16.mxu1 %v5504_v21 }
 0x215   : > { %3977 = vmatpush2.bf16.msra.mxu0 %v5499_v22 }
 0x216   : > { %4018 = vmatpush2.bf16.msra.mxu1 %v5502_v39 }
 0x218   : > { %v3734_v40 = vpop.f32.mrf.mxu0  ;;  %3979 = vmatmul.mubr.bf16.vlgmr.msra.gmra.mxu0 %v5925_v59 }
 0x219   : > { %v3775_v0 = vpop.f32.mrf.mxu1  ;;  %4020 = vmatmul.mubr.bf16.vlgmr.msra.gmra.mxu1 %v5929_v60 }
 0x21a   : > { %v3776_v27 = vadd.f32 %v3775_v0, %v3734_v40  ;;  %v3736_v28 = vpop.f32.mrf.mxu0 }
 0x21b   : > { %v3777_v29 = vpop.f32.mrf.mxu1 }
 0x21c   : > { %v3778_v30 = vadd.f32 %v3777_v29, %v3736_v28  ;;  %v3738_v31 = vpop.f32.mrf.mxu0 }
 0x21d   : > { %v3779_v32 = vpop.f32.mrf.mxu1 }
 0x21e   : > { %v3739_v33 = vpop.f32.mrf.mxu0 }
 0x21f   : > { %v3780_v23 = vpop.f32.mrf.mxu1 }
 0x258   : > { %v3816_v24 = vpop.f32.mrf.mxu0 }
 0x259   : > { %v3857_v34 = vpop.f32.mrf.mxu1  ;;  %v3817_v35 = vadd.f32 %v3816_v24, %v3776_v27 }
 0x25a   : > { %v3818_v36 = vpop.f32.mrf.mxu0 }
 0x25b   : > { %v3859_v43 = vpop.f32.mrf.mxu1  ;;  %v3858_v44 = vadd.f32 %v3857_v34, %v3817_v35  ;;  %v3819_v45 = vadd.f32 %v3818_v36, %v3778_v30 }
 0x25c   : > { %v3820_v7 = vpop.f32.mrf.mxu0 }
 0x25d   : > { %v3861_v8 = vpop.f32.mrf.mxu1  ;;  %v3860_v59 = vadd.f32 %v3859_v43, %v3819_v45 }
 0x25e   : > { %v3821_v3 = vpop.f32.mrf.mxu0 }
 0x25f   : > { %v3862_v60 = vpop.f32.mrf.mxu1 }
 0x298   : > { %v3898_v49 = vpop.f32.mrf.mxu0 }
 0x299   : > { %v3939_v50 = vpop.f32.mrf.mxu1  ;;  %v3899_v55 = vadd.f32 %v3898_v49, %v3858_v44 }
 0x29a   : > { %v3900_v51 = vpop.f32.mrf.mxu0 }
 0x29b   : > { %v3941_v53 = vpop.f32.mrf.mxu1  ;;  %v3901_v56 = vadd.f32 %v3900_v51, %v3860_v59  ;;  %v3940_v61 = vadd.f32 %v3939_v50, %v3899_v55 }
 0x29c   : > { %v3902_v37 = vpop.f32.mrf.mxu0 }
 0x29d   : > { %v3943_v38 = vpop.f32.mrf.mxu1  ;;  %v3942_v2 = vadd.f32 %v3941_v53, %v3901_v56 }
 0x29e   : > { %v3903_v10 = vpop.f32.mrf.mxu0 }
 0x29f   : > { %v3944_v54 = vpop.f32.mrf.mxu1 }
 0x2d8   : > { %v3980_v62 = vpop.f32.mrf.mxu0 }
 0x2d9   : > { %v4021_v1 = vpop.f32.mrf.mxu1  ;;  %v3981_v17 = vadd.f32 %v3980_v62, %v3940_v61 }
 0x2da   : > { %v3982_v41 = vpop.f32.mrf.mxu0 }
 0x2db   : > { %v4023_v42 = vpop.f32.mrf.mxu1  ;;  %v4022_v4 = vadd.f32 %v4021_v1, %v3981_v17  ;;  %v3983_v5 = vadd.f32 %v3982_v41, %v3942_v2 }
 0x2dc   : > { %v3984_v25 = vpop.f32.mrf.mxu0 }
 0x2dd   : > { %v4025_v26 = vpop.f32.mrf.mxu1  ;;  %v4030_v9 = vadd.f32 %v4022_v4, %v234_v18  ;;  %v4024_v11 = vadd.f32 %v4023_v42, %v3983_v5  ;;  %4039 = sbr.rel (%p4691_p7) target bundleno = 750 (0x2ee), region = 40 }
 0x2de   : > { %v3985_v12 = vpop.f32.mrf.mxu0 }
 0x2df   : > { %v4026_v13 = vpop.f32.mrf.mxu1  ;;  %4034 = vst [vmem:[#allocation2 + $0x18] sm:$0xff] %v4030_v9  ;;  %v4031_v14 = vadd.f32 %v4024_v11, %v235_v6 }
 0x2e1   : > { %4035 = vst [vmem:[#allocation2 + $0x8] sm:$0xff] %v4031_v14 }
 0x2e2   : > { %v4046_v15 = vlaneseq  ;;  %v4044_v19 = vld [vmem:[%s6254_s2] sm:$0xf]  ;;  %v4040_v46 = vld [vmem:[#allocation2 + $0x10] sm:$0xff] }
 0x2e3   : > { %v4041_v52 = vld [vmem:[#allocation2] sm:$0xff] }
 0x2e4   : > { %v4047_v16 = vshrl.u32 %v4046_v15, 7 }
 0x2e6   : > { %v4048_v47 = vsub.s32 0, %v4047_v16  ;;  %v4052_v57 = vsub.s32 1, %v4047_v16  ;;  %v4056_v63 = vsub.s32 2, %v4047_v16  ;;  %v4060_v48 = vsub.s32 3, %v4047_v16  ;;  %v4042_v20 = vld [vmem:[#allocation2 + $0x18] sm:$0xff] }
 0x2e8   : > { %v4043_v58 = vld [vmem:[#allocation2 + $0x8] sm:$0xff]  ;;  %v4049_v21 = vrot.slane %v4044_v19, %v4048_v47  ;;  %v4053_v22 = vrot.slane %v4044_v19, %v4052_v57  ;;  %v4057_v39 = vrot.slane %v4044_v19, %v4056_v63  ;;  %v4061_v40 = vrot.slane %v4044_v19, %v4060_v48 }
 0x2ea   : > { %v4066_v0 = vadd.f32 %v4049_v21, %v4040_v46  ;;  %v4067_v27 = vadd.f32 %v4053_v22, %v4041_v52  ;;  %v4068_v28 = vadd.f32 %v4057_v39, %v4042_v20  ;;  %v4069_v29 = vadd.f32 %v4061_v40, %v4043_v58 }
 0x2ec   : > { %4070 = vst [vmem:[%s6255_s3] sm:$0xff] %v4066_v0  ;;  %4071 = vst [vmem:[%s6255_s3 + $0x8] sm:$0xff] %v4067_v27 }
 0x2ed   : > { %4072 = vst [vmem:[%s6255_s3 + $0x10] sm:$0xff] %v4068_v28  ;;  %4073 = vst [vmem:[%s6255_s3 + $0x18] sm:$0xff] %v4069_v29 }
 0x2ee PF: > { %s13_s14 = sadd.s32 1, %s5527_s14   ;;  %s6256_s12 = smov %s5523_s13 }
 0x2ef   : > { %p10_p8 = scmp.ge.s32.totalorder %s13_s14, 4   ;;  %s6257_s13 = smov %s6259_s15 }
 0x2f1   :  { %12 = sbr.rel (!%p10_p8) target bundleno = 2 (0x2), region = 73 }

// kernel: discriminator_forward.15
= control target key start
LH: loop header
LB: loop body
LE: loop exit
PB: predicated region body
PF: predicated region fallthrough
CT: control target
= control target key end

     0   :  { %s2275_s12 = smov 0   ;;  %s2277_s13 = smov 0   ;;  %s2460_s0 = inlined_call_operand.vmem [shape: bf16[8,8192], index: 0, kind: input, shape index: {}]   ;;  %s2461_s1 = inlined_call_operand.vmem [shape: bf16[8192,128], index: 1, kind: input, shape index: {}]   ;;  %s2462_s2 = inlined_call_operand.vmem [shape: f32[1,128], index: 2, kind: input, shape index: {}]   ;;  %s2463_s3 = inlined_call_operand.vmem [shape: f32[8,128], index: 3, kind: output, shape index: {}]  }
   0x1   :  { %s2279_s14 = smov 0  }
   0x2 LB: > { %s22_s15 = sadd.s32 1, %s2248_s13  ;;  %p1730_p0 = scmp.ge.s32.totalorder %s2252_s14, 1  ;;  %s2252_s14 = sphi %s2279_s14, %s13_s14   ;;  %s2248_s13 = sphi %s2277_s13, %s2465_s13   ;;  %s2244_s12 = sphi %s2275_s12, %s2464_s12  }
   0x3   : > { %p23_p1 = scmp.ge.s32.totalorder %s22_s15, 4  ;;  %p167_p2 = scmp.lt.s32.totalorder %s2252_s14, 5 }
   0x5   : > { %s2467_s15 = smov (%p23_p1, %s22_s15), 0  ;;  %p168_p3 = pnand %p1730_p0, %p167_p2 }
   0x6   : > { %s1731_s16 = sshll.u32 (!%p168_p3), %s2244_s12, 4  ;;  %s1733_s17 = sshll.u32 (!%p168_p3), %s2244_s12, 8 }
   0x7   : > { %171 = sbr.rel (%p168_p3) target bundleno = 366 (0x16e), region = 32  ;;  %p202_p4 = scmp.lt.s32.totalorder (!%p168_p3), %s1731_s16, 63 }
   0x8   : > { %p210_p5 = scmp.lt.s32.totalorder (!%p168_p3), %s1733_s17, 1023  ;;  %p1735_p6 = scmp.ne.s32.totalorder (!%p168_p3), %s2244_s12, 0 }
   0xc   : > { %s2469_s16 = smov (!%p202_p4, %s1731_s16), 63  ;;  %s2471_s17 = smov (!%p210_p5, %s1733_s17), 1023 }
   0xd   : > { %s1732_s18 = sshll.u32 %s2469_s16, 2  ;;  %s1734_s22 = sshll.u32 %s2471_s17, 2 }
   0xe   : > { %s2300_s21 = scalar_lea.vmem %s2460_s0, %s1732_s18  ;;  %s2305_s25 = scalar_lea.vmem %s2461_s1, %s1734_s22 }
   0xf   : > { %223 = sbr.rel (%p1735_p6) target bundleno = 22 (0x16), region = 36 }
  0x14   : > { %v2254_v0 = vmov 0.0  }
  0x15   : > { %224 = vst [vmem:[#allocation2] sm:$0xff] %v2254_v0 }
  0x16 PF: > { %v2086_v1 = vld [vmem:[%s2305_s25 + $0x78] sm:$0xff]   ;;  %v2090_v5 = vld [vmem:[%s2305_s25 + $0x70] sm:$0xff]   ;;  %v2094_v9 = vld [vmem:[%s2305_s25 + $0x68] sm:$0xff]   ;;  %p1880_p7 = scmp.ne.s32.totalorder %s2244_s12, 3 }
  0x17   : > { %v2087_v2 = vld [vmem:[%s2305_s25 + $0xf8] sm:$0xff]   ;;  %1885 = vmatprep.subr.bf16.mxu0 %v2086_v1  ;;  %v2091_v6 = vld [vmem:[%s2305_s25 + $0xf0] sm:$0xff]   ;;  %v2095_v10 = vld [vmem:[%s2305_s25 + $0xe8] sm:$0xff]  }
  0x18   : > { %v2088_v3 = vld [vmem:[%s2305_s25 + $0x38] sm:$0xff]   ;;  %1907 = vmatprep.subr.bf16.mxu1 %v2087_v2  ;;  %v2092_v7 = vld [vmem:[%s2305_s25 + $0x30] sm:$0xff]   ;;  %v2096_v11 = vld [vmem:[%s2305_s25 + $0x28] sm:$0xff]  }
  0x19   : > { %v2089_v4 = vld [vmem:[%s2305_s25 + $0xb8] sm:$0xff]   ;;  %1886 = vmatpush3.bf16.msra.mxu0 %v2088_v3  ;;  %v2093_v8 = vld [vmem:[%s2305_s25 + $0xb0] sm:$0xff]   ;;  %v2097_v12 = vld [vmem:[%s2305_s25 + $0xa8] sm:$0xff]  }
  0x1a   : > { %1908 = vmatpush3.bf16.msra.mxu1 %v2089_v4  ;;  %1887 = vmatprep.subr.bf16.mxu0 %v2090_v5  ;;  %v2098_v13 = vld [vmem:[%s2305_s25 + $0x60] sm:$0xff]   ;;  %v2102_v17 = vld [vmem:[%s2305_s25 + $0x58] sm:$0xff]   ;;  %v2106_v21 = vld [vmem:[%s2305_s25 + $0x50] sm:$0xff]  }
  0x1b   : > { %1909 = vmatprep.subr.bf16.mxu1 %v2091_v6  ;;  %v2099_v14 = vld [vmem:[%s2305_s25 + $0xe0] sm:$0xff]   ;;  %v2103_v18 = vld [vmem:[%s2305_s25 + $0xd8] sm:$0xff]   ;;  %v2107_v22 = vld [vmem:[%s2305_s25 + $0xd0] sm:$0xff]  }
  0x1c   : > { %v2100_v15 = vld [vmem:[%s2305_s25 + $0x20] sm:$0xff]   ;;  %v2104_v19 = vld [vmem:[%s2305_s25 + $0x18] sm:$0xff]   ;;  %v2108_v23 = vld [vmem:[%s2305_s25 + $0x10] sm:$0xff]  }
  0x1d   : > { %1888 = vmatpush3.bf16.msra.mxu0 %v2092_v7  ;;  %v2101_v16 = vld [vmem:[%s2305_s25 + $0xa0] sm:$0xff]   ;;  %v2105_v20 = vld [vmem:[%s2305_s25 + $0x98] sm:$0xff]   ;;  %v2109_v24 = vld [vmem:[%s2305_s25 + $0x90] sm:$0xff]  }
  0x1e   : > { %1910 = vmatpush3.bf16.msra.mxu1 %v2093_v8  ;;  %1889 = vmatprep.subr.bf16.mxu0 %v2094_v9  ;;  %v2110_v25 = vld [vmem:[%s2305_s25 + $0x48] sm:$0xff]   ;;  %v2114_v29 = vld [vmem:[%s2305_s25 + $0x40] sm:$0xff]   ;;  %v2122_v39 = vld [vmem:[%s2305_s25 + $0x178] sm:$0xff]  }
  0x1f   : > { %1911 = vmatprep.subr.bf16.mxu1 %v2095_v10  ;;  %v2111_v26 = vld [vmem:[%s2305_s25 + $0xc8] sm:$0xff]   ;;  %v2115_v30 = vld [vmem:[%s2305_s25 + $0xc0] sm:$0xff]   ;;  %v2123_v40 = vld [vmem:[%s2305_s25 + $0x1f8] sm:$0xff]  }
  0x20   : > { %v2112_v27 = vld [vmem:[%s2305_s25 + $0x8] sm:$0xff]   ;;  %v2116_v31 = vld [vmem:[%s2305_s25] sm:$0xff]   ;;  %v2124_v41 = vld [vmem:[%s2305_s25 + $0x138] sm:$0xff]  }
  0x21   : > { %1890 = vmatpush3.bf16.msra.mxu0 %v2096_v11  ;;  %v2113_v28 = vld [vmem:[%s2305_s25 + $0x88] sm:$0xff]   ;;  %v2117_v32 = vld [vmem:[%s2305_s25 + $0x80] sm:$0xff]   ;;  %v2125_v42 = vld [vmem:[%s2305_s25 + $0x1b8] sm:$0xff]  }
  0x22   : > { %1912 = vmatpush3.bf16.msra.mxu1 %v2097_v12  ;;  %1891 = vmatprep.subr.bf16.mxu0 %v2098_v13  ;;  %v226_v33 = vld [vmem:[%s2300_s21] sm:$0xff]  ;;  %v227_v34 = vld [vmem:[%s2300_s21 + $0x8] sm:$0xff]  ;;  %v2126_v43 = vld [vmem:[%s2305_s25 + $0x170] sm:$0xff]  }
  0x23   : > { %1913 = vmatprep.subr.bf16.mxu1 %v2099_v14  ;;  %v1736_v35 = vcombine.low %v226_v33, %v226_v33  ;;  %v1737_v36 = vcombine.high %v226_v33, %v226_v33  ;;  %v1738_v37 = vcombine.low %v227_v34, %v227_v34  ;;  %v1739_v38 = vcombine.high %v227_v34, %v227_v34  ;;  %v2127_v44 = vld [vmem:[%s2305_s25 + $0x1f0] sm:$0xff]   ;;  %v2130_v47 = vld [vmem:[%s2305_s25 + $0x168] sm:$0xff]   ;;  %v2134_v51 = vld [vmem:[%s2305_s25 + $0x160] sm:$0xff]  }
  0x24   : > { %v2128_v45 = vld [vmem:[%s2305_s25 + $0x130] sm:$0xff]   ;;  %v2131_v48 = vld [vmem:[%s2305_s25 + $0x1e8] sm:$0xff]   ;;  %v2135_v52 = vld [vmem:[%s2305_s25 + $0x1e0] sm:$0xff]  }
  0x25   : > { %1892 = vmatpush3.bf16.msra.mxu0 %v2100_v15  ;;  %1346 = vmatprep.mubr.bf16.mxu0 %v1737_v36  ;;  %v2129_v46 = vld [vmem:[%s2305_s25 + $0x1b0] sm:$0xff]   ;;  %v2132_v49 = vld [vmem:[%s2305_s25 + $0x128] sm:$0xff]   ;;  %v2136_v53 = vld [vmem:[%s2305_s25 + $0x120] sm:$0xff]  }
  0x26   : > { %1914 = vmatpush3.bf16.msra.mxu1 %v2101_v16  ;;  %1893 = vmatprep.subr.bf16.mxu0 %v2102_v17  ;;  %v2133_v50 = vld [vmem:[%s2305_s25 + $0x1a8] sm:$0xff]   ;;  %v2137_v54 = vld [vmem:[%s2305_s25 + $0x1a0] sm:$0xff]   ;;  %v2138_v55 = vld [vmem:[%s2305_s25 + $0x158] sm:$0xff]  }
  0x27   : > { %1915 = vmatprep.subr.bf16.mxu1 %v2103_v18  ;;  %1386 = vmatprep.mubr.bf16.mxu1 %v1739_v38  ;;  %v2139_v56 = vld [vmem:[%s2305_s25 + $0x1d8] sm:$0xff]   ;;  %v2142_v59 = vld [vmem:[%s2305_s25 + $0x150] sm:$0xff]   ;;  %v2146_v63 = vld [vmem:[%s2305_s25 + $0x148] sm:$0xff]  }
  0x28   : > { %v2140_v57 = vld [vmem:[%s2305_s25 + $0x118] sm:$0xff]   ;;  %v2143_v60 = vld [vmem:[%s2305_s25 + $0x1d0] sm:$0xff]   ;;  %v2147_v0 = vld [vmem:[%s2305_s25 + $0x1c8] sm:$0xff]  }
  0x29   : > { %1894 = vmatpush3.bf16.msra.mxu0 %v2104_v19  ;;  %v2141_v58 = vld [vmem:[%s2305_s25 + $0x198] sm:$0xff]   ;;  %v2144_v61 = vld [vmem:[%s2305_s25 + $0x110] sm:$0xff]   ;;  %v2148_v1 = vld [vmem:[%s2305_s25 + $0x108] sm:$0xff]  }
  0x2a   : > { %1916 = vmatpush3.bf16.msra.mxu1 %v2105_v20  ;;  %1895 = vmatprep.subr.bf16.mxu0 %v2106_v21  ;;  %v2145_v62 = vld [vmem:[%s2305_s25 + $0x190] sm:$0xff]   ;;  %v2149_v2 = vld [vmem:[%s2305_s25 + $0x188] sm:$0xff]   ;;  %v2150_v3 = vld [vmem:[%s2305_s25 + $0x140] sm:$0xff]  }
  0x2b   : > { %1917 = vmatprep.subr.bf16.mxu1 %v2107_v22  ;;  %v2151_v4 = vld [vmem:[%s2305_s25 + $0x1c0] sm:$0xff]   ;;  %v228_v7 = vld [vmem:[%s2300_s21 + $0x10] sm:$0xff]  ;;  %v229_v10 = vld [vmem:[%s2300_s21 + $0x18] sm:$0xff] }
  0x2c   : > { %v2152_v5 = vld [vmem:[%s2305_s25 + $0x100] sm:$0xff]   ;;  %v1740_v8 = vcombine.low %v228_v7, %v228_v7  ;;  %v1741_v9 = vcombine.high %v228_v7, %v228_v7  ;;  %v1742_v11 = vcombine.low %v229_v10, %v229_v10  ;;  %v1743_v12 = vcombine.high %v229_v10, %v229_v10  ;;  %v2158_v13 = vld [vmem:[%s2305_s25 + $0x278] sm:$0xff]   ;;  %v2162_v17 = vld [vmem:[%s2305_s25 + $0x270] sm:$0xff]  }
  0x2d   : > { %1896 = vmatpush3.bf16.msra.mxu0 %v2108_v23  ;;  %v2153_v6 = vld [vmem:[%s2305_s25 + $0x180] sm:$0xff]   ;;  %v2159_v14 = vld [vmem:[%s2305_s25 + $0x2f8] sm:$0xff]   ;;  %v2163_v18 = vld [vmem:[%s2305_s25 + $0x2f0] sm:$0xff]  }
  0x2e   : > { %1918 = vmatpush3.bf16.msra.mxu1 %v2109_v24  ;;  %1897 = vmatprep.subr.bf16.mxu0 %v2110_v25  ;;  %v2160_v15 = vld [vmem:[%s2305_s25 + $0x238] sm:$0xff]   ;;  %v2164_v19 = vld [vmem:[%s2305_s25 + $0x230] sm:$0xff]   ;;  %v2166_v21 = vld [vmem:[%s2305_s25 + $0x268] sm:$0xff]  }
  0x2f   : > { %1919 = vmatprep.subr.bf16.mxu1 %v2111_v26  ;;  %v2161_v16 = vld [vmem:[%s2305_s25 + $0x2b8] sm:$0xff]   ;;  %v2165_v20 = vld [vmem:[%s2305_s25 + $0x2b0] sm:$0xff]   ;;  %v2167_v22 = vld [vmem:[%s2305_s25 + $0x2e8] sm:$0xff]  }
  0x30   : > { %v2168_v23 = vld [vmem:[%s2305_s25 + $0x228] sm:$0xff]   ;;  %v2170_v25 = vld [vmem:[%s2305_s25 + $0x260] sm:$0xff]   ;;  %v2178_v33 = vld [vmem:[%s2305_s25 + $0x250] sm:$0xff]  }
  0x31   : > { %1898 = vmatpush3.bf16.msra.mxu0 %v2112_v27  ;;  %v2169_v24 = vld [vmem:[%s2305_s25 + $0x2a8] sm:$0xff]   ;;  %v2171_v26 = vld [vmem:[%s2305_s25 + $0x2e0] sm:$0xff]   ;;  %v2179_v34 = vld [vmem:[%s2305_s25 + $0x2d0] sm:$0xff]  }
  0x32   : > { %1920 = vmatpush3.bf16.msra.mxu1 %v2113_v28  ;;  %1899 = vmatprep.subr.bf16.mxu0 %v2114_v29  ;;  %v2172_v27 = vld [vmem:[%s2305_s25 + $0x220] sm:$0xff]   ;;  %v2174_v29 = vld [vmem:[%s2305_s25 + $0x258] sm:$0xff]   ;;  %v2181_v36 = vld [vmem:[%s2305_s25 + $0x290] sm:$0xff]  }
  0x33   : > { %1921 = vmatprep.subr.bf16.mxu1 %v2115_v30  ;;  %v2173_v28 = vld [vmem:[%s2305_s25 + $0x2a0] sm:$0xff]   ;;  %v2175_v30 = vld [vmem:[%s2305_s25 + $0x2d8] sm:$0xff]   ;;  %v2183_v38 = vld [vmem:[%s2305_s25 + $0x2c8] sm:$0xff]  }
  0x34   : > { %v2214_v7 = vld [vmem:[%s2305_s25 + $0x350] sm:$0xff]  }
  0x35   : > { %1900 = vmatpush3.bf16.msra.mxu0 %v2116_v31  ;;  %v2176_v31 = vld [vmem:[%s2305_s25 + $0x218] sm:$0xff]   ;;  %v2217_v10 = vld [vmem:[%s2305_s25 + $0x390] sm:$0xff]  }
  0x36   : > { %1922 = vmatpush3.bf16.msra.mxu1 %v2117_v32  ;;  %1929 = vmatprep.subr.bf16.mxu0 %v2122_v39  ;;  %v2177_v32 = vld [vmem:[%s2305_s25 + $0x298] sm:$0xff]   ;;  %v2184_v39 = vld [vmem:[%s2305_s25 + $0x208] sm:$0xff]  }
  0x37   : > { %1951 = vmatprep.subr.bf16.mxu1 %v2123_v40  ;;  %v2185_v40 = vld [vmem:[%s2305_s25 + $0x288] sm:$0xff]  }
  0x38   : > { %1347 = vmatmul.mubr.bf16.vlgmr.msra.gmra.mxu0 %v1736_v35  ;;  %v2180_v35 = vld [vmem:[%s2305_s25 + $0x210] sm:$0xff]  }
  0x39   : > { %1387 = vmatmul.mubr.bf16.vlgmr.msra.gmra.mxu1 %v1738_v37  ;;  %1930 = vmatpush3.bf16.msra.mxu0 %v2124_v41  ;;  %v2182_v37 = vld [vmem:[%s2305_s25 + $0x248] sm:$0xff]   ;;  %v2186_v41 = vld [vmem:[%s2305_s25 + $0x240] sm:$0xff]  }
  0x3a   : > { %1952 = vmatpush3.bf16.msra.mxu1 %v2125_v42  ;;  %1931 = vmatprep.subr.bf16.mxu0 %v2126_v43  ;;  %v2187_v42 = vld [vmem:[%s2305_s25 + $0x2c0] sm:$0xff]  }
  0x3b   : > { %1953 = vmatprep.subr.bf16.mxu1 %v2127_v44  ;;  %1426 = vmatprep.mubr.bf16.mxu0 %v1741_v9  ;;  %v2188_v43 = vld [vmem:[%s2305_s25 + $0x200] sm:$0xff]   ;;  %v2216_v9 = vld [vmem:[%s2305_s25 + $0x310] sm:$0xff]  }
  0x3c   : > { %1466 = vmatprep.mubr.bf16.mxu1 %v1743_v12  ;;  %v2189_v44 = vld [vmem:[%s2305_s25 + $0x280] sm:$0xff]   ;;  %v2219_v12 = vld [vmem:[%s2305_s25 + $0x3c8] sm:$0xff]  }
  0x3d   : > { %1932 = vmatpush3.bf16.msra.mxu0 %v2128_v45  ;;  %v230_v45 = vld [vmem:[%s2300_s21 + $0x20] sm:$0xff] }
  0x3e   : > { %1954 = vmatpush3.bf16.msra.mxu1 %v2129_v46  ;;  %1933 = vmatprep.subr.bf16.mxu0 %v2130_v47  ;;  %v231_v46 = vld [vmem:[%s2300_s21 + $0x28] sm:$0xff]  ;;  %v1744_v47 = vcombine.low %v230_v45, %v230_v45 }
  0x3f   : > { %1955 = vmatprep.subr.bf16.mxu1 %v2131_v48  ;;  %v1745_v48 = vcombine.high %v230_v45, %v230_v45 }
  0x41   : > { %1934 = vmatpush3.bf16.msra.mxu0 %v2132_v49  ;;  %v1746_v49 = vcombine.low %v231_v46, %v231_v46 }
  0x42   : > { %1956 = vmatpush3.bf16.msra.mxu1 %v2133_v50  ;;  %1935 = vmatprep.subr.bf16.mxu0 %v2134_v51  ;;  %v1747_v50 = vcombine.high %v231_v46, %v231_v46  ;;  %v2194_v51 = vld [vmem:[%s2305_s25 + $0x378] sm:$0xff]  }
  0x43   : > { %1957 = vmatprep.subr.bf16.mxu1 %v2135_v52  ;;  %v2195_v52 = vld [vmem:[%s2305_s25 + $0x3f8] sm:$0xff]  }
  0x45   : > { %1936 = vmatpush3.bf16.msra.mxu0 %v2136_v53  ;;  %v2196_v53 = vld [vmem:[%s2305_s25 + $0x338] sm:$0xff]  }
  0x46   : > { %1958 = vmatpush3.bf16.msra.mxu1 %v2137_v54  ;;  %1937 = vmatprep.subr.bf16.mxu0 %v2138_v55  ;;  %v2197_v54 = vld [vmem:[%s2305_s25 + $0x3b8] sm:$0xff]   ;;  %v2198_v55 = vld [vmem:[%s2305_s25 + $0x370] sm:$0xff]  }
  0x47   : > { %1959 = vmatprep.subr.bf16.mxu1 %v2139_v56  ;;  %v2199_v56 = vld [vmem:[%s2305_s25 + $0x3f0] sm:$0xff]  }
  0x49   : > { %1938 = vmatpush3.bf16.msra.mxu0 %v2140_v57  ;;  %v2200_v57 = vld [vmem:[%s2305_s25 + $0x330] sm:$0xff]  }
  0x4a   : > { %1960 = vmatpush3.bf16.msra.mxu1 %v2141_v58  ;;  %1939 = vmatprep.subr.bf16.mxu0 %v2142_v59  ;;  %v2201_v58 = vld [vmem:[%s2305_s25 + $0x3b0] sm:$0xff]   ;;  %v2202_v59 = vld [vmem:[%s2305_s25 + $0x368] sm:$0xff]  }
  0x4b   : > { %1961 = vmatprep.subr.bf16.mxu1 %v2143_v60  ;;  %v2203_v60 = vld [vmem:[%s2305_s25 + $0x3e8] sm:$0xff]  }
  0x4d   : > { %1940 = vmatpush3.bf16.msra.mxu0 %v2144_v61  ;;  %v2204_v61 = vld [vmem:[%s2305_s25 + $0x328] sm:$0xff]  }
  0x4e   : > { %1962 = vmatpush3.bf16.msra.mxu1 %v2145_v62  ;;  %1941 = vmatprep.subr.bf16.mxu0 %v2146_v63  ;;  %v2205_v62 = vld [vmem:[%s2305_s25 + $0x3a8] sm:$0xff]   ;;  %v2206_v63 = vld [vmem:[%s2305_s25 + $0x360] sm:$0xff]  }
  0x4f   : > { %1963 = vmatprep.subr.bf16.mxu1 %v2147_v0  ;;  %v2207_v0 = vld [vmem:[%s2305_s25 + $0x3e0] sm:$0xff]  }
  0x51   : > { %1942 = vmatpush3.bf16.msra.mxu0 %v2148_v1  ;;  %v2208_v1 = vld [vmem:[%s2305_s25 + $0x320] sm:$0xff]  }
  0x52   : > { %1964 = vmatpush3.bf16.msra.mxu1 %v2149_v2  ;;  %1943 = vmatprep.subr.bf16.mxu0 %v2150_v3  ;;  %v2209_v2 = vld [vmem:[%s2305_s25 + $0x3a0] sm:$0xff]   ;;  %v2210_v3 = vld [vmem:[%s2305_s25 + $0x358] sm:$0xff]  }
  0x53   : > { %1965 = vmatprep.subr.bf16.mxu1 %v2151_v4  ;;  %v2211_v4 = vld [vmem:[%s2305_s25 + $0x3d8] sm:$0xff]  }
  0x55   : > { %1944 = vmatpush3.bf16.msra.mxu0 %v2152_v5  ;;  %v2212_v5 = vld [vmem:[%s2305_s25 + $0x318] sm:$0xff]  }
  0x56   : > { %1966 = vmatpush3.bf16.msra.mxu1 %v2153_v6  ;;  %1973 = vmatprep.subr.bf16.mxu0 %v2158_v13  ;;  %v2213_v6 = vld [vmem:[%s2305_s25 + $0x398] sm:$0xff]   ;;  %v2220_v13 = vld [vmem:[%s2305_s25 + $0x308] sm:$0xff]  }
  0x57   : > { %1995 = vmatprep.subr.bf16.mxu1 %v2159_v14  ;;  %v2221_v14 = vld [vmem:[%s2305_s25 + $0x388] sm:$0xff]  }
  0x58   : > { %1427 = vmatmul.mubr.bf16.vlgmr.msra.gmra.mxu0 %v1740_v8  ;;  %v2215_v8 = vld [vmem:[%s2305_s25 + $0x3d0] sm:$0xff]  }
  0x59   : > { %1467 = vmatmul.mubr.bf16.vlgmr.msra.gmra.mxu1 %v1742_v11  ;;  %1974 = vmatpush3.bf16.msra.mxu0 %v2160_v15  ;;  %v2218_v11 = vld [vmem:[%s2305_s25 + $0x348] sm:$0xff]   ;;  %v2222_v15 = vld [vmem:[%s2305_s25 + $0x340] sm:$0xff]  }
  0x5a   : > { %1996 = vmatpush3.bf16.msra.mxu1 %v2161_v16  ;;  %1975 = vmatprep.subr.bf16.mxu0 %v2162_v17  ;;  %v2223_v16 = vld [vmem:[%s2305_s25 + $0x3c0] sm:$0xff]  }
  0x5b   : > { %1997 = vmatprep.subr.bf16.mxu1 %v2163_v18  ;;  %1506 = vmatprep.mubr.bf16.mxu0 %v1745_v48  ;;  %v2224_v17 = vld [vmem:[%s2305_s25 + $0x300] sm:$0xff]  }
  0x5c   : > { %1546 = vmatprep.mubr.bf16.mxu1 %v1747_v50  ;;  %v2225_v18 = vld [vmem:[%s2305_s25 + $0x380] sm:$0xff]  }
  0x5d   : > { %1976 = vmatpush3.bf16.msra.mxu0 %v2164_v19  ;;  %v232_v19 = vld [vmem:[%s2300_s21 + $0x30] sm:$0xff] }
  0x5e   : > { %1998 = vmatpush3.bf16.msra.mxu1 %v2165_v20  ;;  %1977 = vmatprep.subr.bf16.mxu0 %v2166_v21  ;;  %v233_v20 = vld [vmem:[%s2300_s21 + $0x38] sm:$0xff]  ;;  %v1748_v21 = vcombine.low %v232_v19, %v232_v19 }
  0x5f   : > { %1999 = vmatprep.subr.bf16.mxu1 %v2167_v22  ;;  %v1749_v22 = vcombine.high %v232_v19, %v232_v19 }
  0x61   : > { %1978 = vmatpush3.bf16.msra.mxu0 %v2168_v23  ;;  %v1750_v23 = vcombine.low %v233_v20, %v233_v20 }
  0x62   : > { %2000 = vmatpush3.bf16.msra.mxu1 %v2169_v24  ;;  %1979 = vmatprep.subr.bf16.mxu0 %v2170_v25  ;;  %v1751_v24 = vcombine.high %v233_v20, %v233_v20 }
  0x63   : > { %2001 = vmatprep.subr.bf16.mxu1 %v2171_v26 }
  0x65   : > { %1980 = vmatpush3.bf16.msra.mxu0 %v2172_v27 }
  0x66   : > { %2002 = vmatpush3.bf16.msra.mxu1 %v2173_v28  ;;  %1981 = vmatprep.subr.bf16.mxu0 %v2174_v29 }
  0x67   : > { %2003 = vmatprep.subr.bf16.mxu1 %v2175_v30 }
  0x69   : > { %1982 = vmatpush3.bf16.msra.mxu0 %v2176_v31 }
  0x6a   : > { %2004 = vmatpush3.bf16.msra.mxu1 %v2177_v32  ;;  %1983 = vmatprep.subr.bf16.mxu0 %v2178_v33 }
  0x6b   : > { %2005 = vmatprep.subr.bf16.mxu1 %v2179_v34 }
  0x6d   : > { %1984 = vmatpush3.bf16.msra.mxu0 %v2180_v35 }
  0x6e   : > { %2006 = vmatpush3.bf16.msra.mxu1 %v2181_v36  ;;  %1985 = vmatprep.subr.bf16.mxu0 %v2182_v37 }
  0x6f   : > { %2007 = vmatprep.subr.bf16.mxu1 %v2183_v38 }
  0x71   : > { %1986 = vmatpush3.bf16.msra.mxu0 %v2184_v39 }
  0x72   : > { %2008 = vmatpush3.bf16.msra.mxu1 %v2185_v40  ;;  %1987 = vmatprep.subr.bf16.mxu0 %v2186_v41 }
  0x73   : > { %2009 = vmatprep.subr.bf16.mxu1 %v2187_v42 }
  0x75   : > { %1988 = vmatpush3.bf16.msra.mxu0 %v2188_v43 }
  0x76   : > { %2010 = vmatpush3.bf16.msra.mxu1 %v2189_v44  ;;  %2017 = vmatprep.subr.bf16.mxu0 %v2194_v51 }
  0x77   : > { %2039 = vmatprep.subr.bf16.mxu1 %v2195_v52 }
  0x78   : > { %1507 = vmatmul.mubr.bf16.vlgmr.msra.gmra.mxu0 %v1744_v47 }
  0x79   : > { %1547 = vmatmul.mubr.bf16.vlgmr.msra.gmra.mxu1 %v1746_v49  ;;  %2018 = vmatpush3.bf16.msra.mxu0 %v2196_v53 }
  0x7a   : > { %2040 = vmatpush3.bf16.msra.mxu1 %v2197_v54  ;;  %2019 = vmatprep.subr.bf16.mxu0 %v2198_v55 }
  0x7b   : > { %2041 = vmatprep.subr.bf16.mxu1 %v2199_v56  ;;  %1586 = vmatprep.mubr.bf16.mxu0 %v1749_v22 }
  0x7c   : > { %1626 = vmatprep.mubr.bf16.mxu1 %v1751_v24 }
  0x7d   : > { %2020 = vmatpush3.bf16.msra.mxu0 %v2200_v57 }
  0x7e   : > { %2042 = vmatpush3.bf16.msra.mxu1 %v2201_v58  ;;  %2021 = vmatprep.subr.bf16.mxu0 %v2202_v59 }
  0x7f   : > { %2043 = vmatprep.subr.bf16.mxu1 %v2203_v60 }
  0x81   : > { %2022 = vmatpush3.bf16.msra.mxu0 %v2204_v61 }
  0x82   : > { %2044 = vmatpush3.bf16.msra.mxu1 %v2205_v62  ;;  %2023 = vmatprep.subr.bf16.mxu0 %v2206_v63 }
  0x83   : > { %2045 = vmatprep.subr.bf16.mxu1 %v2207_v0 }
  0x85   : > { %2024 = vmatpush3.bf16.msra.mxu0 %v2208_v1 }
  0x86   : > { %2046 = vmatpush3.bf16.msra.mxu1 %v2209_v2  ;;  %2025 = vmatprep.subr.bf16.mxu0 %v2210_v3 }
  0x87   : > { %2047 = vmatprep.subr.bf16.mxu1 %v2211_v4 }
  0x89   : > { %2026 = vmatpush3.bf16.msra.mxu0 %v2212_v5  ;;  %v225_v5 = vld [vmem:[#allocation2] sm:$0xff] }
  0x8a   : > { %2048 = vmatpush3.bf16.msra.mxu1 %v2213_v6  ;;  %2027 = vmatprep.subr.bf16.mxu0 %v2214_v7 }
  0x8b   : > { %2049 = vmatprep.subr.bf16.mxu1 %v2215_v8 }
  0x8d   : > { %2028 = vmatpush3.bf16.msra.mxu0 %v2216_v9 }
  0x8e   : > { %2050 = vmatpush3.bf16.msra.mxu1 %v2217_v10  ;;  %2029 = vmatprep.subr.bf16.mxu0 %v2218_v11 }
  0x8f   : > { %2051 = vmatprep.subr.bf16.mxu1 %v2219_v12 }
  0x91   : > { %2030 = vmatpush3.bf16.msra.mxu0 %v2220_v13 }
  0x92   : > { %2052 = vmatpush3.bf16.msra.mxu1 %v2221_v14  ;;  %2031 = vmatprep.subr.bf16.mxu0 %v2222_v15 }
  0x93   : > { %2053 = vmatprep.subr.bf16.mxu1 %v2223_v16 }
  0x95   : > { %2032 = vmatpush3.bf16.msra.mxu0 %v2224_v17 }
  0x96   : > { %2054 = vmatpush3.bf16.msra.mxu1 %v2225_v18 }
  0x98   : > { %1587 = vmatmul.mubr.bf16.vlgmr.msra.gmra.mxu0 %v1748_v21 }
  0x99   : > { %1627 = vmatmul.mubr.bf16.vlgmr.msra.gmra.mxu1 %v1750_v23 }
  0xf8   : > { %v1901_v25 = vpop.f32.mrf.mxu0 }
  0xf9   : > { %v1923_v26 = vpop.f32.mrf.mxu1 }
  0xfa   : > { %v1902_v27 = vpop.f32.mrf.mxu0 }
  0xfb   : > { %v1924_v28 = vpop.f32.mrf.mxu1  ;;  %v1903_v29 = vadd.f32 %v1902_v27, %v1901_v25 }
  0xfc   : > { %v1925_v30 = vadd.f32 %v1924_v28, %v1923_v26  ;;  %v1904_v31 = vpop.f32.mrf.mxu0 }
  0xfd   : > { %v1926_v32 = vpop.f32.mrf.mxu1 }
  0xfe   : > { %v1389_v33 = vadd.f32 %v1925_v30, %v1903_v29  ;;  %v1905_v34 = vpop.f32.mrf.mxu0 }
  0xff   : > { %v1927_v35 = vpop.f32.mrf.mxu1 }
 0x118   : > { %v1945_v36 = vpop.f32.mrf.mxu0 }
 0x119   : > { %v1967_v37 = vpop.f32.mrf.mxu1 }
 0x11a   : > { %v1946_v38 = vpop.f32.mrf.mxu0 }
 0x11b   : > { %v1968_v39 = vpop.f32.mrf.mxu1  ;;  %v1947_v52 = vadd.f32 %v1946_v38, %v1945_v36 }
 0x11c   : > { %v1948_v40 = vpop.f32.mrf.mxu0  ;;  %v1969_v54 = vadd.f32 %v1968_v39, %v1967_v37 }
 0x11d   : > { %v1970_v41 = vpop.f32.mrf.mxu1  ;;  %v1429_v53 = vadd.f32 %v1947_v52, %v1389_v33 }
 0x11e   : > { %v1949_v42 = vpop.f32.mrf.mxu0 }
 0x11f   : > { %v1971_v43 = vpop.f32.mrf.mxu1  ;;  %v1469_v56 = vadd.f32 %v1969_v54, %v1429_v53 }
 0x138   : > { %v1989_v44 = vpop.f32.mrf.mxu0 }
 0x139   : > { %v2011_v45 = vpop.f32.mrf.mxu1 }
 0x13a   : > { %v1990_v46 = vpop.f32.mrf.mxu0 }
 0x13b   : > { %v2012_v47 = vpop.f32.mrf.mxu1  ;;  %v1991_v55 = vadd.f32 %v1990_v46, %v1989_v44 }
 0x13c   : > { %v1992_v48 = vpop.f32.mrf.mxu0  ;;  %v2013_v58 = vadd.f32 %v2012_v47, %v2011_v45 }
 0x13d   : > { %v2014_v49 = vpop.f32.mrf.mxu1  ;;  %v1509_v57 = vadd.f32 %v1991_v55, %v1469_v56 }
 0x13e   : > { %v1993_v50 = vpop.f32.mrf.mxu0 }
 0x13f   : > { %v2015_v51 = vpop.f32.mrf.mxu1  ;;  %v1549_v62 = vadd.f32 %v2013_v58, %v1509_v57 }
 0x158   : > { %v2033_v59 = vpop.f32.mrf.mxu0 }
 0x159   : > { %v2055_v60 = vpop.f32.mrf.mxu1 }
 0x15a   : > { %v2034_v61 = vpop.f32.mrf.mxu0 }
 0x15b   : > { %v2035_v63 = vadd.f32 %v2034_v61, %v2033_v59  ;;  %v2056_v0 = vpop.f32.mrf.mxu1 }
 0x15c   : > { %v2036_v1 = vpop.f32.mrf.mxu0  ;;  %v2057_v3 = vadd.f32 %v2056_v0, %v2055_v60 }
 0x15d   : > { %v1589_v2 = vadd.f32 %v2035_v63, %v1549_v62  ;;  %v2058_v4 = vpop.f32.mrf.mxu1 }
 0x15e   : > { %v2037_v6 = vpop.f32.mrf.mxu0 }
 0x15f   : > { %v1629_v7 = vadd.f32 %v2057_v3, %v1589_v2  ;;  %v2059_v8 = vpop.f32.mrf.mxu1  ;;  %1639 = sbr.rel (%p1880_p7) target bundleno = 366 (0x16e), region = 40 }
 0x161   : > { %v1634_v9 = vadd.f32 %v1629_v7, %v225_v5 }
 0x163   : > { %1635 = vst [vmem:[#allocation2] sm:$0xff] %v1634_v9 }
 0x164   : > { %v1881_v11 = vld [vmem:[%s2462_s2] ss:$0 sm:$0xff] }
 0x16a   : > { %v1640_v10 = vld [vmem:[#allocation2] sm:$0xff] }
 0x16b   : > { %v1648_v12 = vadd.f32 %v1881_v11, %v1640_v10 }
 0x16d   : > { %1649 = vst [vmem:[%s2463_s3] sm:$0xff] %v1648_v12 }
 0x16e PF: > { %s13_s14 = sadd.s32 1, %s2252_s14   ;;  %s2464_s12 = smov %s2248_s13 }
 0x16f   : > { %p10_p8 = scmp.ge.s32.totalorder %s13_s14, 6   ;;  %s2465_s13 = smov %s2467_s15 }
 0x171   :  { %12 = sbr.rel (!%p10_p8) target bundleno = 2 (0x2), region = 73 }

</bundles_post_ra>
